<compile_context>
chip_gen: v6e
topology: v6e:2x2x1
jax: 0.10.0
libtpu: 0.0.40
codegen_flags: <defaults>
</compile_context>

<pallas_src>
import functools

import jax
import jax.numpy as jnp
from jax.experimental import pallas as pl
from jax.experimental.pallas import tpu as pltpu

NUM_GROUPS = 32
EPS = 1e-6


# ----------------------------- chip-dependent knobs -----------------------------

def _vmem_limit_bytes():
    # ~40 MiB on v7x-class chips (64 MiB physical VMEM, leave Mosaic headroom),
    # ~100 MiB on v5e/v6e (128 MiB physical) so larger tiles stay legal.
    try:
        cap = pltpu.get_tpu_info().vmem_capacity_bytes
    except Exception:
        cap = 64 * 1024 * 1024
    return 40 * 1024 * 1024 if cap <= 64 * 1024 * 1024 else 100 * 1024 * 1024


def _mxu_depth():
    # 128-deep MXU on <= v5, 256-deep on v6e / v7x.
    try:
        kind = jax.devices()[0].device_kind.lower()
    except Exception:
        return 256
    for v in ("v2", "v3", "v4", "v5"):
        if v in kind:
            return 128
    return 256


def _tap_groups(c, mxu_depth):
    # One im2col matmul with K = 9*C when 3*C under-fills a 256-deep MXU (v6e/v7x);
    # otherwise three K = 3*C matmuls (also the right grouping on the 128-deep v5e MXU,
    # where a wider K only adds im2col copy traffic with no utilization gain).
    if mxu_depth >= 256 and 3 * c < 256:
        return 1
    return 3


# ----------------------------- host-side prep -----------------------------

def _prep_w3(w, dtype, tap_groups):
    # HWIO (3, 3, Cin, Cout) -> (tap_groups, taps_per_group*Cin, Cout).
    # The K axis order is (dy[, dx], cin), matching the lane-axis concatenation of the
    # shifted patches in _conv3x3.
    kh, kw, cin, cout = w.shape
    if tap_groups == 1:
        return w.reshape(1, kh * kw * cin, cout).astype(dtype)
    return w.reshape(kh, kw * cin, cout).astype(dtype)


def _group_matrices(C, G):
    # One-hot channel->group matrix and its transpose, built once on the host and passed
    # as constant-index inputs (hoisted out of the kernel per the perf review).
    ch = jnp.arange(C, dtype=jnp.int32) // (C // G)
    gmat = (ch[:, None] == jnp.arange(G, dtype=jnp.int32)[None, :]).astype(jnp.float32)
    return gmat, gmat.T


# ----------------------------- in-kernel helpers -----------------------------

def _gn_scale_shift(x2d, gamma, beta, gmat, gmat_t):
    """Per-channel (1,C) scale/shift so that GroupNorm(x) == x*scale + shift.

    Two-pass (centered) variance; group reduce via the precomputed one-hot matrices.
    """
    HW, C = x2d.shape
    G = gmat.shape[-1]
    count = float(HW * (C // G))
    ch_sum = jnp.sum(x2d, axis=0, keepdims=True)                                  # (1, C)
    mean_g = jnp.dot(ch_sum, gmat, preferred_element_type=jnp.float32) / count    # (1, G)
    mean_c = jnp.dot(mean_g, gmat_t, preferred_element_type=jnp.float32)          # (1, C)
    d = x2d - mean_c
    var_sum = jnp.sum(d * d, axis=0, keepdims=True)                               # (1, C)
    var_g = jnp.dot(var_sum, gmat, preferred_element_type=jnp.float32) / count    # (1, G)
    rstd_c = jnp.dot(jax.lax.rsqrt(var_g + EPS), gmat_t,
                     preferred_element_type=jnp.float32)                          # (1, C)
    scale = rstd_c * gamma
    shift = beta - mean_c * scale
    return scale, shift


def _fill_halo(xp_ref, y3):
    """Write y3 (H,W,C) into the interior of the (H+2,W+2,C) VMEM halo buffer.

    Only a W-axis halo concat plus leading-dim-offset stores (no full padded-tensor
    materialization); the two border rows are re-zeroed each step (tiny stores), which is
    safe even when the "parallel" grid axis is split across megacore TensorCores.
    """
    H, W, C = y3.shape
    zc = jnp.zeros((H, 1, C), xp_ref.dtype)
    xp_ref[0:1, :, :] = jnp.zeros((1, W + 2, C), xp_ref.dtype)
    xp_ref[H + 1:H + 2, :, :] = jnp.zeros((1, W + 2, C), xp_ref.dtype)
    xp_ref[1:H + 1, :, :] = jnp.concatenate([zc, y3.astype(xp_ref.dtype), zc], axis=1)
    # TODO(synk): direct sublane-offset interior store xp_ref[1:H+1, 1:W+1, :] = y3 would
    # drop the remaining W-axis concat copy.


def _conv3x3(xp_ref, w_ref, bias, H, W, C):
    """3x3 conv from a zero-padded (H+2,W+2,C) VMEM buffer.

    Weights come pre-grouped as (G, taps_per_group*C, Cout); bias is folded into the first
    matmul and accumulation happens in vregs (no zero-filled scratch / extra bias pass).
    """
    G = w_ref.shape[0]
    taps = 9 // G
    HW = H * W
    acc = None
    for g in range(G):
        offs = ([(dy, dx) for dy in range(3) for dx in range(3)] if G == 1
                else [(g, dx) for dx in range(3)])
        patch = jnp.concatenate(
            [xp_ref[dy:dy + H, dx:dx + W, :] for (dy, dx) in offs], axis=-1)
        d = jnp.dot(patch.reshape(HW, taps * C), w_ref[g],
                    preferred_element_type=jnp.float32)
        acc = d + bias if acc is None else acc + d
    return acc


# ----------------------------- fused Pallas kernel -----------------------------

def _residual_block_kernel(has_up, x_ref, g1_ref, b1_ref, gm1_ref, gmt1_ref,
                           w1_ref, cb1_ref, g2_ref, b2_ref, gm2_ref, gmt2_ref,
                           w2_ref, cb2_ref, *rest):
    if has_up:
        upw_ref, upb_ref, o_ref, xp1_ref, xp2_ref = rest
    else:
        o_ref, xp1_ref, xp2_ref = rest
    _, H, W, Cin = x_ref.shape
    Cout = o_ref.shape[-1]
    HW = H * W

    # GroupNorm1 (whole-image stats in VMEM) + Swish, applied as one FMA per element.
    x = x_ref[...].reshape(HW, Cin).astype(jnp.float32)
    sc1, sh1 = _gn_scale_shift(x, g1_ref[...], b1_ref[...], gm1_ref[...], gmt1_ref[...])
    y = x * sc1 + sh1
    y = y * jax.nn.sigmoid(y)

    # conv1 (3x3), halo handled in VMEM; f32 result stays resident.
    _fill_halo(xp1_ref, y.reshape(H, W, Cin))
    h = _conv3x3(xp1_ref, w1_ref, cb1_ref[...], H, W, Cin)            # (HW, Cout) f32

    # GroupNorm2 stats straight from the f32 conv1 result (never touches HBM) + Swish.
    sc2, sh2 = _gn_scale_shift(h, g2_ref[...], b2_ref[...], gm2_ref[...], gmt2_ref[...])
    z = h * sc2 + sh2
    z = z * jax.nn.sigmoid(z)

    # conv2 (3x3) + residual epilogue fused into the single output store.
    _fill_halo(xp2_ref, z.reshape(H, W, Cout))
    out = _conv3x3(xp2_ref, w2_ref, cb2_ref[...], H, W, Cout)

    if has_up:
        skip = jnp.dot(x_ref[...].reshape(HW, Cin), upw_ref[...],
                       preferred_element_type=jnp.float32) + upb_ref[...]
    else:
        skip = x   # Cin == Cout in this branch
    o_ref[...] = (out + skip).reshape(1, H, W, Cout).astype(o_ref.dtype)


# ----------------------------- wrapper -----------------------------

def residual_block_pallas(params, x_nchw):
    # Accepts NCHW (PyTorch), computes in NHWC, returns NCHW.
    x = jnp.transpose(x_nchw, (0, 2, 3, 1))
    N, H, W, Cin = x.shape
    Cout = params["conv1_w"].shape[-1]
    G = NUM_GROUPS
    assert Cin % G == 0 and Cout % G == 0
    has_up = "up_w" in params

    depth = _mxu_depth()
    w1 = _prep_w3(params["conv1_w"], x.dtype, _tap_groups(Cin, depth))
    w2 = _prep_w3(params["conv2_w"], x.dtype, _tap_groups(Cout, depth))
    gm1, gmt1 = _group_matrices(Cin, G)
    gm2, gmt2 = _group_matrices(Cout, G)
    f32 = jnp.float32

    def _const(shape):
        nd = len(shape)
        return pl.BlockSpec(shape, lambda n, _nd=nd: (0,) * _nd)

    in_specs = [
        pl.BlockSpec((1, H, W, Cin), lambda n: (n, 0, 0, 0)),
        _const((1, Cin)), _const((1, Cin)),
        _const((Cin, G)), _const((G, Cin)),
        _const(tuple(w1.shape)), _const((1, Cout)),
        _const((1, Cout)), _const((1, Cout)),
        _const((Cout, G)), _const((G, Cout)),
        _const(tuple(w2.shape)), _const((1, Cout)),
    ]
    args = [
        x,
        params["gn1_gamma"].reshape(1, Cin).astype(f32),
        params["gn1_beta"].reshape(1, Cin).astype(f32),
        gm1, gmt1,
        w1, params["conv1_b"].reshape(1, Cout).astype(f32),
        params["gn2_gamma"].reshape(1, Cout).astype(f32),
        params["gn2_beta"].reshape(1, Cout).astype(f32),
        gm2, gmt2,
        w2, params["conv2_b"].reshape(1, Cout).astype(f32),
    ]
    if has_up:
        in_specs += [_const((Cin, Cout)), _const((1, Cout))]
        args += [params["up_w"].astype(x.dtype),
                 params["up_b"].reshape(1, Cout).astype(f32)]

    out = pl.pallas_call(
        functools.partial(_residual_block_kernel, has_up),
        out_shape=jax.ShapeDtypeStruct((N, H, W, Cout), x.dtype),
        grid=(N,),
        in_specs=in_specs,
        out_specs=pl.BlockSpec((1, H, W, Cout), lambda n: (n, 0, 0, 0)),
        scratch_shapes=[
            pltpu.VMEM((H + 2, W + 2, Cin), x.dtype),    # conv1 halo buffer
            pltpu.VMEM((H + 2, W + 2, Cout), x.dtype),   # conv2 halo buffer
        ],
        compiler_params=pltpu.CompilerParams(
            dimension_semantics=("parallel",),
            vmem_limit_bytes=_vmem_limit_bytes()),
    )(*args)
    return jnp.transpose(out, (0, 3, 1, 2))


# ----------------------------- params init -----------------------------

def init_residual_block_params(key, in_channels, out_channels):
    ks = jax.random.split(key, 10)
    p = {
        "gn1_gamma": 1.0 + 0.1 * jax.random.normal(ks[0], (in_channels,), jnp.float32),
        "gn1_beta": 0.1 * jax.random.normal(ks[1], (in_channels,), jnp.float32),
        "conv1_w": jax.random.normal(ks[2], (3, 3, in_channels, out_channels),
                                     jnp.float32) / (9.0 * in_channels) ** 0.5,
        "conv1_b": 0.1 * jax.random.normal(ks[3], (out_channels,), jnp.float32),
        "gn2_gamma": 1.0 + 0.1 * jax.random.normal(ks[4], (out_channels,), jnp.float32),
        "gn2_beta": 0.1 * jax.random.normal(ks[5], (out_channels,), jnp.float32),
        "conv2_w": jax.random.normal(ks[6], (3, 3, out_channels, out_channels),
                                     jnp.float32) / (9.0 * out_channels) ** 0.5,
        "conv2_b": 0.1 * jax.random.normal(ks[7], (out_channels,), jnp.float32),
    }
    if in_channels != out_channels:
        p["up_w"] = jax.random.normal(ks[8], (in_channels, out_channels),
                                      jnp.float32) / in_channels ** 0.5
        p["up_b"] = 0.1 * jax.random.normal(ks[9], (out_channels,), jnp.float32)
    return p


# ----------------------------- pure-JAX reference -----------------------------

def residual_block_ref(params, x_nchw):
    x = jnp.transpose(x_nchw, (0, 2, 3, 1))

    def gn(v, g, b):
        N, H, W, C = v.shape
        cg = C // NUM_GROUPS
        vr = v.reshape(N, H, W, NUM_GROUPS, cg)
        mean = vr.mean(axis=(1, 2, 4), keepdims=True)
        var = vr.var(axis=(1, 2, 4), keepdims=True)
        vn = ((vr - mean) * jax.lax.rsqrt(var + EPS)).reshape(N, H, W, C)
        return vn * g.reshape(1, 1, 1, C) + b.reshape(1, 1, 1, C)

    def swish(v):
        return v * jax.nn.sigmoid(v)

    def conv(v, w, b):
        return jax.lax.conv_general_dilated(
            v, w, (1, 1), [(1, 1), (1, 1)],
            dimension_numbers=("NHWC", "HWIO", "NHWC")) + b.reshape(1, 1, 1, -1)

    h = conv(swish(gn(x, params["gn1_gamma"], params["gn1_beta"])),
             params["conv1_w"], params["conv1_b"])
    h = conv(swish(gn(h, params["gn2_gamma"], params["gn2_beta"])),
             params["conv2_w"], params["conv2_b"])
    if "up_w" in params:
        skip = jnp.einsum("nhwc,cd->nhwd", x, params["up_w"]) \
            + params["up_b"].reshape(1, 1, 1, -1)
    else:
        skip = x
    return jnp.transpose(skip + h, (0, 3, 1, 2))


# ----------------------------- main -----------------------------

if __name__ == "__main__":
    key = jax.random.PRNGKey(0)
    k_x, k_p1, k_p2 = jax.random.split(key, 3)

    N, Cin, H, W = 2, 32, 16, 16   # channels must be divisible by 32 groups
    x = jax.random.normal(k_x, (N, Cin, H, W), jnp.float32)

    # Case 1: in_channels != out_channels (fused 1x1 channel_up epilogue)
    params_a = init_residual_block_params(k_p1, in_channels=32, out_channels=64)
    out_a = jax.block_until_ready(residual_block_pallas(params_a, x))
    ref_a = jax.block_until_ready(residual_block_ref(params_a, x))

    # Case 2: in_channels == out_channels (plain residual add epilogue)
    params_b = init_residual_block_params(k_p2, in_channels=32, out_channels=32)
    out_b = jax.block_until_ready(residual_block_pallas(params_b, x))
    ref_b = jax.block_until_ready(residual_block_ref(params_b, x))

    assert out_a.shape == (N, 64, H, W)
    assert out_b.shape == (N, 32, H, W)
    assert jnp.allclose(out_a, ref_a, atol=2e-3, rtol=2e-3), \
        f"mismatch (in!=out): {jnp.max(jnp.abs(out_a - ref_a))}"
    assert jnp.allclose(out_b, ref_b, atol=2e-3, rtol=2e-3), \
        f"mismatch (in==out): {jnp.max(jnp.abs(out_b - ref_b))}"

    print("KERNEL_OK")
</pallas_src>

<mosaic_0001>
module attributes {stable_mosaic.version = 11 : i64} {
  func.func @_residual_block_kernel(%arg0: i32, %arg1: memref<1x16x16x32xf32, #tpu.memory_space<vmem>>, %arg2: memref<1x32xf32, #tpu.memory_space<vmem>>, %arg3: memref<1x32xf32, #tpu.memory_space<vmem>>, %arg4: memref<32x32xf32, #tpu.memory_space<vmem>>, %arg5: memref<32x32xf32, #tpu.memory_space<vmem>>, %arg6: memref<1x288x64xf32, #tpu.memory_space<vmem>>, %arg7: memref<1x64xf32, #tpu.memory_space<vmem>>, %arg8: memref<1x64xf32, #tpu.memory_space<vmem>>, %arg9: memref<1x64xf32, #tpu.memory_space<vmem>>, %arg10: memref<64x32xf32, #tpu.memory_space<vmem>>, %arg11: memref<32x64xf32, #tpu.memory_space<vmem>>, %arg12: memref<1x576x64xf32, #tpu.memory_space<vmem>>, %arg13: memref<1x64xf32, #tpu.memory_space<vmem>>, %arg14: memref<32x64xf32, #tpu.memory_space<vmem>>, %arg15: memref<1x64xf32, #tpu.memory_space<vmem>>, %arg16: memref<1x16x16x64xf32, #tpu.memory_space<vmem>>, %arg17: memref<18x18x32xf32, #tpu.memory_space<vmem>>, %arg18: memref<18x18x64xf32, #tpu.memory_space<vmem>>) attributes {dimension_semantics = [#tpu.dimension_semantics<parallel>], iteration_bounds = array<i64: 2>, scalar_prefetch = 0 : i64, scratch_operands = 2 : i64, tpu.core_type = #tpu.core_type<tc>, window_params = [{transform_indices = @transform_0, window_bounds = array<i64: 1, 16, 16, 32>}, {pipeline_mode = #tpu.pipeline_mode<synchronous>, transform_indices = @transform_1, window_bounds = array<i64: 1, 32>}, {pipeline_mode = #tpu.pipeline_mode<synchronous>, transform_indices = @transform_2, window_bounds = array<i64: 1, 32>}, {pipeline_mode = #tpu.pipeline_mode<synchronous>, transform_indices = @transform_3, window_bounds = array<i64: 32, 32>}, {pipeline_mode = #tpu.pipeline_mode<synchronous>, transform_indices = @transform_4, window_bounds = array<i64: 32, 32>}, {pipeline_mode = #tpu.pipeline_mode<synchronous>, transform_indices = @transform_5, window_bounds = array<i64: 1, 288, 64>}, {pipeline_mode = #tpu.pipeline_mode<synchronous>, transform_indices = @transform_6, window_bounds = array<i64: 1, 64>}, {pipeline_mode = #tpu.pipeline_mode<synchronous>, transform_indices = @transform_7, window_bounds = array<i64: 1, 64>}, {pipeline_mode = #tpu.pipeline_mode<synchronous>, transform_indices = @transform_8, window_bounds = array<i64: 1, 64>}, {pipeline_mode = #tpu.pipeline_mode<synchronous>, transform_indices = @transform_9, window_bounds = array<i64: 64, 32>}, {pipeline_mode = #tpu.pipeline_mode<synchronous>, transform_indices = @transform_10, window_bounds = array<i64: 32, 64>}, {pipeline_mode = #tpu.pipeline_mode<synchronous>, transform_indices = @transform_11, window_bounds = array<i64: 1, 576, 64>}, {pipeline_mode = #tpu.pipeline_mode<synchronous>, transform_indices = @transform_12, window_bounds = array<i64: 1, 64>}, {pipeline_mode = #tpu.pipeline_mode<synchronous>, transform_indices = @transform_13, window_bounds = array<i64: 32, 64>}, {pipeline_mode = #tpu.pipeline_mode<synchronous>, transform_indices = @transform_14, window_bounds = array<i64: 1, 64>}, {transform_indices = @transform_15, window_bounds = array<i64: 1, 16, 16, 64>}]} {
    %c0 = arith.constant 0 : index
    %c0_0 = arith.constant 0 : index
    %c0_1 = arith.constant 0 : index
    %c0_2 = arith.constant 0 : index
    %0 = vector.load %arg1[%c0, %c0_0, %c0_1, %c0_2] : memref<1x16x16x32xf32, #tpu.memory_space<vmem>>, vector<1x16x16x32xf32>
    %1 = vector.shape_cast %0 : vector<1x16x16x32xf32> to vector<256x32xf32>
    %c0_3 = arith.constant 0 : index
    %c0_4 = arith.constant 0 : index
    %2 = vector.load %arg2[%c0_3, %c0_4] : memref<1x32xf32, #tpu.memory_space<vmem>>, vector<1x32xf32>
    %c0_5 = arith.constant 0 : index
    %c0_6 = arith.constant 0 : index
    %3 = vector.load %arg3[%c0_5, %c0_6] : memref<1x32xf32, #tpu.memory_space<vmem>>, vector<1x32xf32>
    %c0_7 = arith.constant 0 : index
    %c0_8 = arith.constant 0 : index
    %4 = vector.load %arg4[%c0_7, %c0_8] : memref<32x32xf32, #tpu.memory_space<vmem>>, vector<32x32xf32>
    %c0_9 = arith.constant 0 : index
    %c0_10 = arith.constant 0 : index
    %5 = vector.load %arg5[%c0_9, %c0_10] : memref<32x32xf32, #tpu.memory_space<vmem>>, vector<32x32xf32>
    %cst = arith.constant dense<0.000000e+00> : vector<32xf32>
    %6 = vector.multi_reduction <add>, %1, %cst [0] : vector<256x32xf32> to vector<32xf32>
    %7 = vector.shape_cast %6 : vector<32xf32> to vector<1x32xf32>
    %cst_11 = arith.constant dense<0.000000e+00> : vector<1x32xf32>
    %8 = tpu.matmul %7, %4, %cst_11 {dimension_numbers = #tpu.dot_dimension_numbers<[1], [0], [0], [1], [0, 0, 1, 1], [], []>} : vector<1x32xf32>, vector<32x32xf32>, vector<1x32xf32> -> vector<1x32xf32>
    %cst_12 = arith.constant 2.560000e+02 : f32
    %9 = vector.broadcast %cst_12 : f32 to vector<1x32xf32>
    %10 = arith.divf %8, %9 : vector<1x32xf32>
    %cst_13 = arith.constant dense<0.000000e+00> : vector<1x32xf32>
    %11 = tpu.matmul %10, %5, %cst_13 {dimension_numbers = #tpu.dot_dimension_numbers<[1], [0], [0], [1], [0, 0, 1, 1], [], []>} : vector<1x32xf32>, vector<32x32xf32>, vector<1x32xf32> -> vector<1x32xf32>
    %12 = vector.broadcast %11 : vector<1x32xf32> to vector<256x32xf32>
    %13 = arith.subf %1, %12 : vector<256x32xf32>
    %14 = arith.mulf %13, %13 : vector<256x32xf32>
    %cst_14 = arith.constant dense<0.000000e+00> : vector<32xf32>
    %15 = vector.multi_reduction <add>, %14, %cst_14 [0] : vector<256x32xf32> to vector<32xf32>
    %16 = vector.shape_cast %15 : vector<32xf32> to vector<1x32xf32>
    %cst_15 = arith.constant dense<0.000000e+00> : vector<1x32xf32>
    %17 = tpu.matmul %16, %4, %cst_15 {dimension_numbers = #tpu.dot_dimension_numbers<[1], [0], [0], [1], [0, 0, 1, 1], [], []>} : vector<1x32xf32>, vector<32x32xf32>, vector<1x32xf32> -> vector<1x32xf32>
    %cst_16 = arith.constant 2.560000e+02 : f32
    %18 = vector.broadcast %cst_16 : f32 to vector<1x32xf32>
    %19 = arith.divf %17, %18 : vector<1x32xf32>
    %cst_17 = arith.constant 9.99999997E-7 : f32
    %20 = vector.broadcast %cst_17 : f32 to vector<1x32xf32>
    %21 = arith.addf %19, %20 : vector<1x32xf32>
    %22 = math.rsqrt %21 : vector<1x32xf32>
    %cst_18 = arith.constant dense<0.000000e+00> : vector<1x32xf32>
    %23 = tpu.matmul %22, %5, %cst_18 {dimension_numbers = #tpu.dot_dimension_numbers<[1], [0], [0], [1], [0, 0, 1, 1], [], []>} : vector<1x32xf32>, vector<32x32xf32>, vector<1x32xf32> -> vector<1x32xf32>
    %24 = arith.mulf %23, %2 : vector<1x32xf32>
    %25 = arith.mulf %11, %24 : vector<1x32xf32>
    %26 = arith.subf %3, %25 : vector<1x32xf32>
    %27 = vector.broadcast %24 : vector<1x32xf32> to vector<256x32xf32>
    %28 = arith.mulf %1, %27 : vector<256x32xf32>
    %29 = vector.broadcast %26 : vector<1x32xf32> to vector<256x32xf32>
    %30 = arith.addf %28, %29 : vector<256x32xf32>
    %31 = arith.negf %30 : vector<256x32xf32>
    %32 = math.exp %31 : vector<256x32xf32>
    %cst_19 = arith.constant 1.000000e+00 : f32
    %33 = vector.broadcast %cst_19 : f32 to vector<256x32xf32>
    %34 = arith.addf %33, %32 : vector<256x32xf32>
    %35 = arith.divf %33, %34 : vector<256x32xf32>
    %36 = arith.mulf %30, %35 : vector<256x32xf32>
    %37 = vector.shape_cast %36 : vector<256x32xf32> to vector<16x16x32xf32>
    %cst_20 = arith.constant 0.000000e+00 : f32
    %38 = vector.broadcast %cst_20 : f32 to vector<16x1x32xf32>
    %cst_21 = arith.constant 0.000000e+00 : f32
    %39 = vector.broadcast %cst_21 : f32 to vector<1x18x32xf32>
    %c0_22 = arith.constant 0 : index
    %c0_23 = arith.constant 0 : index
    %c0_24 = arith.constant 0 : index
    %40 = vector.load %arg17[%c0_22, %c0_23, %c0_24] : memref<18x18x32xf32, #tpu.memory_space<vmem>>, vector<1x18x32xf32>
    tpu.vector_store %arg17[%c0_22, %c0_23, %c0_24], %39 {strides = array<i32>} : memref<18x18x32xf32, #tpu.memory_space<vmem>>, vector<1x18x32xf32>,
    %cst_25 = arith.constant 0.000000e+00 : f32
    %41 = vector.broadcast %cst_25 : f32 to vector<1x18x32xf32>
    %c17 = arith.constant 17 : index
    %c0_26 = arith.constant 0 : index
    %c0_27 = arith.constant 0 : index
    %42 = vector.load %arg17[%c17, %c0_26, %c0_27] : memref<18x18x32xf32, #tpu.memory_space<vmem>>, vector<1x18x32xf32>
    tpu.vector_store %arg17[%c17, %c0_26, %c0_27], %41 {strides = array<i32>} : memref<18x18x32xf32, #tpu.memory_space<vmem>>, vector<1x18x32xf32>,
    %43 = tpu.concatenate %38, %37, %38 in 1 : vector<16x1x32xf32>, vector<16x16x32xf32>, vector<16x1x32xf32> -> vector<16x18x32xf32>
    %c1 = arith.constant 1 : index
    %c0_28 = arith.constant 0 : index
    %c0_29 = arith.constant 0 : index
    %44 = vector.load %arg17[%c1, %c0_28, %c0_29] : memref<18x18x32xf32, #tpu.memory_space<vmem>>, vector<16x18x32xf32>
    tpu.vector_store %arg17[%c1, %c0_28, %c0_29], %43 {strides = array<i32>} : memref<18x18x32xf32, #tpu.memory_space<vmem>>, vector<16x18x32xf32>,
    %c0_30 = arith.constant 0 : index
    %c0_31 = arith.constant 0 : index
    %45 = vector.load %arg7[%c0_30, %c0_31] : memref<1x64xf32, #tpu.memory_space<vmem>>, vector<1x64xf32>
    %c0_32 = arith.constant 0 : index
    %c0_33 = arith.constant 0 : index
    %c0_34 = arith.constant 0 : index
    %46 = vector.load %arg17[%c0_32, %c0_33, %c0_34] : memref<18x18x32xf32, #tpu.memory_space<vmem>>, vector<16x16x32xf32>
    %c0_35 = arith.constant 0 : index
    %c1_36 = arith.constant 1 : index
    %c0_37 = arith.constant 0 : index
    %47 = vector.load %arg17[%c0_35, %c1_36, %c0_37] : memref<18x18x32xf32, #tpu.memory_space<vmem>>, vector<16x16x32xf32>
    %c0_38 = arith.constant 0 : index
    %c2 = arith.constant 2 : index
    %c0_39 = arith.constant 0 : index
    %48 = vector.load %arg17[%c0_38, %c2, %c0_39] : memref<18x18x32xf32, #tpu.memory_space<vmem>>, vector<16x16x32xf32>
    %c1_40 = arith.constant 1 : index
    %c0_41 = arith.constant 0 : index
    %c0_42 = arith.constant 0 : index
    %49 = vector.load %arg17[%c1_40, %c0_41, %c0_42] : memref<18x18x32xf32, #tpu.memory_space<vmem>>, vector<16x16x32xf32>
    %c1_43 = arith.constant 1 : index
    %c1_44 = arith.constant 1 : index
    %c0_45 = arith.constant 0 : index
    %50 = vector.load %arg17[%c1_43, %c1_44, %c0_45] : memref<18x18x32xf32, #tpu.memory_space<vmem>>, vector<16x16x32xf32>
    %c1_46 = arith.constant 1 : index
    %c2_47 = arith.constant 2 : index
    %c0_48 = arith.constant 0 : index
    %51 = vector.load %arg17[%c1_46, %c2_47, %c0_48] : memref<18x18x32xf32, #tpu.memory_space<vmem>>, vector<16x16x32xf32>
    %c2_49 = arith.constant 2 : index
    %c0_50 = arith.constant 0 : index
    %c0_51 = arith.constant 0 : index
    %52 = vector.load %arg17[%c2_49, %c0_50, %c0_51] : memref<18x18x32xf32, #tpu.memory_space<vmem>>, vector<16x16x32xf32>
    %c2_52 = arith.constant 2 : index
    %c1_53 = arith.constant 1 : index
    %c0_54 = arith.constant 0 : index
    %53 = vector.load %arg17[%c2_52, %c1_53, %c0_54] : memref<18x18x32xf32, #tpu.memory_space<vmem>>, vector<16x16x32xf32>
    %c2_55 = arith.constant 2 : index
    %c2_56 = arith.constant 2 : index
    %c0_57 = arith.constant 0 : index
    %54 = vector.load %arg17[%c2_55, %c2_56, %c0_57] : memref<18x18x32xf32, #tpu.memory_space<vmem>>, vector<16x16x32xf32>
    %55 = tpu.concatenate %46, %47, %48, %49, %50, %51, %52, %53, %54 in 2 : vector<16x16x32xf32>, vector<16x16x32xf32>, vector<16x16x32xf32>, vector<16x16x32xf32>, vector<16x16x32xf32>, vector<16x16x32xf32>, vector<16x16x32xf32>, vector<16x16x32xf32>, vector<16x16x32xf32> -> vector<16x16x288xf32>
    %56 = vector.shape_cast %55 : vector<16x16x288xf32> to vector<256x288xf32>
    %c0_58 = arith.constant 0 : index
    %c0_59 = arith.constant 0 : index
    %c0_60 = arith.constant 0 : index
    %57 = vector.load %arg6[%c0_58, %c0_59, %c0_60] : memref<1x288x64xf32, #tpu.memory_space<vmem>>, vector<1x288x64xf32>
    %58 = vector.shape_cast %57 : vector<1x288x64xf32> to vector<288x64xf32>
    %cst_61 = arith.constant dense<0.000000e+00> : vector<256x64xf32>
    %59 = tpu.matmul %56, %58, %cst_61 {dimension_numbers = #tpu.dot_dimension_numbers<[1], [0], [0], [1], [0, 0, 1, 1], [], []>} : vector<256x288xf32>, vector<288x64xf32>, vector<256x64xf32> -> vector<256x64xf32>
    %60 = vector.broadcast %45 : vector<1x64xf32> to vector<256x64xf32>
    %61 = arith.addf %59, %60 : vector<256x64xf32>
    %c0_62 = arith.constant 0 : index
    %c0_63 = arith.constant 0 : index
    %62 = vector.load %arg8[%c0_62, %c0_63] : memref<1x64xf32, #tpu.memory_space<vmem>>, vector<1x64xf32>
    %c0_64 = arith.constant 0 : index
    %c0_65 = arith.constant 0 : index
    %63 = vector.load %arg9[%c0_64, %c0_65] : memref<1x64xf32, #tpu.memory_space<vmem>>, vector<1x64xf32>
    %c0_66 = arith.constant 0 : index
    %c0_67 = arith.constant 0 : index
    %64 = vector.load %arg10[%c0_66, %c0_67] : memref<64x32xf32, #tpu.memory_space<vmem>>, vector<64x32xf32>
    %c0_68 = arith.constant 0 : index
    %c0_69 = arith.constant 0 : index
    %65 = vector.load %arg11[%c0_68, %c0_69] : memref<32x64xf32, #tpu.memory_space<vmem>>, vector<32x64xf32>
    %cst_70 = arith.constant dense<0.000000e+00> : vector<64xf32>
    %66 = vector.multi_reduction <add>, %61, %cst_70 [0] : vector<256x64xf32> to vector<64xf32>
    %67 = vector.shape_cast %66 : vector<64xf32> to vector<1x64xf32>
    %cst_71 = arith.constant dense<0.000000e+00> : vector<1x32xf32>
    %68 = tpu.matmul %67, %64, %cst_71 {dimension_numbers = #tpu.dot_dimension_numbers<[1], [0], [0], [1], [0, 0, 1, 1], [], []>} : vector<1x64xf32>, vector<64x32xf32>, vector<1x32xf32> -> vector<1x32xf32>
    %cst_72 = arith.constant 5.120000e+02 : f32
    %69 = vector.broadcast %cst_72 : f32 to vector<1x32xf32>
    %70 = arith.divf %68, %69 : vector<1x32xf32>
    %cst_73 = arith.constant dense<0.000000e+00> : vector<1x64xf32>
    %71 = tpu.matmul %70, %65, %cst_73 {dimension_numbers = #tpu.dot_dimension_numbers<[1], [0], [0], [1], [0, 0, 1, 1], [], []>} : vector<1x32xf32>, vector<32x64xf32>, vector<1x64xf32> -> vector<1x64xf32>
    %72 = vector.broadcast %71 : vector<1x64xf32> to vector<256x64xf32>
    %73 = arith.subf %61, %72 : vector<256x64xf32>
    %74 = arith.mulf %73, %73 : vector<256x64xf32>
    %cst_74 = arith.constant dense<0.000000e+00> : vector<64xf32>
    %75 = vector.multi_reduction <add>, %74, %cst_74 [0] : vector<256x64xf32> to vector<64xf32>
    %76 = vector.shape_cast %75 : vector<64xf32> to vector<1x64xf32>
    %cst_75 = arith.constant dense<0.000000e+00> : vector<1x32xf32>
    %77 = tpu.matmul %76, %64, %cst_75 {dimension_numbers = #tpu.dot_dimension_numbers<[1], [0], [0], [1], [0, 0, 1, 1], [], []>} : vector<1x64xf32>, vector<64x32xf32>, vector<1x32xf32> -> vector<1x32xf32>
    %cst_76 = arith.constant 5.120000e+02 : f32
    %78 = vector.broadcast %cst_76 : f32 to vector<1x32xf32>
    %79 = arith.divf %77, %78 : vector<1x32xf32>
    %cst_77 = arith.constant 9.99999997E-7 : f32
    %80 = vector.broadcast %cst_77 : f32 to vector<1x32xf32>
    %81 = arith.addf %79, %80 : vector<1x32xf32>
    %82 = math.rsqrt %81 : vector<1x32xf32>
    %cst_78 = arith.constant dense<0.000000e+00> : vector<1x64xf32>
    %83 = tpu.matmul %82, %65, %cst_78 {dimension_numbers = #tpu.dot_dimension_numbers<[1], [0], [0], [1], [0, 0, 1, 1], [], []>} : vector<1x32xf32>, vector<32x64xf32>, vector<1x64xf32> -> vector<1x64xf32>
    %84 = arith.mulf %83, %62 : vector<1x64xf32>
    %85 = arith.mulf %71, %84 : vector<1x64xf32>
    %86 = arith.subf %63, %85 : vector<1x64xf32>
    %87 = vector.broadcast %84 : vector<1x64xf32> to vector<256x64xf32>
    %88 = arith.mulf %61, %87 : vector<256x64xf32>
    %89 = vector.broadcast %86 : vector<1x64xf32> to vector<256x64xf32>
    %90 = arith.addf %88, %89 : vector<256x64xf32>
    %91 = arith.negf %90 : vector<256x64xf32>
    %92 = math.exp %91 : vector<256x64xf32>
    %cst_79 = arith.constant 1.000000e+00 : f32
    %93 = vector.broadcast %cst_79 : f32 to vector<256x64xf32>
    %94 = arith.addf %93, %92 : vector<256x64xf32>
    %95 = arith.divf %93, %94 : vector<256x64xf32>
    %96 = arith.mulf %90, %95 : vector<256x64xf32>
    %97 = vector.shape_cast %96 : vector<256x64xf32> to vector<16x16x64xf32>
    %cst_80 = arith.constant 0.000000e+00 : f32
    %98 = vector.broadcast %cst_80 : f32 to vector<16x1x64xf32>
    %cst_81 = arith.constant 0.000000e+00 : f32
    %99 = vector.broadcast %cst_81 : f32 to vector<1x18x64xf32>
    %c0_82 = arith.constant 0 : index
    %c0_83 = arith.constant 0 : index
    %c0_84 = arith.constant 0 : index
    %100 = vector.load %arg18[%c0_82, %c0_83, %c0_84] : memref<18x18x64xf32, #tpu.memory_space<vmem>>, vector<1x18x64xf32>
    tpu.vector_store %arg18[%c0_82, %c0_83, %c0_84], %99 {strides = array<i32>} : memref<18x18x64xf32, #tpu.memory_space<vmem>>, vector<1x18x64xf32>,
    %cst_85 = arith.constant 0.000000e+00 : f32
    %101 = vector.broadcast %cst_85 : f32 to vector<1x18x64xf32>
    %c17_86 = arith.constant 17 : index
    %c0_87 = arith.constant 0 : index
    %c0_88 = arith.constant 0 : index
    %102 = vector.load %arg18[%c17_86, %c0_87, %c0_88] : memref<18x18x64xf32, #tpu.memory_space<vmem>>, vector<1x18x64xf32>
    tpu.vector_store %arg18[%c17_86, %c0_87, %c0_88], %101 {strides = array<i32>} : memref<18x18x64xf32, #tpu.memory_space<vmem>>, vector<1x18x64xf32>,
    %103 = tpu.concatenate %98, %97, %98 in 1 : vector<16x1x64xf32>, vector<16x16x64xf32>, vector<16x1x64xf32> -> vector<16x18x64xf32>
    %c1_89 = arith.constant 1 : index
    %c0_90 = arith.constant 0 : index
    %c0_91 = arith.constant 0 : index
    %104 = vector.load %arg18[%c1_89, %c0_90, %c0_91] : memref<18x18x64xf32, #tpu.memory_space<vmem>>, vector<16x18x64xf32>
    tpu.vector_store %arg18[%c1_89, %c0_90, %c0_91], %103 {strides = array<i32>} : memref<18x18x64xf32, #tpu.memory_space<vmem>>, vector<16x18x64xf32>,
    %c0_92 = arith.constant 0 : index
    %c0_93 = arith.constant 0 : index
    %105 = vector.load %arg13[%c0_92, %c0_93] : memref<1x64xf32, #tpu.memory_space<vmem>>, vector<1x64xf32>
    %c0_94 = arith.constant 0 : index
    %c0_95 = arith.constant 0 : index
    %c0_96 = arith.constant 0 : index
    %106 = vector.load %arg18[%c0_94, %c0_95, %c0_96] : memref<18x18x64xf32, #tpu.memory_space<vmem>>, vector<16x16x64xf32>
    %c0_97 = arith.constant 0 : index
    %c1_98 = arith.constant 1 : index
    %c0_99 = arith.constant 0 : index
    %107 = vector.load %arg18[%c0_97, %c1_98, %c0_99] : memref<18x18x64xf32, #tpu.memory_space<vmem>>, vector<16x16x64xf32>
    %c0_100 = arith.constant 0 : index
    %c2_101 = arith.constant 2 : index
    %c0_102 = arith.constant 0 : index
    %108 = vector.load %arg18[%c0_100, %c2_101, %c0_102] : memref<18x18x64xf32, #tpu.memory_space<vmem>>, vector<16x16x64xf32>
    %c1_103 = arith.constant 1 : index
    %c0_104 = arith.constant 0 : index
    %c0_105 = arith.constant 0 : index
    %109 = vector.load %arg18[%c1_103, %c0_104, %c0_105] : memref<18x18x64xf32, #tpu.memory_space<vmem>>, vector<16x16x64xf32>
    %c1_106 = arith.constant 1 : index
    %c1_107 = arith.constant 1 : index
    %c0_108 = arith.constant 0 : index
    %110 = vector.load %arg18[%c1_106, %c1_107, %c0_108] : memref<18x18x64xf32, #tpu.memory_space<vmem>>, vector<16x16x64xf32>
    %c1_109 = arith.constant 1 : index
    %c2_110 = arith.constant 2 : index
    %c0_111 = arith.constant 0 : index
    %111 = vector.load %arg18[%c1_109, %c2_110, %c0_111] : memref<18x18x64xf32, #tpu.memory_space<vmem>>, vector<16x16x64xf32>
    %c2_112 = arith.constant 2 : index
    %c0_113 = arith.constant 0 : index
    %c0_114 = arith.constant 0 : index
    %112 = vector.load %arg18[%c2_112, %c0_113, %c0_114] : memref<18x18x64xf32, #tpu.memory_space<vmem>>, vector<16x16x64xf32>
    %c2_115 = arith.constant 2 : index
    %c1_116 = arith.constant 1 : index
    %c0_117 = arith.constant 0 : index
    %113 = vector.load %arg18[%c2_115, %c1_116, %c0_117] : memref<18x18x64xf32, #tpu.memory_space<vmem>>, vector<16x16x64xf32>
    %c2_118 = arith.constant 2 : index
    %c2_119 = arith.constant 2 : index
    %c0_120 = arith.constant 0 : index
    %114 = vector.load %arg18[%c2_118, %c2_119, %c0_120] : memref<18x18x64xf32, #tpu.memory_space<vmem>>, vector<16x16x64xf32>
    %115 = tpu.concatenate %106, %107, %108, %109, %110, %111, %112, %113, %114 in 2 : vector<16x16x64xf32>, vector<16x16x64xf32>, vector<16x16x64xf32>, vector<16x16x64xf32>, vector<16x16x64xf32>, vector<16x16x64xf32>, vector<16x16x64xf32>, vector<16x16x64xf32>, vector<16x16x64xf32> -> vector<16x16x576xf32>
    %116 = vector.shape_cast %115 : vector<16x16x576xf32> to vector<256x576xf32>
    %c0_121 = arith.constant 0 : index
    %c0_122 = arith.constant 0 : index
    %c0_123 = arith.constant 0 : index
    %117 = vector.load %arg12[%c0_121, %c0_122, %c0_123] : memref<1x576x64xf32, #tpu.memory_space<vmem>>, vector<1x576x64xf32>
    %118 = vector.shape_cast %117 : vector<1x576x64xf32> to vector<576x64xf32>
    %cst_124 = arith.constant dense<0.000000e+00> : vector<256x64xf32>
    %119 = tpu.matmul %116, %118, %cst_124 {dimension_numbers = #tpu.dot_dimension_numbers<[1], [0], [0], [1], [0, 0, 1, 1], [], []>} : vector<256x576xf32>, vector<576x64xf32>, vector<256x64xf32> -> vector<256x64xf32>
    %120 = vector.broadcast %105 : vector<1x64xf32> to vector<256x64xf32>
    %121 = arith.addf %119, %120 : vector<256x64xf32>
    %c0_125 = arith.constant 0 : index
    %c0_126 = arith.constant 0 : index
    %c0_127 = arith.constant 0 : index
    %c0_128 = arith.constant 0 : index
    %122 = vector.load %arg1[%c0_125, %c0_126, %c0_127, %c0_128] : memref<1x16x16x32xf32, #tpu.memory_space<vmem>>, vector<1x16x16x32xf32>
    %123 = vector.shape_cast %122 : vector<1x16x16x32xf32> to vector<256x32xf32>
    %c0_129 = arith.constant 0 : index
    %c0_130 = arith.constant 0 : index
    %124 = vector.load %arg14[%c0_129, %c0_130] : memref<32x64xf32, #tpu.memory_space<vmem>>, vector<32x64xf32>
    %cst_131 = arith.constant dense<0.000000e+00> : vector<256x64xf32>
    %125 = tpu.matmul %123, %124, %cst_131 {dimension_numbers = #tpu.dot_dimension_numbers<[1], [0], [0], [1], [0, 0, 1, 1], [], []>} : vector<256x32xf32>, vector<32x64xf32>, vector<256x64xf32> -> vector<256x64xf32>
    %c0_132 = arith.constant 0 : index
    %c0_133 = arith.constant 0 : index
    %126 = vector.load %arg15[%c0_132, %c0_133] : memref<1x64xf32, #tpu.memory_space<vmem>>, vector<1x64xf32>
    %127 = vector.broadcast %126 : vector<1x64xf32> to vector<256x64xf32>
    %128 = arith.addf %125, %127 : vector<256x64xf32>
    %129 = arith.addf %121, %128 : vector<256x64xf32>
    %130 = vector.shape_cast %129 : vector<256x64xf32> to vector<1x16x16x64xf32>
    %c0_134 = arith.constant 0 : index
    %c0_135 = arith.constant 0 : index
    %c0_136 = arith.constant 0 : index
    %c0_137 = arith.constant 0 : index
    %131 = vector.load %arg16[%c0_134, %c0_135, %c0_136, %c0_137] : memref<1x16x16x64xf32, #tpu.memory_space<vmem>>, vector<1x16x16x64xf32>
    tpu.vector_store %arg16[%c0_134, %c0_135, %c0_136, %c0_137], %130 {strides = array<i32>} : memref<1x16x16x64xf32, #tpu.memory_space<vmem>>, vector<1x16x16x64xf32>,
    return
  }
  func.func @transform_0(%arg0: i32) -> (i32, i32, i32, i32) {
    %c0_i32 = arith.constant 0 : i32
    %c0_i32_0 = arith.constant 0 : i32
    %c0_i32_1 = arith.constant 0 : i32
    %c0_i32_2 = arith.constant 0 : i32
    return %arg0, %c0_i32, %c0_i32_0, %c0_i32_1 : i32, i32, i32, i32
  }
  func.func @transform_1(%arg0: i32) -> (i32, i32) {
    %c0_i32 = arith.constant 0 : i32
    %c0_i32_0 = arith.constant 0 : i32
    %c0_i32_1 = arith.constant 0 : i32
    return %c0_i32, %c0_i32_0 : i32, i32
  }
  func.func @transform_2(%arg0: i32) -> (i32, i32) {
    %c0_i32 = arith.constant 0 : i32
    %c0_i32_0 = arith.constant 0 : i32
    %c0_i32_1 = arith.constant 0 : i32
    return %c0_i32, %c0_i32_0 : i32, i32
  }
  func.func @transform_3(%arg0: i32) -> (i32, i32) {
    %c0_i32 = arith.constant 0 : i32
    %c0_i32_0 = arith.constant 0 : i32
    %c0_i32_1 = arith.constant 0 : i32
    return %c0_i32, %c0_i32_0 : i32, i32
  }
  func.func @transform_4(%arg0: i32) -> (i32, i32) {
    %c0_i32 = arith.constant 0 : i32
    %c0_i32_0 = arith.constant 0 : i32
    %c0_i32_1 = arith.constant 0 : i32
    return %c0_i32, %c0_i32_0 : i32, i32
  }
  func.func @transform_5(%arg0: i32) -> (i32, i32, i32) {
    %c0_i32 = arith.constant 0 : i32
    %c0_i32_0 = arith.constant 0 : i32
    %c0_i32_1 = arith.constant 0 : i32
    %c0_i32_2 = arith.constant 0 : i32
    return %c0_i32, %c0_i32_0, %c0_i32_1 : i32, i32, i32
  }
  func.func @transform_6(%arg0: i32) -> (i32, i32) {
    %c0_i32 = arith.constant 0 : i32
    %c0_i32_0 = arith.constant 0 : i32
    %c0_i32_1 = arith.constant 0 : i32
    return %c0_i32, %c0_i32_0 : i32, i32
  }
  func.func @transform_7(%arg0: i32) -> (i32, i32) {
    %c0_i32 = arith.constant 0 : i32
    %c0_i32_0 = arith.constant 0 : i32
    %c0_i32_1 = arith.constant 0 : i32
    return %c0_i32, %c0_i32_0 : i32, i32
  }
  func.func @transform_8(%arg0: i32) -> (i32, i32) {
    %c0_i32 = arith.constant 0 : i32
    %c0_i32_0 = arith.constant 0 : i32
    %c0_i32_1 = arith.constant 0 : i32
    return %c0_i32, %c0_i32_0 : i32, i32
  }
  func.func @transform_9(%arg0: i32) -> (i32, i32) {
    %c0_i32 = arith.constant 0 : i32
    %c0_i32_0 = arith.constant 0 : i32
    %c0_i32_1 = arith.constant 0 : i32
    return %c0_i32, %c0_i32_0 : i32, i32
  }
  func.func @transform_10(%arg0: i32) -> (i32, i32) {
    %c0_i32 = arith.constant 0 : i32
    %c0_i32_0 = arith.constant 0 : i32
    %c0_i32_1 = arith.constant 0 : i32
    return %c0_i32, %c0_i32_0 : i32, i32
  }
  func.func @transform_11(%arg0: i32) -> (i32, i32, i32) {
    %c0_i32 = arith.constant 0 : i32
    %c0_i32_0 = arith.constant 0 : i32
    %c0_i32_1 = arith.constant 0 : i32
    %c0_i32_2 = arith.constant 0 : i32
    return %c0_i32, %c0_i32_0, %c0_i32_1 : i32, i32, i32
  }
  func.func @transform_12(%arg0: i32) -> (i32, i32) {
    %c0_i32 = arith.constant 0 : i32
    %c0_i32_0 = arith.constant 0 : i32
    %c0_i32_1 = arith.constant 0 : i32
    return %c0_i32, %c0_i32_0 : i32, i32
  }
  func.func @transform_13(%arg0: i32) -> (i32, i32) {
    %c0_i32 = arith.constant 0 : i32
    %c0_i32_0 = arith.constant 0 : i32
    %c0_i32_1 = arith.constant 0 : i32
    return %c0_i32, %c0_i32_0 : i32, i32
  }
  func.func @transform_14(%arg0: i32) -> (i32, i32) {
    %c0_i32 = arith.constant 0 : i32
    %c0_i32_0 = arith.constant 0 : i32
    %c0_i32_1 = arith.constant 0 : i32
    return %c0_i32, %c0_i32_0 : i32, i32
  }
  func.func @transform_15(%arg0: i32) -> (i32, i32, i32, i32) {
    %c0_i32 = arith.constant 0 : i32
    %c0_i32_0 = arith.constant 0 : i32
    %c0_i32_1 = arith.constant 0 : i32
    %c0_i32_2 = arith.constant 0 : i32
    return %arg0, %c0_i32, %c0_i32_0, %c0_i32_1 : i32, i32, i32, i32
  }
}

</mosaic_0001>

<bundles_post_ra>
// kernel: tpu_custom_call.1
= control target key start
LH: loop header
LB: loop body
LE: loop exit
PB: predicated region body
PF: predicated region fallthrough
CT: control target
= control target key end

     0   :  { %s12250_s0 = inlined_call_operand.vmem [shape: f32[2,16,16,32], index: 0, kind: input, shape index: {}]   ;;  %s12251_s1 = inlined_call_operand.vmem [shape: f32[1,32], index: 1, kind: input, shape index: {}]   ;;  %s12252_s2 = inlined_call_operand.vmem [shape: f32[1,32], index: 2, kind: input, shape index: {}]   ;;  %s12253_s3 = inlined_call_operand.vmem [shape: f32[32,32], index: 3, kind: input, shape index: {}]   ;;  %s12254_s4 = inlined_call_operand.vmem [shape: f32[32,32], index: 4, kind: input, shape index: {}]   ;;  %s12255_s5 = inlined_call_operand.vmem [shape: f32[1,288,64], index: 5, kind: input, shape index: {}]   ;;  %s12256_s6 = inlined_call_operand.vmem [shape: f32[1,64], index: 6, kind: input, shape index: {}]   ;;  %s12257_s7 = inlined_call_operand.vmem [shape: f32[1,64], index: 7, kind: input, shape index: {}]   ;;  %s12258_s8 = inlined_call_operand.vmem [shape: f32[1,64], index: 8, kind: input, shape index: {}]   ;;  %s12259_s9 = inlined_call_operand.vmem [shape: f32[64,32], index: 9, kind: input, shape index: {}]   ;;  %s12260_s10 = inlined_call_operand.vmem [shape: f32[32,64], index: 10, kind: input, shape index: {}]   ;;  %s12261_s11 = inlined_call_operand.vmem [shape: f32[1,576,64], index: 11, kind: input, shape index: {}]   ;;  %s12262_s12 = inlined_call_operand.vmem [shape: f32[1,64], index: 12, kind: input, shape index: {}]   ;;  %s12263_s13 = inlined_call_operand.vmem [shape: f32[32,64], index: 13, kind: input, shape index: {}]   ;;  %s12264_s14 = inlined_call_operand.vmem [shape: f32[1,64], index: 14, kind: input, shape index: {}]   ;;  %s12265_s15 = inlined_call_operand.hbm [shape: f32[2,16,16,64], index: 15, kind: output, shape index: {}]  }
   0x1   :  { %12269 = sst [smem:[#allocation9_spill]] %s12250_s0 }
   0x2   :  { %12270 = sst [smem:[#allocation10_spill]] %s12251_s1 }
   0x3   :  { %12271 = sst [smem:[#allocation11_spill]] %s12252_s2 }
   0x4   :  { %20 = vsyncpa [#allocation5], 0 }
   0x5   :  { %22 = vsyncpa [#allocation5 + $0x1], 0  ;;  %s8606_s18 = smov 0   ;;  %s8608_s19 = smov 0  }
   0x6   :  { %s8610_s20 = smov 0   ;;  %s8612_s21 = smov 0  }
   0x7 LB: > { %12272 = sst [smem:[#allocation7_spill]] %s8512_s20  ;;  %s8627_s22 = sadd.s32 4294967295, %s8516_s21   ;;  %s8516_s21 = sphi %s8612_s21, %s12284_s21   ;;  %s8512_s20 = sphi %s8610_s20, %s12281_s20   ;;  %s8508_s19 = sphi %s8608_s19, %s12283_s19   ;;  %s8504_s18 = sphi %s8606_s18, %s12282_s18  }
   0x8   : > { %s6716_s23 = sadd.s32 4294967294, %s8516_s21   ;;  %s8631_s24 = sadd.s32 1, %s8516_s21  }
   0x9   : > { %s355_s25 = sadd.s32 1, %s8512_s20  ;;  %s352_s26 = ssub.s32 %s8516_s21, %s8631_s24 }
   0xa   : > { %p365_p0 = scmp.ne.s32.totalorder %s8512_s20, %s8508_s19  ;;  %p353_p1 = scmp.eq.s32.totalorder %s352_s26, 0 }
   0xb   : > { %p366_p2 = scmp.eq.s32.totalorder %s8627_s22, 1  ;;  %p371_p3 = scmp.ne.s32.totalorder %s8508_s19, %s8504_s18 }
   0xc   : > { %p372_p4 = scmp.eq.s32.totalorder %s6716_s23, 1  ;;  %p6719_p7 = scmp.ge.s32.totalorder %s8516_s21, 1 }
   0xd   : > { %s8642_s27 = scalar_select %p353_p1, %s8512_s20, %s355_s25  }
   0xe   : > { %p8644_p5 = por %p366_p2, %p365_p0  ;;  %p8648_p6 = por %p372_p4, %p371_p3 }
   0xf   : > { %12273 = sst [smem:[#allocation8_spill]] %s8642_s27  ;;  %p440_p8 = scmp.lt.s32.totalorder %s8516_s21, 3 }
  0x11   : > { %p441_p9 = pnand %p6719_p7, %p440_p8 }
  0x12   : > { %p488_p10 = scmp.lt.s32.totalorder (!%p441_p9), %s8627_s22, 1  ;;  %s12276_s0 = sld [smem:[#allocation9_spill]] (!%p441_p9) }
  0x13   : > { %444 = sbr.rel (%p441_p9) target bundleno = 3063 (0xbf7), region = 80  ;;  %s12277_s1 = sld [smem:[#allocation10_spill]] (!%p441_p9) }
  0x14   : > { %s12278_s2 = sld [smem:[#allocation11_spill]] (!%p441_p9)  ;;  %s12267_s25 = smov (!%p441_p9), 64  }
  0x15   : > { %s6900_s17 = sshll.u32 (!%p441_p9), %s8627_s22, 12 }
  0x16   : > { %s12196_s27 = scalar_lea.hbm (!%p441_p9), %s12265_s15, %s6900_s17 }
  0x18   : > { %v8657_v0 = vld [vmem:[%s12253_s3 + $0x18] sm:$0xff]  ;;  %v8518_v1 = vmov 0.0   ;;  %v8664_v2 = vld [vmem:[%s12253_s3 + $0x10] sm:$0xff]  ;;  %vm8519_vm0 = vmmov 0   ;;  %vm535_vm1 = vcmask 261120   ;;  %vm1342_vm2 = vcmask 254976  }
  0x19   : > { %7061 = vmatprep.subr.mxu0 %v8518_v1  ;;  %7069 = vmatprep.mubr.msk.f32.mxu0 %vm8519_vm0, %v8518_v1  ;;  %v8671_v3 = vld [vmem:[%s12254_s4 + $0x18] sm:$0xff]  ;;  %s489_s30 = scalar_select %p488_p10, %s8627_s22, 1  ;;  %1340 = vst.msk [vmem:[#allocation2] sm:$0xff] %vm535_vm1, %v8518_v1  ;;  %1341 = vst.msk [vmem:[#allocation2 + $0x8] sm:$0xff] %vm535_vm1, %v8518_v1  ;;  %v8691_v4 = vld [vmem:[%s12254_s4 + $0x10] sm:$0xff]  ;;  %vm1380_vm3 = vcmask 1040384  }
  0x1a   : > { %7062 = vmatpush3.msra.mxu0 %v8657_v0  ;;  %1343 = vst.msk [vmem:[#allocation2 + $0x10] sm:$0x3] %vm1342_vm2, %v8518_v1  ;;  %1347 = vst.msk [vmem:[#allocation2 + $0x1a8] sm:$0x3] %vm1342_vm2, %v8518_v1  ;;  %7072 = vmatprep.subr.mxu1 %v8518_v1  ;;  %v8697_v5 = vld [vmem:[%s12253_s3 + $0x8] sm:$0xff]  ;;  %v8706_v6 = vld [vmem:[%s12253_s3] sm:$0xff] }
  0x1b   : > { %1345 = vst.msk [vmem:[#allocation2 + $0x198] sm:$0xff] %vm535_vm1, %v8518_v1  ;;  %1346 = vst.msk [vmem:[#allocation2 + $0x1a0] sm:$0xff] %vm535_vm1, %v8518_v1  ;;  %7063 = vmatprep.subr.mxu0 %v8518_v1  ;;  %7073 = vmatpush3.msra.mxu1 %v8671_v3  ;;  %s6899_s26 = sshll.u32 %s489_s30, 8  ;;  %vm2648_vm4 = vcmask 523264   ;;  %s8521_s30 = smov 32   ;;  %vm2681_vm5 = vcmask 785408  }
  0x1c   : > { %7064 = vmatpush3.msra.mxu0 %v8664_v2  ;;  %7074 = vmatprep.subr.mxu1 %v8518_v1  ;;  %s8711_s23 = scalar_lea.vmem %s12276_s0, %s6899_s26  ;;  %s8520_s26 = smov 96   ;;  %4216 = vst.msk [vmem:[#allocation3] sm:$0xff] %vm2648_vm4, %v8518_v1  ;;  %4217 = vst.msk [vmem:[#allocation3 + $0x8] sm:$0xff] %vm2648_vm4, %v8518_v1  ;;  %vm4218_vm6 = vcmask 517120  }
  0x1d   : > { %7065 = vmatprep.subr.mxu0 %v8518_v1  ;;  %7075 = vmatpush3.msra.mxu1 %v8691_v4  ;;  %v8716_v7 = vld [vmem:[%s8711_s23] sm:$0xff]  ;;  %v8719_v8 = vld [vmem:[%s8711_s23 + $0x8] sm:$0xff]  ;;  %v8722_v9 = vld [vmem:[%s8711_s23 + $0x10] sm:$0xff]  ;;  %4221 = vst.msk [vmem:[#allocation3 + $0x198] sm:$0xff] %vm2648_vm4, %v8518_v1  ;;  %s12279_s0 = smov 64  }
  0x1e   : > { %7066 = vmatpush3.msra.mxu0 %v8697_v5  ;;  %7076 = vmatprep.subr.mxu1 %v8518_v1  ;;  %v8727_v10 = vld [vmem:[%s8711_s23 + $0x18] sm:$0xff]  ;;  %v536_v11 = vsel %vm535_vm1, %v8716_v7, 0.0  ;;  %v537_v12 = vsel %vm535_vm1, %v8719_v8, 0.0  ;;  %v539_v13 = vsel %vm535_vm1, %v8722_v9, 0.0  ;;  %v8739_v14 = vld [vmem:[%s8711_s23 + $0x20] sm:$0xff]  ;;  %v8745_v17 = vld [vmem:[%s8711_s23 + $0x28] sm:$0xff] }
  0x1f   : > { %7067 = vmatprep.subr.mxu0 %v8518_v1  ;;  %7080 = vmatprep.mubr.msk.f32.mxu1 %vm8519_vm0, %v8518_v1  ;;  %v538_v15 = vadd.f32 %v537_v12, %v536_v11  ;;  %v541_v16 = vsel %vm535_vm1, %v8727_v10, 0.0  ;;  %v543_v19 = vsel %vm535_vm1, %v8739_v14, 0.0  ;;  %v8750_v20 = vld [vmem:[%s8711_s23 + $0x30] sm:$0xff]  ;;  %v545_v22 = vsel %vm535_vm1, %v8745_v17, 0.0  ;;  %v8755_v23 = vld [vmem:[%s8711_s23 + $0x38] sm:$0xff]  ;;  %v8760_v26 = vld [vmem:[%s8711_s23 + $0x40] sm:$0xff] }
  0x20   : > { %7068 = vmatpush3.msra.mxu0 %v8706_v6  ;;  %v547_v25 = vsel %vm535_vm1, %v8750_v20, 0.0  ;;  %v549_v28 = vsel %vm535_vm1, %v8755_v23, 0.0  ;;  %v8765_v29 = vld [vmem:[%s8711_s23 + $0x48] sm:$0xff]  ;;  %v551_v31 = vsel %vm535_vm1, %v8760_v26, 0.0  ;;  %v8770_v32 = vld [vmem:[%s8711_s23 + $0x50] sm:$0xff]  ;;  %v8775_v35 = vld [vmem:[%s8711_s23 + $0x58] sm:$0xff] }
  0x21   : > { %7083 = vmatprep.subr.mxu0 %v8518_v1  ;;  %v540_v18 = vadd.f32 %v539_v13, %v538_v15  ;;  %v553_v34 = vsel %vm535_vm1, %v8765_v29, 0.0  ;;  %v555_v37 = vsel %vm535_vm1, %v8770_v32, 0.0  ;;  %v8780_v38 = vld [vmem:[%s8711_s23 + $0x60] sm:$0xff]  ;;  %v557_v40 = vsel %vm535_vm1, %v8775_v35, 0.0  ;;  %v8785_v41 = vld [vmem:[%s8711_s23 + $0x68] sm:$0xff]  ;;  %v8790_v44 = vld [vmem:[%s8711_s23 + $0x70] sm:$0xff] }
  0x22   : > { %v559_v43 = vsel %vm535_vm1, %v8780_v38, 0.0  ;;  %v561_v46 = vsel %vm535_vm1, %v8785_v41, 0.0  ;;  %v8795_v47 = vld [vmem:[%s8711_s23 + $0x78] sm:$0xff]  ;;  %v563_v49 = vsel %vm535_vm1, %v8790_v44, 0.0  ;;  %v8800_v50 = vld [vmem:[%s8711_s23 + $0x80] sm:$0xff]  ;;  %v8805_v53 = vld [vmem:[%s8711_s23 + $0x88] sm:$0xff] }
  0x23   : > { %v542_v21 = vadd.f32 %v541_v16, %v540_v18  ;;  %v565_v52 = vsel %vm535_vm1, %v8795_v47, 0.0  ;;  %v567_v55 = vsel %vm535_vm1, %v8800_v50, 0.0  ;;  %v8810_v56 = vld [vmem:[%s8711_s23 + $0x90] sm:$0xff]  ;;  %v569_v58 = vsel %vm535_vm1, %v8805_v53, 0.0  ;;  %v8815_v59 = vld [vmem:[%s8711_s23 + $0x98] sm:$0xff]  ;;  %v8820_v62 = vld [vmem:[%s8711_s23 + $0xa0] sm:$0xff] }
  0x24   : > { %v571_v61 = vsel %vm535_vm1, %v8810_v56, 0.0  ;;  %v573_v11 = vsel %vm535_vm1, %v8815_v59, 0.0  ;;  %v8825_v12 = vld [vmem:[%s8711_s23 + $0xa8] sm:$0xff]  ;;  %v575_v15 = vsel %vm535_vm1, %v8820_v62, 0.0  ;;  %v8830_v16 = vld [vmem:[%s8711_s23 + $0xb0] sm:$0xff]  ;;  %4222 = vst.msk [vmem:[#allocation3 + $0x1a0] sm:$0xff] %vm2648_vm4, %v8518_v1 }
  0x25   : > { %v544_v24 = vadd.f32 %v543_v19, %v542_v21  ;;  %v577_v19 = vsel %vm535_vm1, %v8825_v12, 0.0  ;;  %v8835_v21 = vld [vmem:[%s8711_s23 + $0xb8] sm:$0xff]  ;;  %4219 = vst.msk [vmem:[#allocation3 + $0x10] sm:$0x3] %vm4218_vm6, %v8518_v1  ;;  %4223 = vst.msk [vmem:[#allocation3 + $0x1a8] sm:$0x3] %vm4218_vm6, %v8518_v1 }
  0x27   : > { %v546_v27 = vadd.f32 %v545_v22, %v544_v24  ;;  %v579_v24 = vsel %vm535_vm1, %v8830_v16, 0.0 }
  0x29   : > { %v548_v30 = vadd.f32 %v547_v25, %v546_v27  ;;  %v8840_v25 = vld [vmem:[%s8711_s23 + $0xc0] sm:$0xff] }
  0x2b   : > { %v550_v33 = vadd.f32 %v549_v28, %v548_v30  ;;  %v581_v28 = vsel %vm535_vm1, %v8835_v21, 0.0  ;;  %v8845_v30 = vld [vmem:[%s8711_s23 + $0xc8] sm:$0xff] }
  0x2d   : > { %v552_v36 = vadd.f32 %v551_v31, %v550_v33  ;;  %v583_v33 = vsel %vm535_vm1, %v8840_v25, 0.0 }
  0x2f   : > { %v554_v39 = vadd.f32 %v553_v34, %v552_v36  ;;  %v8850_v34 = vld [vmem:[%s8711_s23 + $0xd0] sm:$0xff] }
  0x31   : > { %v556_v42 = vadd.f32 %v555_v37, %v554_v39  ;;  %v585_v37 = vsel %vm535_vm1, %v8845_v30, 0.0  ;;  %v8855_v39 = vld [vmem:[%s8711_s23 + $0xd8] sm:$0xff] }
  0x33   : > { %v558_v45 = vadd.f32 %v557_v40, %v556_v42  ;;  %v587_v42 = vsel %vm535_vm1, %v8850_v34, 0.0 }
  0x35   : > { %v560_v48 = vadd.f32 %v559_v43, %v558_v45  ;;  %v8860_v43 = vld [vmem:[%s8711_s23 + $0xe0] sm:$0xff] }
  0x37   : > { %v562_v51 = vadd.f32 %v561_v46, %v560_v48  ;;  %v589_v46 = vsel %vm535_vm1, %v8855_v39, 0.0  ;;  %v8865_v48 = vld [vmem:[%s8711_s23 + $0xe8] sm:$0xff] }
  0x39   : > { %v564_v54 = vadd.f32 %v563_v49, %v562_v51  ;;  %v591_v51 = vsel %vm535_vm1, %v8860_v43, 0.0 }
  0x3b   : > { %v566_v57 = vadd.f32 %v565_v52, %v564_v54  ;;  %v8870_v52 = vld [vmem:[%s8711_s23 + $0xf0] sm:$0xff] }
  0x3d   : > { %v568_v60 = vadd.f32 %v567_v55, %v566_v57  ;;  %v593_v55 = vsel %vm535_vm1, %v8865_v48, 0.0  ;;  %v8875_v57 = vld [vmem:[%s8711_s23 + $0xf8] sm:$0xff] }
  0x3f   : > { %v570_v63 = vadd.f32 %v569_v58, %v568_v60  ;;  %v595_v60 = vsel %vm535_vm1, %v8870_v52, 0.0 }
  0x41   : > { %v572_v13 = vadd.f32 %v571_v61, %v570_v63  ;;  %v597_v63 = vsel %vm535_vm1, %v8875_v57, 0.0 }
  0x43   : > { %v574_v18 = vadd.f32 %v573_v11, %v572_v13 }
  0x45   : > { %v576_v22 = vadd.f32 %v575_v15, %v574_v18 }
  0x47   : > { %v578_v27 = vadd.f32 %v577_v19, %v576_v22 }
  0x49   : > { %v580_v31 = vadd.f32 %v579_v24, %v578_v27 }
  0x4b   : > { %v582_v36 = vadd.f32 %v581_v28, %v580_v31 }
  0x4d   : > { %v584_v40 = vadd.f32 %v583_v33, %v582_v36 }
  0x4f   : > { %v586_v45 = vadd.f32 %v585_v37, %v584_v40 }
  0x51   : > { %v588_v49 = vadd.f32 %v587_v42, %v586_v45 }
  0x53   : > { %v590_v54 = vadd.f32 %v589_v46, %v588_v49 }
  0x55   : > { %v592_v58 = vadd.f32 %v591_v51, %v590_v54 }
  0x57   : > { %v594_v61 = vadd.f32 %v593_v55, %v592_v58 }
  0x59   : > { %v596_v11 = vadd.f32 %v595_v60, %v594_v61 }
  0x5b   : > { %v598_v13 = vadd.f32 %v597_v63, %v596_v11 }
  0x5d   : > { %v599_v15 = vrot.slane %v598_v13, 4 }
  0x5f   : > { %v600_v18 = vadd.f32 %v599_v15, %v598_v13 }
  0x61   : > { %v601_v19 = vrot.slane %v600_v18, 2 }
  0x63   : > { %v602_v22 = vadd.f32 %v601_v19, %v600_v18 }
  0x65   : > { %v603_v24 = vrot.slane %v602_v22, 1 }
  0x67   : > { %v604_v27 = vadd.f32 %v603_v24, %v602_v22 }
  0x69   : > { %7070 = vmatmul.mubr.msk.f32.vlgmr.msra.gmra.mxu0 %vm535_vm1, %v604_v27 }
  0x6a   : > { %7084 = vmatpush3.msra.mxu0 %v8657_v0  ;;  %7091 = vmatprep.mubr.msk.f32.mxu0 %vm8519_vm0, %v8518_v1  ;;  %v532_v0 = vld [vmem:[%s12254_s4 + $0x8] sm:$0xff] }
  0x6b   : > { %7085 = vmatprep.subr.mxu0 %v8518_v1  ;;  %7077 = vmatpush3.msra.mxu1 %v532_v0 }
  0x6c   : > { %7086 = vmatpush3.msra.mxu0 %v8664_v2  ;;  %7078 = vmatprep.subr.mxu1 %v8518_v1  ;;  %v531_v2 = vld [vmem:[%s12254_s4] sm:$0xff] }
  0x6d   : > { %7087 = vmatprep.subr.mxu0 %v8518_v1  ;;  %7079 = vmatpush3.msra.mxu1 %v531_v2 }
  0x6e   : > { %7088 = vmatpush3.msra.mxu0 %v8697_v5  ;;  %7094 = vmatprep.subr.mxu1 %v8518_v1 }
  0x6f   : > { %7089 = vmatprep.subr.mxu0 %v8518_v1 }
  0x70   : > { %7090 = vmatpush3.msra.mxu0 %v8706_v6  ;;  %v753_v6 = vlaneseq }
  0x71   : > { %2948 = vmatprep.subr.mxu0 %v8518_v1 }
  0x72   : > { %v754_v33 = vshrl.u32 %v753_v6, 7 }
  0x74   : > { %v8910_v40 = vsub.s32 0, %v754_v33 }
 0x129   : > { %v674_v5 = vpop.f32.mrf.mxu0 }
 0x12a   : > { %v679_v28 = vmul.f32 0.00390625, %v674_v5 }
 0x12b   : > { %v7071_v31 = vpop.f32.mrf.mxu0 }
 0x12c   : > { %7081 = vmatmul.mubr.msk.f32.vlgmr.msra.gmra.mxu1 %vm535_vm1, %v679_v28 }
 0x12d   : > { %7095 = vmatpush3.msra.mxu1 %v8671_v3  ;;  %7102 = vmatprep.mubr.msk.f32.mxu1 %vm8519_vm0, %v8518_v1 }
 0x12e   : > { %7096 = vmatprep.subr.mxu1 %v8518_v1 }
 0x12f   : > { %7097 = vmatpush3.msra.mxu1 %v8691_v4 }
 0x130   : > { %7098 = vmatprep.subr.mxu1 %v8518_v1 }
 0x131   : > { %7099 = vmatpush3.msra.mxu1 %v532_v0 }
 0x132   : > { %7100 = vmatprep.subr.mxu1 %v8518_v1 }
 0x133   : > { %7101 = vmatpush3.msra.mxu1 %v531_v2 }
 0x1ec   : > { %v8908_v36 = vpop.f32.mrf.mxu1 }
 0x1ed   : > { %v8914_v3 = vrot.slane %v8908_v36, %v8910_v40 }
 0x1ee   : > { %v7082_v37 = vpop.f32.mrf.mxu1 }
 0x1ef   : > { %v757_v4 = vsub.f32 %v8716_v7, %v8914_v3  ;;  %v758_v42 = vsub.f32 %v8719_v8, %v8914_v3  ;;  %v759_v45 = vsub.f32 %v8722_v9, %v8914_v3  ;;  %v760_v46 = vsub.f32 %v8727_v10, %v8914_v3 }
 0x1f0   : > { %v761_v54 = vsub.f32 %v8739_v14, %v8914_v3  ;;  %v762_v58 = vsub.f32 %v8745_v17, %v8914_v3  ;;  %v763_v13 = vsub.f32 %v8750_v20, %v8914_v3  ;;  %v764_v22 = vsub.f32 %v8755_v23, %v8914_v3 }
 0x1f1   : > { %v789_v49 = vmul.f32 %v757_v4, %v757_v4  ;;  %v790_v51 = vmul.f32 %v758_v42, %v758_v42  ;;  %v791_v55 = vmul.f32 %v759_v45, %v759_v45  ;;  %v792_v60 = vmul.f32 %v760_v46, %v760_v46 }
 0x1f2   : > { %v793_v15 = vmul.f32 %v761_v54, %v761_v54  ;;  %v794_v24 = vmul.f32 %v762_v58, %v762_v58  ;;  %v765_v2 = vsub.f32 %v8760_v26, %v8914_v3  ;;  %v795_v5 = vmul.f32 %v763_v13, %v763_v13 }
 0x1f3   : > { %v821_v61 = vsel %vm535_vm1, %v789_v49, 0.0  ;;  %v822_v63 = vsel %vm535_vm1, %v790_v51, 0.0  ;;  %v824_v18 = vsel %vm535_vm1, %v791_v55, 0.0  ;;  %v826_v27 = vsel %vm535_vm1, %v792_v60, 0.0 }
 0x1f4   : > { %v823_v11 = vadd.f32 %v822_v63, %v821_v61  ;;  %v828_v28 = vsel %vm535_vm1, %v793_v15, 0.0  ;;  %v766_v6 = vsub.f32 %v8765_v29, %v8914_v3  ;;  %v796_v33 = vmul.f32 %v764_v22, %v764_v22 }
 0x1f5   : > { %v830_v37 = vsel %vm535_vm1, %v794_v24, 0.0  ;;  %v767_v42 = vsub.f32 %v8770_v32, %v8914_v3  ;;  %v797_v45 = vmul.f32 %v765_v2, %v765_v2  ;;  %v832_v46 = vsel %vm535_vm1, %v795_v5, 0.0 }
 0x1f6   : > { %v825_v19 = vadd.f32 %v824_v18, %v823_v11  ;;  %v768_v51 = vsub.f32 %v8775_v35, %v8914_v3  ;;  %v798_v54 = vmul.f32 %v766_v6, %v766_v6  ;;  %v834_v55 = vsel %vm535_vm1, %v796_v33, 0.0 }
 0x1f7   : > { %v769_v60 = vsub.f32 %v8780_v38, %v8914_v3  ;;  %v799_v61 = vmul.f32 %v767_v42, %v767_v42  ;;  %v836_v63 = vsel %vm535_vm1, %v797_v45, 0.0  ;;  %v770_v13 = vsub.f32 %v8785_v41, %v8914_v3 }
 0x1f8   : > { %v827_v0 = vadd.f32 %v826_v27, %v825_v19  ;;  %v800_v15 = vmul.f32 %v768_v51, %v768_v51  ;;  %v838_v18 = vsel %vm535_vm1, %v798_v54, 0.0  ;;  %v771_v22 = vsub.f32 %v8790_v44, %v8914_v3 }
 0x1f9   : > { %v801_v24 = vmul.f32 %v769_v60, %v769_v60  ;;  %v840_v27 = vsel %vm535_vm1, %v799_v61, 0.0  ;;  %v772_v2 = vsub.f32 %v8795_v47, %v8914_v3  ;;  %v802_v5 = vmul.f32 %v770_v13, %v770_v13 }
 0x1fa   : > { %v829_v31 = vadd.f32 %v828_v28, %v827_v0  ;;  %v842_v28 = vsel %vm535_vm1, %v800_v15, 0.0  ;;  %v773_v6 = vsub.f32 %v8800_v50, %v8914_v3  ;;  %v803_v33 = vmul.f32 %v771_v22, %v771_v22 }
 0x1fb   : > { %v774_v42 = vsub.f32 %v8805_v53, %v8914_v3  ;;  %v804_v45 = vmul.f32 %v772_v2, %v772_v2  ;;  %v775_v51 = vsub.f32 %v8810_v56, %v8914_v3  ;;  %v776_v60 = vsub.f32 %v8815_v59, %v8914_v3 }
 0x1fc   : > { %v831_v4 = vadd.f32 %v830_v37, %v829_v31  ;;  %v844_v37 = vsel %vm535_vm1, %v801_v24, 0.0  ;;  %v805_v54 = vmul.f32 %v773_v6, %v773_v6  ;;  %v777_v13 = vsub.f32 %v8820_v62, %v8914_v3 }
 0x1fd   : > { %v806_v61 = vmul.f32 %v774_v42, %v774_v42  ;;  %v807_v15 = vmul.f32 %v775_v51, %v775_v51  ;;  %v778_v22 = vsub.f32 %v8825_v12, %v8914_v3  ;;  %v808_v24 = vmul.f32 %v776_v60, %v776_v60 }
 0x1fe   : > { %v833_v49 = vadd.f32 %v832_v46, %v831_v4  ;;  %v846_v46 = vsel %vm535_vm1, %v802_v5, 0.0  ;;  %v779_v2 = vsub.f32 %v8830_v16, %v8914_v3  ;;  %v809_v5 = vmul.f32 %v777_v13, %v777_v13 }
 0x1ff   : > { %v780_v6 = vsub.f32 %v8835_v21, %v8914_v3  ;;  %v781_v42 = vsub.f32 %v8840_v25, %v8914_v3  ;;  %v782_v51 = vsub.f32 %v8845_v30, %v8914_v3  ;;  %v783_v60 = vsub.f32 %v8850_v34, %v8914_v3 }
 0x200   : > { %v835_v58 = vadd.f32 %v834_v55, %v833_v49  ;;  %v848_v55 = vsel %vm535_vm1, %v803_v33, 0.0  ;;  %v810_v33 = vmul.f32 %v778_v22, %v778_v22  ;;  %v784_v13 = vsub.f32 %v8855_v39, %v8914_v3 }
 0x201   : > { %v785_v22 = vsub.f32 %v8860_v43, %v8914_v3 }
 0x202   : > { %v837_v11 = vadd.f32 %v836_v63, %v835_v58  ;;  %v850_v63 = vsel %vm535_vm1, %v804_v45, 0.0  ;;  %v811_v45 = vmul.f32 %v779_v2, %v779_v2  ;;  %v786_v2 = vsub.f32 %v8865_v48, %v8914_v3 }
 0x204   : > { %v839_v19 = vadd.f32 %v838_v18, %v837_v11  ;;  %v852_v18 = vsel %vm535_vm1, %v805_v54, 0.0  ;;  %v812_v54 = vmul.f32 %v780_v6, %v780_v6  ;;  %v787_v6 = vsub.f32 %v8870_v52, %v8914_v3 }
 0x206   : > { %v841_v0 = vadd.f32 %v840_v27, %v839_v19  ;;  %v854_v27 = vsel %vm535_vm1, %v806_v61, 0.0  ;;  %v813_v61 = vmul.f32 %v781_v42, %v781_v42  ;;  %v788_v42 = vsub.f32 %v8875_v57, %v8914_v3 }
 0x208   : > { %v843_v31 = vadd.f32 %v842_v28, %v841_v0  ;;  %v856_v28 = vsel %vm535_vm1, %v807_v15, 0.0  ;;  %v814_v15 = vmul.f32 %v782_v51, %v782_v51  ;;  %v819_v51 = vmul.f32 %v787_v6, %v787_v6  ;;  %v2845_v6 = vld [vmem:[%s12255_s5 + $0x118] sm:$0xff] }
 0x209   : > { %7105 = vmatprep.subr.mxu1 %v2845_v6 }
 0x20a   : > { %v845_v4 = vadd.f32 %v844_v37, %v843_v31  ;;  %v858_v37 = vsel %vm535_vm1, %v808_v24, 0.0  ;;  %v815_v24 = vmul.f32 %v783_v60, %v783_v60 }
 0x20c   : > { %v847_v49 = vadd.f32 %v846_v46, %v845_v4  ;;  %v860_v46 = vsel %vm535_vm1, %v809_v5, 0.0  ;;  %v816_v5 = vmul.f32 %v784_v13, %v784_v13 }
 0x20e   : > { %v849_v58 = vadd.f32 %v848_v55, %v847_v49  ;;  %v862_v55 = vsel %vm535_vm1, %v810_v33, 0.0  ;;  %v817_v33 = vmul.f32 %v785_v22, %v785_v22 }
 0x210   : > { %v851_v11 = vadd.f32 %v850_v63, %v849_v58  ;;  %v864_v63 = vsel %vm535_vm1, %v811_v45, 0.0  ;;  %v818_v45 = vmul.f32 %v786_v2, %v786_v2 }
 0x212   : > { %v853_v19 = vadd.f32 %v852_v18, %v851_v11  ;;  %v866_v18 = vsel %vm535_vm1, %v812_v54, 0.0  ;;  %v876_v54 = vsel %vm535_vm1, %v817_v33, 0.0  ;;  %v878_v60 = vsel %vm535_vm1, %v818_v45, 0.0  ;;  %v2844_v33 = vld [vmem:[%s12255_s5 + $0x110] sm:$0xff] }
 0x214   : > { %v855_v0 = vadd.f32 %v854_v27, %v853_v19  ;;  %v868_v27 = vsel %vm535_vm1, %v813_v61, 0.0 }
 0x216   : > { %v857_v31 = vadd.f32 %v856_v28, %v855_v0  ;;  %v870_v28 = vsel %vm535_vm1, %v814_v15, 0.0 }
 0x218   : > { %v859_v4 = vadd.f32 %v858_v37, %v857_v31  ;;  %v872_v37 = vsel %vm535_vm1, %v815_v24, 0.0 }
 0x21a   : > { %v861_v49 = vadd.f32 %v860_v46, %v859_v4  ;;  %v874_v46 = vsel %vm535_vm1, %v816_v5, 0.0 }
 0x21c   : > { %v863_v58 = vadd.f32 %v862_v55, %v861_v49 }
 0x21e   : > { %v865_v11 = vadd.f32 %v864_v63, %v863_v58  ;;  %v820_v58 = vmul.f32 %v788_v42, %v788_v42  ;;  %v880_v63 = vsel %vm535_vm1, %v819_v51, 0.0  ;;  %v525_v42 = vld [vmem:[%s12277_s1] sm:$0x1] }
 0x220   : > { %v867_v19 = vadd.f32 %v866_v18, %v865_v11  ;;  %v882_v13 = vsel %vm535_vm1, %v820_v58, 0.0 }
 0x222   : > { %v869_v0 = vadd.f32 %v868_v27, %v867_v19 }
 0x224   : > { %v871_v31 = vadd.f32 %v870_v28, %v869_v0 }
 0x226   : > { %v873_v4 = vadd.f32 %v872_v37, %v871_v31  ;;  %v2843_v37 = vld [vmem:[%s12255_s5 + $0x108] sm:$0xff] }
 0x228   : > { %v875_v49 = vadd.f32 %v874_v46, %v873_v4  ;;  %v2842_v4 = vld [vmem:[%s12255_s5 + $0x100] sm:$0xff] }
 0x22a   : > { %v877_v55 = vadd.f32 %v876_v54, %v875_v49  ;;  %v526_v49 = vld [vmem:[%s12278_s2] sm:$0x1] }
 0x22c   : > { %v879_v61 = vadd.f32 %v878_v60, %v877_v55 }
 0x22e   : > { %v881_v11 = vadd.f32 %v880_v63, %v879_v61 }
 0x230   : > { %v883_v15 = vadd.f32 %v882_v13, %v881_v11 }
 0x232   : > { %v884_v18 = vrot.slane %v883_v15, 4 }
 0x234   : > { %v885_v3 = vadd.f32 %v884_v18, %v883_v15 }
 0x236   : > { %v886_v19 = vrot.slane %v885_v3, 2 }
 0x238   : > { %v887_v22 = vadd.f32 %v886_v19, %v885_v3 }
 0x23a   : > { %v888_v24 = vrot.slane %v887_v22, 1 }
 0x23c   : > { %v889_v27 = vadd.f32 %v888_v24, %v887_v22 }
 0x23e   : > { %7092 = vmatmul.mubr.msk.f32.vlgmr.msra.gmra.mxu0 %vm535_vm1, %v889_v27 }
 0x2fe   : > { %v959_v0 = vpop.f32.mrf.mxu0 }
 0x2ff   : > { %v963_v2 = vmul.f32 0.00390625, %v959_v0 }
 0x300   : > { %v7093_v5 = vpop.f32.mrf.mxu0 }
 0x301   : > { %v964_v28 = vadd.f32 1e-06, %v963_v2 }
 0x303   : > { %8195 = vrsqrt.f32 %v964_v28 }
 0x310   : > { %v8196_v31 = vpop.eup %8195 }
 0x311   : > { %7103 = vmatmul.mubr.msk.f32.vlgmr.msra.gmra.mxu1 %vm535_vm1, %v8196_v31 }
 0x312   : > { %7106 = vmatpush3.msra.mxu1 %v2845_v6 }
 0x313   : > { %7107 = vmatprep.subr.mxu1 %v2844_v33 }
 0x314   : > { %7108 = vmatpush3.msra.mxu1 %v2844_v33 }
 0x315   : > { %7109 = vmatprep.subr.mxu1 %v2843_v37 }
 0x316   : > { %7110 = vmatpush3.msra.mxu1 %v2843_v37 }
 0x317   : > { %7111 = vmatprep.subr.mxu1 %v2842_v4 }
 0x318   : > { %7112 = vmatpush3.msra.mxu1 %v2842_v4 }
 0x319   : > { %7161 = vmatprep.subr.mxu1 %v8518_v1 }
 0x3d1   : > { %v1035_v45 = vpop.f32.mrf.mxu1 }
 0x3d2   : > { %v1039_v46 = vmul.f32 %v1035_v45, %v525_v42 }
 0x3d3   : > { %v7104_v51 = vpop.f32.mrf.mxu1 }
 0x3d4   : > { %v1040_v54 = vmul.f32 %v1039_v46, %v8908_v36  ;;  %v9035_v55 = vrot.slane %v1039_v46, %v8910_v40 }
 0x3d6   : > { %v1041_v58 = vsub.f32 %v526_v49, %v1040_v54  ;;  %v1067_v60 = vmul.f32 %v9035_v55, %v8825_v12  ;;  %v1068_v63 = vmul.f32 %v9035_v55, %v8830_v16  ;;  %v1069_v11 = vmul.f32 %v9035_v55, %v8835_v21 }
 0x3d7   : > { %v1070_v13 = vmul.f32 %v9035_v55, %v8840_v25  ;;  %v1071_v36 = vmul.f32 %v9035_v55, %v8845_v30  ;;  %v1072_v15 = vmul.f32 %v9035_v55, %v8850_v34  ;;  %v1073_v12 = vmul.f32 %v9035_v55, %v8855_v39 }
 0x3d8   : > { %v9040_v61 = vrot.slane %v1041_v58, %v8910_v40  ;;  %v1074_v30 = vmul.f32 %v9035_v55, %v8860_v43  ;;  %v1075_v3 = vmul.f32 %v9035_v55, %v8865_v48  ;;  %v1076_v19 = vmul.f32 %v9035_v55, %v8870_v52 }
 0x3d9   : > { %v1077_v48 = vmul.f32 %v9035_v55, %v8875_v57  ;;  %v1048_v6 = vmul.f32 %v9035_v55, %v8722_v9  ;;  %v1049_v37 = vmul.f32 %v9035_v55, %v8727_v10  ;;  %v1050_v45 = vmul.f32 %v9035_v55, %v8739_v14 }
 0x3da   : > { %v9055_v18 = vadd.f32 %v9040_v61, %v1067_v60  ;;  %v9058_v16 = vadd.f32 %v9040_v61, %v1068_v63  ;;  %v9061_v21 = vadd.f32 %v9040_v61, %v1069_v11  ;;  %v9064_v25 = vadd.f32 %v9040_v61, %v1070_v13  ;;  %v2825_v13 = vld [vmem:[%s12255_s5 + $0x78] sm:$0xff] }
 0x3db   : > { %v9069_v34 = vadd.f32 %v9040_v61, %v1071_v36  ;;  %v9072_v39 = vadd.f32 %v9040_v61, %v1072_v15  ;;  %v9079_v22 = vadd.f32 %v9040_v61, %v1073_v12  ;;  %v9083_v27 = vadd.f32 %v9040_v61, %v1074_v30  ;;  %v2824_v36 = vld [vmem:[%s12255_s5 + $0x70] sm:$0xff]  ;;  %2949 = vmatpush1.msra.mxu0 %v2825_v13 }
 0x3dc   : > { %v6748_v24 = vmul.f32 -1.442695, %v9055_v18  ;;  %v6749_v43 = vmul.f32 -1.442695, %v9058_v16  ;;  %v6750_v0 = vmul.f32 -1.442695, %v9061_v21  ;;  %v9091_v5 = vadd.f32 %v9040_v61, %v1075_v3  ;;  %2950 = vmatprep.subr.mxu0 %v8518_v1 }
 0x3dd   : > { %v6751_v2 = vmul.f32 -1.442695, %v9064_v25  ;;  %v6752_v52 = vmul.f32 -1.442695, %v9069_v34  ;;  %v9095_v28 = vadd.f32 %v9040_v61, %v1076_v19  ;;  %v6753_v31 = vmul.f32 -1.442695, %v9072_v39  ;;  %2951 = vmatpush1.msra.mxu0 %v2824_v36 }
 0x3de   : > { %8197 = vpow2.f32 %v6748_v24  ;;  %v9101_v33 = vadd.f32 %v9040_v61, %v1077_v48  ;;  %v6754_v57 = vmul.f32 -1.442695, %v9079_v22  ;;  %v6755_v4 = vmul.f32 -1.442695, %v9083_v27  ;;  %2952 = vmatprep.subr.mxu0 %v8518_v1 }
 0x3df   : > { %8199 = vpow2.f32 %v6749_v43  ;;  %v9108_v42 = vadd.f32 %v9040_v61, %v1048_v6  ;;  %v6756_v9 = vmul.f32 -1.442695, %v9091_v5  ;;  %v9114_v46 = vadd.f32 %v9040_v61, %v1049_v37 }
 0x3e0   : > { %8201 = vpow2.f32 %v6750_v0  ;;  %v1051_v49 = vmul.f32 %v9035_v55, %v8745_v17  ;;  %v6757_v10 = vmul.f32 -1.442695, %v9095_v28  ;;  %v9120_v51 = vadd.f32 %v9040_v61, %v1050_v45 }
 0x3e1   : > { %8203 = vpow2.f32 %v6751_v2  ;;  %v1046_v54 = vmul.f32 %v9035_v55, %v8716_v7  ;;  %v6758_v14 = vmul.f32 -1.442695, %v9101_v33  ;;  %v6729_v60 = vmul.f32 -1.442695, %v9108_v42 }
 0x3e2   : > { %8205 = vpow2.f32 %v6752_v52  ;;  %v9126_v58 = vadd.f32 %v9040_v61, %v1051_v49  ;;  %v6730_v63 = vmul.f32 -1.442695, %v9114_v46  ;;  %v6731_v11 = vmul.f32 -1.442695, %v9120_v51 }
 0x3e3   : > { %8207 = vpow2.f32 %v6753_v31  ;;  %v9130_v17 = vadd.f32 %v9040_v61, %v1046_v54  ;;  %v1047_v7 = vmul.f32 %v9035_v55, %v8719_v8  ;;  %v1052_v8 = vmul.f32 %v9035_v55, %v8750_v20  ;;  %v2823_v20 = vld [vmem:[%s12255_s5 + $0x68] sm:$0xff] }
 0x3e4   : > { %8209 = vpow2.f32 %v6754_v57  ;;  %v6732_v15 = vmul.f32 -1.442695, %v9126_v58  ;;  %v9152_v19 = vmul.f32 %v9035_v55, %v8815_v59  ;;  %v1053_v0 = vmul.f32 %v9035_v55, %v8755_v23  ;;  %v2822_v59 = vld [vmem:[%s12255_s5 + $0x60] sm:$0xff]  ;;  %2953 = vmatpush1.msra.mxu0 %v2823_v20 }
 0x3e5   : > { %8211 = vpow2.f32 %v6755_v4  ;;  %v6727_v12 = vmul.f32 -1.442695, %v9130_v17  ;;  %v9145_v30 = vadd.f32 %v9040_v61, %v1047_v7  ;;  %v9158_v2 = vadd.f32 %v9040_v61, %v1052_v8  ;;  %2954 = vmatprep.subr.mxu0 %v8518_v1 }
 0x3e6   : > { %8213 = vpow2.f32 %v6756_v9  ;;  %v1066_v52 = vmul.f32 %v9035_v55, %v8820_v62  ;;  %v9172_v37 = vadd.f32 %v9040_v61, %v1053_v0  ;;  %v1054_v4 = vmul.f32 %v9035_v55, %v8760_v26  ;;  %2955 = vmatpush1.msra.mxu0 %v2822_v59 }
 0x3e7   : > { %8215 = vpow2.f32 %v6757_v10  ;;  %v9169_v6 = vmul.f32 -1.442695, %v9145_v30  ;;  %v1055_v62 = vmul.f32 %v9035_v55, %v8765_v29  ;;  %v1056_v49 = vmul.f32 %v9035_v55, %v8770_v32  ;;  %v2821_v10 = vld [vmem:[%s12255_s5 + $0x58] sm:$0xff]  ;;  %2956 = vmatprep.subr.mxu0 %v8518_v1  ;;  %v2820_v29 = vld [vmem:[%s12255_s5 + $0x50] sm:$0xff] }
 0x3e8   : > { %8217 = vpow2.f32 %v6758_v14  ;;  %v9185_v26 = vmul.f32 -1.442695, %v9158_v2  ;;  %v1057_v7 = vmul.f32 %v9035_v55, %v8775_v35  ;;  %2957 = vmatpush1.msra.mxu0 %v2821_v10  ;;  %v1058_v35 = vmul.f32 %v9035_v55, %v8780_v38  ;;  %v2818_v38 = vld [vmem:[%s12255_s5 + $0x40] sm:$0xff] }
 0x3e9   : > { %8219 = vpow2.f32 %v6729_v60  ;;  %v9188_v60 = vadd.f32 %v9040_v61, %v1054_v4  ;;  %2958 = vmatprep.subr.mxu0 %v8518_v1 }
 0x3ea   : > { %8221 = vpow2.f32 %v6730_v63  ;;  %2959 = vmatpush1.msra.mxu0 %v2820_v29  ;;  %v9227_v4 = vadd.f32 %v9040_v61, %v1058_v35  ;;  %v2817_v29 = vld [vmem:[%s12255_s5 + $0x38] sm:$0xff] }
 0x3eb   : > { %v8198_v3 = vpop.eup %8197  ;;  %8223 = vpow2.f32 %v6731_v11  ;;  %v9195_v11 = vadd.f32 %v9040_v61, %v1055_v62  ;;  %v9215_v59 = vmul.f32 -1.442695, %v9188_v60  ;;  %2960 = vmatprep.subr.mxu0 %v8518_v1  ;;  %v9232_v62 = vadd.f32 %v9040_v61, %v1066_v52 }
 0x3ec   : > { %v8200_v24 = vpop.eup %8199  ;;  %v1233_v43 = vadd.f32 1.0, %v8198_v3  ;;  %8225 = vpow2.f32 %v6732_v15  ;;  %v9200_v15 = vmul.f32 -1.442695, %v9172_v37 }
 0x3ed   : > { %v8202_v48 = vpop.eup %8201  ;;  %v1234_v31 = vadd.f32 1.0, %v8200_v24  ;;  %8227 = vpow2.f32 %v6727_v12  ;;  %v9203_v12 = vadd.f32 %v9040_v61, %v1056_v49  ;;  %v9207_v24 = vadd.f32 %v9040_v61, %v1057_v7 }
 0x3ee   : > { %v8204_v23 = vpop.eup %8203  ;;  %v1235_v57 = vadd.f32 1.0, %v8202_v48  ;;  %8229 = vrcp.f32 %v1233_v43  ;;  %v2819_v43 = vld [vmem:[%s12255_s5 + $0x48] sm:$0xff]  ;;  %v1059_v48 = vmul.f32 %v9035_v55, %v8785_v41  ;;  %v1060_v41 = vmul.f32 %v9035_v55, %v8790_v44 }
 0x3ef   : > { %v8206_v45 = vpop.eup %8205  ;;  %v1236_v9 = vadd.f32 1.0, %v8204_v23  ;;  %8231 = vrcp.f32 %v1234_v31  ;;  %2961 = vmatpush1.msra.mxu0 %v2819_v43  ;;  %v9259_v43 = vmul.f32 -1.442695, %v9207_v24 }
 0x3f0   : > { %v8208_v54 = vpop.eup %8207  ;;  %v1237_v14 = vadd.f32 1.0, %v8206_v45  ;;  %8233 = vrcp.f32 %v1235_v57  ;;  %v9224_v57 = vmul.f32 -1.442695, %v9195_v11  ;;  %2962 = vmatprep.subr.mxu0 %v8518_v1 }
 0x3f1   : > { %v8210_v32 = vpop.eup %8209  ;;  %v1238_v63 = vadd.f32 1.0, %v8208_v54  ;;  %8235 = vrcp.f32 %v1236_v9  ;;  %v9236_v54 = vmul.f32 -1.442695, %v9203_v12  ;;  %2963 = vmatpush1.msra.mxu0 %v2818_v38  ;;  %v1063_v38 = vmul.f32 %v9035_v55, %v8805_v53  ;;  %v2814_v53 = vld [vmem:[%s12255_s5 + $0x20] sm:$0xff] }
 0x3f2   : > { %v8212_v13 = vpop.eup %8211  ;;  %v1239_v36 = vadd.f32 1.0, %v8210_v32  ;;  %8237 = vrcp.f32 %v1237_v14  ;;  %v1061_v14 = vmul.f32 %v9035_v55, %v8795_v47  ;;  %v9244_v32 = vadd.f32 %v9040_v61, %v1059_v48  ;;  %2964 = vmatprep.subr.mxu0 %v8518_v1  ;;  %v2816_v47 = vld [vmem:[%s12255_s5 + $0x30] sm:$0xff] }
 0x3f3   : > { %v8214_v8 = vpop.eup %8213  ;;  %v1240_v3 = vadd.f32 1.0, %v8212_v13  ;;  %8239 = vrcp.f32 %v1238_v63  ;;  %v9247_v63 = vadd.f32 %v9040_v61, %v1060_v41  ;;  %2965 = vmatpush1.msra.mxu0 %v2817_v29 }
 0x3f4   : > { %v8216_v0 = vpop.eup %8215  ;;  %v1241_v20 = vadd.f32 1.0, %v8214_v8  ;;  %8241 = vrcp.f32 %v1239_v36  ;;  %v9254_v36 = vadd.f32 %v9040_v61, %v1061_v14  ;;  %v1062_v8 = vmul.f32 %v9035_v55, %v8800_v50  ;;  %2966 = vmatprep.subr.mxu0 %v8518_v1 }
 0x3f5   : > { %v8218_v31 = vpop.eup %8217  ;;  %v1242_v23 = vadd.f32 1.0, %v8216_v0  ;;  %8243 = vrcp.f32 %v1240_v3  ;;  %v9262_v0 = vmul.f32 -1.442695, %v9227_v4  ;;  %2967 = vmatpush1.msra.mxu0 %v2816_v47  ;;  %v9290_v14 = vadd.f32 %v9040_v61, %v1063_v38 }
 0x3f6   : > { %v8220_v45 = vpop.eup %8219  ;;  %v1243_v9 = vadd.f32 1.0, %v8218_v31  ;;  %8245 = vrcp.f32 %v1241_v20  ;;  %v9268_v50 = vadd.f32 %v9040_v61, %v1062_v8  ;;  %v2815_v31 = vld [vmem:[%s12255_s5 + $0x28] sm:$0xff]  ;;  %2968 = vmatprep.subr.mxu0 %v8518_v1 }
 0x3f7   : > { %v8222_v49 = vpop.eup %8221  ;;  %8247 = vrcp.f32 %v1242_v23  ;;  %v1214_v10 = vadd.f32 1.0, %v8220_v45  ;;  %v9274_v45 = vmul.f32 -1.442695, %v9244_v32  ;;  %2969 = vmatpush1.msra.mxu0 %v2815_v31 }
 0x3f8   : > { %v8224_v44 = vpop.eup %8223  ;;  %8249 = vrcp.f32 %v1243_v9  ;;  %v1215_v52 = vadd.f32 1.0, %v8222_v49  ;;  %v9277_v9 = vmul.f32 -1.442695, %v9247_v63  ;;  %2970 = vmatprep.subr.mxu0 %v8518_v1 }
 0x3f9   : > { %v8226_v7 = vpop.eup %8225  ;;  %8251 = vrcp.f32 %v1214_v10  ;;  %v1216_v13 = vadd.f32 1.0, %v8224_v44  ;;  %v9287_v10 = vmul.f32 -1.442695, %v9254_v36  ;;  %2971 = vmatpush1.msra.mxu0 %v2814_v53 }
 0x3fa   : > { %v8228_v3 = vpop.eup %8227  ;;  %8253 = vrcp.f32 %v1215_v52  ;;  %v1217_v35 = vadd.f32 1.0, %v8226_v7  ;;  %v9297_v52 = vmul.f32 %v9035_v55, %v8810_v56  ;;  %v2813_v56 = vld [vmem:[%s12255_s5 + $0x18] sm:$0xff]  ;;  %2972 = vmatprep.subr.mxu0 %v8518_v1 }
 0x3fb   : > { %v8230_v20 = vpop.eup %8229  ;;  %8255 = vrcp.f32 %v1216_v13  ;;  %v1212_v48 = vadd.f32 1.0, %v8228_v3  ;;  %2973 = vmatpush1.msra.mxu0 %v2813_v56 }
 0x3fc   : > { %v8232_v23 = vpop.eup %8231  ;;  %8257 = vrcp.f32 %v1217_v35  ;;  %v9280_v41 = vmul.f32 %v8230_v20, %v9055_v18  ;;  %2974 = vmatprep.subr.mxu0 %v8518_v1 }
 0x3fd   : > { %v8234_v49 = vpop.eup %8233  ;;  %8259 = vrcp.f32 %v1212_v48  ;;  %v1330_v29 = vmul.f32 %v8232_v23, %v9058_v16  ;;  %v9306_v16 = vmul.f32 -1.442695, %v9268_v50 }
 0x3fe   : > { %v8236_v44 = vpop.eup %8235  ;;  %v1331_v18 = vmul.f32 %v8234_v49, %v9061_v21  ;;  %8261 = vpow2.f32 %v9169_v6  ;;  %v1412_v47 = vrot.slane %v9280_v41, 7 }
 0x3ff   : > { %v8238_v7 = vpop.eup %8237  ;;  %v9302_v13 = vmul.f32 %v8236_v44, %v9064_v25  ;;  %8263 = vpow2.f32 %v9185_v26  ;;  %v1414_v21 = vrot.slane %v1330_v29, 7  ;;  %v2812_v26 = vld [vmem:[%s12255_s5 + $0x10] sm:$0xff] }
 0x400   : > { %v8240_v55 = vpop.eup %8239  ;;  %v9312_v6 = vmul.f32 %v8238_v7, %v9069_v34  ;;  %v1415_v8 = vrot.slane %v1331_v18, 7  ;;  %8265 = vpow2.f32 %v9200_v15  ;;  %v1503_v25 = vsel %vm1380_vm3, %v1412_v47, 0.0  ;;  %2975 = vmatpush1.msra.mxu0 %v2812_v26 }
 0x401   : > { %v8242_v3 = vpop.eup %8241  ;;  %v1334_v35 = vmul.f32 %v8240_v55, %v9072_v39  ;;  %v1417_v20 = vrot.slane %v9302_v13, 7  ;;  %8267 = vpow2.f32 %v9215_v59  ;;  %1542 = vst.msk [vmem:[#allocation2 + $0x118] sm:$0x3] %vm1342_vm2, %v1503_v25  ;;  %v1488_v34 = vsel %vm1380_vm3, 0.0, %v1414_v21  ;;  %2976 = vmatprep.subr.mxu0 %v8518_v1 }
 0x402   : > { %v8244_v15 = vpop.eup %8243  ;;  %v1335_v48 = vmul.f32 %v8242_v3, %v9079_v22  ;;  %v1418_v38 = vrot.slane %v9312_v6, 7  ;;  %8269 = vpow2.f32 %v9224_v57  ;;  %v1416_v31 = vsel %vm1380_vm3, %v1414_v21, %v1415_v8  ;;  %1543 = vst.msk [vmem:[#allocation2 + $0x120] sm:$0xff] %vm535_vm1, %v1488_v34  ;;  %v2811_v57 = vld [vmem:[%s12255_s5 + $0x8] sm:$0xff] }
 0x403   : > { %v8246_v39 = vpop.eup %8245  ;;  %v1336_v59 = vmul.f32 %v8244_v15, %v9083_v27  ;;  %v1420_v23 = vrot.slane %v1334_v35, 7  ;;  %8271 = vpow2.f32 %v9236_v54  ;;  %1544 = vst.msk [vmem:[#allocation2 + $0x128] sm:$0xff] %vm535_vm1, %v1416_v31  ;;  %v1504_v22 = vsel %vm1380_vm3, %v1415_v8, 0.0  ;;  %v2810_v54 = vld [vmem:[%s12255_s5] sm:$0xff]  ;;  %2977 = vmatpush1.msra.mxu0 %v2811_v57 }
 0x404   : > { %v8248_v53 = vpop.eup %8247  ;;  %v1337_v49 = vmul.f32 %v8246_v39, %v9091_v5  ;;  %v1421_v29 = vrot.slane %v1335_v48, 7  ;;  %8273 = vpow2.f32 %v9259_v43  ;;  %1545 = vst.msk [vmem:[#allocation2 + $0x130] sm:$0x3] %vm1342_vm2, %v1504_v22  ;;  %v1419_v27 = vsel %vm1380_vm3, %v1417_v20, %v1418_v38  ;;  %2978 = vmatprep.subr.mxu0 %v8518_v1 }
 0x405   : > { %v8250_v44 = vpop.eup %8249  ;;  %v1338_v5 = vmul.f32 %v8248_v53, %v9095_v28  ;;  %v1423_v18 = vrot.slane %v1336_v59, 7  ;;  %v1490_v43 = vsel %vm1380_vm3, 0.0, %v1420_v23  ;;  %8275 = vpow2.f32 %v9262_v0  ;;  %1547 = vst.msk [vmem:[#allocation2 + $0x140] sm:$0xff] %vm535_vm1, %v1419_v27  ;;  %2979 = vmatpush1.msra.mxu0 %v2810_v54 }
 0x406   : > { %v8252_v7 = vpop.eup %8251  ;;  %v1339_v21 = vmul.f32 %v8250_v44, %v9101_v33  ;;  %v1424_v56 = vrot.slane %v1337_v49, 7  ;;  %v1422_v55 = vsel %vm1380_vm3, %v1420_v23, %v1421_v29  ;;  %v1506_v8 = vsel %vm1380_vm3, %v1421_v29, 0.0  ;;  %1549 = vst.msk [vmem:[#allocation2 + $0x150] sm:$0xff] %vm535_vm1, %v1490_v43  ;;  %v2841_v33 = vld [vmem:[%s12255_s5 + $0xf8] sm:$0xff]  ;;  %2980 = vmatprep.subr.mxu0 %v8518_v1 }
 0x407   : > { %v8254_v28 = vpop.eup %8253  ;;  %v1426_v25 = vrot.slane %v1338_v5, 7  ;;  %v1491_v26 = vsel %vm1380_vm3, 0.0, %v1423_v18  ;;  %1550 = vst.msk [vmem:[#allocation2 + $0x158] sm:$0xff] %vm535_vm1, %v1422_v55  ;;  %v1310_v0 = vmul.f32 %v8252_v7, %v9108_v42  ;;  %8277 = vpow2.f32 %v9274_v45  ;;  %v2840_v42 = vld [vmem:[%s12255_s5 + $0xf0] sm:$0xff]  ;;  %2981 = vmatpush2.msra.mxu0 %v2841_v33  ;;  %v2837_v33 = vld [vmem:[%s12255_s5 + $0xd8] sm:$0xff] }
 0x408   : > { %1551 = vst.msk [vmem:[#allocation2 + $0x160] sm:$0x3] %vm1342_vm2, %v1506_v8  ;;  %v8256_v3 = vpop.eup %8255  ;;  %v1427_v35 = vrot.slane %v1339_v21, 7  ;;  %v1425_v34 = vsel %vm1380_vm3, %v1423_v18, %v1424_v56  ;;  %v1507_v15 = vsel %vm1380_vm3, %v1424_v56, 0.0  ;;  %v1311_v48 = vmul.f32 %v8254_v28, %v9114_v46  ;;  %2982 = vmatprep.subr.mxu0 %v8518_v1 }
 0x409   : > { %1552 = vst.msk [vmem:[#allocation2 + $0x168] sm:$0xff] %vm535_vm1, %v1491_v26  ;;  %v8258_v45 = vpop.eup %8257  ;;  %v1492_v31 = vsel %vm1380_vm3, 0.0, %v1426_v25  ;;  %1553 = vst.msk [vmem:[#allocation2 + $0x170] sm:$0xff] %vm535_vm1, %v1425_v34  ;;  %v1384_v39 = vrot.slane %v1310_v0, 7  ;;  %v1312_v59 = vmul.f32 %v8256_v3, %v9120_v51  ;;  %8279 = vpow2.f32 %v9277_v9  ;;  %2983 = vmatpush2.msra.mxu0 %v2840_v42 }
 0x40a   : > { %1554 = vst.msk [vmem:[#allocation2 + $0x178] sm:$0x3] %vm1342_vm2, %v1507_v15  ;;  %v8260_v46 = vpop.eup %8259  ;;  %v1428_v23 = vsel %vm1380_vm3, %v1426_v25, %v1427_v35  ;;  %v1508_v22 = vsel %vm1380_vm3, %v1427_v35, 0.0  ;;  %v1385_v57 = vrot.slane %v1311_v48, 7  ;;  %v1313_v53 = vmul.f32 %v8258_v45, %v9126_v58  ;;  %v2839_v58 = vld [vmem:[%s12255_s5 + $0xe8] sm:$0xff]  ;;  %2984 = vmatprep.subr.mxu0 %v8518_v1 }
 0x40b   : > { %1555 = vst.msk [vmem:[#allocation2 + $0x180] sm:$0xff] %vm535_vm1, %v1492_v31  ;;  %v8262_v49 = vpop.eup %8261  ;;  %1556 = vst.msk [vmem:[#allocation2 + $0x188] sm:$0xff] %vm535_vm1, %v1428_v23  ;;  %v1478_v51 = vsel %vm1380_vm3, 0.0, %v1384_v39  ;;  %v1387_v9 = vrot.slane %v1312_v59, 7  ;;  %v9391_v29 = vmul.f32 %v8260_v46, %v9130_v17  ;;  %8281 = vpow2.f32 %v9287_v10  ;;  %v2838_v17 = vld [vmem:[%s12255_s5 + $0xe0] sm:$0xff]  ;;  %2985 = vmatpush2.msra.mxu0 %v2839_v58  ;;  %v2835_v31 = vld [vmem:[%s12255_s5 + $0xc8] sm:$0xff] }
 0x40c   : > { %1557 = vst.msk [vmem:[#allocation2 + $0x190] sm:$0x3] %vm1342_vm2, %v1508_v22  ;;  %v8264_v27 = vpop.eup %8263  ;;  %v1386_v54 = vsel %vm1380_vm3, %v1384_v39, %v1385_v57  ;;  %v1494_v44 = vsel %vm1380_vm3, %v1385_v57, 0.0  ;;  %v1388_v5 = vrot.slane %v1313_v53, 7  ;;  %v1213_v18 = vadd.f32 1.0, %v8262_v49  ;;  %2986 = vmatprep.subr.mxu0 %v8518_v1 }
 0x40d   : > { %1513 = vst.msk [vmem:[#allocation2 + $0x30] sm:$0xff] %vm535_vm1, %v1478_v51  ;;  %v8266_v10 = vpop.eup %8265  ;;  %1514 = vst.msk [vmem:[#allocation2 + $0x38] sm:$0xff] %vm535_vm1, %v1386_v54  ;;  %v1479_v43 = vsel %vm1380_vm3, 0.0, %v1387_v9  ;;  %v1381_v7 = vrot.slane %v9391_v29, 7  ;;  %v1218_v21 = vadd.f32 1.0, %v8264_v27  ;;  %8283 = vpow2.f32 %v9306_v16  ;;  %2987 = vmatpush2.msra.mxu0 %v2838_v17  ;;  %v2832_v17 = vld [vmem:[%s12255_s5 + $0xb0] sm:$0xff] }
 0x40e   : > { %1515 = vst.msk [vmem:[#allocation2 + $0x40] sm:$0x3] %vm1342_vm2, %v1494_v44  ;;  %v8268_v56 = vpop.eup %8267  ;;  %v1389_v55 = vsel %vm1380_vm3, %v1387_v9, %v1388_v5  ;;  %8285 = vrcp.f32 %v1213_v18  ;;  %v1495_v8 = vsel %vm1380_vm3, %v1388_v5, 0.0  ;;  %v1219_v28 = vadd.f32 1.0, %v8266_v10  ;;  %2988 = vmatprep.subr.mxu0 %v8518_v1  ;;  %v2833_v44 = vld [vmem:[%s12255_s5 + $0xb8] sm:$0xff] }
 0x40f   : > { %1516 = vst.msk [vmem:[#allocation2 + $0x48] sm:$0xff] %vm535_vm1, %v1479_v43  ;;  %v8270_v25 = vpop.eup %8269  ;;  %1517 = vst.msk [vmem:[#allocation2 + $0x50] sm:$0xff] %vm535_vm1, %v1389_v55  ;;  %v1477_v26 = vsel %vm1380_vm3, 0.0, %v1381_v7  ;;  %8287 = vrcp.f32 %v1218_v21  ;;  %v1220_v16 = vadd.f32 1.0, %v8268_v56  ;;  %v1489_v0 = vsel %vm1380_vm3, 0.0, %v1417_v20  ;;  %v2836_v20 = vld [vmem:[%s12255_s5 + $0xd0] sm:$0xff]  ;;  %2989 = vmatpush2.msra.mxu0 %v2837_v33 }
 0x410   : > { %1518 = vst.msk [vmem:[#allocation2 + $0x58] sm:$0x3] %vm1342_vm2, %v1495_v8  ;;  %v8272_v3 = vpop.eup %8271  ;;  %8289 = vrcp.f32 %v1219_v28  ;;  %v1221_v35 = vadd.f32 1.0, %v8270_v25  ;;  %v9427_v34 = vadd.f32 %v9040_v61, %v9297_v52  ;;  %v1505_v13 = vsel %vm1380_vm3, %v1418_v38, 0.0  ;;  %2990 = vmatprep.subr.mxu0 %v8518_v1  ;;  %v2831_v56 = vld [vmem:[%s12255_s5 + $0xa8] sm:$0xff]  ;;  %v2830_v33 = vld [vmem:[%s12255_s5 + $0xa0] sm:$0xff] }
 0x411   : > { %1510 = vst.msk [vmem:[#allocation2 + $0x18] sm:$0xff] %vm535_vm1, %v1477_v26  ;;  %1546 = vst.msk [vmem:[#allocation2 + $0x138] sm:$0xff] %vm535_vm1, %v1489_v0  ;;  %v8274_v15 = vpop.eup %8273  ;;  %8291 = vrcp.f32 %v1220_v16  ;;  %v1222_v48 = vadd.f32 1.0, %v8272_v3  ;;  %v6744_v45 = vmul.f32 -1.442695, %v9290_v14  ;;  %v9441_v6 = vadd.f32 %v9040_v61, %v9152_v19  ;;  %2991 = vmatpush2.msra.mxu0 %v2836_v20  ;;  %v2834_v61 = vld [vmem:[%s12255_s5 + $0xc0] sm:$0xff] }
 0x412   : > { %1548 = vst.msk [vmem:[#allocation2 + $0x148] sm:$0x3] %vm1342_vm2, %v1505_v13  ;;  %v8276_v52 = vpop.eup %8275  ;;  %8293 = vrcp.f32 %v1221_v35  ;;  %v1223_v42 = vadd.f32 1.0, %v8274_v15  ;;  %v6745_v23 = vmul.f32 -1.442695, %v9427_v34  ;;  %2992 = vmatprep.subr.mxu0 %v8518_v1 }
 0x413   : > { %8295 = vrcp.f32 %v1222_v48  ;;  %v1224_v38 = vadd.f32 1.0, %v8276_v52  ;;  %2993 = vmatpush2.msra.mxu0 %v2835_v31  ;;  %v6746_v49 = vmul.f32 -1.442695, %v9441_v6  ;;  %v6747_v54 = vmul.f32 -1.442695, %v9232_v62 }
 0x414   : > { %v8278_v39 = vpop.eup %8277  ;;  %v9447_v59 = vld [vmem:[#allocation2 + $0x32] sm:$0xff]  ;;  %8297 = vrcp.f32 %v1223_v42  ;;  %2994 = vmatprep.subr.mxu0 %v8518_v1 }
 0x415   : > { %v9449_v46 = vld [vmem:[#allocation2 + $0x3a] sm:$0xff]  ;;  %7113 = vmatprep.mubr.msk.f32.mxu1 %vm535_vm1, %v9447_v59  ;;  %v9458_v19 = vld [vmem:[#allocation2 + $0x31] sm:$0xff]  ;;  %v1225_v22 = vadd.f32 1.0, %v8278_v39  ;;  %8299 = vrcp.f32 %v1224_v38  ;;  %2995 = vmatpush2.msra.mxu0 %v2834_v61 }
 0x416   : > { %v8280_v57 = vpop.eup %8279  ;;  %7114 = vmatmul.mubr.msk.f32.vlgmr.msra.gmra.mxu1 %vm535_vm1, %v9449_v46  ;;  %v9462_v53 = vld [vmem:[#allocation2 + $0x4a] sm:$0xff]  ;;  %8301 = vpow2.f32 %v6744_v45  ;;  %2996 = vmatprep.subr.mxu0 %v8518_v1 }
 0x417   : > { %7116 = vmatprep.mubr.msk.f32.mxu1 %vm535_vm1, %v9462_v53  ;;  %8303 = vrcp.f32 %v1225_v22  ;;  %v1226_v9 = vadd.f32 1.0, %v8280_v57  ;;  %v9474_v5 = vld [vmem:[#allocation2 + $0x52] sm:$0xff]  ;;  %2997 = vmatpush2.msra.mxu0 %v2833_v44 }
 0x418   : > { %v1655_v51 = vld [vmem:[#allocation2 + $0x18] sm:$0xff]  ;;  %v8282_v58 = vpop.eup %8281  ;;  %8305 = vpow2.f32 %v6745_v23  ;;  %2998 = vmatprep.subr.mxu0 %v8518_v1  ;;  %v2828_v39 = vld [vmem:[%s12255_s5 + $0x90] sm:$0xff] }
 0x419   : > { %v7405_v27 = vpack.i.bf16 %v1655_v51, %v9458_v19  ;;  %v1227_v18 = vadd.f32 1.0, %v8282_v58  ;;  %8307 = vrcp.f32 %v1226_v9  ;;  %2999 = vmatpush2.msra.mxu0 %v2832_v17  ;;  %v1591_v17 = vld [vmem:[#allocation2 + $0x1] sm:$0xff] }
 0x41a   : > { %v8284_v10 = vpop.eup %8283  ;;  %7117 = vmatmul.mubr.msk.f32.gmra.mxu1 %vm535_vm1, %v9474_v5  ;;  %8309 = vpow2.f32 %v6746_v49  ;;  %3000 = vmatprep.subr.mxu0 %v8518_v1 }
 0x41b   : > { %7406 = vrot.lane.b32.xlu1 %v7405_v27, %s8520_s26  ;;  %v8286_v43 = vpop.eup %8285  ;;  %8311 = vrcp.f32 %v1227_v18  ;;  %v1228_v21 = vadd.f32 1.0, %v8284_v10  ;;  %3001 = vmatpush2.msra.mxu0 %v2831_v56  ;;  %v2826_v56 = vld [vmem:[%s12255_s5 + $0x80] sm:$0xff] }
 0x41c   : > { %v8288_v55 = vpop.eup %8287  ;;  %v1309_v8 = vmul.f32 %v8286_v43, %v9145_v30  ;;  %8313 = vpow2.f32 %v6747_v54  ;;  %3002 = vmatprep.subr.mxu0 %v8518_v1 }
 0x41d   : > { %v8290_v28 = vpop.eup %8289  ;;  %v1314_v25 = vmul.f32 %v8288_v55, %v9158_v2  ;;  %8315 = vrcp.f32 %v1228_v21  ;;  %v2829_v2 = vld [vmem:[%s12255_s5 + $0x98] sm:$0xff]  ;;  %3003 = vmatpush2.msra.mxu0 %v2830_v33 }
 0x41e   : > { %v8292_v26 = vpop.eup %8291  ;;  %v1382_v16 = vrot.slane %v1309_v8, 7  ;;  %v1315_v0 = vmul.f32 %v8290_v28, %v9172_v37  ;;  %3004 = vmatprep.subr.mxu0 %v8518_v1 }
 0x41f   : > { %v8294_v3 = vpop.eup %8293  ;;  %v1390_v35 = vrot.slane %v1314_v25, 7  ;;  %v1316_v30 = vmul.f32 %v8292_v26, %v9188_v60  ;;  %3005 = vmatpush2.msra.mxu0 %v2829_v2 }
 0x420   : > { %v8296_v13 = vpop.eup %8295  ;;  %v1383_v37 = vsel %vm1380_vm3, %v1381_v7, %v1382_v16  ;;  %v1391_v20 = vrot.slane %v1315_v0, 7  ;;  %v1493_v15 = vsel %vm1380_vm3, %v1382_v16, 0.0  ;;  %v1317_v48 = vmul.f32 %v8294_v3, %v9195_v11  ;;  %3006 = vmatprep.subr.mxu0 %v8518_v1 }
 0x421   : > { %v8298_v52 = vpop.eup %8297  ;;  %1511 = vst.msk [vmem:[#allocation2 + $0x20] sm:$0xff] %vm535_vm1, %v1383_v37  ;;  %v1480_v60 = vsel %vm1380_vm3, 0.0, %v1390_v35  ;;  %v1393_v42 = vrot.slane %v1316_v30, 7  ;;  %v1318_v45 = vmul.f32 %v8296_v13, %v9203_v12  ;;  %3007 = vmatpush2.msra.mxu0 %v2828_v39  ;;  %v1623_v13 = vld [vmem:[#allocation2 + $0x2] sm:$0xff]  ;;  %v9560_v37 = vld [vmem:[#allocation2 + $0x30] sm:$0xff] }
 0x422   : > { %1512 = vst.msk [vmem:[#allocation2 + $0x28] sm:$0x3] %vm1342_vm2, %v1493_v15  ;;  %v8300_v29 = vpop.eup %8299  ;;  %v1392_v7 = vsel %vm1380_vm3, %v1390_v35, %v1391_v20  ;;  %v1496_v11 = vsel %vm1380_vm3, %v1391_v20, 0.0  ;;  %v1394_v38 = vrot.slane %v1317_v48, 7  ;;  %v1319_v31 = vmul.f32 %v8298_v52, %v9207_v24  ;;  %v2827_v24 = vld [vmem:[%s12255_s5 + $0x88] sm:$0xff]  ;;  %3008 = vmatprep.subr.mxu0 %v8518_v1 }
 0x423   : > { %1519 = vst.msk [vmem:[#allocation2 + $0x60] sm:$0xff] %vm535_vm1, %v1480_v60  ;;  %v8302_v23 = vpop.eup %8301  ;;  %1520 = vst.msk [vmem:[#allocation2 + $0x68] sm:$0xff] %vm535_vm1, %v1392_v7  ;;  %v1481_v12 = vsel %vm1380_vm3, 0.0, %v1393_v42  ;;  %v1396_v61 = vrot.slane %v1318_v45, 7  ;;  %v1320_v22 = vmul.f32 %v8300_v29, %v9227_v4  ;;  %3009 = vmatpush2.msra.mxu0 %v2827_v24  ;;  %v9569_v60 = vld [vmem:[#allocation2 + $0x39] sm:$0xff] }
 0x424   : > { %1521 = vst.msk [vmem:[#allocation2 + $0x70] sm:$0x3] %vm1342_vm2, %v1496_v11  ;;  %v8304_v57 = vpop.eup %8303  ;;  %v1395_v49 = vsel %vm1380_vm3, %v1393_v42, %v1394_v38  ;;  %v1497_v51 = vsel %vm1380_vm3, %v1394_v38, 0.0  ;;  %v1397_v9 = vrot.slane %v1319_v31, 7  ;;  %v1229_v58 = vadd.f32 1.0, %v8302_v23  ;;  %3010 = vmatprep.subr.mxu0 %v8518_v1  ;;  %v1624_v23 = vld [vmem:[#allocation2 + $0xa] sm:$0xff] }
 0x425   : > { %1522 = vst.msk [vmem:[#allocation2 + $0x78] sm:$0xff] %vm535_vm1, %v1481_v12  ;;  %v8306_v27 = vpop.eup %8305  ;;  %1523 = vst.msk [vmem:[#allocation2 + $0x80] sm:$0xff] %vm535_vm1, %v1395_v49  ;;  %v1482_v4 = vsel %vm1380_vm3, 0.0, %v1396_v61  ;;  %v1321_v54 = vmul.f32 %v8304_v57, %v9244_v32  ;;  %v1399_v44 = vrot.slane %v1320_v22, 7  ;;  %v1592_v32 = vld [vmem:[#allocation2 + $0x9] sm:$0xff]  ;;  %3011 = vmatpush2.msra.mxu0 %v2826_v56  ;;  %v7400_v38 = vpack.i.bf16 %v1623_v13, %v9560_v37 }
 0x426   : > { %1524 = vst.msk [vmem:[#allocation2 + $0x88] sm:$0x3] %vm1342_vm2, %v1497_v51  ;;  %v8308_v18 = vpop.eup %8307  ;;  %v1398_v10 = vsel %vm1380_vm3, %v1396_v61, %v1397_v9  ;;  %v1498_v43 = vsel %vm1380_vm3, %v1397_v9, 0.0  ;;  %8317 = vrcp.f32 %v1229_v58  ;;  %v1230_v21 = vadd.f32 1.0, %v8306_v27  ;;  %5762 = vmatprep.subr.mxu0 %v8518_v1  ;;  %v9589_v22 = vld [vmem:[#allocation2 + $0x48] sm:$0xff] }
 0x427   : > { %1525 = vst.msk [vmem:[#allocation2 + $0x90] sm:$0xff] %vm535_vm1, %v1482_v4  ;;  %v8310_v55 = vpop.eup %8309  ;;  %1526 = vst.msk [vmem:[#allocation2 + $0x98] sm:$0xff] %vm535_vm1, %v1398_v10  ;;  %v1400_v8 = vrot.slane %v1321_v54, 7  ;;  %v1483_v28 = vsel %vm1380_vm3, 0.0, %v1399_v44  ;;  %v1322_v25 = vmul.f32 %v8308_v18, %v9247_v63  ;;  %v9625_v56 = vld [vmem:[#allocation2 + $0x49] sm:$0xff]  ;;  %v7470_v41 = vpack.i.bf16 %v9569_v60, %v9474_v5 }
 0x428   : > { %1527 = vst.msk [vmem:[#allocation2 + $0xa0] sm:$0x3] %vm1342_vm2, %v1498_v43  ;;  %v8312_v26 = vpop.eup %8311  ;;  %v9542_v16 = vld [vmem:[#allocation2 + $0x1a] sm:$0xff]  ;;  %v1231_v33 = vadd.f32 1.0, %v8310_v55  ;;  %8319 = vrcp.f32 %v1230_v21 }
 0x429   : > { %v9544_v0 = vld [vmem:[#allocation2 + $0x22] sm:$0xff]  ;;  %1528 = vst.msk [vmem:[#allocation2 + $0xa8] sm:$0xff] %vm535_vm1, %v1483_v28  ;;  %v8314_v63 = vpop.eup %8313  ;;  %v7395_v3 = vpack.i.bf16 %v1591_v17, %v9542_v16  ;;  %v1401_v20 = vsel %vm1380_vm3, %v1399_v44, %v1400_v8  ;;  %v1499_v15 = vsel %vm1380_vm3, %v1400_v8, 0.0  ;;  %v1323_v42 = vmul.f32 %v8312_v26, %v9254_v36  ;;  %v9606_v27 = vld [vmem:[#allocation2 + $0x19] sm:$0xff] }
 0x42a   : > { %v8316_v35 = vpop.eup %8315  ;;  %v9557_v30 = vld [vmem:[#allocation2 + $0x62] sm:$0xff]  ;;  %v7410_v2 = vpack.i.bf16 %v1592_v32, %v9544_v0  ;;  %1529 = vst.msk [vmem:[#allocation2 + $0xb0] sm:$0xff] %vm535_vm1, %v1401_v20  ;;  %v1402_v45 = vrot.slane %v1322_v25, 7  ;;  %8321 = vrcp.f32 %v1231_v33  ;;  %v1232_v11 = vadd.f32 1.0, %v8314_v63 }
 0x42b   : > { %7396 = vrot.lane.b32.xlu0 %v7395_v3, %s8521_s30  ;;  %7119 = vmatprep.mubr.msk.f32.mxu1 %vm535_vm1, %v9557_v30  ;;  %v9567_v48 = vld [vmem:[#allocation2 + $0x6a] sm:$0xff]  ;;  %v1656_v52 = vld [vmem:[#allocation2 + $0x20] sm:$0xff]  ;;  %1530 = vst.msk [vmem:[#allocation2 + $0xb8] sm:$0x3] %vm1342_vm2, %v1499_v15  ;;  %v1324_v29 = vmul.f32 %v8316_v35, %v9268_v50  ;;  %v1403_v31 = vrot.slane %v1323_v42, 7  ;;  %v1753_v50 = vld [vmem:[#allocation2 + $0x38] sm:$0xff]  ;;  %v7430_v58 = vpack.i.bf16 %v9542_v16, %v9589_v22 }
 0x42c   : > { %7411 = vrot.lane.b32.xlu1 %v7410_v2, %s8521_s30  ;;  %7120 = vmatmul.mubr.msk.f32.gmra.mxu1 %vm535_vm1, %v9567_v48  ;;  %v9578_v7 = vld [vmem:[#allocation2 + $0x7a] sm:$0xff]  ;;  %v1484_v36 = vsel %vm1380_vm3, 0.0, %v1402_v45  ;;  %v7420_v12 = vpack.i.bf16 %v1656_v52, %v9569_v60  ;;  %8323 = vrcp.f32 %v1232_v11  ;;  %v7415_v9 = vpack.i.bf16 %v1624_v23, %v1753_v50  ;;  %v1755_v3 = vld [vmem:[#allocation2 + $0x50] sm:$0xff] }
 0x42d   : > { %7122 = vmatprep.mubr.msk.f32.mxu1 %vm535_vm1, %v9578_v7  ;;  %v1405_v39 = vrot.slane %v1324_v29, 7  ;;  %1531 = vst.msk [vmem:[#allocation2 + $0xc0] sm:$0xff] %vm535_vm1, %v1484_v36  ;;  %v9587_v61 = vld [vmem:[#allocation2 + $0x82] sm:$0xff]  ;;  %v1404_v24 = vsel %vm1380_vm3, %v1402_v45, %v1403_v31  ;;  %v1500_v57 = vsel %vm1380_vm3, %v1403_v31, 0.0  ;;  %v7425_v43 = vpack.i.bf16 %v9606_v27, %v9447_v59  ;;  %v1758_v60 = vld [vmem:[#allocation2 + $0x78] sm:$0xff] }
 0x42e   : > { %v9597_v51 = vld [vmem:[#allocation2 + $0x92] sm:$0xff]  ;;  %1532 = vst.msk [vmem:[#allocation2 + $0xc8] sm:$0xff] %vm535_vm1, %v1404_v24  ;;  %v9611_v44 = vld [vmem:[#allocation2 + $0x21] sm:$0xff]  ;;  %v1789_v36 = vld [vmem:[#allocation2 + $0x69] sm:$0xff] }
 0x42f   : > { %7401 = vrot.lane.b32.xlu0 %v7400_v38, %s12267_s25  ;;  %v1485_v49 = vsel %vm1380_vm3, 0.0, %v1405_v39  ;;  %1533 = vst.msk [vmem:[#allocation2 + $0xd0] sm:$0x3] %vm1342_vm2, %v1500_v57  ;;  %v9609_v54 = vld [vmem:[#allocation2 + $0x9a] sm:$0xff]  ;;  %v7440_v21 = vpack.i.bf16 %v9611_v44, %v9449_v46  ;;  %v7480_v23 = vpack.i.bf16 %v1755_v3, %v1789_v36  ;;  %v7490_v57 = vpack.i.bf16 %v9462_v53, %v1758_v60 }
 0x430   : > { %7421 = vrot.lane.b32.xlu1 %v7420_v12, %s8520_s26  ;;  %7123 = vmatmul.mubr.msk.f32.gmra.mxu1 %vm535_vm1, %v9587_v61  ;;  %1534 = vst.msk [vmem:[#allocation2 + $0xd8] sm:$0xff] %vm535_vm1, %v1485_v49 }
 0x431   : > { %7125 = vmatprep.mubr.msk.f32.mxu1 %vm535_vm1, %v9597_v51  ;;  %v9616_v18 = vld [vmem:[#allocation2 + $0xaa] sm:$0xff] }
 0x432   : > { %v9629_v8 = vld [vmem:[#allocation2 + $0xb2] sm:$0xff] }
 0x433   : > { %v8318_v4 = vpop.eup %8317  ;;  %7416 = vrot.lane.b32.xlu0 %v7415_v9, %s12267_s25  ;;  %v9707_v9 = vld [vmem:[#allocation2 + $0x122] sm:$0xff] }
 0x434   : > { %7431 = vrot.lane.b32.xlu1 %v7430_v58, %s12267_s25  ;;  %7126 = vmatmul.mubr.msk.f32.gmra.mxu1 %vm535_vm1, %v9609_v54  ;;  %v1325_v17 = vmul.f32 %v8318_v4, %v9290_v14  ;;  %v9631_v14 = vld [vmem:[#allocation2 + $0x51] sm:$0xff]  ;;  %v7485_v58 = vpack.i.bf16 %v9625_v56, %v9557_v30 }
 0x435   : > { %v8320_v10 = vpop.eup %8319  ;;  %7128 = vmatprep.mubr.msk.f32.mxu1 %vm535_vm1, %v9616_v18  ;;  %v9636_v28 = vld [vmem:[#allocation2 + $0xc2] sm:$0xff]  ;;  %v7450_v63 = vpack.i.bf16 %v1753_v50, %v9631_v14  ;;  %v9717_v4 = vld [vmem:[#allocation2 + $0x12a] sm:$0xff] }
 0x436   : > { %v1406_v55 = vrot.slane %v1325_v17, 7  ;;  %v1326_v32 = vmul.f32 %v8320_v10, %v9427_v34  ;;  %v7435_v34 = vpack.i.bf16 %v9560_v37, %v9625_v56  ;;  %v9650_v20 = vld [vmem:[#allocation2 + $0xca] sm:$0xff]  ;;  %v1756_v37 = vld [vmem:[#allocation2 + $0x60] sm:$0xff] }
 0x437   : > { %7426 = vrot.lane.b32.xlu0 %v7425_v43, %s8521_s30  ;;  %v8322_v33 = vpop.eup %8321  ;;  %v7460_v42 = vpack.i.bf16 %v9447_v59, %v1756_v37  ;;  %v1757_v50 = vld [vmem:[#allocation2 + $0x68] sm:$0xff]  ;;  %v9721_v10 = vld [vmem:[#allocation2 + $0x13a] sm:$0xff] }
 0x438   : > { %7441 = vrot.lane.b32.xlu1 %v7440_v21, %s8521_s30  ;;  %7129 = vmatmul.mubr.msk.f32.gmra.mxu1 %vm535_vm1, %v9629_v8  ;;  %v1407_v25 = vsel %vm1380_vm3, %v1405_v39, %v1406_v55  ;;  %v1501_v26 = vsel %vm1380_vm3, %v1406_v55, 0.0  ;;  %v1408_v16 = vrot.slane %v1326_v32, 7  ;;  %v1327_v35 = vmul.f32 %v8322_v33, %v9441_v6  ;;  %v1791_v17 = vld [vmem:[#allocation2 + $0x81] sm:$0xff]  ;;  %v1760_v32 = vld [vmem:[#allocation2 + $0x90] sm:$0xff] }
 0x439   : > { %7131 = vmatprep.mubr.msk.f32.mxu1 %vm535_vm1, %v9636_v28  ;;  %1535 = vst.msk [vmem:[#allocation2 + $0xe0] sm:$0xff] %vm535_vm1, %v1407_v25  ;;  %v8324_v13 = vpop.eup %8323  ;;  %v7445_v6 = vpack.i.bf16 %v9544_v0, %v1755_v3  ;;  %v7455_v0 = vpack.i.bf16 %v9458_v19, %v9462_v53  ;;  %v1790_v53 = vld [vmem:[#allocation2 + $0x79] sm:$0xff]  ;;  %v7510_v21 = vpack.i.bf16 %v1757_v50, %v1791_v17  ;;  %v9727_v55 = vld [vmem:[#allocation2 + $0x142] sm:$0xff]  ;;  %v1842_v33 = vld [vmem:[#allocation2 + $0x16a] sm:$0xff] }
 0x43a   : > { %1536 = vst.msk [vmem:[#allocation2 + $0xe8] sm:$0x3] %vm1342_vm2, %v1501_v26  ;;  %v1486_v2 = vsel %vm1380_vm3, 0.0, %v1408_v16  ;;  %v1409_v15 = vrot.slane %v1327_v35, 7  ;;  %v1328_v52 = vmul.f32 %v8324_v13, %v9232_v62  ;;  %v7495_v43 = vpack.i.bf16 %v1756_v37, %v1790_v53  ;;  %v1759_v56 = vld [vmem:[#allocation2 + $0x80] sm:$0xff]  ;;  %v1792_v3 = vld [vmem:[#allocation2 + $0x91] sm:$0xff] }
 0x43b   : > { %7436 = vrot.lane.b32.xlu0 %v7435_v34, %s8520_s26  ;;  %1537 = vst.msk [vmem:[#allocation2 + $0xf0] sm:$0xff] %vm535_vm1, %v1486_v2  ;;  %v7505_v25 = vpack.i.bf16 %v9474_v5, %v1759_v56  ;;  %v7520_v26 = vpack.i.bf16 %v9557_v30, %v1760_v32  ;;  %v1843_v5 = vld [vmem:[#allocation2 + $0x172] sm:$0xff]  ;;  %v1844_v35 = vld [vmem:[#allocation2 + $0x182] sm:$0xff]  ;;  %v7525_v2 = vpack.i.bf16 %v1758_v60, %v1792_v3 }
 0x43c   : > { %7451 = vrot.lane.b32.xlu1 %v7450_v63, %s8520_s26  ;;  %7132 = vmatmul.mubr.msk.f32.gmra.mxu1 %vm535_vm1, %v9650_v20  ;;  %v1410_v45 = vsel %vm1380_vm3, %v1408_v16, %v1409_v15  ;;  %v1502_v29 = vsel %vm1380_vm3, %v1409_v15, 0.0  ;;  %v1411_v11 = vrot.slane %v1328_v52, 7  ;;  %v9739_v16 = vld [vmem:[#allocation2 + $0x15a] sm:$0xff]  ;;  %v7530_v63 = vpack.i.bf16 %v1789_v36, %v9587_v61  ;;  %v1845_v15 = vld [vmem:[#allocation2 + $0x18a] sm:$0xff] }
 0x43d   : > { %1538 = vst.msk [vmem:[#allocation2 + $0xf8] sm:$0xff] %vm535_vm1, %v1410_v45  ;;  %v1793_v30 = vld [vmem:[#allocation2 + $0x99] sm:$0xff]  ;;  %v1762_v52 = vld [vmem:[#allocation2 + $0xa8] sm:$0xff]  ;;  %v7545_v45 = vpack.i.bf16 %v1790_v53, %v9597_v51  ;;  %v7575_v36 = vpack.i.bf16 %v1792_v3, %v9616_v18 }
 0x43e   : > { %1539 = vst.msk [vmem:[#allocation2 + $0x100] sm:$0x3] %vm1342_vm2, %v1502_v29  ;;  %v1413_v62 = vsel %vm1380_vm3, %v1411_v11, %v1412_v47  ;;  %v1487_v59 = vsel %vm1380_vm3, 0.0, %v1411_v11  ;;  %v1788_v47 = vld [vmem:[#allocation2 + $0x61] sm:$0xff]  ;;  %v7540_v13 = vpack.i.bf16 %v1759_v56, %v1793_v30  ;;  %v1761_v37 = vld [vmem:[#allocation2 + $0x98] sm:$0xff]  ;;  %v7560_v29 = vpack.i.bf16 %v1791_v17, %v9609_v54  ;;  %v1794_v11 = vld [vmem:[#allocation2 + $0xa9] sm:$0xff] }
 0x43f   : > { %7446 = vrot.lane.b32.xlu0 %v7445_v6, %s12267_s25  ;;  %1540 = vst.msk [vmem:[#allocation2 + $0x108] sm:$0xff] %vm535_vm1, %v1487_v59  ;;  %1541 = vst.msk [vmem:[#allocation2 + $0x110] sm:$0xff] %vm535_vm1, %v1413_v62  ;;  %v7465_v19 = vpack.i.bf16 %v9589_v22, %v1788_v47  ;;  %v7475_v22 = vpack.i.bf16 %v9449_v46, %v1757_v50  ;;  %v7500_v46 = vpack.i.bf16 %v9631_v14, %v9567_v48  ;;  %v9731_v14 = vld [vmem:[#allocation2 + $0x152] sm:$0xff]  ;;  %v1797_v50 = vld [vmem:[#allocation2 + $0xc9] sm:$0xff] }
 0x440   : > { %v9664_v38 = vld [vmem:[#allocation2 + $0xda] sm:$0xff]  ;;  %7461 = vrot.lane.b32.xlu1 %v7460_v42, %s12267_s25  ;;  %v7515_v34 = vpack.i.bf16 %v1788_v47, %v9578_v7  ;;  %v7535_v6 = vpack.i.bf16 %v9567_v48, %v1761_v37  ;;  %v7550_v42 = vpack.i.bf16 %v9578_v7, %v1762_v52  ;;  %v1795_v62 = vld [vmem:[#allocation2 + $0xb1] sm:$0xff]  ;;  %v7555_v59 = vpack.i.bf16 %v1760_v32, %v1794_v11 }
 0x441   : > { %7134 = vmatprep.mubr.msk.f32.mxu1 %vm535_vm1, %v9664_v38  ;;  %v9675_v31 = vld [vmem:[#allocation2 + $0xe2] sm:$0xff]  ;;  %v7620_v53 = vpack.i.bf16 %v1795_v62, %v9650_v20  ;;  %v1798_v17 = vld [vmem:[#allocation2 + $0xd9] sm:$0xff] }
 0x442   : > { %7135 = vmatmul.mubr.msk.f32.gmra.mxu1 %vm535_vm1, %v9675_v31  ;;  %v1764_v48 = vld [vmem:[#allocation2 + $0xc0] sm:$0xff] }
 0x443   : > { %7456 = vrot.lane.b32.xlu0 %v7455_v0, %s8521_s30  ;;  %v7570_v0 = vpack.i.bf16 %v1761_v37, %v1795_v62  ;;  %v7580_v47 = vpack.i.bf16 %v9597_v51, %v1764_v48  ;;  %v1767_v32 = vld [vmem:[#allocation2 + $0xe0] sm:$0xff] }
 0x444   : > { %7471 = vrot.lane.b32.xlu1 %v7470_v41, %s8521_s30  ;;  %v9686_v39 = vld [vmem:[#allocation2 + $0xf2] sm:$0xff] }
 0x445   : > { %7137 = vmatprep.mubr.msk.f32.mxu1 %vm535_vm1, %v9686_v39  ;;  %v9691_v12 = vld [vmem:[#allocation2 + $0xfa] sm:$0xff]  ;;  %v1763_v41 = vld [vmem:[#allocation2 + $0xb0] sm:$0xff] }
 0x446   : > { %7138 = vmatmul.mubr.msk.f32.gmra.mxu1 %vm535_vm1, %v9691_v12  ;;  %v9695_v24 = vld [vmem:[#allocation2 + $0x10a] sm:$0xff]  ;;  %v9703_v49 = vld [vmem:[#allocation2 + $0x112] sm:$0xff]  ;;  %v7565_v7 = vpack.i.bf16 %v9587_v61, %v1763_v41 }
 0x447   : > { %7466 = vrot.lane.b32.xlu0 %v7465_v19, %s8520_s26  ;;  %7140 = vmatprep.mubr.msk.f32.mxu1 %vm535_vm1, %v9695_v24  ;;  %v7590_v19 = vpack.i.bf16 %v1793_v30, %v9629_v8  ;;  %v1766_v61 = vld [vmem:[#allocation2 + $0xd8] sm:$0xff]  ;;  %v9800_v37 = vld [vmem:[#allocation2 + $0x109] sm:$0xff] }
 0x448   : > { %7481 = vrot.lane.b32.xlu1 %v7480_v23, %s8520_s26  ;;  %v1796_v23 = vld [vmem:[#allocation2 + $0xc1] sm:$0xff]  ;;  %v1769_v30 = vld [vmem:[#allocation2 + $0xf8] sm:$0xff] }
 0x449   : > { %v7585_v60 = vpack.i.bf16 %v1762_v52, %v1796_v23 }
 0x44a   : > { %7141 = vmatmul.mubr.msk.f32.gmra.mxu1 %vm535_vm1, %v9703_v49 }
 0x44b   : > { %7476 = vrot.lane.b32.xlu0 %v7475_v22, %s12267_s25  ;;  %7143 = vmatprep.mubr.msk.f32.mxu1 %vm535_vm1, %v9707_v9  ;;  %v7600_v22 = vpack.i.bf16 %v1763_v41, %v1797_v50  ;;  %v1559_v41 = vld [vmem:[#allocation2] sm:$0xff] }
 0x44c   : > { %7491 = vrot.lane.b32.xlu1 %v7490_v57, %s12267_s25  ;;  %v1765_v57 = vld [vmem:[#allocation2 + $0xc8] sm:$0xff] }
 0x44d   : > { %v7595_v51 = vpack.i.bf16 %v9609_v54, %v1765_v57  ;;  %v1768_v54 = vld [vmem:[#allocation2 + $0xf0] sm:$0xff] }
 0x44e   : > { %7144 = vmatmul.mubr.msk.f32.gmra.mxu1 %vm535_vm1, %v9717_v4 }
 0x44f   : > { %7486 = vrot.lane.b32.xlu0 %v7485_v58, %s8521_s30  ;;  %7146 = vmatprep.mubr.msk.f32.mxu1 %vm535_vm1, %v9721_v10  ;;  %v7610_v58 = vpack.i.bf16 %v9616_v18, %v1766_v61  ;;  %v7625_v18 = vpack.i.bf16 %v9629_v8, %v1767_v32  ;;  %v1770_v8 = vld [vmem:[#allocation2 + $0x108] sm:$0xff] }
 0x450   : > { %7501 = vrot.lane.b32.xlu1 %v7500_v46, %s8521_s30  ;;  %v7605_v46 = vpack.i.bf16 %v1794_v11, %v9636_v28 }
 0x452   : > { %7147 = vmatmul.mubr.msk.f32.gmra.mxu1 %vm535_vm1, %v9727_v55 }
 0x453   : > { %7496 = vrot.lane.b32.xlu0 %v7495_v43, %s8520_s26  ;;  %7149 = vmatprep.mubr.msk.f32.mxu1 %vm535_vm1, %v9731_v14  ;;  %v1799_v43 = vld [vmem:[#allocation2 + $0xe1] sm:$0xff] }
 0x454   : > { %7511 = vrot.lane.b32.xlu1 %v7510_v21, %s8520_s26  ;;  %v7615_v21 = vpack.i.bf16 %v1764_v48, %v1798_v17  ;;  %v7630_v56 = vpack.i.bf16 %v1765_v57, %v1799_v43 }
 0x456   : > { %7150 = vmatmul.mubr.msk.f32.gmra.mxu1 %vm535_vm1, %v9739_v16 }
 0x457   : > { %7506 = vrot.lane.b32.xlu0 %v7505_v25, %s12267_s25  ;;  %7152 = vmatprep.mubr.msk.f32.mxu1 %vm535_vm1, %v1842_v33  ;;  %v7640_v25 = vpack.i.bf16 %v9636_v28, %v1768_v54  ;;  %v7650_v33 = vpack.i.bf16 %v1797_v50, %v9675_v31  ;;  %v7655_v28 = vpack.i.bf16 %v9650_v20, %v1769_v30 }
 0x458   : > { %7521 = vrot.lane.b32.xlu1 %v7520_v26, %s12267_s25  ;;  %v7635_v26 = vpack.i.bf16 %v1796_v23, %v9664_v38  ;;  %v7675_v20 = vpack.i.bf16 %v1768_v54, %v9800_v37 }
 0x45a   : > { %7153 = vmatmul.mubr.msk.f32.gmra.mxu1 %vm535_vm1, %v1843_v5 }
 0x45b   : > { %7516 = vrot.lane.b32.xlu0 %v7515_v34, %s8521_s30  ;;  %7155 = vmatprep.mubr.msk.f32.mxu1 %vm535_vm1, %v1844_v35  ;;  %v1800_v34 = vld [vmem:[#allocation2 + $0xf1] sm:$0xff]  ;;  %v7670_v35 = vpack.i.bf16 %v9664_v38, %v1770_v8 }
 0x45c   : > { %7531 = vrot.lane.b32.xlu1 %v7530_v63, %s8521_s30  ;;  %v1801_v63 = vld [vmem:[#allocation2 + $0xf9] sm:$0xff]  ;;  %v7645_v3 = vpack.i.bf16 %v1766_v61, %v1800_v34 }
 0x45d   : > { %v7660_v5 = vpack.i.bf16 %v1767_v32, %v1801_v63 }
 0x45e   : > { %7156 = vmatmul.mubr.msk.f32.gmra.mxu1 %vm535_vm1, %v1845_v15  ;;  %v9803_v15 = vld [vmem:[#allocation2 + $0x111] sm:$0xff] }
 0x45f   : > { %7526 = vrot.lane.b32.xlu0 %v7525_v2, %s8520_s26  ;;  %v7665_v2 = vpack.i.bf16 %v1798_v17, %v9686_v39  ;;  %v7690_v38 = vpack.i.bf16 %v1769_v30, %v9803_v15  ;;  %v1560_v17 = vld [vmem:[#allocation2 + $0x8] sm:$0xff] }
 0x460   : > { %7541 = vrot.lane.b32.xlu1 %v7540_v13, %s8520_s26  ;;  %v7680_v13 = vpack.i.bf16 %v1799_v43, %v9691_v12 }
 0x463   : > { %7536 = vrot.lane.b32.xlu0 %v7535_v6, %s12267_s25  ;;  %v1771_v6 = vld [vmem:[#allocation2 + $0x110] sm:$0xff] }
 0x464   : > { %7551 = vrot.lane.b32.xlu1 %v7550_v42, %s12267_s25  ;;  %v9809_v42 = vld [vmem:[#allocation2 + $0x120] sm:$0xff] }
 0x465   : > { %v7700_v62 = vpack.i.bf16 %v9686_v39, %v9809_v42 }
 0x467   : > { %7546 = vrot.lane.b32.xlu0 %v7545_v45, %s8521_s30 }
 0x468   : > { %7561 = vrot.lane.b32.xlu1 %v7560_v29, %s8521_s30  ;;  %v7685_v29 = vpack.i.bf16 %v9675_v31, %v1771_v6 }
 0x46b   : > { %7556 = vrot.lane.b32.xlu0 %v7555_v59, %s8520_s26 }
 0x46c   : > { %7571 = vrot.lane.b32.xlu1 %v7570_v0, %s8520_s26 }
 0x46f   : > { %7566 = vrot.lane.b32.xlu0 %v7565_v7, %s12267_s25  ;;  %v7695_v7 = vpack.i.bf16 %v1800_v34, %v9695_v24 }
 0x470   : > { %7581 = vrot.lane.b32.xlu1 %v7580_v47, %s12267_s25  ;;  %v7710_v47 = vpack.i.bf16 %v1801_v63, %v9703_v49 }
 0x473   : > { %7576 = vrot.lane.b32.xlu0 %v7575_v36, %s8521_s30  ;;  %v9819_v36 = vld [vmem:[#allocation2 + $0x121] sm:$0xff] }
 0x474   : > { %7591 = vrot.lane.b32.xlu1 %v7590_v19, %s8521_s30 }
 0x477   : > { %7586 = vrot.lane.b32.xlu0 %v7585_v60, %s8520_s26 }
 0x478   : > { %7601 = vrot.lane.b32.xlu1 %v7600_v22, %s8520_s26 }
 0x47b   : > { %7596 = vrot.lane.b32.xlu0 %v7595_v51, %s12267_s25  ;;  %v9825_v51 = vld [vmem:[#allocation2 + $0x129] sm:$0xff] }
 0x47c   : > { %7611 = vrot.lane.b32.xlu1 %v7610_v58, %s12267_s25 }
 0x47f   : > { %7606 = vrot.lane.b32.xlu0 %v7605_v46, %s8521_s30 }
 0x480   : > { %7621 = vrot.lane.b32.xlu1 %v7620_v53, %s8521_s30  ;;  %v7705_v53 = vpack.i.bf16 %v1770_v8, %v9819_v36 }
 0x483   : > { %7616 = vrot.lane.b32.xlu0 %v7615_v21, %s8520_s26 }
 0x484   : > { %7631 = vrot.lane.b32.xlu1 %v7630_v56, %s8520_s26 }
 0x487   : > { %7626 = vrot.lane.b32.xlu0 %v7625_v18, %s12267_s25 }
 0x488   : > { %7641 = vrot.lane.b32.xlu1 %v7640_v25, %s12267_s25 }
 0x48b   : > { %7636 = vrot.lane.b32.xlu0 %v7635_v26, %s8521_s30  ;;  %v7720_v26 = vpack.i.bf16 %v1771_v6, %v9825_v51 }
 0x48c   : > { %7651 = vrot.lane.b32.xlu1 %v7650_v33, %s8521_s30  ;;  %v1773_v33 = vld [vmem:[#allocation2 + $0x128] sm:$0xff] }
 0x48d   : > { %v7407_v52 = vpop.permute.xlu1 %7406 }
 0x48e   : > { %v7409_v31 = vunpack.i.h.bf16 %v7407_v52  ;;  %v7408_v19 = vunpack.i.l.bf16 %v7407_v52 }
 0x48f   : > { %7646 = vrot.lane.b32.xlu0 %v7645_v3, %s8520_s26  ;;  %v9838_v3 = vld [vmem:[#allocation2 + $0x138] sm:$0xff] }
 0x490   : > { %7661 = vrot.lane.b32.xlu1 %v7660_v5, %s8520_s26 }
 0x493   : > { %7656 = vrot.lane.b32.xlu0 %v7655_v28, %s12267_s25 }
 0x494   : > { %7671 = vrot.lane.b32.xlu1 %v7670_v35, %s12267_s25 }
 0x497   : > { %7666 = vrot.lane.b32.xlu0 %v7665_v2, %s8521_s30  ;;  %v7715_v2 = vpack.i.bf16 %v9691_v12, %v1773_v33 }
 0x498   : > { %7681 = vrot.lane.b32.xlu1 %v7680_v13, %s8521_s30 }
 0x49b   : > { %7676 = vrot.lane.b32.xlu0 %v7675_v20, %s8520_s26  ;;  %v7730_v20 = vpack.i.bf16 %v9695_v24, %v9838_v3 }
 0x49c   : > { %7691 = vrot.lane.b32.xlu1 %v7690_v38, %s8520_s26 }
 0x49d   : > { %v7397_v45 = vpop.permute.xlu0 %7396 }
 0x49e   : > { %v7412_v11 = vpop.permute.xlu1 %7411  ;;  %v7399_v59 = vunpack.i.h.bf16 %v7397_v45  ;;  %v7398_v0 = vunpack.i.l.bf16 %v7397_v45  ;;  %v1689_v45 = vld [vmem:[#allocation2 + $0x31] sm:$0xff] }
 0x49f   : > { %7686 = vrot.lane.b32.xlu0 %v7685_v29, %s12267_s25  ;;  %v7414_v60 = vunpack.i.h.bf16 %v7412_v11  ;;  %v7413_v22 = vunpack.i.l.bf16 %v7412_v11  ;;  %v1561_v29 = vld [vmem:[#allocation2 + $0x18] sm:$0xff] }
 0x4a0   : > { %7701 = vrot.lane.b32.xlu1 %v7700_v62, %s12267_s25  ;;  %v2714_v57 = vsel %vm535_vm1, %v9606_v27, %v7398_v0  ;;  %v2616_v61 = vsel %vm535_vm1, %v1559_v41, %v7399_v59  ;;  %v7725_v59 = vpack.i.bf16 %v9800_v37, %v9707_v9 }
 0x4a1   : > { %v7402_v48 = vpop.permute.xlu0 %7401  ;;  %v2715_v34 = vsel %vm535_vm1, %v9611_v44, %v7413_v22  ;;  %v2617_v63 = vsel %vm535_vm1, %v1560_v17, %v7414_v60 }
 0x4a2   : > { %v7404_v23 = vunpack.i.h.bf16 %v7402_v48  ;;  %v7403_v50 = vunpack.i.l.bf16 %v7402_v48  ;;  %v7422_v39 = vpop.permute.xlu1 %7421  ;;  %v7740_v48 = vpack.i.bf16 %v9803_v15, %v9717_v4 }
 0x4a3   : > { %7696 = vrot.lane.b32.xlu0 %v7695_v7, %s8521_s30  ;;  %v7424_v21 = vunpack.i.h.bf16 %v7422_v39  ;;  %v7423_v56 = vunpack.i.l.bf16 %v7422_v39  ;;  %v9856_v7 = vld [vmem:[#allocation2 + $0x139] sm:$0xff] }
 0x4a4   : > { %v2746_v58 = vsel %vm2648_vm4, %v2714_v57, %v7403_v50  ;;  %v2649_v46 = vsel %vm2648_vm4, %v2616_v61, %v7404_v23  ;;  %7711 = vrot.lane.b32.xlu1 %v7710_v47, %s8521_s30  ;;  %v9861_v50 = vld [vmem:[#allocation2 + $0x141] sm:$0xff]  ;;  %v7735_v57 = vpack.i.bf16 %v9809_v42, %v9856_v7 }
 0x4a5   : > { %v7417_v43 = vpop.permute.xlu0 %7416  ;;  %v2778_v32 = vsel %vm2681_vm5, %v2746_v58, %v7408_v19  ;;  %v2682_v27 = vsel %vm2681_vm5, %v2649_v46, %v7409_v31  ;;  %v7750_v17 = vpack.i.bf16 %v1773_v33, %v9861_v50 }
 0x4a6   : > { %v7419_v54 = vunpack.i.h.bf16 %v7417_v43  ;;  %v7418_v18 = vunpack.i.l.bf16 %v7417_v43  ;;  %3012 = vmatprep.mubr.f32.mxu0 %v2778_v32  ;;  %v7432_v25 = vpop.permute.xlu1 %7431  ;;  %v1775_v43 = vld [vmem:[#allocation2 + $0x140] sm:$0xff] }
 0x4a7   : > { %3013 = vmatmul.mubr.f32.vlgmr.msra.gmra.mxu0 %v2682_v27  ;;  %7706 = vrot.lane.b32.xlu0 %v7705_v53, %s8520_s26  ;;  %v7434_v38 = vunpack.i.h.bf16 %v7432_v25  ;;  %v7433_v6 = vunpack.i.l.bf16 %v7432_v25  ;;  %v1690_v53 = vld [vmem:[#allocation2 + $0x39] sm:$0xff]  ;;  %v9872_v27 = vld [vmem:[#allocation2 + $0x150] sm:$0xff] }
 0x4a8   : > { %v2747_v5 = vsel %vm2648_vm4, %v2715_v34, %v7418_v18  ;;  %v2650_v30 = vsel %vm2648_vm4, %v2617_v63, %v7419_v54  ;;  %7721 = vrot.lane.b32.xlu1 %v7720_v26, %s8520_s26  ;;  %v7745_v26 = vpack.i.bf16 %v9703_v49, %v1775_v43 }
 0x4a9   : > { %v7427_v8 = vpop.permute.xlu0 %7426  ;;  %v2779_v28 = vsel %vm2681_vm5, %v2747_v5, %v7423_v56  ;;  %v2683_v35 = vsel %vm2681_vm5, %v2650_v30, %v7424_v21  ;;  %v1562_v21 = vld [vmem:[#allocation2 + $0x20] sm:$0xff]  ;;  %v7760_v30 = vpack.i.bf16 %v9707_v9, %v9872_v27 }
 0x4aa   : > { %v7429_v13 = vunpack.i.h.bf16 %v7427_v8  ;;  %v7428_v52 = vunpack.i.l.bf16 %v7427_v8  ;;  %3017 = vmatprep.mubr.f32.mxu0 %v2779_v28  ;;  %v7442_v44 = vpop.permute.xlu1 %7441 }
 0x4ab   : > { %3018 = vmatmul.mubr.f32.gmra.mxu0 %v2683_v35  ;;  %7716 = vrot.lane.b32.xlu0 %v7715_v2, %s12267_s25  ;;  %v7444_v47 = vunpack.i.h.bf16 %v7442_v44  ;;  %v7443_v31 = vunpack.i.l.bf16 %v7442_v44  ;;  %v1691_v35 = vld [vmem:[#allocation2 + $0x49] sm:$0xff]  ;;  %v7755_v44 = vpack.i.bf16 %v9819_v36, %v9721_v10 }
 0x4ac   : > { %7731 = vrot.lane.b32.xlu1 %v7730_v20, %s12267_s25  ;;  %v2716_v11 = vsel %vm535_vm1, %v1689_v45, %v7428_v52  ;;  %v2618_v12 = vsel %vm535_vm1, %v1561_v29, %v7429_v13  ;;  %v1563_v2 = vld [vmem:[#allocation2 + $0x30] sm:$0xff] }
 0x4ad   : > { %v7437_v62 = vpop.permute.xlu0 %7436  ;;  %v2748_v19 = vsel %vm2648_vm4, %v2716_v11, %v7433_v6  ;;  %v2651_v23 = vsel %vm2648_vm4, %v2618_v12, %v7434_v38  ;;  %v2717_v56 = vsel %vm535_vm1, %v1690_v53, %v7443_v31  ;;  %v2619_v32 = vsel %vm535_vm1, %v1562_v21, %v7444_v47  ;;  %v9890_v45 = vld [vmem:[#allocation2 + $0x151] sm:$0xff] }
 0x4ae   : > { %v7439_v0 = vunpack.i.h.bf16 %v7437_v62  ;;  %v7438_v41 = vunpack.i.l.bf16 %v7437_v62  ;;  %v7452_v24 = vpop.permute.xlu1 %7451  ;;  %v7770_v6 = vpack.i.bf16 %v9825_v51, %v9727_v55 }
 0x4af   : > { %7726 = vrot.lane.b32.xlu0 %v7725_v59, %s8521_s30  ;;  %v7454_v60 = vunpack.i.h.bf16 %v7452_v24  ;;  %v7453_v15 = vunpack.i.l.bf16 %v7452_v24  ;;  %v9895_v59 = vld [vmem:[#allocation2 + $0x159] sm:$0xff]  ;;  %v7765_v24 = vpack.i.bf16 %v9838_v3, %v9890_v45 }
 0x4b0   : > { %v2780_v37 = vsel %vm2681_vm5, %v2748_v19, %v7438_v41  ;;  %v2684_v39 = vsel %vm2681_vm5, %v2651_v23, %v7439_v0  ;;  %7741 = vrot.lane.b32.xlu1 %v7740_v48, %s8521_s30  ;;  %v1692_v19 = vld [vmem:[#allocation2 + $0x51] sm:$0xff]  ;;  %v7780_v23 = vpack.i.bf16 %v1775_v43, %v9895_v59 }
 0x4b1   : > { %v7447_v22 = vpop.permute.xlu0 %7446  ;;  %3022 = vmatprep.mubr.f32.mxu0 %v2780_v37  ;;  %v9903_v37 = vld [vmem:[#allocation2 + $0x158] sm:$0xff] }
 0x4b2   : > { %v7449_v61 = vunpack.i.h.bf16 %v7447_v22  ;;  %v7448_v58 = vunpack.i.l.bf16 %v7447_v22  ;;  %3023 = vmatmul.mubr.f32.gmra.mxu0 %v2684_v39  ;;  %v7462_v46 = vpop.permute.xlu1 %7461  ;;  %v1564_v39 = vld [vmem:[#allocation2 + $0x38] sm:$0xff]  ;;  %v9908_v22 = vld [vmem:[#allocation2 + $0x168] sm:$0xff] }
 0x4b3   : > { %7736 = vrot.lane.b32.xlu0 %v7735_v57, %s8520_s26  ;;  %v7464_v8 = vunpack.i.h.bf16 %v7462_v46  ;;  %v7463_v28 = vunpack.i.l.bf16 %v7462_v46  ;;  %v7775_v46 = vpack.i.bf16 %v9717_v4, %v9903_v37 }
 0x4b4   : > { %v2749_v54 = vsel %vm2648_vm4, %v2717_v56, %v7448_v58  ;;  %7751 = vrot.lane.b32.xlu1 %v7750_v17, %s8520_s26  ;;  %v2652_v42 = vsel %vm2648_vm4, %v2619_v32, %v7449_v61  ;;  %v7790_v56 = vpack.i.bf16 %v9721_v10, %v9908_v22 }
 0x4b5   : > { %v7457_v18 = vpop.permute.xlu0 %7456  ;;  %v2781_v25 = vsel %vm2681_vm5, %v2749_v54, %v7453_v15  ;;  %v2685_v33 = vsel %vm2681_vm5, %v2652_v42, %v7454_v60  ;;  %v1693_v42 = vld [vmem:[#allocation2 + $0x61] sm:$0xff] }
 0x4b6   : > { %v7459_v34 = vunpack.i.h.bf16 %v7457_v18  ;;  %v7458_v63 = vunpack.i.l.bf16 %v7457_v18  ;;  %3027 = vmatprep.mubr.f32.mxu0 %v2781_v25  ;;  %v7472_v5 = vpop.permute.xlu1 %7471  ;;  %v1565_v18 = vld [vmem:[#allocation2 + $0x48] sm:$0xff] }
 0x4b7   : > { %7746 = vrot.lane.b32.xlu0 %v7745_v26, %s12267_s25  ;;  %3028 = vmatmul.mubr.f32.gmra.mxu0 %v2685_v33  ;;  %v7474_v29 = vunpack.i.h.bf16 %v7472_v5  ;;  %v7473_v11 = vunpack.i.l.bf16 %v7472_v5  ;;  %v7785_v33 = vpack.i.bf16 %v9856_v7, %v9731_v14  ;;  %v7800_v5 = vpack.i.bf16 %v9861_v50, %v9739_v16 }
 0x4b8   : > { %7761 = vrot.lane.b32.xlu1 %v7760_v30, %s12267_s25  ;;  %v2718_v49 = vsel %vm535_vm1, %v1691_v35, %v7458_v63  ;;  %v2620_v13 = vsel %vm535_vm1, %v1563_v2, %v7459_v34  ;;  %v9927_v30 = vld [vmem:[#allocation2 + $0x169] sm:$0xff] }
 0x4b9   : > { %v7467_v52 = vpop.permute.xlu0 %7466  ;;  %v2750_v12 = vsel %vm2648_vm4, %v2718_v49, %v7463_v28  ;;  %v2653_v62 = vsel %vm2648_vm4, %v2620_v13, %v7464_v8  ;;  %v2719_v60 = vsel %vm535_vm1, %v1692_v19, %v7473_v11  ;;  %v2621_v15 = vsel %vm535_vm1, %v1564_v39, %v7474_v29  ;;  %v9932_v49 = vld [vmem:[#allocation2 + $0x171] sm:$0xff]  ;;  %v1650_v11 = vld [vmem:[#allocation2 + $0x142] sm:$0xff] }
 0x4ba   : > { %v7469_v20 = vunpack.i.h.bf16 %v7467_v52  ;;  %v7468_v38 = vunpack.i.l.bf16 %v7467_v52  ;;  %v7482_v9 = vpop.permute.xlu1 %7481  ;;  %v7795_v52 = vpack.i.bf16 %v9872_v27, %v9927_v30  ;;  %v7810_v29 = vpack.i.bf16 %v9903_v37, %v9932_v49  ;;  %v9946_v27 = vld [vmem:[#allocation2 + $0x180] sm:$0xff]  ;;  %v9955_v39 = vld [vmem:[#allocation2 + $0x16a] sm:$0xff] }
 0x4bb   : > { %7756 = vrot.lane.b32.xlu0 %v7755_v44, %s8521_s30  ;;  %v7484_v41 = vunpack.i.h.bf16 %v7482_v9  ;;  %v7483_v55 = vunpack.i.l.bf16 %v7482_v9  ;;  %v9939_v44 = vld [vmem:[#allocation2 + $0x170] sm:$0xff] }
 0x4bc   : > { %v2782_v36 = vsel %vm2681_vm5, %v2750_v12, %v7468_v38  ;;  %v2686_v0 = vsel %vm2681_vm5, %v2653_v62, %v7469_v20  ;;  %7771 = vrot.lane.b32.xlu1 %v7770_v6, %s8521_s30  ;;  %v1694_v6 = vld [vmem:[#allocation2 + $0x69] sm:$0xff] }
 0x4bd   : > { %v7477_v51 = vpop.permute.xlu0 %7476  ;;  %3032 = vmatprep.mubr.f32.mxu0 %v2782_v36  ;;  %v1566_v12 = vld [vmem:[#allocation2 + $0x50] sm:$0xff] }
 0x4be   : > { %v7479_v48 = vunpack.i.h.bf16 %v7477_v51  ;;  %v7478_v47 = vunpack.i.l.bf16 %v7477_v51  ;;  %3033 = vmatmul.mubr.f32.gmra.mxu0 %v2686_v0  ;;  %v7492_v31 = vpop.permute.xlu1 %7491  ;;  %v1651_v0 = vld [vmem:[#allocation2 + $0x152] sm:$0xff] }
 0x4bf   : > { %7766 = vrot.lane.b32.xlu0 %v7765_v24, %s8520_s26  ;;  %v7494_v32 = vunpack.i.h.bf16 %v7492_v31  ;;  %v7493_v54 = vunpack.i.l.bf16 %v7492_v31  ;;  %v7820_v37 = vpack.i.bf16 %v1651_v0, %v9946_v27  ;;  %v1749_v0 = vld [vmem:[#allocation2 + $0x182] sm:$0xff] }
 0x4c0   : > { %v2751_v3 = vsel %vm2648_vm4, %v2719_v60, %v7478_v47  ;;  %7781 = vrot.lane.b32.xlu1 %v7780_v23, %s8520_s26  ;;  %v2654_v57 = vsel %vm2648_vm4, %v2621_v15, %v7479_v48  ;;  %v7805_v48 = vpack.i.bf16 %v1650_v11, %v9939_v44 }
 0x4c1   : > { %v7487_v61 = vpop.permute.xlu0 %7486  ;;  %v2783_v58 = vsel %vm2681_vm5, %v2751_v3, %v7483_v55  ;;  %v2687_v53 = vsel %vm2681_vm5, %v2654_v57, %v7484_v41  ;;  %v1695_v3 = vld [vmem:[#allocation2 + $0x79] sm:$0xff] }
 0x4c2   : > { %v7489_v17 = vunpack.i.h.bf16 %v7487_v61  ;;  %v7488_v43 = vunpack.i.l.bf16 %v7487_v61  ;;  %3037 = vmatprep.mubr.f32.mxu0 %v2783_v58  ;;  %v7502_v21 = vpop.permute.xlu1 %7501  ;;  %v1567_v57 = vld [vmem:[#allocation2 + $0x60] sm:$0xff]  ;;  %v9958_v61 = vld [vmem:[#allocation2 + $0x172] sm:$0xff] }
 0x4c3   : > { %7776 = vrot.lane.b32.xlu0 %v7775_v46, %s12267_s25  ;;  %3038 = vmatmul.mubr.f32.gmra.mxu0 %v2687_v53  ;;  %v7504_v8 = vunpack.i.h.bf16 %v7502_v21  ;;  %v7503_v28 = vunpack.i.l.bf16 %v7502_v21 }
 0x4c4   : > { %7791 = vrot.lane.b32.xlu1 %v7790_v56, %s12267_s25  ;;  %v2720_v4 = vsel %vm535_vm1, %v1693_v42, %v7488_v43  ;;  %v2622_v25 = vsel %vm535_vm1, %v1565_v18, %v7489_v17  ;;  %v7815_v17 = vpack.i.bf16 %v9890_v45, %v9955_v39 }
 0x4c5   : > { %v7497_v26 = vpop.permute.xlu0 %7496  ;;  %v2752_v35 = vsel %vm2648_vm4, %v2720_v4, %v7493_v54  ;;  %v2655_v2 = vsel %vm2648_vm4, %v2622_v25, %v7494_v32  ;;  %v2721_v62 = vsel %vm535_vm1, %v1694_v6, %v7503_v28  ;;  %v2623_v36 = vsel %vm535_vm1, %v1566_v12, %v7504_v8  ;;  %v9967_v54 = vld [vmem:[#allocation2 + $0x181] sm:$0xff] }
 0x4c6   : > { %v7499_v34 = vunpack.i.h.bf16 %v7497_v26  ;;  %v7498_v63 = vunpack.i.l.bf16 %v7497_v26  ;;  %v7512_v10 = vpop.permute.xlu1 %7511  ;;  %v7830_v32 = vpack.i.bf16 %v9895_v59, %v9958_v61  ;;  %v9972_v26 = vld [vmem:[#allocation2 + $0x189] sm:$0xff] }
 0x4c7   : > { %7786 = vrot.lane.b32.xlu0 %v7785_v33, %s8521_s30  ;;  %v7514_v13 = vunpack.i.h.bf16 %v7512_v10  ;;  %v7513_v16 = vunpack.i.l.bf16 %v7512_v10  ;;  %v7825_v10 = vpack.i.bf16 %v9908_v22, %v9967_v54  ;;  %v9979_v8 = vld [vmem:[#allocation2 + $0x188] sm:$0xff]  ;;  %v1782_v22 = vld [vmem:[#allocation2 + $0x198] sm:$0xff] }
 0x4c8   : > { %v2784_v14 = vsel %vm2681_vm5, %v2752_v35, %v7498_v63  ;;  %v2688_v7 = vsel %vm2681_vm5, %v2655_v2, %v7499_v34  ;;  %7801 = vrot.lane.b32.xlu1 %v7800_v5, %s8521_s30  ;;  %v1652_v5 = vld [vmem:[#allocation2 + $0x15a] sm:$0xff] }
 0x4c9   : > { %v7507_v50 = vpop.permute.xlu0 %7506  ;;  %3042 = vmatprep.mubr.f32.mxu0 %v2784_v14  ;;  %v1696_v14 = vld [vmem:[#allocation2 + $0x81] sm:$0xff]  ;;  %v7835_v6 = vpack.i.bf16 %v1652_v5, %v9979_v8 }
 0x4ca   : > { %v7509_v20 = vunpack.i.h.bf16 %v7507_v50  ;;  %v7508_v38 = vunpack.i.l.bf16 %v7507_v50  ;;  %3043 = vmatmul.mubr.f32.gmra.mxu0 %v2688_v7  ;;  %v7522_v9 = vpop.permute.xlu1 %7521  ;;  %v7840_v7 = vpack.i.bf16 %v9939_v44, %v9972_v26 }
 0x4cb   : > { %7796 = vrot.lane.b32.xlu0 %v7795_v52, %s8520_s26  ;;  %v7524_v60 = vunpack.i.h.bf16 %v7522_v9  ;;  %v7523_v15 = vunpack.i.l.bf16 %v7522_v9 }
 0x4cc   : > { %v2753_v41 = vsel %vm2648_vm4, %v2721_v62, %v7508_v38  ;;  %7811 = vrot.lane.b32.xlu1 %v7810_v29, %s8520_s26  ;;  %v2656_v55 = vsel %vm2648_vm4, %v2623_v36, %v7509_v20  ;;  %v7850_v36 = vpack.i.bf16 %v9955_v39, %v1782_v22 }
 0x4cd   : > { %v7517_v51 = vpop.permute.xlu0 %7516  ;;  %v2785_v24 = vsel %vm2681_vm5, %v2753_v41, %v7513_v16  ;;  %v2689_v47 = vsel %vm2681_vm5, %v2656_v55, %v7514_v13  ;;  %v1568_v13 = vld [vmem:[#allocation2 + $0x68] sm:$0xff]  ;;  %v1846_v16 = vld [vmem:[#allocation2 + $0x19a] sm:$0xff] }
 0x4ce   : > { %v7519_v31 = vunpack.i.h.bf16 %v7517_v51  ;;  %v7518_v19 = vunpack.i.l.bf16 %v7517_v51  ;;  %3047 = vmatprep.mubr.f32.mxu0 %v2785_v24  ;;  %v7532_v23 = vpop.permute.xlu1 %7531  ;;  %7158 = vmatprep.mubr.msk.f32.mxu1 %vm535_vm1, %v1846_v16  ;;  %v1847_v41 = vld [vmem:[#allocation2 + $0x1a2] sm:$0xff]  ;;  %v1697_v24 = vld [vmem:[#allocation2 + $0x91] sm:$0xff] }
 0x4cf   : > { %7806 = vrot.lane.b32.xlu0 %v7805_v48, %s12267_s25  ;;  %3048 = vmatmul.mubr.f32.gmra.mxu0 %v2689_v47  ;;  %v7534_v42 = vunpack.i.h.bf16 %v7532_v23  ;;  %v7533_v18 = vunpack.i.l.bf16 %v7532_v23  ;;  %v1569_v48 = vld [vmem:[#allocation2 + $0x78] sm:$0xff]  ;;  %v1750_v47 = vld [vmem:[#allocation2 + $0x18a] sm:$0xff] }
 0x4d0   : > { %7821 = vrot.lane.b32.xlu1 %v7820_v37, %s12267_s25  ;;  %v2722_v58 = vsel %vm535_vm1, %v1695_v3, %v7518_v19  ;;  %v2624_v46 = vsel %vm535_vm1, %v1567_v57, %v7519_v31  ;;  %7159 = vmatmul.mubr.msk.f32.gmra.mxu1 %vm535_vm1, %v1847_v41  ;;  %v7845_v37 = vpack.i.bf16 %v9927_v30, %v1749_v0  ;;  %v1814_v57 = vld [vmem:[#allocation2 + $0x199] sm:$0xff] }
 0x4d1   : > { %v7527_v53 = vpop.permute.xlu0 %7526  ;;  %v2754_v4 = vsel %vm2648_vm4, %v2722_v58, %v7523_v15  ;;  %v2657_v25 = vsel %vm2648_vm4, %v2624_v46, %v7524_v60  ;;  %v2723_v50 = vsel %vm535_vm1, %v1696_v14, %v7533_v18  ;;  %v2625_v52 = vsel %vm535_vm1, %v1568_v13, %v7534_v42  ;;  %7177 = vmatprep.mubr.msk.f32.mxu1 %vm8519_vm0, %v8518_v1 }
 0x4d2   : > { %v7529_v43 = vunpack.i.h.bf16 %v7527_v53  ;;  %v7528_v21 = vunpack.i.l.bf16 %v7527_v53  ;;  %v7542_v56 = vpop.permute.xlu1 %7541  ;;  %v7860_v3 = vpack.i.bf16 %v9932_v49, %v1750_v47 }
 0x4d3   : > { %7816 = vrot.lane.b32.xlu0 %v7815_v17, %s8521_s30  ;;  %v7544_v34 = vunpack.i.h.bf16 %v7542_v56  ;;  %v7543_v59 = vunpack.i.l.bf16 %v7542_v56 }
 0x4d4   : > { %v2786_v45 = vsel %vm2681_vm5, %v2754_v4, %v7528_v21  ;;  %v2690_v33 = vsel %vm2681_vm5, %v2657_v25, %v7529_v43  ;;  %7831 = vrot.lane.b32.xlu1 %v7830_v32, %s8521_s30  ;;  %v1815_v43 = vld [vmem:[#allocation2 + $0x1a1] sm:$0xff]  ;;  %v7855_v4 = vpack.i.bf16 %v9946_v27, %v1814_v57 }
 0x4d5   : > { %v7537_v63 = vpop.permute.xlu0 %7536  ;;  %3052 = vmatprep.mubr.f32.mxu0 %v2786_v45 }
 0x4d6   : > { %v7539_v28 = vunpack.i.h.bf16 %v7537_v63  ;;  %v7538_v35 = vunpack.i.l.bf16 %v7537_v63  ;;  %3053 = vmatmul.mubr.f32.gmra.mxu0 %v2690_v33  ;;  %v7552_v2 = vpop.permute.xlu1 %7551  ;;  %v1783_v63 = vld [vmem:[#allocation2 + $0x1a0] sm:$0xff] }
 0x4d7   : > { %7826 = vrot.lane.b32.xlu0 %v7825_v10, %s8520_s26  ;;  %v7554_v55 = vunpack.i.h.bf16 %v7552_v2  ;;  %v7553_v51 = vunpack.i.l.bf16 %v7552_v2  ;;  %v1570_v10 = vld [vmem:[#allocation2 + $0x80] sm:$0xff] }
 0x4d8   : > { %v2755_v20 = vsel %vm2648_vm4, %v2723_v50, %v7538_v35  ;;  %7841 = vrot.lane.b32.xlu1 %v7840_v7, %s8520_s26  ;;  %v2658_v38 = vsel %vm2648_vm4, %v2625_v52, %v7539_v28  ;;  %v7865_v7 = vpack.i.bf16 %v9958_v61, %v1783_v63 }
 0x4d9   : > { %v7547_v9 = vpop.permute.xlu0 %7546  ;;  %v2787_v44 = vsel %vm2681_vm5, %v2755_v20, %v7543_v59  ;;  %v2691_v29 = vsel %vm2681_vm5, %v2658_v38, %v7544_v34  ;;  %v1698_v34 = vld [vmem:[#allocation2 + $0x99] sm:$0xff]  ;;  %v7870_v59 = vpack.i.bf16 %v9979_v8, %v1815_v43  ;;  %v1699_v20 = vld [vmem:[#allocation2 + $0xa9] sm:$0xff] }
 0x4da   : > { %v7549_v11 = vunpack.i.h.bf16 %v7547_v9  ;;  %v7548_v12 = vunpack.i.l.bf16 %v7547_v9  ;;  %3057 = vmatprep.mubr.f32.mxu0 %v2787_v44  ;;  %v7562_v62 = vpop.permute.xlu1 %7561  ;;  %v1571_v38 = vld [vmem:[#allocation2 + $0x90] sm:$0xff] }
 0x4db   : > { %7836 = vrot.lane.b32.xlu0 %v7835_v6, %s12267_s25  ;;  %3058 = vmatmul.mubr.f32.gmra.mxu0 %v2691_v29  ;;  %v7564_v58 = vunpack.i.h.bf16 %v7562_v62  ;;  %v7563_v46 = vunpack.i.l.bf16 %v7562_v62 }
 0x4dc   : > { %7851 = vrot.lane.b32.xlu1 %v7850_v36, %s12267_s25  ;;  %v2724_v31 = vsel %vm535_vm1, %v1697_v24, %v7548_v12  ;;  %v2626_v19 = vsel %vm535_vm1, %v1569_v48, %v7549_v11 }
 0x4dd   : > { %v7557_v23 = vpop.permute.xlu0 %7556  ;;  %v2756_v53 = vsel %vm2648_vm4, %v2724_v31, %v7553_v51  ;;  %v2659_v17 = vsel %vm2648_vm4, %v2626_v19, %v7554_v55  ;;  %v2725_v5 = vsel %vm535_vm1, %v1698_v34, %v7563_v46  ;;  %v2627_v28 = vsel %vm535_vm1, %v1570_v10, %v7564_v58 }
 0x4de   : > { %v7559_v39 = vunpack.i.h.bf16 %v7557_v23  ;;  %v7558_v60 = vunpack.i.l.bf16 %v7557_v23  ;;  %v7572_v15 = vpop.permute.xlu1 %7571  ;;  %v1700_v23 = vld [vmem:[#allocation2 + $0xb1] sm:$0xff] }
 0x4df   : > { %7846 = vrot.lane.b32.xlu0 %v7845_v37, %s8521_s30  ;;  %v7574_v32 = vunpack.i.h.bf16 %v7572_v15  ;;  %v7573_v42 = vunpack.i.l.bf16 %v7572_v15  ;;  %v1572_v37 = vld [vmem:[#allocation2 + $0x98] sm:$0xff] }
 0x4e0   : > { %v2788_v21 = vsel %vm2681_vm5, %v2756_v53, %v7558_v60  ;;  %v2692_v56 = vsel %vm2681_vm5, %v2659_v17, %v7559_v39  ;;  %7861 = vrot.lane.b32.xlu1 %v7860_v3, %s8521_s30 }
 0x4e1   : > { %v7567_v18 = vpop.permute.xlu0 %7566  ;;  %3062 = vmatprep.mubr.f32.mxu0 %v2788_v21 }
 0x4e2   : > { %v7569_v25 = vunpack.i.h.bf16 %v7567_v18  ;;  %v7568_v45 = vunpack.i.l.bf16 %v7567_v18  ;;  %3063 = vmatmul.mubr.f32.gmra.mxu0 %v2692_v56  ;;  %v7582_v33 = vpop.permute.xlu1 %7581 }
 0x4e3   : > { %7856 = vrot.lane.b32.xlu0 %v7855_v4, %s8520_s26  ;;  %v7584_v52 = vunpack.i.h.bf16 %v7582_v33  ;;  %v7583_v22 = vunpack.i.l.bf16 %v7582_v33 }
 0x4e4   : > { %v2757_v35 = vsel %vm2648_vm4, %v2725_v5, %v7568_v45  ;;  %7871 = vrot.lane.b32.xlu1 %v7870_v59, %s8520_s26  ;;  %v2660_v27 = vsel %vm2648_vm4, %v2627_v28, %v7569_v25 }
 0x4e5   : > { %v7577_v2 = vpop.permute.xlu0 %7576  ;;  %v2789_v14 = vsel %vm2681_vm5, %v2757_v35, %v7573_v42  ;;  %v2693_v8 = vsel %vm2681_vm5, %v2660_v27, %v7574_v32  ;;  %v1701_v32 = vld [vmem:[#allocation2 + $0xc1] sm:$0xff] }
 0x4e6   : > { %v7579_v13 = vunpack.i.h.bf16 %v7577_v2  ;;  %v7578_v16 = vunpack.i.l.bf16 %v7577_v2  ;;  %3067 = vmatprep.mubr.f32.mxu0 %v2789_v14  ;;  %v7592_v50 = vpop.permute.xlu1 %7591  ;;  %v1573_v42 = vld [vmem:[#allocation2 + $0xa8] sm:$0xff] }
 0x4e7   : > { %7866 = vrot.lane.b32.xlu0 %v7865_v7, %s12267_s25  ;;  %3068 = vmatmul.mubr.f32.gmra.mxu0 %v2693_v8  ;;  %v7594_v12 = vunpack.i.h.bf16 %v7592_v50  ;;  %v7593_v62 = vunpack.i.l.bf16 %v7592_v50  ;;  %v1574_v50 = vld [vmem:[#allocation2 + $0xb0] sm:$0xff] }
 0x4e8   : > { %v2726_v9 = vsel %vm535_vm1, %v1699_v20, %v7578_v16  ;;  %v2628_v44 = vsel %vm535_vm1, %v1571_v38, %v7579_v13  ;;  %v1702_v16 = vld [vmem:[#allocation2 + $0xc9] sm:$0xff] }
 0x4e9   : > { %v7587_v6 = vpop.permute.xlu0 %7586  ;;  %v2758_v36 = vsel %vm2648_vm4, %v2726_v9, %v7583_v22  ;;  %v2661_v0 = vsel %vm2648_vm4, %v2628_v44, %v7584_v52  ;;  %v2727_v39 = vsel %vm535_vm1, %v1700_v23, %v7593_v62  ;;  %v2629_v60 = vsel %vm535_vm1, %v1572_v37, %v7594_v12 }
 0x4ea   : > { %v7589_v29 = vunpack.i.h.bf16 %v7587_v6  ;;  %v7588_v61 = vunpack.i.l.bf16 %v7587_v6  ;;  %v7602_v11 = vpop.permute.xlu1 %7601 }
 0x4eb   : > { %v7604_v51 = vunpack.i.h.bf16 %v7602_v11  ;;  %v7603_v24 = vunpack.i.l.bf16 %v7602_v11 }
 0x4ec   : > { %v2790_v41 = vsel %vm2681_vm5, %v2758_v36, %v7588_v61  ;;  %v2694_v55 = vsel %vm2681_vm5, %v2661_v0, %v7589_v29  ;;  %v1703_v36 = vld [vmem:[#allocation2 + $0xd9] sm:$0xff] }
 0x4ed   : > { %v7597_v48 = vpop.permute.xlu0 %7596  ;;  %3072 = vmatprep.mubr.f32.mxu0 %v2790_v41  ;;  %v1575_v0 = vld [vmem:[#allocation2 + $0xc0] sm:$0xff] }
 0x4ee   : > { %v7599_v47 = vunpack.i.h.bf16 %v7597_v48  ;;  %v7598_v31 = vunpack.i.l.bf16 %v7597_v48  ;;  %3073 = vmatmul.mubr.f32.gmra.mxu0 %v2694_v55  ;;  %v7612_v19 = vpop.permute.xlu1 %7611 }
 0x4ef   : > { %v7614_v21 = vunpack.i.h.bf16 %v7612_v19  ;;  %v7613_v56 = vunpack.i.l.bf16 %v7612_v19 }
 0x4f0   : > { %v2759_v15 = vsel %vm2648_vm4, %v2727_v39, %v7598_v31  ;;  %v2662_v3 = vsel %vm2648_vm4, %v2629_v60, %v7599_v47 }
 0x4f1   : > { %v7607_v57 = vpop.permute.xlu0 %7606  ;;  %v2791_v58 = vsel %vm2681_vm5, %v2759_v15, %v7603_v24  ;;  %v2695_v46 = vsel %vm2681_vm5, %v2662_v3, %v7604_v51 }
 0x4f2   : > { %v7609_v53 = vunpack.i.h.bf16 %v7607_v57  ;;  %v7608_v17 = vunpack.i.l.bf16 %v7607_v57  ;;  %3077 = vmatprep.mubr.f32.mxu0 %v2791_v58  ;;  %v7622_v43 = vpop.permute.xlu1 %7621 }
 0x4f3   : > { %3078 = vmatmul.mubr.f32.gmra.mxu0 %v2695_v46  ;;  %v7624_v59 = vunpack.i.h.bf16 %v7622_v43  ;;  %v7623_v63 = vunpack.i.l.bf16 %v7622_v43  ;;  %v1576_v43 = vld [vmem:[#allocation2 + $0xc8] sm:$0xff] }
 0x4f4   : > { %v2728_v18 = vsel %vm535_vm1, %v1701_v32, %v7608_v17  ;;  %v2630_v4 = vsel %vm535_vm1, %v1573_v42, %v7609_v53  ;;  %v1704_v17 = vld [vmem:[#allocation2 + $0xe1] sm:$0xff] }
 0x4f5   : > { %v7617_v25 = vpop.permute.xlu0 %7616  ;;  %v2760_v10 = vsel %vm2648_vm4, %v2728_v18, %v7613_v56  ;;  %v2663_v5 = vsel %vm2648_vm4, %v2630_v4, %v7614_v21  ;;  %v2729_v52 = vsel %vm535_vm1, %v1702_v16, %v7623_v63  ;;  %v2631_v22 = vsel %vm535_vm1, %v1574_v50, %v7624_v59 }
 0x4f6   : > { %v7619_v45 = vunpack.i.h.bf16 %v7617_v25  ;;  %v7618_v33 = vunpack.i.l.bf16 %v7617_v25  ;;  %v7632_v34 = vpop.permute.xlu1 %7631 }
 0x4f7   : > { %v7634_v27 = vunpack.i.h.bf16 %v7632_v34  ;;  %v7633_v2 = vunpack.i.l.bf16 %v7632_v34 }
 0x4f8   : > { %v2792_v28 = vsel %vm2681_vm5, %v2760_v10, %v7618_v33  ;;  %v2696_v35 = vsel %vm2681_vm5, %v2663_v5, %v7619_v45  ;;  %v1705_v10 = vld [vmem:[#allocation2 + $0xf1] sm:$0xff] }
 0x4f9   : > { %v7627_v14 = vpop.permute.xlu0 %7626  ;;  %3082 = vmatprep.mubr.f32.mxu0 %v2792_v28  ;;  %v1577_v5 = vld [vmem:[#allocation2 + $0xd8] sm:$0xff] }
 0x4fa   : > { %v7629_v7 = vunpack.i.h.bf16 %v7627_v14  ;;  %v7628_v8 = vunpack.i.l.bf16 %v7627_v14  ;;  %3083 = vmatmul.mubr.f32.gmra.mxu0 %v2696_v35  ;;  %v7642_v13 = vpop.permute.xlu1 %7641 }
 0x4fb   : > { %v7644_v12 = vunpack.i.h.bf16 %v7642_v13  ;;  %v7643_v62 = vunpack.i.l.bf16 %v7642_v13 }
 0x4fc   : > { %v2761_v20 = vsel %vm2648_vm4, %v2729_v52, %v7628_v8  ;;  %v2664_v38 = vsel %vm2648_vm4, %v2631_v22, %v7629_v7 }
 0x4fd   : > { %v7637_v9 = vpop.permute.xlu0 %7636  ;;  %v2793_v44 = vsel %vm2681_vm5, %v2761_v20, %v7633_v2  ;;  %v2697_v6 = vsel %vm2681_vm5, %v2664_v38, %v7634_v27 }
 0x4fe   : > { %v7639_v29 = vunpack.i.h.bf16 %v7637_v9  ;;  %v7638_v61 = vunpack.i.l.bf16 %v7637_v9  ;;  %3087 = vmatprep.mubr.f32.mxu0 %v2793_v44  ;;  %v7652_v11 = vpop.permute.xlu1 %7651 }
 0x4ff   : > { %3088 = vmatmul.mubr.f32.gmra.mxu0 %v2697_v6  ;;  %v7654_v31 = vunpack.i.h.bf16 %v7652_v11  ;;  %v7653_v19 = vunpack.i.l.bf16 %v7652_v11  ;;  %v1578_v11 = vld [vmem:[#allocation2 + $0xe0] sm:$0xff] }
 0x500   : > { %v2730_v41 = vsel %vm535_vm1, %v1703_v36, %v7638_v61  ;;  %v2632_v55 = vsel %vm535_vm1, %v1575_v0, %v7639_v29  ;;  %v1706_v61 = vld [vmem:[#allocation2 + $0xf9] sm:$0xff] }
 0x501   : > { %v7647_v51 = vpop.permute.xlu0 %7646  ;;  %v2762_v23 = vsel %vm2648_vm4, %v2730_v41, %v7643_v62  ;;  %v2665_v37 = vsel %vm2648_vm4, %v2632_v55, %v7644_v12  ;;  %v2731_v21 = vsel %vm535_vm1, %v1704_v17, %v7653_v19  ;;  %v2633_v56 = vsel %vm535_vm1, %v1576_v43, %v7654_v31 }
 0x502   : > { %v7649_v24 = vunpack.i.h.bf16 %v7647_v51  ;;  %v7648_v48 = vunpack.i.l.bf16 %v7647_v51  ;;  %v7662_v47 = vpop.permute.xlu1 %7661 }
 0x503   : > { %v7664_v15 = vunpack.i.h.bf16 %v7662_v47  ;;  %v7663_v3 = vunpack.i.l.bf16 %v7662_v47 }
 0x504   : > { %v2794_v39 = vsel %vm2681_vm5, %v2762_v23, %v7648_v48  ;;  %v2698_v60 = vsel %vm2681_vm5, %v2665_v37, %v7649_v24  ;;  %v1707_v23 = vld [vmem:[#allocation2 + $0x109] sm:$0xff] }
 0x505   : > { %v7657_v57 = vpop.permute.xlu0 %7656  ;;  %3092 = vmatprep.mubr.f32.mxu0 %v2794_v39  ;;  %v1579_v37 = vld [vmem:[#allocation2 + $0xf0] sm:$0xff] }
 0x506   : > { %v7659_v58 = vunpack.i.h.bf16 %v7657_v57  ;;  %v7658_v46 = vunpack.i.l.bf16 %v7657_v57  ;;  %3093 = vmatmul.mubr.f32.gmra.mxu0 %v2698_v60  ;;  %v7672_v53 = vpop.permute.xlu1 %7671 }
 0x507   : > { %v7674_v59 = vunpack.i.h.bf16 %v7672_v53  ;;  %v7673_v63 = vunpack.i.l.bf16 %v7672_v53 }
 0x508   : > { %v2763_v32 = vsel %vm2648_vm4, %v2731_v21, %v7658_v46  ;;  %v2666_v42 = vsel %vm2648_vm4, %v2633_v56, %v7659_v58 }
 0x509   : > { %v7667_v18 = vpop.permute.xlu0 %7666  ;;  %v2795_v4 = vsel %vm2681_vm5, %v2763_v32, %v7663_v3  ;;  %v2699_v25 = vsel %vm2681_vm5, %v2666_v42, %v7664_v15 }
 0x50a   : > { %v7669_v45 = vunpack.i.h.bf16 %v7667_v18  ;;  %v7668_v33 = vunpack.i.l.bf16 %v7667_v18  ;;  %3097 = vmatprep.mubr.f32.mxu0 %v2795_v4  ;;  %v7682_v34 = vpop.permute.xlu1 %7681 }
 0x50b   : > { %3098 = vmatmul.mubr.f32.gmra.mxu0 %v2699_v25  ;;  %v7684_v8 = vunpack.i.h.bf16 %v7682_v34  ;;  %v7683_v13 = vunpack.i.l.bf16 %v7682_v34  ;;  %v1580_v34 = vld [vmem:[#allocation2 + $0xf8] sm:$0xff] }
 0x50c   : > { %v2732_v28 = vsel %vm535_vm1, %v1705_v10, %v7668_v33  ;;  %v2634_v35 = vsel %vm535_vm1, %v1577_v5, %v7669_v45  ;;  %v1708_v33 = vld [vmem:[#allocation2 + $0x111] sm:$0xff] }
 0x50d   : > { %v7677_v27 = vpop.permute.xlu0 %7676  ;;  %v2764_v16 = vsel %vm2648_vm4, %v2732_v28, %v7673_v63  ;;  %v2667_v50 = vsel %vm2648_vm4, %v2634_v35, %v7674_v59  ;;  %v2733_v12 = vsel %vm535_vm1, %v1706_v61, %v7683_v13  ;;  %v2635_v62 = vsel %vm535_vm1, %v1578_v11, %v7684_v8 }
 0x50e   : > { %v7679_v2 = vunpack.i.h.bf16 %v7677_v27  ;;  %v7678_v14 = vunpack.i.l.bf16 %v7677_v27  ;;  %v7692_v7 = vpop.permute.xlu1 %7691 }
 0x50f   : > { %v7694_v20 = vunpack.i.h.bf16 %v7692_v7  ;;  %v7693_v38 = vunpack.i.l.bf16 %v7692_v7 }
 0x510   : > { %v2796_v52 = vsel %vm2681_vm5, %v2764_v16, %v7678_v14  ;;  %v2700_v22 = vsel %vm2681_vm5, %v2667_v50, %v7679_v2  ;;  %v1709_v16 = vld [vmem:[#allocation2 + $0x121] sm:$0xff] }
 0x511   : > { %v7687_v9 = vpop.permute.xlu0 %7686  ;;  %3102 = vmatprep.mubr.f32.mxu0 %v2796_v52  ;;  %v1581_v50 = vld [vmem:[#allocation2 + $0x108] sm:$0xff] }
 0x512   : > { %v7689_v44 = vunpack.i.h.bf16 %v7687_v9  ;;  %v7688_v6 = vunpack.i.l.bf16 %v7687_v9  ;;  %3103 = vmatmul.mubr.f32.gmra.mxu0 %v2700_v22  ;;  %v7702_v29 = vpop.permute.xlu1 %7701 }
 0x513   : > { %v7704_v31 = vunpack.i.h.bf16 %v7702_v29  ;;  %v7703_v19 = vunpack.i.l.bf16 %v7702_v29 }
 0x514   : > { %v2765_v36 = vsel %vm2648_vm4, %v2733_v12, %v7688_v6  ;;  %v2668_v0 = vsel %vm2648_vm4, %v2635_v62, %v7689_v44 }
 0x515   : > { %v7697_v41 = vpop.permute.xlu0 %7696  ;;  %v2797_v55 = vsel %vm2681_vm5, %v2765_v36, %v7693_v38  ;;  %v2701_v51 = vsel %vm2681_vm5, %v2668_v0, %v7694_v20 }
 0x516   : > { %v7699_v24 = vunpack.i.h.bf16 %v7697_v41  ;;  %v7698_v48 = vunpack.i.l.bf16 %v7697_v41  ;;  %3107 = vmatprep.mubr.f32.mxu0 %v2797_v55  ;;  %v7712_v47 = vpop.permute.xlu1 %7711 }
 0x517   : > { %3108 = vmatmul.mubr.f32.gmra.mxu0 %v2701_v51  ;;  %v7714_v46 = vunpack.i.h.bf16 %v7712_v47  ;;  %v7713_v53 = vunpack.i.l.bf16 %v7712_v47  ;;  %v1582_v47 = vld [vmem:[#allocation2 + $0x110] sm:$0xff] }
 0x518   : > { %v2734_v39 = vsel %vm535_vm1, %v1707_v23, %v7698_v48  ;;  %v2636_v60 = vsel %vm535_vm1, %v1579_v37, %v7699_v24  ;;  %v1710_v48 = vld [vmem:[#allocation2 + $0x129] sm:$0xff] }
 0x519   : > { %v7707_v15 = vpop.permute.xlu0 %7706  ;;  %v2766_v17 = vsel %vm2648_vm4, %v2734_v39, %v7703_v19  ;;  %v2669_v43 = vsel %vm2648_vm4, %v2636_v60, %v7704_v31  ;;  %v2735_v59 = vsel %vm535_vm1, %v1708_v33, %v7713_v53  ;;  %v2637_v63 = vsel %vm535_vm1, %v1580_v34, %v7714_v46 }
 0x51a   : > { %v7709_v3 = vunpack.i.h.bf16 %v7707_v15  ;;  %v7708_v57 = vunpack.i.l.bf16 %v7707_v15  ;;  %v7722_v58 = vpop.permute.xlu1 %7721 }
 0x51b   : > { %v7724_v32 = vunpack.i.h.bf16 %v7722_v58  ;;  %v7723_v42 = vunpack.i.l.bf16 %v7722_v58 }
 0x51c   : > { %v2798_v21 = vsel %vm2681_vm5, %v2766_v17, %v7708_v57  ;;  %v2702_v56 = vsel %vm2681_vm5, %v2669_v43, %v7709_v3  ;;  %v1711_v17 = vld [vmem:[#allocation2 + $0x139] sm:$0xff] }
 0x51d   : > { %v7717_v18 = vpop.permute.xlu0 %7716  ;;  %3112 = vmatprep.mubr.f32.mxu0 %v2798_v21  ;;  %v1583_v43 = vld [vmem:[#allocation2 + $0x120] sm:$0xff] }
 0x51e   : > { %v7719_v4 = vunpack.i.h.bf16 %v7717_v18  ;;  %v7718_v25 = vunpack.i.l.bf16 %v7717_v18  ;;  %3113 = vmatmul.mubr.f32.gmra.mxu0 %v2702_v56  ;;  %v7732_v45 = vpop.permute.xlu1 %7731 }
 0x51f   : > { %v7734_v8 = vunpack.i.h.bf16 %v7732_v45  ;;  %v7733_v13 = vunpack.i.l.bf16 %v7732_v45 }
 0x520   : > { %v2767_v10 = vsel %vm2648_vm4, %v2735_v59, %v7718_v25  ;;  %v2670_v5 = vsel %vm2648_vm4, %v2637_v63, %v7719_v4 }
 0x521   : > { %v7727_v28 = vpop.permute.xlu0 %7726  ;;  %v2799_v35 = vsel %vm2681_vm5, %v2767_v10, %v7723_v42  ;;  %v2703_v27 = vsel %vm2681_vm5, %v2670_v5, %v7724_v32 }
 0x522   : > { %v7729_v2 = vunpack.i.h.bf16 %v7727_v28  ;;  %v7728_v14 = vunpack.i.l.bf16 %v7727_v28  ;;  %3117 = vmatprep.mubr.f32.mxu0 %v2799_v35  ;;  %v7742_v7 = vpop.permute.xlu1 %7741 }
 0x523   : > { %3118 = vmatmul.mubr.f32.gmra.mxu0 %v2703_v27  ;;  %v7744_v6 = vunpack.i.h.bf16 %v7742_v7  ;;  %v7743_v29 = vunpack.i.l.bf16 %v7742_v7  ;;  %v1584_v7 = vld [vmem:[#allocation2 + $0x128] sm:$0xff] }
 0x524   : > { %v2736_v52 = vsel %vm535_vm1, %v1709_v16, %v7728_v14  ;;  %v2638_v22 = vsel %vm535_vm1, %v1581_v50, %v7729_v2  ;;  %v1712_v14 = vld [vmem:[#allocation2 + $0x141] sm:$0xff] }
 0x525   : > { %v7737_v20 = vpop.permute.xlu0 %7736  ;;  %v2768_v61 = vsel %vm2648_vm4, %v2736_v52, %v7733_v13  ;;  %v2671_v11 = vsel %vm2648_vm4, %v2638_v22, %v7734_v8  ;;  %v2737_v31 = vsel %vm535_vm1, %v1710_v48, %v7743_v29  ;;  %v2639_v19 = vsel %vm535_vm1, %v1582_v47, %v7744_v6 }
 0x526   : > { %v7739_v38 = vunpack.i.h.bf16 %v7737_v20  ;;  %v7738_v9 = vunpack.i.l.bf16 %v7737_v20  ;;  %v7752_v44 = vpop.permute.xlu1 %7751 }
 0x527   : > { %v7754_v36 = vunpack.i.h.bf16 %v7752_v44  ;;  %v7753_v0 = vunpack.i.l.bf16 %v7752_v44 }
 0x528   : > { %v2800_v12 = vsel %vm2681_vm5, %v2768_v61, %v7738_v9  ;;  %v2704_v62 = vsel %vm2681_vm5, %v2671_v11, %v7739_v38  ;;  %v1713_v61 = vld [vmem:[#allocation2 + $0x151] sm:$0xff] }
 0x529   : > { %v7747_v41 = vpop.permute.xlu0 %7746  ;;  %3122 = vmatprep.mubr.f32.mxu0 %v2800_v12  ;;  %v1585_v11 = vld [vmem:[#allocation2 + $0x138] sm:$0xff] }
 0x52a   : > { %v7749_v55 = vunpack.i.h.bf16 %v7747_v41  ;;  %v7748_v51 = vunpack.i.l.bf16 %v7747_v41  ;;  %3123 = vmatmul.mubr.f32.gmra.mxu0 %v2704_v62  ;;  %v7762_v24 = vpop.permute.xlu1 %7761 }
 0x52b   : > { %v7764_v46 = vunpack.i.h.bf16 %v7762_v24  ;;  %v7763_v53 = vunpack.i.l.bf16 %v7762_v24 }
 0x52c   : > { %v2769_v23 = vsel %vm2648_vm4, %v2737_v31, %v7748_v51  ;;  %v2672_v37 = vsel %vm2648_vm4, %v2639_v19, %v7749_v55 }
 0x52d   : > { %v7757_v39 = vpop.permute.xlu0 %7756  ;;  %v2801_v60 = vsel %vm2681_vm5, %v2769_v23, %v7753_v0  ;;  %v2705_v15 = vsel %vm2681_vm5, %v2672_v37, %v7754_v36 }
 0x52e   : > { %v7759_v3 = vunpack.i.h.bf16 %v7757_v39  ;;  %v7758_v57 = vunpack.i.l.bf16 %v7757_v39  ;;  %3127 = vmatprep.mubr.f32.mxu0 %v2801_v60  ;;  %v7772_v58 = vpop.permute.xlu1 %7771 }
 0x52f   : > { %3128 = vmatmul.mubr.f32.gmra.mxu0 %v2705_v15  ;;  %v7774_v25 = vunpack.i.h.bf16 %v7772_v58  ;;  %v7773_v45 = vunpack.i.l.bf16 %v7772_v58  ;;  %v1586_v58 = vld [vmem:[#allocation2 + $0x140] sm:$0xff] }
 0x530   : > { %v2738_v21 = vsel %vm535_vm1, %v1711_v17, %v7758_v57  ;;  %v2640_v56 = vsel %vm535_vm1, %v1583_v43, %v7759_v3  ;;  %v1714_v57 = vld [vmem:[#allocation2 + $0x159] sm:$0xff] }
 0x531   : > { %v7767_v32 = vpop.permute.xlu0 %7766  ;;  %v2770_v33 = vsel %vm2648_vm4, %v2738_v21, %v7763_v53  ;;  %v2673_v34 = vsel %vm2648_vm4, %v2640_v56, %v7764_v46  ;;  %v2739_v8 = vsel %vm535_vm1, %v1712_v14, %v7773_v45  ;;  %v2641_v13 = vsel %vm535_vm1, %v1584_v7, %v7774_v25 }
 0x532   : > { %v7769_v42 = vunpack.i.h.bf16 %v7767_v32  ;;  %v7768_v18 = vunpack.i.l.bf16 %v7767_v32  ;;  %v7782_v4 = vpop.permute.xlu1 %7781 }
 0x533   : > { %v7784_v10 = vunpack.i.h.bf16 %v7782_v4  ;;  %v7783_v5 = vunpack.i.l.bf16 %v7782_v4 }
 0x534   : > { %v2802_v59 = vsel %vm2681_vm5, %v2770_v33, %v7768_v18  ;;  %v2706_v63 = vsel %vm2681_vm5, %v2673_v34, %v7769_v42  ;;  %v1587_v33 = vld [vmem:[#allocation2 + $0x150] sm:$0xff] }
 0x535   : > { %v7777_v28 = vpop.permute.xlu0 %7776  ;;  %3132 = vmatprep.mubr.f32.mxu0 %v2802_v59 }
 0x536   : > { %v7779_v35 = vunpack.i.h.bf16 %v7777_v28  ;;  %v7778_v27 = vunpack.i.l.bf16 %v7777_v28  ;;  %3133 = vmatmul.mubr.f32.gmra.mxu0 %v2706_v63  ;;  %v7792_v2 = vpop.permute.xlu1 %7791 }
 0x537   : > { %v7794_v6 = vunpack.i.h.bf16 %v7792_v2  ;;  %v7793_v29 = vunpack.i.l.bf16 %v7792_v2 }
 0x538   : > { %v2771_v16 = vsel %vm2648_vm4, %v2739_v8, %v7778_v27  ;;  %v2674_v50 = vsel %vm2648_vm4, %v2641_v13, %v7779_v35 }
 0x539   : > { %v7787_v52 = vpop.permute.xlu0 %7786  ;;  %v2803_v22 = vsel %vm2681_vm5, %v2771_v16, %v7783_v5  ;;  %v2707_v20 = vsel %vm2681_vm5, %v2674_v50, %v7784_v10 }
 0x53a   : > { %v7789_v38 = vunpack.i.h.bf16 %v7787_v52  ;;  %v7788_v9 = vunpack.i.l.bf16 %v7787_v52  ;;  %3137 = vmatprep.mubr.f32.mxu0 %v2803_v22  ;;  %v7802_v44 = vpop.permute.xlu1 %7801 }
 0x53b   : > { %3138 = vmatmul.mubr.f32.gmra.mxu0 %v2707_v20  ;;  %v7804_v51 = vunpack.i.h.bf16 %v7802_v44  ;;  %v7803_v24 = vunpack.i.l.bf16 %v7802_v44  ;;  %v1588_v20 = vld [vmem:[#allocation2 + $0x158] sm:$0xff] }
 0x53c   : > { %v2740_v12 = vsel %vm535_vm1, %v1713_v61, %v7788_v9  ;;  %v2642_v62 = vsel %vm535_vm1, %v1585_v11, %v7789_v38 }
 0x53d   : > { %v7797_v36 = vpop.permute.xlu0 %7796  ;;  %v2772_v48 = vsel %vm2648_vm4, %v2740_v12, %v7793_v29  ;;  %v2675_v47 = vsel %vm2648_vm4, %v2642_v62, %v7794_v6  ;;  %v2741_v46 = vsel %vm535_vm1, %v1714_v57, %v7803_v24  ;;  %v2643_v53 = vsel %vm535_vm1, %v1586_v58, %v7804_v51 }
 0x53e   : > { %v7799_v0 = vunpack.i.h.bf16 %v7797_v36  ;;  %v7798_v41 = vunpack.i.l.bf16 %v7797_v36  ;;  %v7812_v55 = vpop.permute.xlu1 %7811 }
 0x53f   : > { %v7814_v23 = vunpack.i.h.bf16 %v7812_v55  ;;  %v7813_v37 = vunpack.i.l.bf16 %v7812_v55  ;;  %v1589_v55 = vld [vmem:[#allocation2 + $0x168] sm:$0xff] }
 0x540   : > { %v2804_v31 = vsel %vm2681_vm5, %v2772_v48, %v7798_v41  ;;  %v2708_v19 = vsel %vm2681_vm5, %v2675_v47, %v7799_v0 }
 0x541   : > { %v7807_v39 = vpop.permute.xlu0 %7806  ;;  %3142 = vmatprep.mubr.f32.mxu0 %v2804_v31 }
 0x542   : > { %v7809_v60 = vunpack.i.h.bf16 %v7807_v39  ;;  %v7808_v15 = vunpack.i.l.bf16 %v7807_v39  ;;  %3143 = vmatmul.mubr.f32.gmra.mxu0 %v2708_v19  ;;  %v7822_v3 = vpop.permute.xlu1 %7821 }
 0x543   : > { %v7824_v25 = vunpack.i.h.bf16 %v7822_v3  ;;  %v7823_v45 = vunpack.i.l.bf16 %v7822_v3 }
 0x544   : > { %v2773_v17 = vsel %vm2648_vm4, %v2741_v46, %v7808_v15  ;;  %v2676_v43 = vsel %vm2648_vm4, %v2643_v53, %v7809_v60  ;;  %v1590_v53 = vld [vmem:[#allocation2 + $0x170] sm:$0xff] }
 0x545   : > { %v7817_v21 = vpop.permute.xlu0 %7816  ;;  %v2805_v56 = vsel %vm2681_vm5, %v2773_v17, %v7813_v37  ;;  %v2709_v32 = vsel %vm2681_vm5, %v2676_v43, %v7814_v23 }
 0x546   : > { %v7819_v42 = vunpack.i.h.bf16 %v7817_v21  ;;  %v7818_v18 = vunpack.i.l.bf16 %v7817_v21  ;;  %3147 = vmatprep.mubr.f32.mxu0 %v2805_v56  ;;  %v7832_v4 = vpop.permute.xlu1 %7831 }
 0x547   : > { %3148 = vmatmul.mubr.f32.gmra.mxu0 %v2709_v32  ;;  %v7834_v35 = vunpack.i.h.bf16 %v7832_v4  ;;  %v7833_v27 = vunpack.i.l.bf16 %v7832_v4 }
 0x548   : > { %v2742_v34 = vsel %vm535_vm1, %v9927_v30, %v7818_v18  ;;  %v2644_v59 = vsel %vm535_vm1, %v1587_v33, %v7819_v42 }
 0x549   : > { %v7827_v63 = vpop.permute.xlu0 %7826  ;;  %v2774_v2 = vsel %vm2648_vm4, %v2742_v34, %v7823_v45  ;;  %v2677_v14 = vsel %vm2648_vm4, %v2644_v59, %v7824_v25  ;;  %v2743_v38 = vsel %vm535_vm1, %v9932_v49, %v7833_v27  ;;  %v2645_v9 = vsel %vm535_vm1, %v1588_v20, %v7834_v35  ;;  %v10158_v34 = vld [vmem:[%s12259_s9 + $0x38] sm:$0xff]  ;;  %v10207_v20 = vld [vmem:[%s12259_s9 + $0x10] sm:$0xff] }
 0x54a   : > { %v7829_v10 = vunpack.i.h.bf16 %v7827_v63  ;;  %v7828_v5 = vunpack.i.l.bf16 %v7827_v63  ;;  %v7842_v28 = vpop.permute.xlu1 %7841  ;;  %7162 = vmatpush3.msra.mxu1 %v10158_v34 }
 0x54b   : > { %v7844_v13 = vunpack.i.h.bf16 %v7842_v28  ;;  %v7843_v16 = vunpack.i.l.bf16 %v7842_v28  ;;  %7163 = vmatprep.subr.mxu1 %v8518_v1  ;;  %v10169_v28 = vld [vmem:[%s12259_s9 + $0x30] sm:$0xff] }
 0x54c   : > { %v2806_v7 = vsel %vm2681_vm5, %v2774_v2, %v7828_v5  ;;  %v2710_v8 = vsel %vm2681_vm5, %v2677_v14, %v7829_v10  ;;  %7164 = vmatpush3.msra.mxu1 %v10169_v28  ;;  %v10178_v2 = vld [vmem:[%s12259_s9 + $0x28] sm:$0xff] }
 0x54d   : > { %v7837_v50 = vpop.permute.xlu0 %7836  ;;  %3152 = vmatprep.mubr.f32.mxu0 %v2806_v7  ;;  %7165 = vmatprep.subr.mxu1 %v8518_v1 }
 0x54e   : > { %v7839_v30 = vunpack.i.h.bf16 %v7837_v50  ;;  %v7838_v52 = vunpack.i.l.bf16 %v7837_v50  ;;  %3153 = vmatmul.mubr.f32.gmra.mxu0 %v2710_v8  ;;  %v7852_v22 = vpop.permute.xlu1 %7851  ;;  %7166 = vmatpush3.msra.mxu1 %v10178_v2  ;;  %v10187_v8 = vld [vmem:[%s12259_s9 + $0x20] sm:$0xff] }
 0x54f   : > { %v7854_v0 = vunpack.i.h.bf16 %v7852_v22  ;;  %v7853_v41 = vunpack.i.l.bf16 %v7852_v22  ;;  %7167 = vmatprep.subr.mxu1 %v8518_v1 }
 0x550   : > { %v2775_v44 = vsel %vm2648_vm4, %v2743_v38, %v7838_v52  ;;  %v2678_v6 = vsel %vm2648_vm4, %v2645_v9, %v7839_v30  ;;  %7168 = vmatpush3.msra.mxu1 %v10187_v8  ;;  %v10198_v52 = vld [vmem:[%s12259_s9 + $0x18] sm:$0xff]  ;;  %v7115_v9 = vpop.f32.mrf.mxu1 }
 0x551   : > { %v7847_v29 = vpop.permute.xlu0 %7846  ;;  %v2807_v61 = vsel %vm2681_vm5, %v2775_v44, %v7843_v16  ;;  %v2711_v11 = vsel %vm2681_vm5, %v2678_v6, %v7844_v13  ;;  %7169 = vmatprep.subr.mxu1 %v8518_v1 }
 0x552   : > { %v7849_v12 = vunpack.i.h.bf16 %v7847_v29  ;;  %v7848_v62 = vunpack.i.l.bf16 %v7847_v29  ;;  %3157 = vmatprep.mubr.f32.mxu0 %v2807_v61  ;;  %v7862_v36 = vpop.permute.xlu1 %7861  ;;  %7170 = vmatpush3.msra.mxu1 %v10198_v52  ;;  %v3239_v6 = vpop.f32.mrf.mxu1 }
 0x553   : > { %3158 = vmatmul.mubr.f32.gmra.mxu0 %v2711_v11  ;;  %v7864_v19 = vunpack.i.h.bf16 %v7862_v36  ;;  %v7863_v23 = vunpack.i.l.bf16 %v7862_v36  ;;  %7171 = vmatprep.subr.mxu1 %v8518_v1 }
 0x554   : > { %v2744_v49 = vsel %vm535_vm1, %v9967_v54, %v7848_v62  ;;  %v2646_v51 = vsel %vm535_vm1, %v1589_v55, %v7849_v12  ;;  %7172 = vmatpush3.msra.mxu1 %v10207_v20  ;;  %v7118_v11 = vpop.f32.mrf.mxu1  ;;  %v10220_v55 = vld [vmem:[%s12259_s9 + $0x8] sm:$0xff] }
 0x555   : > { %v7857_v24 = vpop.permute.xlu0 %7856  ;;  %v2776_v37 = vsel %vm2648_vm4, %v2744_v49, %v7853_v41  ;;  %v2679_v39 = vsel %vm2648_vm4, %v2646_v51, %v7854_v0  ;;  %v2745_v17 = vsel %vm535_vm1, %v9972_v26, %v7863_v23  ;;  %v2647_v43 = vsel %vm535_vm1, %v1590_v53, %v7864_v19  ;;  %7173 = vmatprep.subr.mxu1 %v8518_v1  ;;  %v10225_v49 = vld [vmem:[%s12259_s9] sm:$0xff] }
 0x556   : > { %v7859_v48 = vunpack.i.h.bf16 %v7857_v24  ;;  %v7858_v47 = vunpack.i.l.bf16 %v7857_v24  ;;  %v7872_v31 = vpop.permute.xlu1 %7871  ;;  %v3249_v62 = vpop.f32.mrf.mxu1  ;;  %7174 = vmatpush3.msra.mxu1 %v10220_v55 }
 0x557   : > { %v7874_v3 = vunpack.i.h.bf16 %v7872_v31  ;;  %v7873_v57 = vunpack.i.l.bf16 %v7872_v31  ;;  %7175 = vmatprep.subr.mxu1 %v8518_v1 }
 0x558   : > { %v2808_v60 = vsel %vm2681_vm5, %v2776_v37, %v7858_v47  ;;  %v2712_v15 = vsel %vm2681_vm5, %v2679_v39, %v7859_v48  ;;  %v7121_v0 = vpop.f32.mrf.mxu1  ;;  %7176 = vmatpush3.msra.mxu1 %v10225_v49 }
 0x559   : > { %v7867_v58 = vpop.permute.xlu0 %7866  ;;  %3162 = vmatprep.mubr.f32.mxu0 %v2808_v60  ;;  %7180 = vmatprep.subr.mxu1 %v8518_v1 }
 0x55a   : > { %v7869_v54 = vunpack.i.h.bf16 %v7867_v58  ;;  %v7868_v46 = vunpack.i.l.bf16 %v7867_v58  ;;  %3163 = vmatmul.mubr.f32.gmra.mxu0 %v2712_v15  ;;  %v3259_v24 = vpop.f32.mrf.mxu1 }
 0x55c   : > { %v2777_v21 = vsel %vm2648_vm4, %v2745_v17, %v7868_v46  ;;  %v2680_v56 = vsel %vm2648_vm4, %v2647_v43, %v7869_v54  ;;  %v7124_v47 = vpop.f32.mrf.mxu1 }
 0x55d   : > { %v2809_v32 = vsel %vm2681_vm5, %v2777_v21, %v7873_v57  ;;  %v2713_v42 = vsel %vm2681_vm5, %v2680_v56, %v7874_v3 }
 0x55e   : > { %3167 = vmatprep.mubr.f32.mxu0 %v2809_v32  ;;  %v3269_v19 = vpop.f32.mrf.mxu1 }
 0x55f   : > { %3168 = vmatmul.mubr.f32.gmra.mxu0 %v2713_v42 }
 0x560   : > { %v10237_v39 = vpop.f32.mrf.mxu1 }
 0x562   : > { %v3279_v15 = vpop.f32.mrf.mxu1 }
 0x564   : > { %v10241_v57 = vpop.f32.mrf.mxu1 }
 0x566   : > { %v3289_v46 = vpop.f32.mrf.mxu1 }
 0x567   : > { %v10149_v18 = vpop.f32.mrf.mxu0 }
 0x568   : > { %v10245_v17 = vpop.f32.mrf.mxu1 }
 0x569   : > { %v3016_v4 = vpop.f32.mrf.mxu0 }
 0x56a   : > { %v10249_v21 = vpop.f32.mrf.mxu1 }
 0x56b   : > { %v10151_v25 = vpop.f32.mrf.mxu0 }
 0x56c   : > { %v10253_v42 = vpop.f32.mrf.mxu1 }
 0x56d   : > { %v3021_v45 = vpop.f32.mrf.mxu0 }
 0x56e   : > { %v10255_v45 = vpop.f32.mrf.mxu1 }
 0x572   : > { %v10153_v33 = vpop.f32.mrf.mxu0 }
 0x574   : > { %v3026_v26 = vpop.f32.mrf.mxu0 }
 0x575   : > { %v10260_v26 = vld [vmem:[%s12256_s6] ss:$0 sm:$0xff] }
 0x577   : > { %v10161_v59 = vpop.f32.mrf.mxu0 }
 0x579   : > { %v3031_v63 = vpop.f32.mrf.mxu0 }
 0x57a   : > { %v3020_v63 = vadd.f32 %v10260_v26, %v10151_v25 }
 0x57e   : > { %v10164_v10 = vpop.f32.mrf.mxu0 }
 0x580   : > { %v3036_v5 = vpop.f32.mrf.mxu0 }
 0x583   : > { %v10172_v35 = vpop.f32.mrf.mxu0 }
 0x585   : > { %v3041_v27 = vpop.f32.mrf.mxu0 }
 0x586   : > { %v10266_v27 = vpop.f32.mrf.mxu1 }
 0x58a   : > { %v10181_v14 = vpop.f32.mrf.mxu0 }
 0x58c   : > { %v3046_v7 = vpop.f32.mrf.mxu0 }
 0x58d   : > { %v3015_v7 = vadd.f32 %v10260_v26, %v10149_v18  ;;  %v3035_v18 = vadd.f32 %v10260_v26, %v10164_v10  ;;  %v3045_v10 = vadd.f32 %v10260_v26, %v10181_v14 }
 0x58f   : > { %v10190_v13 = vpop.f32.mrf.mxu0  ;;  %v10280_v25 = vadd.f32 %v3239_v6, %v3015_v7 }
 0x591   : > { %v3051_v16 = vpop.f32.mrf.mxu0  ;;  %v3412_v6 = vsel %vm2648_vm4, %v10280_v25, 0.0 }
 0x592   : > { %v3025_v16 = vadd.f32 %v10260_v26, %v10153_v33 }
 0x596   : > { %v10193_v50 = vpop.f32.mrf.mxu0 }
 0x597   : > { %v3055_v14 = vadd.f32 %v10260_v26, %v10193_v50 }
 0x598   : > { %v3056_v30 = vpop.f32.mrf.mxu0 }
 0x59b   : > { %v10202_v22 = vpop.f32.mrf.mxu0 }
 0x59d   : > { %v3061_v38 = vpop.f32.mrf.mxu0 }
 0x59e   : > { %v10272_v38 = vadd.f32 %v7115_v9, %v3020_v63 }
 0x5a0   : > { %v3413_v33 = vsel %vm2648_vm4, %v10272_v38, 0.0 }
 0x5a2   : > { %v10211_v44 = vpop.f32.mrf.mxu0 }
 0x5a3   : > { %v3065_v50 = vadd.f32 %v10260_v26, %v10211_v44 }
 0x5a4   : > { %v3066_v29 = vpop.f32.mrf.mxu0 }
 0x5a5   : > { %v3030_v29 = vadd.f32 %v10260_v26, %v10161_v59  ;;  %v3040_v59 = vadd.f32 %v10260_v26, %v10172_v35  ;;  %v3050_v35 = vadd.f32 %v10260_v26, %v10190_v13  ;;  %v3060_v13 = vadd.f32 %v10260_v26, %v10202_v22 }
 0x5a7   : > { %v10213_v61 = vpop.f32.mrf.mxu0  ;;  %v10288_v9 = vadd.f32 %v7118_v11, %v3030_v29  ;;  %v10337_v22 = vadd.f32 %v10237_v39, %v3060_v13 }
 0x5a9   : > { %v3071_v12 = vpop.f32.mrf.mxu0  ;;  %v3417_v11 = vsel %vm2648_vm4, %v10288_v9, 0.0 }
 0x5ae   : > { %v10215_v36 = vpop.f32.mrf.mxu0 }
 0x5af   : > { %v3075_v44 = vadd.f32 %v10260_v26, %v10215_v36 }
 0x5b0   : > { %v3076_v41 = vpop.f32.mrf.mxu0 }
 0x5b1   : > { %v10278_v41 = vpop.f32.mrf.mxu1  ;;  %v10357_v13 = vadd.f32 %v10249_v21, %v3075_v44 }
 0x5b3   : > { %v10228_v51 = vpop.f32.mrf.mxu0  ;;  %v3435_v21 = vsel %vm2648_vm4, %v10357_v13, 0.0 }
 0x5b5   : > { %v3081_v48 = vpop.f32.mrf.mxu0 }
 0x5b6   : > { %v10282_v48 = vadd.f32 %v3249_v62, %v3025_v16  ;;  %v10314_v16 = vadd.f32 %v3269_v19, %v3045_v10 }
 0x5b8   : > { %v3415_v62 = vsel %vm2648_vm4, %v10282_v48, 0.0  ;;  %v3423_v19 = vsel %vm2648_vm4, %v10314_v16, 0.0 }
 0x5ba   : > { %v10233_v31 = vpop.f32.mrf.mxu0 }
 0x5bb   : > { %v3085_v36 = vadd.f32 %v10260_v26, %v10233_v31 }
 0x5bc   : > { %v3086_v23 = vpop.f32.mrf.mxu0 }
 0x5bf   : > { %v10235_v37 = vpop.f32.mrf.mxu0 }
 0x5c1   : > { %v3091_v60 = vpop.f32.mrf.mxu0 }
 0x5c2   : > { %v10292_v60 = vpop.f32.mrf.mxu1 }
 0x5c4   : > { %v10310_v7 = vpop.f32.mrf.mxu1 }
 0x5c6   : > { %v10239_v3 = vpop.f32.mrf.mxu0 }
 0x5c7   : > { %v3095_v31 = vadd.f32 %v10260_v26, %v10239_v3 }
 0x5c8   : > { %v3096_v58 = vpop.f32.mrf.mxu0 }
 0x5c9   : > { %v10298_v58 = vadd.f32 %v3259_v24, %v3035_v18  ;;  %v10320_v18 = vadd.f32 %v7124_v47, %v3050_v35 }
 0x5cb   : > { %v10243_v54 = vpop.f32.mrf.mxu0  ;;  %v3419_v24 = vsel %vm2648_vm4, %v10298_v58, 0.0  ;;  %v3425_v47 = vsel %vm2648_vm4, %v10320_v18, 0.0 }
 0x5cd   : > { %v3101_v53 = vpop.f32.mrf.mxu0 }
 0x5ce   : > { %v3414_v53 = vadd.f32 %v3413_v33, %v3412_v6  ;;  %v10330_v6 = vadd.f32 %v3279_v15, %v3055_v14  ;;  %v3429_v14 = vsel %vm2648_vm4, %v10337_v22, 0.0 }
 0x5d0   : > { %v3416_v63 = vadd.f32 %v3415_v62, %v3414_v53  ;;  %v3070_v53 = vadd.f32 %v10260_v26, %v10213_v61  ;;  %v3427_v15 = vsel %vm2648_vm4, %v10330_v6, 0.0  ;;  %v3080_v61 = vadd.f32 %v10260_v26, %v10228_v51 }
 0x5d1   : > { %v3090_v51 = vadd.f32 %v10260_v26, %v10235_v37  ;;  %v3100_v37 = vadd.f32 %v10260_v26, %v10243_v54 }
 0x5d2   : > { %v10247_v43 = vpop.f32.mrf.mxu0  ;;  %v3418_v29 = vadd.f32 %v3417_v11, %v3416_v63  ;;  %v10343_v63 = vadd.f32 %v3289_v46, %v3065_v50  ;;  %v10350_v39 = vadd.f32 %v10241_v57, %v3070_v53  ;;  %v10364_v50 = vadd.f32 %v10245_v17, %v3080_v61 }
 0x5d3   : > { %v10371_v53 = vadd.f32 %v10255_v45, %v3085_v36  ;;  %v10378_v44 = vadd.f32 %v10253_v42, %v3090_v51  ;;  %v10385_v61 = vadd.f32 %v10278_v41, %v3095_v31  ;;  %v3105_v3 = vadd.f32 %v10260_v26, %v10247_v43 }
 0x5d4   : > { %v3106_v56 = vpop.f32.mrf.mxu0  ;;  %v3431_v46 = vsel %vm2648_vm4, %v10343_v63, 0.0  ;;  %v3433_v57 = vsel %vm2648_vm4, %v10350_v39, 0.0  ;;  %v3437_v17 = vsel %vm2648_vm4, %v10364_v50, 0.0  ;;  %v10392_v42 = vadd.f32 %v10266_v27, %v3100_v37 }
 0x5d5   : > { %v10304_v56 = vadd.f32 %v7121_v0, %v3040_v59  ;;  %v10326_v59 = vpop.f32.mrf.mxu1  ;;  %v3439_v45 = vsel %vm2648_vm4, %v10371_v53, 0.0  ;;  %v3443_v41 = vsel %vm2648_vm4, %v10385_v61, 0.0 }
 0x5d6   : > { %v3445_v27 = vsel %vm2648_vm4, %v10392_v42, 0.0 }
 0x5d7   : > { %v10251_v32 = vpop.f32.mrf.mxu0  ;;  %v3421_v0 = vsel %vm2648_vm4, %v10304_v56, 0.0  ;;  %v3339_v35 = vpop.f32.mrf.mxu1 }
 0x5d8   : > { %v3110_v54 = vadd.f32 %v10260_v26, %v10251_v32 }
 0x5d9   : > { %v3111_v4 = vpop.f32.mrf.mxu0 }
 0x5de   : > { %v10264_v5 = vpop.f32.mrf.mxu0 }
 0x5df   : > { %v3115_v43 = vadd.f32 %v10260_v26, %v10264_v5 }
 0x5e0   : > { %v3116_v30 = vpop.f32.mrf.mxu0 }
 0x5e3   : > { %v10276_v12 = vpop.f32.mrf.mxu0 }
 0x5e4   : > { %v3120_v32 = vadd.f32 %v10260_v26, %v10276_v12 }
 0x5e5   : > { %v3121_v23 = vpop.f32.mrf.mxu0 }
 0x5e6   : > { %v3420_v23 = vadd.f32 %v3419_v24, %v3418_v29 }
 0x5e8   : > { %v3422_v62 = vadd.f32 %v3421_v0, %v3420_v23  ;;  %v7148_v0 = vpop.f32.mrf.mxu1 }
 0x5ea   : > { %v10308_v4 = vpop.f32.mrf.mxu0  ;;  %v3424_v11 = vadd.f32 %v3423_v19, %v3422_v62 }
 0x5eb   : > { %v3125_v5 = vadd.f32 %v10260_v26, %v10308_v4 }
 0x5ec   : > { %v3126_v30 = vpop.f32.mrf.mxu0  ;;  %v3426_v24 = vadd.f32 %v3425_v47, %v3424_v11  ;;  %v3349_v47 = vpop.f32.mrf.mxu1 }
 0x5ee   : > { %v3428_v29 = vadd.f32 %v3427_v15, %v3426_v24 }
 0x5ef   : > { %v10324_v33 = vpop.f32.mrf.mxu0 }
 0x5f0   : > { %v3430_v19 = vadd.f32 %v3429_v14, %v3428_v29  ;;  %v7151_v14 = vpop.f32.mrf.mxu1  ;;  %v3130_v12 = vadd.f32 %v10260_v26, %v10324_v33 }
 0x5f1   : > { %v3131_v10 = vpop.f32.mrf.mxu0 }
 0x5f2   : > { %v3432_v62 = vadd.f32 %v3431_v46, %v3430_v19  ;;  %v3441_v46 = vsel %vm2648_vm4, %v10378_v44, 0.0  ;;  %v3359_v19 = vpop.f32.mrf.mxu1 }
 0x5f4   : > { %v3434_v11 = vadd.f32 %v3433_v57, %v3432_v62  ;;  %v10399_v57 = vadd.f32 %v10310_v7, %v3105_v3 }
 0x5f6   : > { %v3134_v30 = vpop.f32.mrf.mxu0  ;;  %v3436_v24 = vadd.f32 %v3435_v21, %v3434_v11  ;;  %v10406_v21 = vadd.f32 %v10292_v60, %v3110_v54  ;;  %v3447_v7 = vsel %vm2648_vm4, %v10399_v57, 0.0 }
 0x5f7   : > { %v3135_v4 = vadd.f32 %v10260_v26, %v3134_v30 }
 0x5f8   : > { %v3136_v23 = vpop.f32.mrf.mxu0  ;;  %v3438_v29 = vadd.f32 %v3437_v17, %v3436_v24  ;;  %v10412_v17 = vadd.f32 %v3339_v35, %v3115_v43  ;;  %v3449_v60 = vsel %vm2648_vm4, %v10406_v21, 0.0 }
 0x5fa   : > { %v3440_v23 = vadd.f32 %v3439_v45, %v3438_v29  ;;  %v10419_v45 = vadd.f32 %v10326_v59, %v3120_v32  ;;  %v3451_v35 = vsel %vm2648_vm4, %v10412_v17, 0.0 }
 0x5fb   : > { %v3139_v10 = vpop.f32.mrf.mxu0 }
 0x5fc   : > { %v3442_v62 = vadd.f32 %v3441_v46, %v3440_v23  ;;  %v10425_v46 = vadd.f32 %v3349_v47, %v3125_v5  ;;  %v3453_v23 = vsel %vm2648_vm4, %v10419_v45, 0.0  ;;  %v3140_v59 = vadd.f32 %v10260_v26, %v3139_v10 }
 0x5fd   : > { %v3141_v15 = vpop.f32.mrf.mxu0 }
 0x5fe   : > { %v3444_v31 = vadd.f32 %v3443_v41, %v3442_v62  ;;  %v7154_v15 = vpop.f32.mrf.mxu1  ;;  %v10430_v41 = vadd.f32 %v7148_v0, %v3130_v12  ;;  %v3455_v62 = vsel %vm2648_vm4, %v10425_v46, 0.0 }
 0x600   : > { %v3446_v37 = vadd.f32 %v3445_v27, %v3444_v31  ;;  %v3369_v29 = vpop.f32.mrf.mxu1  ;;  %v10435_v27 = vadd.f32 %v3359_v19, %v3135_v4  ;;  %v3457_v31 = vsel %vm2648_vm4, %v10430_v41, 0.0 }
 0x602   : > { %v3144_v36 = vpop.f32.mrf.mxu0  ;;  %v3448_v3 = vadd.f32 %v3447_v7, %v3446_v37  ;;  %v7157_v33 = vpop.f32.mrf.mxu1  ;;  %v10440_v7 = vadd.f32 %v7151_v14, %v3140_v59 }
 0x603   : > { %v3145_v47 = vadd.f32 %v10260_v26, %v3144_v36 }
 0x604   : > { %v3146_v51 = vpop.f32.mrf.mxu0  ;;  %v3450_v54 = vadd.f32 %v3449_v60, %v3448_v3  ;;  %v3379_v37 = vpop.f32.mrf.mxu1  ;;  %v3461_v3 = vsel %vm2648_vm4, %v10440_v7, 0.0 }
 0x605   : > { %v10445_v60 = vadd.f32 %v3369_v29, %v3145_v47 }
 0x606   : > { %v3452_v51 = vadd.f32 %v3451_v35, %v3450_v54 }
 0x607   : > { %v3149_v11 = vpop.f32.mrf.mxu0  ;;  %v3463_v54 = vsel %vm2648_vm4, %v10445_v60, 0.0 }
 0x608   : > { %v3454_v30 = vadd.f32 %v3453_v23, %v3452_v51  ;;  %v3150_v0 = vadd.f32 %v10260_v26, %v3149_v11  ;;  %v7160_v11 = vpop.f32.mrf.mxu1 }
 0x609   : > { %v3151_v24 = vpop.f32.mrf.mxu0 }
 0x60a   : > { %v3456_v10 = vadd.f32 %v3455_v62, %v3454_v30  ;;  %v3459_v24 = vsel %vm2648_vm4, %v10435_v27, 0.0  ;;  %v10450_v35 = vadd.f32 %v7154_v15, %v3150_v0  ;;  %v3389_v62 = vpop.f32.mrf.mxu1 }
 0x60c   : > { %v3458_v36 = vadd.f32 %v3457_v31, %v3456_v10  ;;  %v3465_v59 = vsel %vm2648_vm4, %v10450_v35, 0.0 }
 0x60e   : > { %v3154_v43 = vpop.f32.mrf.mxu0  ;;  %v3460_v4 = vadd.f32 %v3459_v24, %v3458_v36 }
 0x60f   : > { %v3155_v19 = vadd.f32 %v10260_v26, %v3154_v43 }
 0x610   : > { %v3156_v32 = vpop.f32.mrf.mxu0  ;;  %v3462_v29 = vadd.f32 %v3461_v3, %v3460_v4 }
 0x611   : > { %v10455_v23 = vadd.f32 %v3379_v37, %v3155_v19 }
 0x612   : > { %v3464_v47 = vadd.f32 %v3463_v54, %v3462_v29 }
 0x613   : > { %v3159_v5 = vpop.f32.mrf.mxu0  ;;  %v3467_v32 = vsel %vm2648_vm4, %v10455_v23, 0.0 }
 0x614   : > { %v3160_v14 = vadd.f32 %v10260_v26, %v3159_v5  ;;  %v3466_v31 = vadd.f32 %v3465_v59, %v3464_v47 }
 0x615   : > { %v3161_v12 = vpop.f32.mrf.mxu0 }
 0x616   : > { %v10459_v43 = vadd.f32 %v7157_v33, %v3160_v14  ;;  %v3468_v5 = vadd.f32 %v3467_v32, %v3466_v31  ;;  %v10501_v32 = vld [vmem:[%s12260_s10] sm:$0xff] }
 0x618   : > { %v3469_v10 = vsel %vm2648_vm4, %v10459_v43, 0.0 }
 0x619   : > { %v3470_v19 = vadd.f32 %v3469_v10, %v3468_v5 }
 0x61a   : > { %v3164_v51 = vpop.f32.mrf.mxu0 }
 0x61b   : > { %v3165_v15 = vadd.f32 %v10260_v26, %v3164_v51 }
 0x61c   : > { %v3166_v30 = vpop.f32.mrf.mxu0 }
 0x61d   : > { %v10464_v0 = vadd.f32 %v3389_v62, %v3165_v15  ;;  %v10478_v15 = vld [vmem:[%s12260_s10 + $0x18] sm:$0xff] }
 0x61f   : > { %v3169_v37 = vpop.f32.mrf.mxu0  ;;  %v3471_v33 = vsel %vm2648_vm4, %v10464_v0, 0.0 }
 0x620   : > { %v3170_v24 = vadd.f32 %v10260_v26, %v3169_v37  ;;  %v3472_v3 = vadd.f32 %v3471_v33, %v3470_v19  ;;  %v10484_v26 = vld [vmem:[%s12260_s10 + $0x10] sm:$0xff] }
 0x621   : > { %v3171_v36 = vpop.f32.mrf.mxu0 }
 0x622   : > { %v10471_v12 = vadd.f32 %v7160_v11, %v3170_v24  ;;  %v10495_v11 = vld [vmem:[%s12260_s10 + $0x8] sm:$0xff] }
 0x624   : > { %v3473_v14 = vsel %vm2648_vm4, %v10471_v12, 0.0 }
 0x625   : > { %v3474_v4 = vadd.f32 %v3473_v14, %v3472_v3 }
 0x627   : > { %v3475_v54 = vrot.slane %v3474_v4, 4 }
 0x629   : > { %v3476_v29 = vadd.f32 %v3475_v54, %v3474_v4 }
 0x62b   : > { %v3477_v59 = vrot.slane %v3476_v29, 2 }
 0x62d   : > { %v3478_v51 = vadd.f32 %v3477_v59, %v3476_v29 }
 0x62f   : > { %v3479_v62 = vrot.slane %v3478_v51, 1 }
 0x631   : > { %v3480_v47 = vadd.f32 %v3479_v62, %v3478_v51 }
 0x633   : > { %7178 = vmatmul.mubr.msk.f32.vlgmr.msra.gmra.mxu1 %vm2648_vm4, %v3480_v47 }
 0x634   : > { %7181 = vmatpush3.msra.mxu1 %v10478_v15  ;;  %7188 = vmatprep.mubr.msk.f32.mxu1 %vm8519_vm0, %v8518_v1 }
 0x635   : > { %7182 = vmatprep.subr.mxu1 %v8518_v1 }
 0x636   : > { %7183 = vmatpush3.msra.mxu1 %v10484_v26 }
 0x637   : > { %7184 = vmatprep.subr.mxu1 %v8518_v1 }
 0x638   : > { %7185 = vmatpush3.msra.mxu1 %v10495_v11 }
 0x639   : > { %7186 = vmatprep.subr.mxu1 %v8518_v1 }
 0x63a   : > { %7187 = vmatpush3.msra.mxu1 %v10501_v32 }
 0x63b   : > { %7191 = vmatprep.subr.mxu1 %v8518_v1 }
 0x6f3   : > { %v3550_v30 = vpop.f32.mrf.mxu1 }
 0x6f4   : > { %v3555_v31 = vmul.f32 0.001953125, %v3550_v30 }
 0x6f5   : > { %v7179_v10 = vpop.f32.mrf.mxu1 }
 0x6f6   : > { %7189 = vmatmul.mubr.msk.f32.vlgmr.msra.gmra.mxu1 %vm535_vm1, %v3555_v31 }
 0x6f7   : > { %7192 = vmatpush3.msra.mxu1 %v10158_v34  ;;  %7207 = vmatprep.mubr.msk.f32.mxu1 %vm8519_vm0, %v8518_v1 }
 0x6f8   : > { %7193 = vmatprep.subr.mxu1 %v8518_v1 }
 0x6f9   : > { %7194 = vmatpush3.msra.mxu1 %v10169_v28 }
 0x6fa   : > { %7195 = vmatprep.subr.mxu1 %v8518_v1 }
 0x6fb   : > { %7196 = vmatpush3.msra.mxu1 %v10178_v2 }
 0x6fc   : > { %7197 = vmatprep.subr.mxu1 %v8518_v1 }
 0x6fd   : > { %7198 = vmatpush3.msra.mxu1 %v10187_v8 }
 0x6fe   : > { %7199 = vmatprep.subr.mxu1 %v8518_v1 }
 0x6ff   : > { %7200 = vmatpush3.msra.mxu1 %v10198_v52 }
 0x700   : > { %7201 = vmatprep.subr.mxu1 %v8518_v1 }
 0x701   : > { %7202 = vmatpush3.msra.mxu1 %v10207_v20 }
 0x702   : > { %7203 = vmatprep.subr.mxu1 %v8518_v1 }
 0x703   : > { %7204 = vmatpush3.msra.mxu1 %v10220_v55 }
 0x704   : > { %7205 = vmatprep.subr.mxu1 %v8518_v1 }
 0x705   : > { %7206 = vmatpush3.msra.mxu1 %v10225_v49 }
 0x706   : > { %7210 = vmatprep.subr.mxu1 %v8518_v1 }
 0x7b6   : > { %v10525_v34 = vpop.f32.mrf.mxu1 }
 0x7b7   : > { %v10529_v2 = vrot.slane %v10525_v34, %v8910_v40 }
 0x7b8   : > { %v7190_v28 = vpop.f32.mrf.mxu1 }
 0x7b9   : > { %v3633_v8 = vsub.f32 %v10280_v25, %v10529_v2  ;;  %v3634_v52 = vsub.f32 %v10272_v38, %v10529_v2  ;;  %v3635_v20 = vsub.f32 %v10282_v48, %v10529_v2  ;;  %v3636_v55 = vsub.f32 %v10288_v9, %v10529_v2 }
 0x7ba   : > { %v3637_v37 = vsub.f32 %v10298_v58, %v10529_v2  ;;  %v3638_v24 = vsub.f32 %v10304_v56, %v10529_v2  ;;  %v3639_v4 = vsub.f32 %v10314_v16, %v10529_v2  ;;  %v3640_v51 = vsub.f32 %v10320_v18, %v10529_v2 }
 0x7bb   : > { %v3665_v49 = vmul.f32 %v3633_v8, %v3633_v8  ;;  %v3666_v5 = vmul.f32 %v3634_v52, %v3634_v52  ;;  %v3667_v33 = vmul.f32 %v3635_v20, %v3635_v20  ;;  %v3668_v19 = vmul.f32 %v3636_v55, %v3636_v55 }
 0x7bc   : > { %v3669_v54 = vmul.f32 %v3637_v37, %v3637_v37  ;;  %v3670_v62 = vmul.f32 %v3638_v24, %v3638_v24  ;;  %v3641_v31 = vsub.f32 %v10330_v6, %v10529_v2  ;;  %v3671_v10 = vmul.f32 %v3639_v4, %v3639_v4 }
 0x7bd   : > { %v3697_v36 = vsel %vm2648_vm4, %v3665_v49, 0.0  ;;  %v3698_v3 = vsel %vm2648_vm4, %v3666_v5, 0.0  ;;  %v3700_v29 = vsel %vm2648_vm4, %v3667_v33, 0.0  ;;  %v3702_v47 = vsel %vm2648_vm4, %v3668_v19, 0.0 }
 0x7be   : > { %v3699_v14 = vadd.f32 %v3698_v3, %v3697_v36  ;;  %v3704_v28 = vsel %vm2648_vm4, %v3669_v54, 0.0  ;;  %v3642_v52 = vsub.f32 %v10337_v22, %v10529_v2  ;;  %v3672_v20 = vmul.f32 %v3640_v51, %v3640_v51 }
 0x7bf   : > { %v3706_v55 = vsel %vm2648_vm4, %v3670_v62, 0.0  ;;  %v3643_v5 = vsub.f32 %v10343_v63, %v10529_v2  ;;  %v3673_v37 = vmul.f32 %v3641_v31, %v3641_v31  ;;  %v3708_v33 = vsel %vm2648_vm4, %v3671_v10, 0.0 }
 0x7c0   : > { %v3701_v59 = vadd.f32 %v3700_v29, %v3699_v14  ;;  %v3644_v19 = vsub.f32 %v10350_v39, %v10529_v2  ;;  %v3674_v36 = vmul.f32 %v3642_v52, %v3642_v52  ;;  %v3710_v3 = vsel %vm2648_vm4, %v3672_v20, 0.0 }
 0x7c1   : > { %v3645_v4 = vsub.f32 %v10357_v13, %v10529_v2  ;;  %v3675_v54 = vmul.f32 %v3643_v5, %v3643_v5  ;;  %v3712_v29 = vsel %vm2648_vm4, %v3673_v37, 0.0  ;;  %v3646_v51 = vsub.f32 %v10364_v50, %v10529_v2 }
 0x7c2   : > { %v3703_v30 = vadd.f32 %v3702_v47, %v3701_v59  ;;  %v3676_v62 = vmul.f32 %v3644_v19, %v3644_v19  ;;  %v3714_v47 = vsel %vm2648_vm4, %v3674_v36, 0.0  ;;  %v3647_v31 = vsub.f32 %v10371_v53, %v10529_v2 }
 0x7c3   : > { %v3677_v10 = vmul.f32 %v3645_v4, %v3645_v4  ;;  %v3648_v52 = vsub.f32 %v10378_v44, %v10529_v2  ;;  %v3678_v20 = vmul.f32 %v3646_v51, %v3646_v51  ;;  %v3649_v5 = vsub.f32 %v10385_v61, %v10529_v2 }
 0x7c4   : > { %v3705_v8 = vadd.f32 %v3704_v28, %v3703_v30  ;;  %v3716_v28 = vsel %vm2648_vm4, %v3675_v54, 0.0  ;;  %v3679_v37 = vmul.f32 %v3647_v31, %v3647_v31  ;;  %v3650_v19 = vsub.f32 %v10392_v42, %v10529_v2 }
 0x7c5   : > { %v3680_v36 = vmul.f32 %v3648_v52, %v3648_v52  ;;  %v3651_v4 = vsub.f32 %v10399_v57, %v10529_v2  ;;  %v3681_v54 = vmul.f32 %v3649_v5, %v3649_v5  ;;  %v3652_v51 = vsub.f32 %v10406_v21, %v10529_v2 }
 0x7c6   : > { %v3707_v49 = vadd.f32 %v3706_v55, %v3705_v8  ;;  %v3718_v55 = vsel %vm2648_vm4, %v3676_v62, 0.0  ;;  %v3682_v62 = vmul.f32 %v3650_v19, %v3650_v19  ;;  %v3653_v31 = vsub.f32 %v10412_v17, %v10529_v2 }
 0x7c7   : > { %v3654_v52 = vsub.f32 %v10419_v45, %v10529_v2  ;;  %v3655_v5 = vsub.f32 %v10425_v46, %v10529_v2  ;;  %v3656_v19 = vsub.f32 %v10430_v41, %v10529_v2 }
 0x7c8   : > { %v3709_v24 = vadd.f32 %v3708_v33, %v3707_v49  ;;  %v3720_v33 = vsel %vm2648_vm4, %v3677_v10, 0.0  ;;  %v3683_v10 = vmul.f32 %v3651_v4, %v3651_v4  ;;  %v3657_v4 = vsub.f32 %v10435_v27, %v10529_v2 }
 0x7ca   : > { %v3711_v14 = vadd.f32 %v3710_v3, %v3709_v24  ;;  %v3722_v3 = vsel %vm2648_vm4, %v3678_v20, 0.0  ;;  %v3684_v20 = vmul.f32 %v3652_v51, %v3652_v51  ;;  %v3658_v51 = vsub.f32 %v10440_v7, %v10529_v2 }
 0x7cc   : > { %v3713_v59 = vadd.f32 %v3712_v29, %v3711_v14  ;;  %v3724_v29 = vsel %vm2648_vm4, %v3679_v37, 0.0  ;;  %v3685_v37 = vmul.f32 %v3653_v31, %v3653_v31  ;;  %v3659_v31 = vsub.f32 %v10445_v60, %v10529_v2 }
 0x7ce   : > { %v3715_v30 = vadd.f32 %v3714_v47, %v3713_v59  ;;  %v3726_v47 = vsel %vm2648_vm4, %v3680_v36, 0.0  ;;  %v3686_v36 = vmul.f32 %v3654_v52, %v3654_v52  ;;  %v3660_v52 = vsub.f32 %v10450_v35, %v10529_v2 }
 0x7d0   : > { %v3717_v8 = vadd.f32 %v3716_v28, %v3715_v30  ;;  %v3728_v28 = vsel %vm2648_vm4, %v3681_v54, 0.0  ;;  %v3687_v54 = vmul.f32 %v3655_v5, %v3655_v5  ;;  %v3661_v5 = vsub.f32 %v10455_v23, %v10529_v2 }
 0x7d2   : > { %v3719_v49 = vadd.f32 %v3718_v55, %v3717_v8  ;;  %v3730_v55 = vsel %vm2648_vm4, %v3682_v62, 0.0  ;;  %v3688_v62 = vmul.f32 %v3656_v19, %v3656_v19  ;;  %v3662_v19 = vsub.f32 %v10459_v43, %v10529_v2 }
 0x7d4   : > { %v3721_v24 = vadd.f32 %v3720_v33, %v3719_v49  ;;  %v3732_v33 = vsel %vm2648_vm4, %v3683_v10, 0.0  ;;  %v3689_v10 = vmul.f32 %v3657_v4, %v3657_v4  ;;  %v3663_v4 = vsub.f32 %v10464_v0, %v10529_v2 }
 0x7d6   : > { %v3723_v14 = vadd.f32 %v3722_v3, %v3721_v24  ;;  %v3734_v3 = vsel %vm2648_vm4, %v3684_v20, 0.0  ;;  %v3690_v20 = vmul.f32 %v3658_v51, %v3658_v51  ;;  %v3664_v51 = vsub.f32 %v10471_v12, %v10529_v2 }
 0x7d8   : > { %v3725_v59 = vadd.f32 %v3724_v29, %v3723_v14  ;;  %v3736_v29 = vsel %vm2648_vm4, %v3685_v37, 0.0  ;;  %v3691_v37 = vmul.f32 %v3659_v31, %v3659_v31  ;;  %v3695_v31 = vmul.f32 %v3663_v4, %v3663_v4 }
 0x7da   : > { %v3727_v30 = vadd.f32 %v3726_v47, %v3725_v59  ;;  %v3738_v47 = vsel %vm2648_vm4, %v3686_v36, 0.0  ;;  %v3692_v36 = vmul.f32 %v3660_v52, %v3660_v52 }
 0x7dc   : > { %v3729_v8 = vadd.f32 %v3728_v28, %v3727_v30  ;;  %v3740_v28 = vsel %vm2648_vm4, %v3687_v54, 0.0  ;;  %v3693_v54 = vmul.f32 %v3661_v5, %v3661_v5 }
 0x7de   : > { %v3731_v49 = vadd.f32 %v3730_v55, %v3729_v8  ;;  %v3742_v55 = vsel %vm2648_vm4, %v3688_v62, 0.0  ;;  %v3694_v62 = vmul.f32 %v3662_v19, %v3662_v19 }
 0x7e0   : > { %v3733_v24 = vadd.f32 %v3732_v33, %v3731_v49  ;;  %v3744_v33 = vsel %vm2648_vm4, %v3689_v10, 0.0  ;;  %v3752_v10 = vsel %vm2648_vm4, %v3693_v54, 0.0  ;;  %v3754_v52 = vsel %vm2648_vm4, %v3694_v62, 0.0  ;;  %v5405_v62 = vld [vmem:[%s12261_s11 + $0x150] sm:$0xff] }
 0x7e2   : > { %v3735_v14 = vadd.f32 %v3734_v3, %v3733_v24  ;;  %v3746_v3 = vsel %vm2648_vm4, %v3690_v20, 0.0 }
 0x7e4   : > { %v3737_v59 = vadd.f32 %v3736_v29, %v3735_v14  ;;  %v3748_v29 = vsel %vm2648_vm4, %v3691_v37, 0.0 }
 0x7e6   : > { %v3739_v30 = vadd.f32 %v3738_v47, %v3737_v59  ;;  %v3750_v47 = vsel %vm2648_vm4, %v3692_v36, 0.0 }
 0x7e8   : > { %v3741_v8 = vadd.f32 %v3740_v28, %v3739_v30 }
 0x7ea   : > { %v3743_v49 = vadd.f32 %v3742_v55, %v3741_v8  ;;  %v3696_v8 = vmul.f32 %v3664_v51, %v3664_v51  ;;  %v3756_v55 = vsel %vm2648_vm4, %v3695_v31, 0.0  ;;  %v5406_v51 = vld [vmem:[%s12261_s11 + $0x158] sm:$0xff] }
 0x7ec   : > { %v3745_v24 = vadd.f32 %v3744_v33, %v3743_v49  ;;  %v3758_v5 = vsel %vm2648_vm4, %v3696_v8, 0.0 }
 0x7ee   : > { %v3747_v14 = vadd.f32 %v3746_v3, %v3745_v24 }
 0x7f0   : > { %v3749_v59 = vadd.f32 %v3748_v29, %v3747_v14 }
 0x7f2   : > { %v3751_v30 = vadd.f32 %v3750_v47, %v3749_v59  ;;  %v5407_v59 = vld [vmem:[%s12261_s11 + $0x160] sm:$0xff] }
 0x7f3   : > { %v3398_v47 = vld [vmem:[%s12257_s7] sm:$0x1] }
 0x7f4   : > { %v3753_v28 = vadd.f32 %v3752_v10, %v3751_v30  ;;  %v5404_v10 = vld [vmem:[%s12261_s11 + $0x148] sm:$0xff] }
 0x7f6   : > { %v3755_v20 = vadd.f32 %v3754_v52, %v3753_v28  ;;  %v5403_v52 = vld [vmem:[%s12261_s11 + $0x140] sm:$0xff] }
 0x7f8   : > { %v3757_v49 = vadd.f32 %v3756_v55, %v3755_v20  ;;  %v3399_v20 = vld [vmem:[%s12258_s8] sm:$0x1] }
 0x7fa   : > { %v3759_v37 = vadd.f32 %v3758_v5, %v3757_v49  ;;  %v5402_v49 = vld [vmem:[%s12261_s11 + $0x138] sm:$0xff] }
 0x7fc   : > { %v3760_v33 = vrot.slane %v3759_v37, 4 }
 0x7fe   : > { %v3761_v2 = vadd.f32 %v3760_v33, %v3759_v37  ;;  %v5401_v37 = vld [vmem:[%s12261_s11 + $0x130] sm:$0xff] }
 0x800   : > { %v3762_v24 = vrot.slane %v3761_v2, 2 }
 0x802   : > { %v3763_v19 = vadd.f32 %v3762_v24, %v3761_v2 }
 0x804   : > { %v3764_v36 = vrot.slane %v3763_v19, 1 }
 0x806   : > { %v3765_v3 = vadd.f32 %v3764_v36, %v3763_v19 }
 0x808   : > { %7208 = vmatmul.mubr.msk.f32.vlgmr.msra.gmra.mxu1 %vm2648_vm4, %v3765_v3 }
 0x809   : > { %7211 = vmatpush3.msra.mxu1 %v10478_v15  ;;  %7218 = vmatprep.mubr.msk.f32.mxu1 %vm8519_vm0, %v8518_v1 }
 0x80a   : > { %7212 = vmatprep.subr.mxu1 %v8518_v1 }
 0x80b   : > { %7213 = vmatpush3.msra.mxu1 %v10484_v26  ;;  %v5410_v26 = vld [vmem:[%s12261_s11 + $0x178] sm:$0xff] }
 0x80c   : > { %7214 = vmatprep.subr.mxu1 %v8518_v1  ;;  %5763 = vmatpush1.msra.mxu0 %v5410_v26 }
 0x80d   : > { %7215 = vmatpush3.msra.mxu1 %v10495_v11  ;;  %5764 = vmatprep.subr.mxu0 %v8518_v1  ;;  %v5409_v11 = vld [vmem:[%s12261_s11 + $0x170] sm:$0xff] }
 0x80e   : > { %7216 = vmatprep.subr.mxu1 %v8518_v1  ;;  %5765 = vmatpush1.msra.mxu0 %v5409_v11  ;;  %v5377_v11 = vld [vmem:[%s12261_s11 + $0x70] sm:$0xff] }
 0x80f   : > { %7217 = vmatpush3.msra.mxu1 %v10501_v32  ;;  %5766 = vmatprep.subr.mxu0 %v8518_v1  ;;  %v5408_v32 = vld [vmem:[%s12261_s11 + $0x168] sm:$0xff] }
 0x810   : > { %5537 = vmatprep.subr.mxu1 %v8518_v1  ;;  %5767 = vmatpush1.msra.mxu0 %v5408_v32 }
 0x811   : > { %5768 = vmatprep.subr.mxu0 %v8518_v1 }
 0x812   : > { %5769 = vmatpush1.msra.mxu0 %v5407_v59 }
 0x813   : > { %5770 = vmatprep.subr.mxu0 %v8518_v1 }
 0x814   : > { %5771 = vmatpush1.msra.mxu0 %v5406_v51 }
 0x815   : > { %5772 = vmatprep.subr.mxu0 %v8518_v1 }
 0x816   : > { %5773 = vmatpush1.msra.mxu0 %v5405_v62 }
 0x817   : > { %5774 = vmatprep.subr.mxu0 %v8518_v1 }
 0x818   : > { %5775 = vmatpush1.msra.mxu0 %v5404_v10 }
 0x819   : > { %5776 = vmatprep.subr.mxu0 %v8518_v1 }
 0x81a   : > { %5777 = vmatpush1.msra.mxu0 %v5403_v52 }
 0x81b   : > { %5778 = vmatprep.subr.mxu0 %v8518_v1 }
 0x81c   : > { %5779 = vmatpush1.msra.mxu0 %v5402_v49 }
 0x81d   : > { %5780 = vmatprep.subr.mxu0 %v8518_v1 }
 0x81e   : > { %5781 = vmatpush1.msra.mxu0 %v5401_v37 }
 0x81f   : > { %5782 = vmatprep.subr.mxu0 %v8518_v1 }
 0x8c8   : > { %v3835_v14 = vpop.f32.mrf.mxu1 }
 0x8c9   : > { %v3839_v4 = vmul.f32 0.001953125, %v3835_v14 }
 0x8ca   : > { %v7209_v15 = vpop.f32.mrf.mxu1 }
 0x8cb   : > { %v3840_v54 = vadd.f32 1e-06, %v3839_v4 }
 0x8cd   : > { %8325 = vrsqrt.f32 %v3840_v54 }
 0x8da   : > { %v8326_v29 = vpop.eup %8325 }
 0x8db   : > { %7219 = vmatmul.mubr.msk.f32.vlgmr.msra.gmra.mxu1 %vm535_vm1, %v8326_v29 }
 0x99b   : > { %v3911_v30 = vpop.f32.mrf.mxu1 }
 0x99c   : > { %v3915_v31 = vmul.f32 %v3911_v30, %v3398_v47 }
 0x99d   : > { %v7220_v28 = vpop.f32.mrf.mxu1 }
 0x99e   : > { %v3916_v8 = vmul.f32 %v3915_v31, %v10525_v34  ;;  %v10682_v5 = vrot.slane %v3915_v31, %v8910_v40 }
 0x9a0   : > { %v3917_v55 = vsub.f32 %v3399_v20, %v3916_v8  ;;  %v3922_v33 = vmul.f32 %v10682_v5, %v10280_v25  ;;  %v3923_v2 = vmul.f32 %v10682_v5, %v10272_v38  ;;  %v3924_v24 = vmul.f32 %v10682_v5, %v10282_v48  ;;  %v5378_v38 = vld [vmem:[%s12261_s11 + $0x78] sm:$0xff]  ;;  %v5400_v25 = vld [vmem:[%s12261_s11 + $0x128] sm:$0xff] }
 0x9a1   : > { %v3926_v19 = vmul.f32 %v10682_v5, %v10298_v58  ;;  %v3927_v48 = vmul.f32 %v10682_v5, %v10304_v56  ;;  %5538 = vmatpush1.msra.mxu1 %v5378_v38  ;;  %v3928_v14 = vmul.f32 %v10682_v5, %v10314_v16  ;;  %5783 = vmatpush1.msra.mxu0 %v5400_v25 }
 0x9a2   : > { %v10686_v34 = vrot.slane %v3917_v55, %v8910_v40  ;;  %v3925_v40 = vmul.f32 %v10682_v5, %v10288_v9  ;;  %v3929_v15 = vmul.f32 %v10682_v5, %v10320_v18  ;;  %5539 = vmatprep.subr.mxu1 %v8518_v1  ;;  %v3930_v56 = vmul.f32 %v10682_v5, %v10330_v6  ;;  %v5376_v18 = vld [vmem:[%s12261_s11 + $0x68] sm:$0xff] }
 0x9a3   : > { %5784 = vmatprep.subr.mxu0 %v8518_v1  ;;  %v3931_v6 = vmul.f32 %v10682_v5, %v10337_v22  ;;  %5540 = vmatpush1.msra.mxu1 %v5377_v11  ;;  %v3932_v62 = vmul.f32 %v10682_v5, %v10343_v63  ;;  %v3933_v22 = vmul.f32 %v10682_v5, %v10350_v39 }
 0x9a4   : > { %v10703_v36 = vadd.f32 %v10686_v34, %v3922_v33  ;;  %v10706_v3 = vadd.f32 %v10686_v34, %v3923_v2  ;;  %v10717_v9 = vadd.f32 %v10686_v34, %v3924_v24  ;;  %v10720_v58 = vadd.f32 %v10686_v34, %v3925_v40  ;;  %5541 = vmatprep.subr.mxu1 %v8518_v1 }
 0x9a5   : > { %v10725_v4 = vadd.f32 %v10686_v34, %v3926_v19  ;;  %v10730_v54 = vadd.f32 %v10686_v34, %v3927_v48  ;;  %v10736_v29 = vadd.f32 %v10686_v34, %v3928_v14  ;;  %v10750_v32 = vadd.f32 %v10686_v34, %v3929_v15  ;;  %5542 = vmatpush1.msra.mxu1 %v5376_v18  ;;  %v5399_v48 = vld [vmem:[%s12261_s11 + $0x120] sm:$0xff]  ;;  %v5373_v18 = vld [vmem:[%s12261_s11 + $0x50] sm:$0xff] }
 0x9a6   : > { %v6796_v16 = vmul.f32 -1.442695, %v10703_v36  ;;  %v6797_v26 = vmul.f32 -1.442695, %v10706_v3  ;;  %v6798_v59 = vmul.f32 -1.442695, %v10717_v9  ;;  %v10757_v47 = vadd.f32 %v10686_v34, %v3930_v56  ;;  %5543 = vmatprep.subr.mxu1 %v8518_v1  ;;  %5785 = vmatpush1.msra.mxu0 %v5399_v48 }
 0x9a7   : > { %v6799_v51 = vmul.f32 -1.442695, %v10720_v58  ;;  %v6800_v30 = vmul.f32 -1.442695, %v10725_v4  ;;  %v10764_v31 = vadd.f32 %v10686_v34, %v3931_v6  ;;  %v6801_v10 = vmul.f32 -1.442695, %v10730_v54  ;;  %5786 = vmatprep.subr.mxu0 %v8518_v1 }
 0x9a8   : > { %8327 = vpow2.f32 %v6796_v16  ;;  %v3934_v63 = vmul.f32 %v10682_v5, %v10357_v13  ;;  %v10770_v28 = vadd.f32 %v10686_v34, %v3932_v62  ;;  %v6802_v8 = vmul.f32 -1.442695, %v10736_v29  ;;  %v5375_v14 = vld [vmem:[%s12261_s11 + $0x60] sm:$0xff]  ;;  %v5398_v16 = vld [vmem:[%s12261_s11 + $0x118] sm:$0xff]  ;;  %v5397_v6 = vld [vmem:[%s12261_s11 + $0x110] sm:$0xff] }
 0x9a9   : > { %8329 = vpow2.f32 %v6797_v26  ;;  %v3935_v39 = vmul.f32 %v10682_v5, %v10364_v50  ;;  %v10777_v52 = vadd.f32 %v10686_v34, %v3933_v22  ;;  %v6803_v20 = vmul.f32 -1.442695, %v10750_v32  ;;  %5544 = vmatpush1.msra.mxu1 %v5375_v14  ;;  %5787 = vmatpush1.msra.mxu0 %v5398_v16  ;;  %v5426_v16 = vld [vmem:[%s12261_s11 + $0x1f8] sm:$0xff] }
 0x9aa   : > { %8331 = vpow2.f32 %v6798_v59  ;;  %v3936_v13 = vmul.f32 %v10682_v5, %v10371_v53  ;;  %v10783_v55 = vadd.f32 %v10686_v34, %v3934_v63  ;;  %v6804_v49 = vmul.f32 -1.442695, %v10757_v47  ;;  %5545 = vmatprep.subr.mxu1 %v8518_v1  ;;  %5788 = vmatprep.subr.mxu0 %v8518_v1 }
 0x9ab   : > { %8333 = vpow2.f32 %v6799_v51  ;;  %v3937_v37 = vmul.f32 %v10682_v5, %v10378_v44  ;;  %v10789_v50 = vadd.f32 %v10686_v34, %v3935_v39  ;;  %v6805_v33 = vmul.f32 -1.442695, %v10764_v31  ;;  %5789 = vmatpush1.msra.mxu0 %v5397_v6  ;;  %v5369_v6 = vld [vmem:[%s12261_s11 + $0x30] sm:$0xff] }
 0x9ac   : > { %8335 = vpow2.f32 %v6800_v30  ;;  %v10793_v2 = vadd.f32 %v10686_v34, %v3936_v13  ;;  %v6806_v53 = vmul.f32 -1.442695, %v10770_v28  ;;  %v6807_v40 = vmul.f32 -1.442695, %v10777_v52  ;;  %5790 = vmatprep.subr.mxu0 %v8518_v1 }
 0x9ad   : > { %8337 = vpow2.f32 %v6801_v10  ;;  %v10797_v24 = vadd.f32 %v10686_v34, %v3937_v37  ;;  %v3938_v44 = vmul.f32 %v10682_v5, %v10385_v61  ;;  %v6808_v19 = vmul.f32 -1.442695, %v10783_v55  ;;  %v5374_v61 = vld [vmem:[%s12261_s11 + $0x58] sm:$0xff]  ;;  %v5371_v37 = vld [vmem:[%s12261_s11 + $0x40] sm:$0xff] }
 0x9ae   : > { %8339 = vpow2.f32 %v6802_v8  ;;  %v3939_v38 = vmul.f32 %v10682_v5, %v10392_v42  ;;  %v6809_v25 = vmul.f32 -1.442695, %v10789_v50  ;;  %v3940_v15 = vmul.f32 %v10682_v5, %v10399_v57  ;;  %5546 = vmatpush1.msra.mxu1 %v5374_v61 }
 0x9af   : > { %8341 = vpow2.f32 %v6803_v20  ;;  %v10818_v42 = vadd.f32 %v10686_v34, %v3938_v44  ;;  %v6810_v56 = vmul.f32 -1.442695, %v10793_v2  ;;  %v3941_v26 = vmul.f32 %v10682_v5, %v10406_v21  ;;  %5547 = vmatprep.subr.mxu1 %v8518_v1 }
 0x9b0   : > { %8343 = vpow2.f32 %v6804_v49  ;;  %v10827_v11 = vadd.f32 %v10686_v34, %v3939_v38  ;;  %v6811_v57 = vmul.f32 -1.442695, %v10797_v24  ;;  %v3942_v21 = vmul.f32 %v10682_v5, %v10412_v17  ;;  %v5372_v17 = vld [vmem:[%s12261_s11 + $0x48] sm:$0xff]  ;;  %5548 = vmatpush1.msra.mxu1 %v5373_v18 }
 0x9b1   : > { %8345 = vpow2.f32 %v6805_v33  ;;  %v3943_v59 = vmul.f32 %v10682_v5, %v10419_v45  ;;  %v10843_v51 = vadd.f32 %v10686_v34, %v3940_v15  ;;  %v3944_v30 = vmul.f32 %v10682_v5, %v10425_v46  ;;  %v5396_v45 = vld [vmem:[%s12261_s11 + $0x108] sm:$0xff]  ;;  %5549 = vmatprep.subr.mxu1 %v8518_v1  ;;  %v5395_v33 = vld [vmem:[%s12261_s11 + $0x100] sm:$0xff] }
 0x9b2   : > { %8347 = vpow2.f32 %v6806_v53  ;;  %v3945_v22 = vmul.f32 %v10682_v5, %v10430_v41  ;;  %v10850_v10 = vadd.f32 %v10686_v34, %v3941_v26  ;;  %v10861_v63 = vadd.f32 %v10686_v34, %v3942_v21  ;;  %5550 = vmatpush1.msra.mxu1 %v5372_v17  ;;  %5791 = vmatpush1.msra.mxu0 %v5396_v45 }
 0x9b3   : > { %8349 = vpow2.f32 %v6807_v40  ;;  %v6812_v8 = vmul.f32 -1.442695, %v10818_v42  ;;  %v10867_v20 = vadd.f32 %v10686_v34, %v3943_v59  ;;  %v6813_v13 = vmul.f32 -1.442695, %v10827_v11  ;;  %5551 = vmatprep.subr.mxu1 %v8518_v1  ;;  %5792 = vmatprep.subr.mxu0 %v8518_v1 }
 0x9b4   : > { %8351 = vpow2.f32 %v6808_v19  ;;  %v3946_v40 = vmul.f32 %v10682_v5, %v10435_v27  ;;  %v10883_v44 = vadd.f32 %v10686_v34, %v3944_v30  ;;  %v6814_v19 = vmul.f32 -1.442695, %v10843_v51  ;;  %v5370_v27 = vld [vmem:[%s12261_s11 + $0x38] sm:$0xff]  ;;  %5552 = vmatpush1.msra.mxu1 %v5371_v37  ;;  %5793 = vmatpush1.msra.mxu0 %v5395_v33 }
 0x9b5   : > { %v8328_v62 = vpop.eup %8327  ;;  %8353 = vpow2.f32 %v6809_v25  ;;  %v3947_v25 = vmul.f32 %v10682_v5, %v10440_v7  ;;  %v10891_v48 = vadd.f32 %v10686_v34, %v3945_v22  ;;  %v6815_v14 = vmul.f32 -1.442695, %v10850_v10  ;;  %5553 = vmatprep.subr.mxu1 %v8518_v1  ;;  %5794 = vmatprep.subr.mxu0 %v8518_v1 }
 0x9b6   : > { %v8330_v46 = vpop.eup %8329  ;;  %v4088_v41 = vadd.f32 1.0, %v8328_v62  ;;  %8355 = vpow2.f32 %v6810_v56  ;;  %v3948_v15 = vmul.f32 %v10682_v5, %v10445_v60  ;;  %v10904_v7 = vadd.f32 %v10686_v34, %v3946_v40  ;;  %5554 = vmatpush1.msra.mxu1 %v5370_v27  ;;  %5795 = vmatpush2.msra.mxu0 %v5426_v16  ;;  %v5367_v40 = vld [vmem:[%s12261_s11 + $0x20] sm:$0xff] }
 0x9b7   : > { %v10864_v39 = vpop.eup %8331  ;;  %v4089_v49 = vadd.f32 1.0, %v8330_v46  ;;  %8357 = vpow2.f32 %v6811_v57  ;;  %v6816_v56 = vmul.f32 -1.442695, %v10861_v63  ;;  %v3949_v57 = vmul.f32 %v10682_v5, %v10450_v35  ;;  %5555 = vmatprep.subr.mxu1 %v8518_v1  ;;  %5796 = vmatprep.subr.mxu0 %v8518_v1 }
 0x9b8   : > { %v10878_v53 = vpop.eup %8333  ;;  %8359 = vrcp.f32 %v4088_v41  ;;  %v10915_v18 = vadd.f32 %v10686_v34, %v3947_v25  ;;  %v6817_v60 = vmul.f32 -1.442695, %v10867_v20  ;;  %v3950_v59 = vmul.f32 %v10682_v5, %v10455_v23  ;;  %v5368_v23 = vld [vmem:[%s12261_s11 + $0x28] sm:$0xff]  ;;  %5556 = vmatpush1.msra.mxu1 %v5369_v6  ;;  %v5365_v6 = vld [vmem:[%s12261_s11 + $0x10] sm:$0xff] }
 0x9b9   : > { %v10886_v38 = vpop.eup %8335  ;;  %8361 = vrcp.f32 %v4089_v49  ;;  %v10928_v35 = vadd.f32 %v10686_v34, %v3948_v15  ;;  %v6818_v62 = vmul.f32 -1.442695, %v10883_v44  ;;  %v3951_v22 = vmul.f32 %v10682_v5, %v10459_v43  ;;  %5557 = vmatprep.subr.mxu1 %v8518_v1  ;;  %v5366_v15 = vld [vmem:[%s12261_s11 + $0x18] sm:$0xff] }
 0x9ba   : > { %v10899_v61 = vpop.eup %8337  ;;  %8363 = vpow2.f32 %v6812_v8  ;;  %v10936_v17 = vadd.f32 %v10686_v34, %v3949_v57  ;;  %v6819_v45 = vmul.f32 -1.442695, %v10891_v48  ;;  %v3952_v41 = vmul.f32 %v10682_v5, %v10464_v0  ;;  %5558 = vmatpush1.msra.mxu1 %v5368_v23  ;;  %v5364_v23 = vld [vmem:[%s12261_s11 + $0x8] sm:$0xff] }
 0x9bb   : > { %v10910_v26 = vpop.eup %8339  ;;  %8365 = vpow2.f32 %v6813_v13  ;;  %v10949_v43 = vadd.f32 %v10686_v34, %v3950_v59  ;;  %v6820_v8 = vmul.f32 -1.442695, %v10904_v7  ;;  %v5425_v13 = vld [vmem:[%s12261_s11 + $0x1f0] sm:$0xff]  ;;  %v3953_v37 = vmul.f32 %v10682_v5, %v10471_v12  ;;  %5559 = vmatprep.subr.mxu1 %v8518_v1 }
 0x9bc   : > { %v10923_v21 = vpop.eup %8341  ;;  %8367 = vpow2.f32 %v6814_v19  ;;  %v10960_v33 = vadd.f32 %v10686_v34, %v3951_v22  ;;  %v6821_v0 = vmul.f32 -1.442695, %v10915_v18  ;;  %5797 = vmatpush2.msra.mxu0 %v5425_v13  ;;  %v10970_v25 = vadd.f32 %v10686_v34, %v3952_v41  ;;  %5560 = vmatpush1.msra.mxu1 %v5367_v40 }
 0x9bd   : > { %v10931_v30 = vpop.eup %8343  ;;  %8369 = vpow2.f32 %v6815_v14  ;;  %v6822_v12 = vmul.f32 -1.442695, %v10928_v35  ;;  %5798 = vmatprep.subr.mxu0 %v8518_v1  ;;  %v10977_v14 = vadd.f32 %v10686_v34, %v3953_v37  ;;  %v6823_v27 = vmul.f32 -1.442695, %v10936_v17  ;;  %v5424_v34 = vld [vmem:[%s12261_s11 + $0x1e8] sm:$0xff]  ;;  %5561 = vmatprep.subr.mxu1 %v8518_v1  ;;  %v5423_v37 = vld [vmem:[%s12261_s11 + $0x1e0] sm:$0xff] }
 0x9be   : > { %v10944_v46 = vpop.eup %8345  ;;  %8371 = vpow2.f32 %v6816_v56  ;;  %v6824_v16 = vmul.f32 -1.442695, %v10949_v43  ;;  %5799 = vmatpush2.msra.mxu0 %v5424_v34  ;;  %5562 = vmatpush1.msra.mxu1 %v5366_v15  ;;  %v4090_v13 = vadd.f32 1.0, %v10864_v39  ;;  %v4092_v15 = vadd.f32 1.0, %v10886_v38  ;;  %v5394_v34 = vld [vmem:[%s12261_s11 + $0xf8] sm:$0xff] }
 0x9bf   : > { %v10955_v49 = vpop.eup %8347  ;;  %8373 = vpow2.f32 %v6817_v60  ;;  %v6825_v60 = vmul.f32 -1.442695, %v10960_v33  ;;  %5800 = vmatprep.subr.mxu0 %v8518_v1  ;;  %5563 = vmatprep.subr.mxu1 %v8518_v1  ;;  %v4094_v38 = vadd.f32 1.0, %v10910_v26  ;;  %v5393_v26 = vld [vmem:[%s12261_s11 + $0xf0] sm:$0xff] }
 0x9c0   : > { %v10967_v19 = vpop.eup %8349  ;;  %8375 = vpow2.f32 %v6818_v62  ;;  %v6826_v62 = vmul.f32 -1.442695, %v10970_v25  ;;  %5564 = vmatpush1.msra.mxu1 %v5365_v6  ;;  %5801 = vmatpush2.msra.mxu0 %v5423_v37  ;;  %v5392_v37 = vld [vmem:[%s12261_s11 + $0xe8] sm:$0xff] }
 0x9c1   : > { %v10974_v5 = vpop.eup %8351  ;;  %8377 = vpow2.f32 %v6819_v45  ;;  %v6827_v45 = vmul.f32 -1.442695, %v10977_v14  ;;  %5565 = vmatprep.subr.mxu1 %v8518_v1  ;;  %5802 = vmatprep.subr.mxu0 %v8518_v1 }
 0x9c2   : > { %v10984_v56 = vpop.eup %8353  ;;  %8379 = vpow2.f32 %v6820_v8  ;;  %5566 = vmatpush1.msra.mxu1 %v5364_v23  ;;  %v4095_v23 = vadd.f32 1.0, %v10923_v21 }
 0x9c3   : > { %v10990_v57 = vpop.eup %8355  ;;  %8381 = vpow2.f32 %v6821_v0  ;;  %5567 = vmatprep.subr.mxu1 %v8518_v1 }
 0x9c4   : > { %v10997_v59 = vpop.eup %8357  ;;  %8383 = vpow2.f32 %v6822_v12  ;;  %v4091_v12 = vadd.f32 1.0, %v10878_v53  ;;  %v4093_v53 = vadd.f32 1.0, %v10899_v61 }
 0x9c5   : > { %v8360_v22 = vpop.eup %8359  ;;  %8385 = vpow2.f32 %v6823_v27 }
 0x9c6   : > { %v8362_v41 = vpop.eup %8361  ;;  %v4184_v8 = vmul.f32 %v8360_v22, %v10703_v36  ;;  %8387 = vpow2.f32 %v6824_v16  ;;  %v5363_v36 = vld [vmem:[%s12261_s11] sm:$0xff] }
 0x9c7   : > { %v11011_v0 = vpop.eup %8363  ;;  %v4185_v40 = vmul.f32 %v8362_v41, %v10706_v3  ;;  %8389 = vpow2.f32 %v6825_v60  ;;  %5568 = vmatpush1.msra.mxu1 %v5363_v36 }
 0x9c8   : > { %v11019_v39 = vpop.eup %8365  ;;  %v4256_v27 = vrot.slane %v4184_v8, 7  ;;  %8391 = vpow2.f32 %v6826_v62  ;;  %v5422_v62 = vld [vmem:[%s12261_s11 + $0x1d8] sm:$0xff]  ;;  %5569 = vmatprep.subr.mxu1 %v8518_v1  ;;  %v4096_v8 = vadd.f32 1.0, %v10931_v30  ;;  %v5421_v30 = vld [vmem:[%s12261_s11 + $0x1d0] sm:$0xff] }
 0x9c9   : > { %v11023_v3 = vpop.eup %8367  ;;  %v4257_v16 = vrot.slane %v4185_v40, 7  ;;  %8393 = vpow2.f32 %v6827_v45  ;;  %5803 = vmatpush2.msra.mxu0 %v5422_v62  ;;  %5570 = vmatpush2.msra.mxu1 %v5394_v34  ;;  %v4467_v34 = vld [vmem:[#allocation3 + $0x9] sm:$0xff] }
 0x9ca   : > { %v11030_v60 = vpop.eup %8369  ;;  %v4352_v6 = vsel %vm1380_vm3, 0.0, %v4256_v27  ;;  %8395 = vrcp.f32 %v4090_v13  ;;  %5804 = vmatprep.subr.mxu0 %v8518_v1  ;;  %v4097_v13 = vadd.f32 1.0, %v10944_v46  ;;  %5571 = vmatprep.subr.mxu1 %v8518_v1  ;;  %v5391_v46 = vld [vmem:[%s12261_s11 + $0xe0] sm:$0xff] }
 0x9cb   : > { %v11037_v22 = vpop.eup %8371  ;;  %4385 = vst.msk [vmem:[#allocation3 + $0x18] sm:$0xff] %vm2648_vm4, %v4352_v6  ;;  %v4258_v61 = vsel %vm1380_vm3, %v4256_v27, %v4257_v16  ;;  %v4368_v45 = vsel %vm1380_vm3, %v4257_v16, 0.0  ;;  %8397 = vrcp.f32 %v4091_v12  ;;  %v4098_v12 = vadd.f32 1.0, %v10955_v49  ;;  %5572 = vmatpush2.msra.mxu1 %v5393_v26  ;;  %5805 = vmatpush2.msra.mxu0 %v5421_v30  ;;  %v4466_v16 = vld [vmem:[#allocation3 + $0x1] sm:$0xff] }
 0x9cc   : > { %v11047_v41 = vpop.eup %8373  ;;  %4386 = vst.msk [vmem:[#allocation3 + $0x20] sm:$0xff] %vm2648_vm4, %v4258_v61  ;;  %8399 = vrcp.f32 %v4092_v15  ;;  %v4099_v27 = vadd.f32 1.0, %v10967_v19  ;;  %5573 = vmatprep.subr.mxu1 %v8518_v1  ;;  %v4100_v49 = vadd.f32 1.0, %v10974_v5  ;;  %5806 = vmatprep.subr.mxu0 %v8518_v1  ;;  %v4101_v19 = vadd.f32 1.0, %v10984_v56  ;;  %v5390_v6 = vld [vmem:[%s12261_s11 + $0xd8] sm:$0xff]  ;;  %v5389_v56 = vld [vmem:[%s12261_s11 + $0xd0] sm:$0xff] }
 0x9cd   : > { %4387 = vst.msk [vmem:[#allocation3 + $0x28] sm:$0x3] %vm4218_vm6, %v4368_v45  ;;  %v8376_v21 = vpop.eup %8375  ;;  %8401 = vrcp.f32 %v4093_v53  ;;  %5574 = vmatpush2.msra.mxu1 %v5392_v37  ;;  %v4102_v61 = vadd.f32 1.0, %v10990_v57  ;;  %v4103_v26 = vadd.f32 1.0, %v10997_v59  ;;  %v4104_v37 = vadd.f32 1.0, %v11011_v0  ;;  %v5420_v57 = vld [vmem:[%s12261_s11 + $0x1c8] sm:$0xff] }
 0x9ce   : > { %v8378_v40 = vpop.eup %8377  ;;  %8403 = vrcp.f32 %v4094_v38  ;;  %5575 = vmatprep.subr.mxu1 %v8518_v1  ;;  %v4105_v59 = vadd.f32 1.0, %v11019_v39  ;;  %v4106_v30 = vadd.f32 1.0, %v11023_v3  ;;  %v5388_v0 = vld [vmem:[%s12261_s11 + $0xc8] sm:$0xff]  ;;  %v5419_v39 = vld [vmem:[%s12261_s11 + $0x1c0] sm:$0xff]  ;;  %5807 = vmatpush2.msra.mxu0 %v5420_v57 }
 0x9cf   : > { %v8380_v36 = vpop.eup %8379  ;;  %8405 = vrcp.f32 %v4095_v23  ;;  %5576 = vmatpush2.msra.mxu1 %v5391_v46  ;;  %5808 = vmatprep.subr.mxu0 %v8518_v1 }
 0x9d0   : > { %v8382_v15 = vpop.eup %8381  ;;  %8407 = vrcp.f32 %v4096_v8  ;;  %5577 = vmatprep.subr.mxu1 %v8518_v1  ;;  %5809 = vmatpush2.msra.mxu0 %v5419_v39 }
 0x9d1   : > { %v8384_v53 = vpop.eup %8383  ;;  %8409 = vrcp.f32 %v4097_v13  ;;  %5578 = vmatpush2.msra.mxu1 %v5390_v6  ;;  %v11100_v6 = vadd.f32 1.0, %v8382_v15  ;;  %5810 = vmatprep.subr.mxu0 %v8518_v1 }
 0x9d2   : > { %v8386_v38 = vpop.eup %8385  ;;  %v4530_v62 = vld [vmem:[#allocation3 + $0x18] sm:$0xff]  ;;  %8411 = vrcp.f32 %v4098_v12  ;;  %5579 = vmatprep.subr.mxu1 %v8518_v1 }
 0x9d3   : > { %v8388_v5 = vpop.eup %8387  ;;  %v7875_v45 = vpack.i.bf16 %v4466_v16, %v4530_v62  ;;  %v4531_v23 = vld [vmem:[#allocation3 + $0x20] sm:$0xff]  ;;  %8413 = vrcp.f32 %v4099_v27  ;;  %v4107_v27 = vadd.f32 1.0, %v11030_v60  ;;  %v4108_v16 = vadd.f32 1.0, %v11037_v22  ;;  %5580 = vmatpush2.msra.mxu1 %v5389_v56  ;;  %v5387_v22 = vld [vmem:[%s12261_s11 + $0xc0] sm:$0xff] }
 0x9d4   : > { %v8390_v8 = vpop.eup %8389  ;;  %v7880_v13 = vpack.i.bf16 %v4467_v34, %v4531_v23  ;;  %8415 = vrcp.f32 %v4100_v49  ;;  %v4109_v49 = vadd.f32 1.0, %v11047_v41  ;;  %v4110_v34 = vadd.f32 1.0, %v8376_v21  ;;  %5581 = vmatprep.subr.mxu1 %v8518_v1 }
 0x9d5   : > { %v8392_v12 = vpop.eup %8391  ;;  %7876 = vrot.lane.b32.xlu0 %v7875_v45, %s12279_s0  ;;  %8417 = vrcp.f32 %v4101_v19  ;;  %v4111_v60 = vadd.f32 1.0, %v8378_v40  ;;  %v11098_v19 = vadd.f32 1.0, %v8380_v36  ;;  %v11107_v62 = vadd.f32 1.0, %v8384_v53  ;;  %5582 = vmatpush2.msra.mxu1 %v5388_v0 }
 0x9d6   : > { %v8394_v46 = vpop.eup %8393  ;;  %7881 = vrot.lane.b32.xlu1 %v7880_v13, %s12279_s0  ;;  %8419 = vrcp.f32 %v4102_v61  ;;  %v11109_v61 = vadd.f32 1.0, %v8386_v38  ;;  %v11113_v15 = vadd.f32 1.0, %v8388_v5  ;;  %v11115_v45 = vadd.f32 1.0, %v8390_v8  ;;  %5583 = vmatprep.subr.mxu1 %v8518_v1 }
 0x9d7   : > { %v8396_v3 = vpop.eup %8395  ;;  %8421 = vrcp.f32 %v4103_v26  ;;  %v11121_v23 = vadd.f32 1.0, %v8392_v12  ;;  %5584 = vmatpush2.msra.mxu1 %v5387_v22  ;;  %v11128_v8 = vadd.f32 1.0, %v8394_v46  ;;  %v5384_v46 = vld [vmem:[%s12261_s11 + $0xa8] sm:$0xff] }
 0x9d8   : > { %v8398_v41 = vpop.eup %8397  ;;  %v4186_v21 = vmul.f32 %v8396_v3, %v10717_v9  ;;  %8423 = vrcp.f32 %v4104_v37  ;;  %v5386_v9 = vld [vmem:[%s12261_s11 + $0xb8] sm:$0xff]  ;;  %5585 = vmatprep.subr.mxu1 %v8518_v1  ;;  %v5417_v3 = vld [vmem:[%s12261_s11 + $0x1b0] sm:$0xff] }
 0x9d9   : > { %v8400_v40 = vpop.eup %8399  ;;  %v4187_v36 = vmul.f32 %v8398_v41, %v10720_v58  ;;  %8425 = vrcp.f32 %v4105_v59  ;;  %v5418_v58 = vld [vmem:[%s12261_s11 + $0x1b8] sm:$0xff]  ;;  %5586 = vmatpush2.msra.mxu1 %v5386_v9 }
 0x9da   : > { %v8402_v53 = vpop.eup %8401  ;;  %v4259_v38 = vrot.slane %v4186_v21, 7  ;;  %8427 = vrcp.f32 %v4106_v30  ;;  %v4188_v26 = vmul.f32 %v8400_v40, %v10725_v4  ;;  %v5385_v4 = vld [vmem:[%s12261_s11 + $0xb0] sm:$0xff]  ;;  %5811 = vmatpush2.msra.mxu0 %v5418_v58  ;;  %5587 = vmatprep.subr.mxu1 %v8518_v1 }
 0x9db   : > { %v8404_v5 = vpop.eup %8403  ;;  %v4260_v56 = vrot.slane %v4187_v36, 7  ;;  %8429 = vrcp.f32 %v4107_v27  ;;  %v4189_v13 = vmul.f32 %v8402_v53, %v10730_v54  ;;  %5812 = vmatprep.subr.mxu0 %v8518_v1  ;;  %5588 = vmatpush2.msra.mxu1 %v5385_v4  ;;  %v5382_v53 = vld [vmem:[%s12261_s11 + $0x98] sm:$0xff] }
 0x9dc   : > { %v8406_v37 = vpop.eup %8405  ;;  %v4353_v57 = vsel %vm1380_vm3, 0.0, %v4259_v38  ;;  %8431 = vrcp.f32 %v4108_v16  ;;  %v4262_v12 = vrot.slane %v4188_v26, 7  ;;  %v11137_v59 = vmul.f32 %v8404_v5, %v10736_v29  ;;  %5589 = vmatprep.subr.mxu1 %v8518_v1  ;;  %5813 = vmatpush2.msra.mxu0 %v5417_v3  ;;  %v4468_v26 = vld [vmem:[#allocation3 + $0x19] sm:$0xff] }
 0x9dd   : > { %v8408_v30 = vpop.eup %8407  ;;  %v4261_v54 = vsel %vm1380_vm3, %v4259_v38, %v4260_v56  ;;  %v4369_v27 = vsel %vm1380_vm3, %v4260_v56, 0.0  ;;  %4388 = vst.msk [vmem:[#allocation3 + $0x30] sm:$0xff] %vm2648_vm4, %v4353_v57  ;;  %8433 = vrcp.f32 %v4109_v49  ;;  %v4263_v0 = vrot.slane %v4189_v13, 7  ;;  %5590 = vmatpush2.msra.mxu1 %v5384_v46  ;;  %5814 = vmatprep.subr.mxu0 %v8518_v1  ;;  %v4469_v56 = vld [vmem:[#allocation3 + $0x21] sm:$0xff] }
 0x9de   : > { %v8410_v29 = vpop.eup %8409  ;;  %4389 = vst.msk [vmem:[#allocation3 + $0x38] sm:$0xff] %vm2648_vm4, %v4261_v54  ;;  %8435 = vrcp.f32 %v4110_v34  ;;  %v11150_v16 = vmul.f32 %v8406_v37, %v10750_v32  ;;  %v11153_v39 = vmul.f32 %v8408_v30, %v10757_v47  ;;  %v4354_v49 = vsel %vm1380_vm3, 0.0, %v4262_v12  ;;  %v5383_v47 = vld [vmem:[%s12261_s11 + $0xa0] sm:$0xff]  ;;  %5591 = vmatprep.subr.mxu1 %v8518_v1  ;;  %v5380_v54 = vld [vmem:[%s12261_s11 + $0x88] sm:$0xff] }
 0x9df   : > { %4390 = vst.msk [vmem:[#allocation3 + $0x40] sm:$0x3] %vm4218_vm6, %v4369_v27  ;;  %v8412_v22 = vpop.eup %8411  ;;  %8437 = vrcp.f32 %v4111_v60  ;;  %v4264_v41 = vsel %vm1380_vm3, %v4262_v12, %v4263_v0  ;;  %v11161_v34 = vmul.f32 %v8410_v29, %v10764_v31  ;;  %v4370_v32 = vsel %vm1380_vm3, %v4263_v0, 0.0  ;;  %5592 = vmatpush2.msra.mxu1 %v5383_v47 }
 0x9e0   : > { %4391 = vst.msk [vmem:[#allocation3 + $0x48] sm:$0xff] %vm2648_vm4, %v4354_v49  ;;  %v8414_v21 = vpop.eup %8413  ;;  %8439 = vrcp.f32 %v11098_v19  ;;  %4392 = vst.msk [vmem:[#allocation3 + $0x50] sm:$0xff] %vm2648_vm4, %v4264_v41  ;;  %v11172_v60 = vmul.f32 %v8412_v22, %v10770_v28  ;;  %v4265_v31 = vrot.slane %v11137_v59, 7  ;;  %v4266_v40 = vrot.slane %v11150_v16, 7  ;;  %5593 = vmatprep.subr.mxu1 %v8518_v1  ;;  %v11219_v59 = vld [vmem:[#allocation3 + $0x1a] sm:$0xff] }
 0x9e1   : > { %4393 = vst.msk [vmem:[#allocation3 + $0x58] sm:$0x3] %vm4218_vm6, %v4370_v32  ;;  %v8416_v36 = vpop.eup %8415  ;;  %8441 = vrcp.f32 %v11100_v6  ;;  %v11180_v9 = vmul.f32 %v8414_v21, %v10777_v52  ;;  %v4268_v19 = vrot.slane %v11153_v39, 7  ;;  %v4269_v28 = vrot.slane %v11161_v34, 7  ;;  %5594 = vmatpush2.msra.mxu1 %v5382_v53 }
 0x9e2   : > { %v8418_v38 = vpop.eup %8417  ;;  %8443 = vrcp.f32 %v11107_v62  ;;  %v11190_v58 = vmul.f32 %v8416_v36, %v10783_v55  ;;  %v4271_v52 = vrot.slane %v11172_v60, 7  ;;  %v4267_v6 = vsel %vm1380_vm3, %v4265_v31, %v4266_v40  ;;  %v5381_v62 = vld [vmem:[%s12261_s11 + $0x90] sm:$0xff]  ;;  %5595 = vmatprep.subr.mxu1 %v8518_v1 }
 0x9e3   : > { %v8420_v5 = vpop.eup %8419  ;;  %8445 = vrcp.f32 %v11109_v61  ;;  %v11198_v13 = vmul.f32 %v8418_v38, %v10789_v50  ;;  %v4272_v4 = vrot.slane %v11180_v9, 7  ;;  %v4270_v55 = vsel %vm1380_vm3, %v4268_v19, %v4269_v28  ;;  %4395 = vst.msk [vmem:[#allocation3 + $0x68] sm:$0xff] %vm2648_vm4, %v4267_v6  ;;  %v5416_v50 = vld [vmem:[%s12261_s11 + $0x1a8] sm:$0xff]  ;;  %5596 = vmatpush2.msra.mxu1 %v5381_v62  ;;  %v11265_v6 = vld [vmem:[%s12261_s11 + $0x238] sm:$0xff] }
 0x9e4   : > { %v8422_v61 = vpop.eup %8421  ;;  %v4532_v37 = vld [vmem:[#allocation3 + $0x30] sm:$0xff]  ;;  %8447 = vrcp.f32 %v11113_v15  ;;  %v11216_v57 = vmul.f32 %v8420_v5, %v10793_v2  ;;  %v4274_v12 = vrot.slane %v11190_v58, 7  ;;  %v4355_v30 = vsel %vm1380_vm3, 0.0, %v4265_v31  ;;  %4398 = vst.msk [vmem:[#allocation3 + $0x80] sm:$0xff] %vm2648_vm4, %v4270_v55  ;;  %5815 = vmatpush2.msra.mxu0 %v5416_v50  ;;  %5597 = vmatprep.subr.mxu1 %v8518_v1 }
 0x9e5   : > { %v8424_v27 = vpop.eup %8423  ;;  %v4533_v0 = vld [vmem:[#allocation3 + $0x38] sm:$0xff]  ;;  %v7885_v15 = vpack.i.bf16 %v4468_v26, %v4532_v37  ;;  %8449 = vrcp.f32 %v11115_v45  ;;  %v11230_v46 = vmul.f32 %v8422_v61, %v10797_v24  ;;  %v4275_v49 = vrot.slane %v11198_v13, 7  ;;  %4394 = vst.msk [vmem:[#allocation3 + $0x60] sm:$0xff] %vm2648_vm4, %v4355_v30  ;;  %5816 = vmatprep.subr.mxu0 %v8518_v1  ;;  %5598 = vmatpush2.msra.mxu1 %v5380_v54  ;;  %v5415_v5 = vld [vmem:[%s12261_s11 + $0x1a0] sm:$0xff] }
 0x9e6   : > { %v11227_v2 = vld [vmem:[#allocation3 + $0x39] sm:$0xff]  ;;  %v11232_v29 = vld [vmem:[#allocation3 + $0x31] sm:$0xff]  ;;  %v8426_v3 = vpop.eup %8425  ;;  %v7890_v22 = vpack.i.bf16 %v4469_v56, %v4533_v0  ;;  %8451 = vrcp.f32 %v11121_v23  ;;  %v11240_v45 = vmul.f32 %v8424_v27, %v10818_v42  ;;  %v4277_v24 = vrot.slane %v11216_v57, 7  ;;  %5599 = vmatprep.subr.mxu1 %v8518_v1  ;;  %5817 = vmatpush2.msra.mxu0 %v5415_v5 }
 0x9e7   : > { %v4534_v41 = vld [vmem:[#allocation3 + $0x48] sm:$0xff]  ;;  %v8428_v32 = vpop.eup %8427  ;;  %7886 = vrot.lane.b32.xlu0 %v7885_v15, %s12279_s0  ;;  %8453 = vrcp.f32 %v11128_v8  ;;  %v4535_v47 = vld [vmem:[#allocation3 + $0x50] sm:$0xff]  ;;  %v11246_v21 = vmul.f32 %v8426_v3, %v10827_v11  ;;  %v4278_v23 = vrot.slane %v11230_v46, 7  ;;  %v4273_v62 = vsel %vm1380_vm3, %v4271_v52, %v4272_v4  ;;  %5818 = vmatprep.subr.mxu0 %v8518_v1 }
 0x9e8   : > { %v7895_v31 = vpack.i.bf16 %v11232_v29, %v4534_v41  ;;  %v11250_v36 = vld [vmem:[#allocation3 + $0x49] sm:$0xff]  ;;  %v8430_v53 = vpop.eup %8429  ;;  %7891 = vrot.lane.b32.xlu1 %v7890_v22, %s12279_s0  ;;  %v7900_v8 = vpack.i.bf16 %v11227_v2, %v4535_v47  ;;  %v4202_v11 = vmul.f32 %v8428_v32, %v10843_v51  ;;  %v4280_v38 = vrot.slane %v11240_v45, 7  ;;  %4401 = vst.msk [vmem:[#allocation3 + $0x98] sm:$0xff] %vm2648_vm4, %v4273_v62 }
 0x9e9   : > { %v5379_v42 = vld [vmem:[%s12261_s11 + $0x80] sm:$0xff]  ;;  %v7910_v26 = vpack.i.bf16 %v11219_v59, %v11250_v36  ;;  %v8432_v56 = vpop.eup %8431  ;;  %v11271_v55 = vmul.f32 %v8430_v53, %v10850_v10  ;;  %v4281_v51 = vrot.slane %v11246_v21, 7  ;;  %v4276_v50 = vsel %vm1380_vm3, %v4274_v12, %v4275_v49  ;;  %v5414_v10 = vld [vmem:[%s12261_s11 + $0x198] sm:$0xff] }
 0x9ea   : > { %v8434_v61 = vpop.eup %8433  ;;  %v4204_v37 = vmul.f32 %v8432_v56, %v10861_v63  ;;  %v4283_v57 = vrot.slane %v4202_v11, 7  ;;  %v4279_v30 = vsel %vm1380_vm3, %v4277_v24, %v4278_v23  ;;  %v4356_v54 = vsel %vm1380_vm3, 0.0, %v4268_v19  ;;  %4404 = vst.msk [vmem:[#allocation3 + $0xb0] sm:$0xff] %vm2648_vm4, %v4276_v50  ;;  %5600 = vmatpush2.msra.mxu1 %v5379_v42  ;;  %5819 = vmatpush2.msra.mxu0 %v5414_v10  ;;  %v4473_v21 = vld [vmem:[#allocation3 + $0x51] sm:$0xff] }
 0x9eb   : > { %v8436_v27 = vpop.eup %8435  ;;  %v11299_v0 = vmul.f32 %v8434_v61, %v10867_v20  ;;  %7896 = vrot.lane.b32.xlu0 %v7895_v31, %s12279_s0  ;;  %v4284_v63 = vrot.slane %v11271_v55, 7  ;;  %v4282_v39 = vsel %vm1380_vm3, %v4280_v38, %v4281_v51  ;;  %v4357_v19 = vsel %vm1380_vm3, 0.0, %v4271_v52  ;;  %4397 = vst.msk [vmem:[#allocation3 + $0x78] sm:$0xff] %vm2648_vm4, %v4356_v54  ;;  %4407 = vst.msk [vmem:[#allocation3 + $0xc8] sm:$0xff] %vm2648_vm4, %v4279_v30  ;;  %v5413_v20 = vld [vmem:[%s12261_s11 + $0x190] sm:$0xff] }
 0x9ec   : > { %7221 = vmatprep.subr.mxu1 %v11265_v6  ;;  %v8438_v15 = vpop.eup %8437  ;;  %7901 = vrot.lane.b32.xlu1 %v7900_v8, %s12279_s0  ;;  %v4206_v3 = vmul.f32 %v8436_v27, %v10883_v44  ;;  %v4286_v22 = vrot.slane %v4204_v37, 7  ;;  %v4358_v60 = vsel %vm1380_vm3, 0.0, %v4274_v12  ;;  %v4359_v52 = vsel %vm1380_vm3, 0.0, %v4277_v24  ;;  %4400 = vst.msk [vmem:[#allocation3 + $0x90] sm:$0xff] %vm2648_vm4, %v4357_v19  ;;  %4410 = vst.msk [vmem:[#allocation3 + $0xe0] sm:$0xff] %vm2648_vm4, %v4282_v39  ;;  %v5412_v12 = vld [vmem:[%s12261_s11 + $0x188] sm:$0xff] }
 0x9ed   : > { %v8440_v45 = vpop.eup %8439  ;;  %v11324_v41 = vmul.f32 %v8438_v15, %v10891_v48  ;;  %v4287_v32 = vrot.slane %v11299_v0, 7  ;;  %v4285_v44 = vsel %vm1380_vm3, %v4283_v57, %v4284_v63  ;;  %v4360_v58 = vsel %vm1380_vm3, 0.0, %v4280_v38  ;;  %4403 = vst.msk [vmem:[#allocation3 + $0xa8] sm:$0xff] %vm2648_vm4, %v4358_v60  ;;  %4406 = vst.msk [vmem:[#allocation3 + $0xc0] sm:$0xff] %vm2648_vm4, %v4359_v52  ;;  %5820 = vmatprep.subr.mxu0 %v8518_v1  ;;  %v4536_v39 = vld [vmem:[#allocation3 + $0x60] sm:$0xff] }
 0x9ee   : > { %v8442_v48 = vpop.eup %8441  ;;  %v4208_v24 = vmul.f32 %v8440_v45, %v10904_v7  ;;  %v4289_v47 = vrot.slane %v4206_v3, 7  ;;  %v4361_v31 = vsel %vm1380_vm3, 0.0, %v4283_v57  ;;  %v4362_v42 = vsel %vm1380_vm3, 0.0, %v4286_v22  ;;  %4409 = vst.msk [vmem:[#allocation3 + $0xd8] sm:$0xff] %vm2648_vm4, %v4360_v58  ;;  %4413 = vst.msk [vmem:[#allocation3 + $0xf8] sm:$0xff] %vm2648_vm4, %v4285_v44  ;;  %5821 = vmatpush2.msra.mxu0 %v5413_v20  ;;  %v4537_v44 = vld [vmem:[#allocation3 + $0x68] sm:$0xff] }
 0x9ef   : > { %v8444_v53 = vpop.eup %8443  ;;  %v11343_v8 = vmul.f32 %v8442_v48, %v10915_v18  ;;  %v4290_v11 = vrot.slane %v11324_v41, 7  ;;  %v4288_v7 = vsel %vm1380_vm3, %v4286_v22, %v4287_v32  ;;  %v4371_v38 = vsel %vm1380_vm3, %v4266_v40, 0.0  ;;  %4412 = vst.msk [vmem:[#allocation3 + $0xf0] sm:$0xff] %vm2648_vm4, %v4361_v31  ;;  %4415 = vst.msk [vmem:[#allocation3 + $0x108] sm:$0xff] %vm2648_vm4, %v4362_v42  ;;  %5822 = vmatprep.subr.mxu0 %v8518_v1  ;;  %v5411_v18 = vld [vmem:[%s12261_s11 + $0x180] sm:$0xff]  ;;  %v4474_v58 = vld [vmem:[#allocation3 + $0x61] sm:$0xff] }
 0x9f0   : > { %v8446_v5 = vpop.eup %8445  ;;  %v4210_v56 = vmul.f32 %v8444_v53, %v10928_v35  ;;  %v4292_v62 = vrot.slane %v4208_v24, 7  ;;  %7911 = vrot.lane.b32.xlu1 %v7910_v26, %s12279_s0  ;;  %v4363_v16 = vsel %vm1380_vm3, 0.0, %v4289_v47  ;;  %v4372_v40 = vsel %vm1380_vm3, %v4269_v28, 0.0  ;;  %4396 = vst.msk [vmem:[#allocation3 + $0x70] sm:$0x3] %vm4218_vm6, %v4371_v38  ;;  %5823 = vmatpush2.msra.mxu0 %v5412_v12  ;;  %v11432_v12 = vld [vmem:[#allocation3 + $0x32] sm:$0xff] }
 0x9f1   : > { %4416 = vst.msk [vmem:[#allocation3 + $0x110] sm:$0xff] %vm2648_vm4, %v4288_v7  ;;  %v8448_v50 = vpop.eup %8447  ;;  %v4211_v35 = vmul.f32 %v8446_v5, %v10936_v17  ;;  %v4293_v10 = vrot.slane %v11343_v8, 7  ;;  %v4291_v61 = vsel %vm1380_vm3, %v4289_v47, %v4290_v11  ;;  %v4373_v59 = vsel %vm1380_vm3, %v4272_v4, 0.0  ;;  %4418 = vst.msk [vmem:[#allocation3 + $0x120] sm:$0xff] %vm2648_vm4, %v4363_v16  ;;  %5824 = vmatprep.subr.mxu0 %v8518_v1  ;;  %v11440_v31 = vld [vmem:[#allocation3 + $0x3a] sm:$0xff]  ;;  %v11446_v7 = vld [vmem:[#allocation3 + $0x4a] sm:$0xff] }
 0x9f2   : > { %4399 = vst.msk [vmem:[#allocation3 + $0x88] sm:$0x3] %vm4218_vm6, %v4372_v40  ;;  %v8450_v34 = vpop.eup %8449  ;;  %v4212_v28 = vmul.f32 %v8448_v50, %v10949_v43  ;;  %v4295_v26 = vrot.slane %v4210_v56, 7  ;;  %v4364_v17 = vsel %vm1380_vm3, 0.0, %v4292_v62  ;;  %v4374_v37 = vsel %vm1380_vm3, %v4275_v49, 0.0  ;;  %5825 = vmatpush2.msra.mxu0 %v5411_v18  ;;  %v4538_v24 = vld [vmem:[#allocation3 + $0x78] sm:$0xff] }
 0x9f3   : > { %4402 = vst.msk [vmem:[#allocation3 + $0xa0] sm:$0x3] %vm4218_vm6, %v4373_v59  ;;  %v8452_v9 = vpop.eup %8451  ;;  %v4213_v4 = vmul.f32 %v8450_v34, %v10960_v33  ;;  %v4296_v57 = vrot.slane %v4211_v35, 7  ;;  %v4294_v1 = vsel %vm1380_vm3, %v4292_v62, %v4293_v10  ;;  %v4375_v43 = vsel %vm1380_vm3, %v4278_v23, 0.0  ;;  %4405 = vst.msk [vmem:[#allocation3 + $0xb8] sm:$0x3] %vm4218_vm6, %v4374_v37 }
 0x9f4   : > { %4419 = vst.msk [vmem:[#allocation3 + $0x128] sm:$0xff] %vm2648_vm4, %v4291_v61  ;;  %4421 = vst.msk [vmem:[#allocation3 + $0x138] sm:$0xff] %vm2648_vm4, %v4364_v17  ;;  %v8454_v13 = vpop.eup %8453  ;;  %v4214_v49 = vmul.f32 %v8452_v9, %v10970_v25  ;;  %v4298_v30 = vrot.slane %v4212_v28, 7  ;;  %v4365_v54 = vsel %vm1380_vm3, 0.0, %v4295_v26  ;;  %v4376_v33 = vsel %vm1380_vm3, %v4281_v51, 0.0  ;;  %v11406_v51 = vld [vmem:[#allocation3 + $0x22] sm:$0xff] }
 0x9f5   : > { %4408 = vst.msk [vmem:[#allocation3 + $0xd0] sm:$0x3] %vm4218_vm6, %v4375_v43  ;;  %v4215_v46 = vmul.f32 %v8454_v13, %v10977_v14  ;;  %v4299_v23 = vrot.slane %v4213_v4, 7  ;;  %v4297_v27 = vsel %vm1380_vm3, %v4295_v26, %v4296_v57  ;;  %v4377_v25 = vsel %vm1380_vm3, %v4284_v63, 0.0  ;;  %4411 = vst.msk [vmem:[#allocation3 + $0xe8] sm:$0x3] %vm4218_vm6, %v4376_v33 }
 0x9f6   : > { %4422 = vst.msk [vmem:[#allocation3 + $0x140] sm:$0xff] %vm2648_vm4, %v4294_v1  ;;  %4424 = vst.msk [vmem:[#allocation3 + $0x150] sm:$0xff] %vm2648_vm4, %v4365_v54  ;;  %v4301_v19 = vrot.slane %v4214_v49, 7  ;;  %v4366_v20 = vsel %vm1380_vm3, 0.0, %v4298_v30  ;;  %v4378_v14 = vsel %vm1380_vm3, %v4287_v32, 0.0  ;;  %v4379_v15 = vsel %vm1380_vm3, %v4290_v11, 0.0 }
 0x9f7   : > { %4414 = vst.msk [vmem:[#allocation3 + $0x100] sm:$0x3] %vm4218_vm6, %v4377_v25  ;;  %v4302_v55 = vrot.slane %v4215_v46, 7  ;;  %v4300_v63 = vsel %vm1380_vm3, %v4298_v30, %v4299_v23  ;;  %v4380_v3 = vsel %vm1380_vm3, %v4293_v10, 0.0  ;;  %v4381_v22 = vsel %vm1380_vm3, %v4296_v57, 0.0  ;;  %v4475_v47 = vld [vmem:[#allocation3 + $0x69] sm:$0xff] }
 0x9f8   : > { %4425 = vst.msk [vmem:[#allocation3 + $0x158] sm:$0xff] %vm2648_vm4, %v4297_v27  ;;  %4427 = vst.msk [vmem:[#allocation3 + $0x168] sm:$0xff] %vm2648_vm4, %v4366_v20  ;;  %v4367_v0 = vsel %vm1380_vm3, 0.0, %v4301_v19  ;;  %v4382_v60 = vsel %vm1380_vm3, %v4299_v23, 0.0  ;;  %v7905_v52 = vpack.i.bf16 %v11232_v29, %v4536_v39  ;;  %v7920_v45 = vpack.i.bf16 %v11406_v51, %v4473_v21  ;;  %v4539_v8 = vld [vmem:[#allocation3 + $0x80] sm:$0xff]  ;;  %v4540_v18 = vld [vmem:[#allocation3 + $0x90] sm:$0xff] }
 0x9f9   : > { %4417 = vst.msk [vmem:[#allocation3 + $0x118] sm:$0x3] %vm4218_vm6, %v4378_v14  ;;  %4420 = vst.msk [vmem:[#allocation3 + $0x130] sm:$0x3] %vm4218_vm6, %v4379_v15  ;;  %v4303_v41 = vsel %vm1380_vm3, %v4301_v19, %v4302_v55  ;;  %v4383_v32 = vsel %vm1380_vm3, %v4302_v55, 0.0  ;;  %v7915_v29 = vpack.i.bf16 %v11227_v2, %v4537_v44  ;;  %v7930_v48 = vpack.i.bf16 %v11432_v12, %v4474_v58  ;;  %v4476_v11 = vld [vmem:[#allocation3 + $0x79] sm:$0xff] }
 0x9fa   : > { %4423 = vst.msk [vmem:[#allocation3 + $0x148] sm:$0x3] %vm4218_vm6, %v4380_v3  ;;  %4426 = vst.msk [vmem:[#allocation3 + $0x160] sm:$0x3] %vm4218_vm6, %v4381_v22  ;;  %7906 = vrot.lane.b32.xlu0 %v7905_v52, %s12279_s0  ;;  %7921 = vrot.lane.b32.xlu1 %v7920_v45, %s12279_s0  ;;  %v7925_v42 = vpack.i.bf16 %v11250_v36, %v4538_v24  ;;  %v7940_v53 = vpack.i.bf16 %v11440_v31, %v4475_v47  ;;  %v4477_v5 = vld [vmem:[#allocation3 + $0x81] sm:$0xff]  ;;  %v11451_v56 = vld [vmem:[#allocation3 + $0x52] sm:$0xff] }
 0x9fb   : > { %4428 = vst.msk [vmem:[#allocation3 + $0x170] sm:$0xff] %vm2648_vm4, %v4300_v63  ;;  %4430 = vst.msk [vmem:[#allocation3 + $0x180] sm:$0xff] %vm2648_vm4, %v4367_v0  ;;  %v7935_v2 = vpack.i.bf16 %v4473_v21, %v4539_v8  ;;  %v7950_v38 = vpack.i.bf16 %v11446_v7, %v4476_v11  ;;  %v7945_v36 = vpack.i.bf16 %v4474_v58, %v4540_v18  ;;  %v4541_v16 = vld [vmem:[#allocation3 + $0x98] sm:$0xff]  ;;  %v11456_v50 = vld [vmem:[#allocation3 + $0x62] sm:$0xff] }
 0x9fc   : > { %4429 = vst.msk [vmem:[#allocation3 + $0x178] sm:$0x3] %vm4218_vm6, %v4382_v60  ;;  %4432 = vst.msk [vmem:[#allocation3 + $0x190] sm:$0x3] %vm4218_vm6, %v4383_v32  ;;  %v7960_v62 = vpack.i.bf16 %v11451_v56, %v4477_v5  ;;  %v4478_v40 = vld [vmem:[#allocation3 + $0x91] sm:$0xff]  ;;  %v11463_v35 = vld [vmem:[%s12263_s13 + $0x18] sm:$0xff]  ;;  %v7955_v10 = vpack.i.bf16 %v4475_v47, %v4541_v16 }
 0x9fd   : > { %4431 = vst.msk [vmem:[#allocation3 + $0x188] sm:$0xff] %vm2648_vm4, %v4303_v41  ;;  %7285 = vmatprep.subr.mxu0 %v11463_v35  ;;  %v7970_v61 = vpack.i.bf16 %v11456_v50, %v4478_v40  ;;  %v4542_v59 = vld [vmem:[#allocation3 + $0xa8] sm:$0xff]  ;;  %v4479_v34 = vld [vmem:[#allocation3 + $0x99] sm:$0xff]  ;;  %v4543_v37 = vld [vmem:[#allocation3 + $0xb0] sm:$0xff] }
 0x9fe   : > { %7916 = vrot.lane.b32.xlu0 %v7915_v29, %s12279_s0  ;;  %7931 = vrot.lane.b32.xlu1 %v7930_v48, %s12279_s0  ;;  %v11467_v28 = vld [vmem:[#allocation3 + $0x6a] sm:$0xff]  ;;  %v7965_v26 = vpack.i.bf16 %v4476_v11, %v4542_v59  ;;  %v4602_v4 = vld [vmem:[#allocation3 + $0x7a] sm:$0xff]  ;;  %v7975_v57 = vpack.i.bf16 %v4477_v5, %v4543_v37  ;;  %v4603_v49 = vld [vmem:[#allocation3 + $0x82] sm:$0xff] }
 0x9ff   : > { %v7980_v17 = vpack.i.bf16 %v11467_v28, %v4479_v34  ;;  %v4480_v9 = vld [vmem:[#allocation3 + $0xa9] sm:$0xff]  ;;  %v4544_v43 = vld [vmem:[#allocation3 + $0xc0] sm:$0xff]  ;;  %v4481_v13 = vld [vmem:[#allocation3 + $0xb1] sm:$0xff] }
 0xa00   : > { %v7990_v1 = vpack.i.bf16 %v4602_v4, %v4480_v9  ;;  %v7985_v30 = vpack.i.bf16 %v4478_v40, %v4544_v43  ;;  %v8000_v54 = vpack.i.bf16 %v4603_v49, %v4481_v13  ;;  %v4545_v33 = vld [vmem:[#allocation3 + $0xc8] sm:$0xff]  ;;  %v4604_v23 = vld [vmem:[#allocation3 + $0x92] sm:$0xff]  ;;  %v4605_v19 = vld [vmem:[#allocation3 + $0x9a] sm:$0xff] }
 0xa01   : > { %v4482_v46 = vld [vmem:[#allocation3 + $0xc1] sm:$0xff]  ;;  %v7995_v27 = vpack.i.bf16 %v4479_v34, %v4545_v33  ;;  %v4546_v39 = vld [vmem:[#allocation3 + $0xd8] sm:$0xff]  ;;  %v4483_v21 = vld [vmem:[#allocation3 + $0xc9] sm:$0xff] }
 0xa02   : > { %7926 = vrot.lane.b32.xlu0 %v7925_v42, %s12279_s0  ;;  %7941 = vrot.lane.b32.xlu1 %v7940_v53, %s12279_s0  ;;  %v8010_v25 = vpack.i.bf16 %v4604_v23, %v4482_v46  ;;  %v8005_v20 = vpack.i.bf16 %v4480_v9, %v4546_v39  ;;  %v8020_v14 = vpack.i.bf16 %v4605_v19, %v4483_v21  ;;  %v4547_v15 = vld [vmem:[#allocation3 + $0xe0] sm:$0xff]  ;;  %v4606_v63 = vld [vmem:[#allocation3 + $0xaa] sm:$0xff]  ;;  %v4607_v52 = vld [vmem:[#allocation3 + $0xb2] sm:$0xff] }
 0xa03   : > { %v4484_v55 = vld [vmem:[#allocation3 + $0xd9] sm:$0xff]  ;;  %v8015_v3 = vpack.i.bf16 %v4481_v13, %v4547_v15  ;;  %v4548_v0 = vld [vmem:[#allocation3 + $0xf0] sm:$0xff]  ;;  %v4485_v60 = vld [vmem:[#allocation3 + $0xe1] sm:$0xff] }
 0xa04   : > { %v8030_v22 = vpack.i.bf16 %v4606_v63, %v4484_v55  ;;  %v8025_v45 = vpack.i.bf16 %v4482_v46, %v4548_v0  ;;  %v8040_v41 = vpack.i.bf16 %v4607_v52, %v4485_v60  ;;  %v4549_v32 = vld [vmem:[#allocation3 + $0xf8] sm:$0xff]  ;;  %v4608_v58 = vld [vmem:[#allocation3 + $0xc2] sm:$0xff]  ;;  %v4609_v42 = vld [vmem:[#allocation3 + $0xca] sm:$0xff] }
 0xa05   : > { %v4486_v44 = vld [vmem:[#allocation3 + $0xf1] sm:$0xff]  ;;  %v8035_v29 = vpack.i.bf16 %v4483_v21, %v4549_v32  ;;  %v4550_v24 = vld [vmem:[#allocation3 + $0x108] sm:$0xff]  ;;  %v4487_v47 = vld [vmem:[#allocation3 + $0xf9] sm:$0xff] }
 0xa06   : > { %7936 = vrot.lane.b32.xlu0 %v7935_v2, %s12279_s0  ;;  %7951 = vrot.lane.b32.xlu1 %v7950_v38, %s12279_s0  ;;  %v8050_v48 = vpack.i.bf16 %v4608_v58, %v4486_v44  ;;  %v8045_v53 = vpack.i.bf16 %v4484_v55, %v4550_v24  ;;  %v8060_v8 = vpack.i.bf16 %v4609_v42, %v4487_v47  ;;  %v4551_v11 = vld [vmem:[#allocation3 + $0x110] sm:$0xff]  ;;  %v4610_v38 = vld [vmem:[#allocation3 + $0xda] sm:$0xff]  ;;  %v4611_v16 = vld [vmem:[#allocation3 + $0xe2] sm:$0xff] }
 0xa07   : > { %v4488_v2 = vld [vmem:[#allocation3 + $0x109] sm:$0xff]  ;;  %v8055_v18 = vpack.i.bf16 %v4485_v60, %v4551_v11  ;;  %v4490_v59 = vld [vmem:[#allocation3 + $0x121] sm:$0xff]  ;;  %v4612_v34 = vld [vmem:[#allocation3 + $0xf2] sm:$0xff] }
 0xa08   : > { %v8070_v5 = vpack.i.bf16 %v4610_v38, %v4488_v2  ;;  %v4554_v37 = vld [vmem:[#allocation3 + $0x138] sm:$0xff]  ;;  %v4491_v9 = vld [vmem:[#allocation3 + $0x129] sm:$0xff]  ;;  %v4555_v43 = vld [vmem:[#allocation3 + $0x140] sm:$0xff] }
 0xa09   : > { %v4613_v4 = vld [vmem:[#allocation3 + $0xfa] sm:$0xff]  ;;  %v4614_v49 = vld [vmem:[#allocation3 + $0x10a] sm:$0xff]  ;;  %v4615_v23 = vld [vmem:[#allocation3 + $0x112] sm:$0xff] }
 0xa0a   : > { %7946 = vrot.lane.b32.xlu0 %v7945_v36, %s12279_s0  ;;  %7961 = vrot.lane.b32.xlu1 %v7960_v62, %s12279_s0  ;;  %v4552_v36 = vld [vmem:[#allocation3 + $0x120] sm:$0xff]  ;;  %v4489_v62 = vld [vmem:[#allocation3 + $0x111] sm:$0xff]  ;;  %v4435_v58 = vld [vmem:[#allocation3 + $0x8] sm:$0xff] }
 0xa0b   : > { %v8065_v40 = vpack.i.bf16 %v4486_v44, %v4552_v36  ;;  %v4492_v13 = vld [vmem:[#allocation3 + $0x139] sm:$0xff]  ;;  %v4556_v33 = vld [vmem:[#allocation3 + $0x150] sm:$0xff]  ;;  %v4493_v46 = vld [vmem:[#allocation3 + $0x141] sm:$0xff] }
 0xa0c   : > { %v4434_v39 = vld [vmem:[#allocation3] sm:$0xff]  ;;  %v8105_v21 = vpack.i.bf16 %v4490_v59, %v4556_v33  ;;  %v8120_v19 = vpack.i.bf16 %v4615_v23, %v4493_v46  ;;  %v4499_v55 = vld [vmem:[#allocation3 + $0xa] sm:$0xff]  ;;  %v4557_v63 = vld [vmem:[#allocation3 + $0x158] sm:$0xff] }
 0xa0d   : > { %v4495_v24 = vld [vmem:[#allocation3 + $0x159] sm:$0xff]  ;;  %v11515_v38 = vld [vmem:[#allocation3 + $0x169] sm:$0xff] }
 0xa0e   : > { %7956 = vrot.lane.b32.xlu0 %v7955_v10, %s12279_s0  ;;  %7971 = vrot.lane.b32.xlu1 %v7970_v61, %s12279_s0  ;;  %v8080_v10 = vpack.i.bf16 %v4611_v16, %v4489_v62  ;;  %v4553_v61 = vld [vmem:[#allocation3 + $0x128] sm:$0xff]  ;;  %v5432_v11 = vld [vmem:[%s12261_s11 + $0x228] sm:$0xff] }
 0xa0f   : > { %v4497_v16 = vld [vmem:[#allocation3 + $0x171] sm:$0xff] }
 0xa10   : > { %v4436_v33 = vld [vmem:[#allocation3 + $0x18] sm:$0xff] }
 0xa11   : > { %v4623_v23 = vld [vmem:[#allocation3 + $0x172] sm:$0xff] }
 0xa12   : > { %7966 = vrot.lane.b32.xlu0 %v7965_v26, %s12279_s0  ;;  %7981 = vrot.lane.b32.xlu1 %v7980_v17, %s12279_s0  ;;  %v8075_v26 = vpack.i.bf16 %v4487_v47, %v4553_v61  ;;  %v8090_v17 = vpack.i.bf16 %v4612_v34, %v4490_v59  ;;  %v4617_v47 = vld [vmem:[#allocation3 + $0x12a] sm:$0xff]  ;;  %v5429_v34 = vld [vmem:[%s12261_s11 + $0x210] sm:$0xff] }
 0xa16   : > { %7976 = vrot.lane.b32.xlu0 %v7975_v57, %s12279_s0  ;;  %7991 = vrot.lane.b32.xlu1 %v7990_v1, %s12279_s0  ;;  %v8085_v57 = vpack.i.bf16 %v4488_v2, %v4554_v37  ;;  %v8100_v1 = vpack.i.bf16 %v4613_v4, %v4491_v9  ;;  %v4559_v2 = vld [vmem:[#allocation3 + $0x170] sm:$0xff] }
 0xa1a   : > { %7986 = vrot.lane.b32.xlu0 %v7985_v30, %s12279_s0  ;;  %8001 = vrot.lane.b32.xlu1 %v8000_v54, %s12279_s0  ;;  %v8095_v30 = vpack.i.bf16 %v4489_v62, %v4555_v43  ;;  %v8110_v54 = vpack.i.bf16 %v4614_v49, %v4492_v13  ;;  %v4560_v62 = vld [vmem:[#allocation3 + $0x180] sm:$0xff] }
 0xa1e   : > { %7996 = vrot.lane.b32.xlu0 %v7995_v27, %s12279_s0  ;;  %8011 = vrot.lane.b32.xlu1 %v8010_v25, %s12279_s0  ;;  %v4498_v25 = vld [vmem:[#allocation3 + $0x2] sm:$0xff] }
 0xa22   : > { %8006 = vrot.lane.b32.xlu0 %v8005_v20, %s12279_s0  ;;  %8021 = vrot.lane.b32.xlu1 %v8020_v14, %s12279_s0 }
 0xa26   : > { %8016 = vrot.lane.b32.xlu0 %v8015_v3, %s12279_s0  ;;  %8031 = vrot.lane.b32.xlu1 %v8030_v22, %s12279_s0  ;;  %v4494_v3 = vld [vmem:[#allocation3 + $0x151] sm:$0xff]  ;;  %v4616_v22 = vld [vmem:[#allocation3 + $0x122] sm:$0xff] }
 0xa27   : > { %v8130_v32 = vpack.i.bf16 %v4616_v22, %v4494_v3  ;;  %v8145_v61 = vpack.i.bf16 %v4494_v3, %v4560_v62  ;;  %v4690_v3 = vld [vmem:[#allocation3 + $0x1a1] sm:$0xff] }
 0xa28   : > { %v4437_v22 = vld [vmem:[#allocation3 + $0x20] sm:$0xff] }
 0xa2a   : > { %8026 = vrot.lane.b32.xlu0 %v8025_v45, %s12279_s0  ;;  %8041 = vrot.lane.b32.xlu1 %v8040_v41, %s12279_s0  ;;  %v8115_v41 = vpack.i.bf16 %v4491_v9, %v4557_v63 }
 0xa2e   : > { %8036 = vrot.lane.b32.xlu0 %v8035_v29, %s12279_s0  ;;  %8051 = vrot.lane.b32.xlu1 %v8050_v48, %s12279_s0  ;;  %v5433_v29 = vld [vmem:[%s12261_s11 + $0x230] sm:$0xff]  ;;  %v4558_v48 = vld [vmem:[#allocation3 + $0x168] sm:$0xff] }
 0xa32   : > { %8046 = vrot.lane.b32.xlu0 %v8045_v53, %s12279_s0  ;;  %8061 = vrot.lane.b32.xlu1 %v8060_v8, %s12279_s0  ;;  %v8125_v53 = vpack.i.bf16 %v4492_v13, %v4558_v48  ;;  %v8140_v8 = vpack.i.bf16 %v4617_v47, %v4495_v24  ;;  %v4500_v13 = vld [vmem:[#allocation3 + $0x1a] sm:$0xff] }
 0xa33   : > { %v4689_v48 = vld [vmem:[#allocation3 + $0x199] sm:$0xff] }
 0xa36   : > { %8056 = vrot.lane.b32.xlu0 %v8055_v18, %s12279_s0  ;;  %8071 = vrot.lane.b32.xlu1 %v8070_v5, %s12279_s0  ;;  %v4618_v18 = vld [vmem:[#allocation3 + $0x13a] sm:$0xff]  ;;  %v8135_v5 = vpack.i.bf16 %v4493_v46, %v4559_v2  ;;  %v4620_v46 = vld [vmem:[#allocation3 + $0x152] sm:$0xff] }
 0xa37   : > { %v8150_v36 = vpack.i.bf16 %v4618_v18, %v11515_v38 }
 0xa3a   : > { %8066 = vrot.lane.b32.xlu0 %v8065_v40, %s12279_s0  ;;  %8081 = vrot.lane.b32.xlu1 %v8080_v10, %s12279_s0  ;;  %v4619_v40 = vld [vmem:[#allocation3 + $0x142] sm:$0xff] }
 0xa3b   : > { %v5430_v10 = vld [vmem:[%s12261_s11 + $0x218] sm:$0xff]  ;;  %v8160_v59 = vpack.i.bf16 %v4619_v40, %v4497_v16 }
 0xa3e   : > { %8076 = vrot.lane.b32.xlu0 %v8075_v26, %s12279_s0  ;;  %8091 = vrot.lane.b32.xlu1 %v8090_v17, %s12279_s0  ;;  %v4561_v26 = vld [vmem:[#allocation3 + $0x188] sm:$0xff]  ;;  %v4621_v17 = vld [vmem:[#allocation3 + $0x15a] sm:$0xff] }
 0xa3f   : > { %v8155_v49 = vpack.i.bf16 %v4495_v24, %v4561_v26  ;;  %v4627_v24 = vld [vmem:[#allocation3 + $0x30] sm:$0xff] }
 0xa42   : > { %8086 = vrot.lane.b32.xlu0 %v8085_v57, %s12279_s0  ;;  %8101 = vrot.lane.b32.xlu1 %v8100_v1, %s12279_s0  ;;  %v5428_v1 = vld [vmem:[%s12261_s11 + $0x208] sm:$0xff] }
 0xa46   : > { %8096 = vrot.lane.b32.xlu0 %v8095_v30, %s12279_s0  ;;  %8111 = vrot.lane.b32.xlu1 %v8110_v54, %s12279_s0  ;;  %v8170_v30 = vpack.i.bf16 %v4621_v17, %v4497_v16  ;;  %v4562_v16 = vld [vmem:[#allocation3 + $0x19] sm:$0xff] }
 0xa47   : > { %v7877_v27 = vpop.permute.xlu0 %7876 }
 0xa48   : > { %v7879_v20 = vunpack.i.h.bf16 %v7877_v27  ;;  %v7878_v14 = vunpack.i.l.bf16 %v7877_v27  ;;  %v7882_v15 = vpop.permute.xlu1 %7881  ;;  %v4688_v27 = vld [vmem:[#allocation3 + $0x189] sm:$0xff] }
 0xa49   : > { %v7883_v0 = vunpack.i.l.bf16 %v7882_v15  ;;  %v7884_v45 = vunpack.i.h.bf16 %v7882_v15  ;;  %v8165_v15 = vpack.i.bf16 %v4620_v46, %v11515_v38 }
 0xa4a   : > { %8106 = vrot.lane.b32.xlu0 %v8105_v21, %s12279_s0  ;;  %8121 = vrot.lane.b32.xlu1 %v8120_v19, %s12279_s0  ;;  %v5267_v60 = vsel %vm2648_vm4, %v4498_v25, %v7878_v14  ;;  %v5235_v52 = vsel %vm2648_vm4, %v4434_v39, %v7879_v20  ;;  %v5427_v19 = vld [vmem:[%s12261_s11 + $0x200] sm:$0xff] }
 0xa4b   : > { %5601 = vmatprep.mubr.f32.mxu1 %v5267_v60  ;;  %v5268_v44 = vsel %vm2648_vm4, %v4499_v55, %v7883_v0  ;;  %v5236_v42 = vsel %vm2648_vm4, %v4435_v58, %v7884_v45  ;;  %v8180_v55 = vpack.i.bf16 %v4623_v23, %v4688_v27  ;;  %v4622_v0 = vld [vmem:[#allocation3 + $0x16a] sm:$0xff]  ;;  %v4687_v60 = vld [vmem:[#allocation3 + $0x181] sm:$0xff]  ;;  %v11579_v27 = vld [vmem:[%s12263_s13 + $0x8] sm:$0xff] }
 0xa4c   : > { %5602 = vmatmul.mubr.f32.vlgmr.msra.gmra.mxu1 %v5235_v52  ;;  %v4625_v52 = vld [vmem:[#allocation3 + $0x18a] sm:$0xff] }
 0xa4d   : > { %7222 = vmatpush3.msra.mxu1 %v11265_v6  ;;  %5606 = vmatprep.mubr.f32.mxu1 %v5268_v44  ;;  %v5431_v6 = vld [vmem:[%s12261_s11 + $0x220] sm:$0xff]  ;;  %v8175_v44 = vpack.i.bf16 %v4622_v0, %v4687_v60  ;;  %v8190_v58 = vpack.i.bf16 %v4625_v52, %v4690_v3  ;;  %v4565_v52 = vld [vmem:[#allocation3 + $0x39] sm:$0xff] }
 0xa4e   : > { %8116 = vrot.lane.b32.xlu0 %v8115_v41, %s12279_s0  ;;  %8131 = vrot.lane.b32.xlu1 %v8130_v32, %s12279_s0 }
 0xa4f   : > { %7223 = vmatprep.subr.mxu1 %v5433_v29 }
 0xa50   : > { %5607 = vmatmul.mubr.f32.gmra.mxu1 %v5236_v42 }
 0xa51   : > { %7224 = vmatpush3.msra.mxu1 %v5433_v29  ;;  %v4624_v29 = vld [vmem:[#allocation3 + $0x182] sm:$0xff] }
 0xa52   : > { %8126 = vrot.lane.b32.xlu0 %v8125_v53, %s12279_s0  ;;  %8141 = vrot.lane.b32.xlu1 %v8140_v8, %s12279_s0  ;;  %v8185_v8 = vpack.i.bf16 %v4624_v29, %v4689_v48 }
 0xa53   : > { %7225 = vmatprep.subr.mxu1 %v5432_v11 }
 0xa54   : > { %7226 = vmatpush3.msra.mxu1 %v5432_v11  ;;  %v4628_v11 = vld [vmem:[#allocation3 + $0x38] sm:$0xff] }
 0xa55   : > { %7227 = vmatprep.subr.mxu1 %v5431_v6 }
 0xa56   : > { %8136 = vrot.lane.b32.xlu0 %v8135_v5, %s12279_s0  ;;  %8151 = vrot.lane.b32.xlu1 %v8150_v36, %s12279_s0 }
 0xa57   : > { %7228 = vmatpush3.msra.mxu1 %v5431_v6 }
 0xa58   : > { %7229 = vmatprep.subr.mxu1 %v5430_v10 }
 0xa59   : > { %v7887_v37 = vpop.permute.xlu0 %7886  ;;  %7230 = vmatpush3.msra.mxu1 %v5430_v10 }
 0xa5a   : > { %8146 = vrot.lane.b32.xlu0 %v8145_v61, %s12279_s0  ;;  %8161 = vrot.lane.b32.xlu1 %v8160_v59, %s12279_s0  ;;  %v7892_v9 = vpop.permute.xlu1 %7891  ;;  %v7889_v4 = vunpack.i.h.bf16 %v7887_v37  ;;  %v7888_v57 = vunpack.i.l.bf16 %v7887_v37  ;;  %v4629_v61 = vld [vmem:[#allocation3 + $0x48] sm:$0xff] }
 0xa5b   : > { %v7893_v43 = vunpack.i.l.bf16 %v7892_v9  ;;  %7231 = vmatprep.subr.mxu1 %v5429_v34  ;;  %v7894_v39 = vunpack.i.h.bf16 %v7892_v9  ;;  %v11567_v9 = vld [vmem:[%s12263_s13 + $0x10] sm:$0xff] }
 0xa5c   : > { %v5269_v54 = vsel %vm2648_vm4, %v4500_v13, %v7888_v57  ;;  %7232 = vmatpush3.msra.mxu1 %v5429_v34  ;;  %v5237_v21 = vsel %vm2648_vm4, %v4436_v33, %v7889_v4 }
 0xa5d   : > { %v7897_v25 = vpop.permute.xlu0 %7896  ;;  %5611 = vmatprep.mubr.f32.mxu1 %v5269_v54  ;;  %7233 = vmatprep.subr.mxu1 %v5428_v1  ;;  %v5270_v14 = vsel %vm2648_vm4, %v11406_v51, %v7893_v43  ;;  %v5238_v41 = vsel %vm2648_vm4, %v4437_v22, %v7894_v39  ;;  %v4564_v39 = vld [vmem:[#allocation3 + $0x31] sm:$0xff] }
 0xa5e   : > { %8156 = vrot.lane.b32.xlu0 %v8155_v49, %s12279_s0  ;;  %8171 = vrot.lane.b32.xlu1 %v8170_v30, %s12279_s0  ;;  %v7898_v20 = vunpack.i.l.bf16 %v7897_v25  ;;  %v7902_v63 = vpop.permute.xlu1 %7901  ;;  %v7899_v45 = vunpack.i.h.bf16 %v7897_v25  ;;  %v4630_v49 = vld [vmem:[#allocation3 + $0x50] sm:$0xff] }
 0xa5f   : > { %5612 = vmatmul.mubr.f32.gmra.mxu1 %v5237_v21  ;;  %v7903_v51 = vunpack.i.l.bf16 %v7902_v63  ;;  %v7904_v47 = vunpack.i.h.bf16 %v7902_v63  ;;  %v11591_v22 = vld [vmem:[%s12263_s13] sm:$0xff] }
 0xa60   : > { %5616 = vmatprep.mubr.f32.mxu1 %v5270_v14  ;;  %7234 = vmatpush3.msra.mxu1 %v5428_v1  ;;  %v5271_v32 = vsel %vm2648_vm4, %v11432_v12, %v7898_v20  ;;  %v5239_v53 = vsel %vm2648_vm4, %v4627_v24, %v7899_v45  ;;  %v4563_v1 = vld [vmem:[#allocation3 + $0x21] sm:$0xff] }
 0xa61   : > { %7235 = vmatprep.subr.mxu1 %v5427_v19  ;;  %v5272_v12 = vsel %vm2648_vm4, %v11440_v31, %v7903_v51  ;;  %v5240_v38 = vsel %vm2648_vm4, %v4628_v11, %v7904_v47  ;;  %v4631_v20 = vld [vmem:[#allocation3 + $0x60] sm:$0xff]  ;;  %v4632_v51 = vld [vmem:[#allocation3 + $0x68] sm:$0xff] }
 0xa62   : > { %8166 = vrot.lane.b32.xlu0 %v8165_v15, %s12279_s0  ;;  %8181 = vrot.lane.b32.xlu1 %v8180_v55, %s12279_s0  ;;  %v7912_v42 = vpop.permute.xlu1 %7911 }
 0xa63   : > { %5617 = vmatmul.mubr.f32.gmra.mxu1 %v5238_v41  ;;  %v7914_v2 = vunpack.i.h.bf16 %v7912_v42  ;;  %v7913_v18 = vunpack.i.l.bf16 %v7912_v42  ;;  %v4566_v42 = vld [vmem:[#allocation3 + $0x49] sm:$0xff] }
 0xa64   : > { %5621 = vmatprep.mubr.f32.mxu1 %v5271_v32  ;;  %7236 = vmatpush3.msra.mxu1 %v5427_v19 }
 0xa65   : > { %7341 = vmatprep.subr.mxu1 %v11463_v35  ;;  %v5299_v10 = vsel %vm2648_vm4, %v4562_v16, %v7914_v2  ;;  %v5241_v37 = vsel %vm2648_vm4, %v4629_v61, %v7913_v18  ;;  %v4567_v16 = vld [vmem:[#allocation3 + $0x51] sm:$0xff] }
 0xa66   : > { %8176 = vrot.lane.b32.xlu0 %v8175_v44, %s12279_s0  ;;  %8191 = vrot.lane.b32.xlu1 %v8190_v58, %s12279_s0 }
 0xa67   : > { %5622 = vmatmul.mubr.f32.gmra.mxu1 %v5239_v53 }
 0xa68   : > { %5626 = vmatprep.mubr.f32.mxu1 %v5272_v12 }
 0xa6a   : > { %8186 = vrot.lane.b32.xlu0 %v8185_v8, %s12279_s0  ;;  %v11601_v8 = vld [vmem:[#allocation3 + $0x7a] sm:$0xff] }
 0xa6b   : > { %5627 = vmatmul.mubr.f32.gmra.mxu1 %v5240_v38 }
 0xa6c   : > { %v7907_v6 = vpop.permute.xlu0 %7906  ;;  %v7922_v5 = vpop.permute.xlu1 %7921 }
 0xa6d   : > { %v7909_v36 = vunpack.i.h.bf16 %v7907_v6  ;;  %v7908_v62 = vunpack.i.l.bf16 %v7907_v6  ;;  %v7924_v40 = vunpack.i.h.bf16 %v7922_v5  ;;  %v7923_v34 = vunpack.i.l.bf16 %v7922_v5 }
 0xa6f   : > { %v5331_v31 = vsel %vm2648_vm4, %v4627_v24, %v7909_v36  ;;  %v5273_v59 = vsel %vm2648_vm4, %v11446_v7, %v7908_v62  ;;  %v5300_v7 = vsel %vm2648_vm4, %v4563_v1, %v7924_v40  ;;  %v5242_v23 = vsel %vm2648_vm4, %v4630_v49, %v7923_v34 }
 0xa70   : > { %v7917_v26 = vpop.permute.xlu0 %7916  ;;  %5826 = vmatprep.mubr.f32.mxu0 %v5331_v31  ;;  %v7932_v17 = vpop.permute.xlu1 %7931  ;;  %5631 = vmatprep.mubr.f32.mxu1 %v5273_v59  ;;  %v11609_v31 = vld [vmem:[#allocation3 + $0x82] sm:$0xff] }
 0xa71   : > { %v7919_v4 = vunpack.i.h.bf16 %v7917_v26  ;;  %v7918_v57 = vunpack.i.l.bf16 %v7917_v26  ;;  %5827 = vmatmul.mubr.f32.vlgmr.msra.gmra.mxu0 %v5299_v10  ;;  %5632 = vmatmul.mubr.f32.gmra.mxu1 %v5241_v37  ;;  %v7934_v43 = vunpack.i.h.bf16 %v7932_v17  ;;  %v7933_v54 = vunpack.i.l.bf16 %v7932_v17  ;;  %v4634_v59 = vld [vmem:[#allocation3 + $0x80] sm:$0xff] }
 0xa72   : > { %7286 = vmatpush3.msra.mxu0 %v11463_v35 }
 0xa73   : > { %v5332_v13 = vsel %vm2648_vm4, %v4628_v11, %v7919_v4  ;;  %v5274_v30 = vsel %vm2648_vm4, %v11451_v56, %v7918_v57  ;;  %7287 = vmatprep.subr.mxu0 %v11567_v9  ;;  %v5301_v21 = vsel %vm2648_vm4, %v4564_v39, %v7934_v43  ;;  %v5243_v3 = vsel %vm2648_vm4, %v4631_v20, %v7933_v54  ;;  %v4633_v11 = vld [vmem:[#allocation3 + $0x78] sm:$0xff]  ;;  %v4568_v43 = vld [vmem:[#allocation3 + $0x61] sm:$0xff]  ;;  %v4635_v54 = vld [vmem:[#allocation3 + $0x90] sm:$0xff] }
 0xa74   : > { %v7927_v33 = vpop.permute.xlu0 %7926  ;;  %5831 = vmatprep.mubr.f32.mxu0 %v5332_v13  ;;  %v7942_v46 = vpop.permute.xlu1 %7941  ;;  %5636 = vmatprep.mubr.f32.mxu1 %v5274_v30 }
 0xa75   : > { %v7929_v35 = vunpack.i.h.bf16 %v7927_v33  ;;  %v7928_v25 = vunpack.i.l.bf16 %v7927_v33  ;;  %5832 = vmatmul.mubr.f32.gmra.mxu0 %v5300_v7  ;;  %5637 = vmatmul.mubr.f32.gmra.mxu1 %v5242_v23  ;;  %v7944_v56 = vunpack.i.h.bf16 %v7942_v46  ;;  %v7943_v15 = vunpack.i.l.bf16 %v7942_v46 }
 0xa76   : > { %7288 = vmatpush3.msra.mxu0 %v11567_v9 }
 0xa77   : > { %v5333_v19 = vsel %vm2648_vm4, %v4629_v61, %v7929_v35  ;;  %v5275_v14 = vsel %vm2648_vm4, %v11456_v50, %v7928_v25  ;;  %7289 = vmatprep.subr.mxu0 %v11579_v27  ;;  %v5302_v45 = vsel %vm2648_vm4, %v4565_v52, %v7944_v56  ;;  %v5244_v48 = vsel %vm2648_vm4, %v4632_v51, %v7943_v15 }
 0xa78   : > { %v7937_v55 = vpop.permute.xlu0 %7936  ;;  %5836 = vmatprep.mubr.f32.mxu0 %v5333_v19  ;;  %v7952_v63 = vpop.permute.xlu1 %7951  ;;  %5641 = vmatprep.mubr.f32.mxu1 %v5275_v14  ;;  %v11623_v14 = vld [vmem:[#allocation3 + $0x9a] sm:$0xff] }
 0xa79   : > { %v7939_v0 = vunpack.i.h.bf16 %v7937_v55  ;;  %v7938_v60 = vunpack.i.l.bf16 %v7937_v55  ;;  %5837 = vmatmul.mubr.f32.gmra.mxu0 %v5301_v21  ;;  %5642 = vmatmul.mubr.f32.gmra.mxu1 %v5243_v3  ;;  %v7954_v50 = vunpack.i.h.bf16 %v7952_v63  ;;  %v7953_v44 = vunpack.i.l.bf16 %v7952_v63  ;;  %v4569_v21 = vld [vmem:[#allocation3 + $0x69] sm:$0xff]  ;;  %v4636_v55 = vld [vmem:[#allocation3 + $0x98] sm:$0xff] }
 0xa7a   : > { %7290 = vmatpush3.msra.mxu0 %v11579_v27 }
 0xa7b   : > { %v5334_v41 = vsel %vm2648_vm4, %v4630_v49, %v7939_v0  ;;  %v5276_v32 = vsel %vm2648_vm4, %v11467_v28, %v7938_v60  ;;  %7291 = vmatprep.subr.mxu0 %v11591_v22  ;;  %v5303_v12 = vsel %vm2648_vm4, %v4566_v42, %v7954_v50  ;;  %v5245_v5 = vsel %vm2648_vm4, %v4633_v11, %v7953_v44  ;;  %v11616_v49 = vld [vmem:[#allocation3 + $0x92] sm:$0xff]  ;;  %v11630_v44 = vld [vmem:[#allocation3 + $0xaa] sm:$0xff] }
 0xa7c   : > { %v7947_v58 = vpop.permute.xlu0 %7946  ;;  %5841 = vmatprep.mubr.f32.mxu0 %v5334_v41  ;;  %v7962_v29 = vpop.permute.xlu1 %7961  ;;  %5646 = vmatprep.mubr.f32.mxu1 %v5276_v32  ;;  %v4570_v41 = vld [vmem:[#allocation3 + $0x79] sm:$0xff] }
 0xa7d   : > { %v7949_v24 = vunpack.i.h.bf16 %v7947_v58  ;;  %v7948_v47 = vunpack.i.l.bf16 %v7947_v58  ;;  %5842 = vmatmul.mubr.f32.gmra.mxu0 %v5302_v45  ;;  %5647 = vmatmul.mubr.f32.gmra.mxu1 %v5244_v48  ;;  %v7964_v53 = vunpack.i.h.bf16 %v7962_v29  ;;  %v7963_v38 = vunpack.i.l.bf16 %v7962_v29  ;;  %v4637_v29 = vld [vmem:[#allocation3 + $0xa8] sm:$0xff] }
 0xa7e   : > { %7292 = vmatpush3.msra.mxu0 %v11591_v22 }
 0xa7f   : > { %v5335_v28 = vsel %vm2648_vm4, %v4631_v20, %v7949_v24  ;;  %v5277_v2 = vsel %vm2648_vm4, %v11601_v8, %v7948_v47  ;;  %v5304_v10 = vsel %vm2648_vm4, %v4567_v16, %v7964_v53  ;;  %v5246_v4 = vsel %vm2648_vm4, %v4634_v59, %v7963_v38 }
 0xa80   : > { %v7957_v18 = vpop.permute.xlu0 %7956  ;;  %5846 = vmatprep.mubr.f32.mxu0 %v5335_v28  ;;  %v7972_v6 = vpop.permute.xlu1 %7971  ;;  %5651 = vmatprep.mubr.f32.mxu1 %v5277_v2 }
 0xa81   : > { %v7959_v36 = vunpack.i.h.bf16 %v7957_v18  ;;  %v7958_v62 = vunpack.i.l.bf16 %v7957_v18  ;;  %5847 = vmatmul.mubr.f32.gmra.mxu0 %v5303_v12  ;;  %5652 = vmatmul.mubr.f32.gmra.mxu1 %v5245_v5  ;;  %v7974_v40 = vunpack.i.h.bf16 %v7972_v6  ;;  %v7973_v26 = vunpack.i.l.bf16 %v7972_v6  ;;  %v11637_v18 = vld [vmem:[#allocation3 + $0xb2] sm:$0xff] }
 0xa82   : > { %v4638_v5 = vld [vmem:[#allocation3 + $0xb0] sm:$0xff] }
 0xa83   : > { %v5336_v61 = vsel %vm2648_vm4, %v4632_v51, %v7959_v36  ;;  %v5278_v34 = vsel %vm2648_vm4, %v11609_v31, %v7958_v62  ;;  %v5305_v13 = vsel %vm2648_vm4, %v4568_v43, %v7974_v40  ;;  %v5247_v25 = vsel %vm2648_vm4, %v4635_v54, %v7973_v26 }
 0xa84   : > { %v7967_v17 = vpop.permute.xlu0 %7966  ;;  %5851 = vmatprep.mubr.f32.mxu0 %v5336_v61  ;;  %v7982_v37 = vpop.permute.xlu1 %7981  ;;  %5656 = vmatprep.mubr.f32.mxu1 %v5278_v34  ;;  %v4572_v34 = vld [vmem:[#allocation3 + $0x91] sm:$0xff] }
 0xa85   : > { %v7969_v57 = vunpack.i.h.bf16 %v7967_v17  ;;  %v7968_v1 = vunpack.i.l.bf16 %v7967_v17  ;;  %5852 = vmatmul.mubr.f32.gmra.mxu0 %v5304_v10  ;;  %5657 = vmatmul.mubr.f32.gmra.mxu1 %v5246_v4  ;;  %v7984_v7 = vunpack.i.h.bf16 %v7982_v37  ;;  %v7983_v46 = vunpack.i.l.bf16 %v7982_v37  ;;  %v11644_v37 = vld [vmem:[#allocation3 + $0xc2] sm:$0xff] }
 0xa87   : > { %v5337_v30 = vsel %vm2648_vm4, %v4633_v11, %v7969_v57  ;;  %v5279_v33 = vsel %vm2648_vm4, %v11616_v49, %v7968_v1  ;;  %v5306_v20 = vsel %vm2648_vm4, %v4569_v21, %v7984_v7  ;;  %v5248_v52 = vsel %vm2648_vm4, %v4636_v55, %v7983_v46  ;;  %v4571_v11 = vld [vmem:[#allocation3 + $0x81] sm:$0xff]  ;;  %v4573_v46 = vld [vmem:[#allocation3 + $0x99] sm:$0xff] }
 0xa88   : > { %v7977_v23 = vpop.permute.xlu0 %7976  ;;  %5856 = vmatprep.mubr.f32.mxu0 %v5337_v30  ;;  %v7992_v35 = vpop.permute.xlu1 %7991  ;;  %5661 = vmatprep.mubr.f32.mxu1 %v5279_v33  ;;  %v4639_v57 = vld [vmem:[#allocation3 + $0xc0] sm:$0xff] }
 0xa89   : > { %v7979_v39 = vunpack.i.h.bf16 %v7977_v23  ;;  %v7978_v56 = vunpack.i.l.bf16 %v7977_v23  ;;  %5857 = vmatmul.mubr.f32.gmra.mxu0 %v5305_v13  ;;  %5662 = vmatmul.mubr.f32.gmra.mxu1 %v5247_v25  ;;  %v7994_v19 = vunpack.i.h.bf16 %v7992_v35  ;;  %v7993_v3 = vunpack.i.l.bf16 %v7992_v35  ;;  %v11651_v25 = vld [vmem:[#allocation3 + $0xca] sm:$0xff] }
 0xa8b   : > { %v5338_v15 = vsel %vm2648_vm4, %v4634_v59, %v7979_v39  ;;  %v5280_v63 = vsel %vm2648_vm4, %v11623_v14, %v7978_v56  ;;  %v5307_v32 = vsel %vm2648_vm4, %v4570_v41, %v7994_v19  ;;  %v5249_v53 = vsel %vm2648_vm4, %v4637_v29, %v7993_v3  ;;  %v4640_v56 = vld [vmem:[#allocation3 + $0xc8] sm:$0xff]  ;;  %v4641_v41 = vld [vmem:[#allocation3 + $0xd8] sm:$0xff] }
 0xa8c   : > { %v7987_v0 = vpop.permute.xlu0 %7986  ;;  %5861 = vmatprep.mubr.f32.mxu0 %v5338_v15  ;;  %v8002_v60 = vpop.permute.xlu1 %8001  ;;  %5666 = vmatprep.mubr.f32.mxu1 %v5280_v63 }
 0xa8d   : > { %v7989_v50 = vunpack.i.h.bf16 %v7987_v0  ;;  %v7988_v45 = vunpack.i.l.bf16 %v7987_v0  ;;  %5862 = vmatmul.mubr.f32.gmra.mxu0 %v5306_v20  ;;  %5667 = vmatmul.mubr.f32.gmra.mxu1 %v5248_v52  ;;  %v8004_v51 = vunpack.i.h.bf16 %v8002_v60  ;;  %v8003_v24 = vunpack.i.l.bf16 %v8002_v60  ;;  %v4574_v0 = vld [vmem:[#allocation3 + $0xa9] sm:$0xff] }
 0xa8f   : > { %v5339_v58 = vsel %vm2648_vm4, %v4635_v54, %v7989_v50  ;;  %v5281_v48 = vsel %vm2648_vm4, %v11630_v44, %v7988_v45  ;;  %v5308_v38 = vsel %vm2648_vm4, %v4571_v11, %v8004_v51  ;;  %v5250_v10 = vsel %vm2648_vm4, %v4638_v5, %v8003_v24  ;;  %v11658_v50 = vld [vmem:[#allocation3 + $0xda] sm:$0xff] }
 0xa90   : > { %v7997_v47 = vpop.permute.xlu0 %7996  ;;  %5866 = vmatprep.mubr.f32.mxu0 %v5339_v58  ;;  %v8012_v42 = vpop.permute.xlu1 %8011  ;;  %5671 = vmatprep.mubr.f32.mxu1 %v5281_v48 }
 0xa91   : > { %v7999_v12 = vunpack.i.h.bf16 %v7997_v47  ;;  %v7998_v28 = vunpack.i.l.bf16 %v7997_v47  ;;  %5867 = vmatmul.mubr.f32.gmra.mxu0 %v5307_v32  ;;  %5672 = vmatmul.mubr.f32.gmra.mxu1 %v5249_v53  ;;  %v8014_v2 = vunpack.i.h.bf16 %v8012_v42  ;;  %v8013_v62 = vunpack.i.l.bf16 %v8012_v42  ;;  %v4575_v42 = vld [vmem:[#allocation3 + $0xb1] sm:$0xff] }
 0xa93   : > { %v5340_v6 = vsel %vm2648_vm4, %v4636_v55, %v7999_v12  ;;  %v5282_v36 = vsel %vm2648_vm4, %v11637_v18, %v7998_v28  ;;  %v5309_v17 = vsel %vm2648_vm4, %v4572_v34, %v8014_v2  ;;  %v5251_v30 = vsel %vm2648_vm4, %v4639_v57, %v8013_v62  ;;  %v11665_v28 = vld [vmem:[#allocation3 + $0xe2] sm:$0xff]  ;;  %v11672_v34 = vld [vmem:[#allocation3 + $0xf2] sm:$0xff] }
 0xa94   : > { %v8007_v16 = vpop.permute.xlu0 %8006  ;;  %5871 = vmatprep.mubr.f32.mxu0 %v5340_v6  ;;  %v8022_v40 = vpop.permute.xlu1 %8021  ;;  %5676 = vmatprep.mubr.f32.mxu1 %v5282_v36  ;;  %v4642_v2 = vld [vmem:[#allocation3 + $0xe0] sm:$0xff] }
 0xa95   : > { %v8009_v61 = vunpack.i.h.bf16 %v8007_v16  ;;  %v8008_v59 = vunpack.i.l.bf16 %v8007_v16  ;;  %5872 = vmatmul.mubr.f32.gmra.mxu0 %v5308_v38  ;;  %5677 = vmatmul.mubr.f32.gmra.mxu1 %v5250_v10  ;;  %v8024_v26 = vunpack.i.h.bf16 %v8022_v40  ;;  %v8023_v43 = vunpack.i.l.bf16 %v8022_v40  ;;  %v4576_v10 = vld [vmem:[#allocation3 + $0xc1] sm:$0xff] }
 0xa97   : > { %v5341_v4 = vsel %vm2648_vm4, %v4637_v29, %v8009_v61  ;;  %v5283_v1 = vsel %vm2648_vm4, %v11644_v37, %v8008_v59  ;;  %v5310_v35 = vsel %vm2648_vm4, %v4573_v46, %v8024_v26  ;;  %v5252_v55 = vsel %vm2648_vm4, %v4640_v56, %v8023_v43 }
 0xa98   : > { %v8017_v7 = vpop.permute.xlu0 %8016  ;;  %5876 = vmatprep.mubr.f32.mxu0 %v5341_v4  ;;  %v8032_v13 = vpop.permute.xlu1 %8031  ;;  %5681 = vmatprep.mubr.f32.mxu1 %v5283_v1 }
 0xa99   : > { %v8019_v54 = vunpack.i.h.bf16 %v8017_v7  ;;  %v8018_v33 = vunpack.i.l.bf16 %v8017_v7  ;;  %5877 = vmatmul.mubr.f32.gmra.mxu0 %v5309_v17  ;;  %5682 = vmatmul.mubr.f32.gmra.mxu1 %v5251_v30  ;;  %v8034_v23 = vunpack.i.h.bf16 %v8032_v13  ;;  %v8033_v19 = vunpack.i.l.bf16 %v8032_v13  ;;  %v4643_v17 = vld [vmem:[#allocation3 + $0xf0] sm:$0xff] }
 0xa9b   : > { %v5342_v39 = vsel %vm2648_vm4, %v4638_v5, %v8019_v54  ;;  %v5284_v21 = vsel %vm2648_vm4, %v11651_v25, %v8018_v33  ;;  %v5311_v52 = vsel %vm2648_vm4, %v4574_v0, %v8034_v23  ;;  %v5253_v48 = vsel %vm2648_vm4, %v4641_v41, %v8033_v19  ;;  %v4577_v54 = vld [vmem:[#allocation3 + $0xc9] sm:$0xff]  ;;  %v11679_v23 = vld [vmem:[#allocation3 + $0xfa] sm:$0xff] }
 0xa9c   : > { %v8027_v20 = vpop.permute.xlu0 %8026  ;;  %5881 = vmatprep.mubr.f32.mxu0 %v5342_v39  ;;  %v8042_v15 = vpop.permute.xlu1 %8041  ;;  %5686 = vmatprep.mubr.f32.mxu1 %v5284_v21  ;;  %v4644_v39 = vld [vmem:[#allocation3 + $0xf8] sm:$0xff] }
 0xa9d   : > { %v8029_v63 = vunpack.i.h.bf16 %v8027_v20  ;;  %v8028_v3 = vunpack.i.l.bf16 %v8027_v20  ;;  %5882 = vmatmul.mubr.f32.gmra.mxu0 %v5310_v35  ;;  %5687 = vmatmul.mubr.f32.gmra.mxu1 %v5252_v55  ;;  %v8044_v60 = vunpack.i.h.bf16 %v8042_v15  ;;  %v8043_v32 = vunpack.i.l.bf16 %v8042_v15 }
 0xa9f   : > { %v5343_v45 = vsel %vm2648_vm4, %v4639_v57, %v8029_v63  ;;  %v5285_v51 = vsel %vm2648_vm4, %v11658_v50, %v8028_v3  ;;  %v5312_v12 = vsel %vm2648_vm4, %v4575_v42, %v8044_v60  ;;  %v5254_v62 = vsel %vm2648_vm4, %v4642_v2, %v8043_v32  ;;  %v4578_v3 = vld [vmem:[#allocation3 + $0xd9] sm:$0xff]  ;;  %v4579_v42 = vld [vmem:[#allocation3 + $0xe1] sm:$0xff] }
 0xaa0   : > { %v8037_v58 = vpop.permute.xlu0 %8036  ;;  %5886 = vmatprep.mubr.f32.mxu0 %v5343_v45  ;;  %v8052_v29 = vpop.permute.xlu1 %8051  ;;  %5691 = vmatprep.mubr.f32.mxu1 %v5285_v51 }
 0xaa1   : > { %v8039_v24 = vunpack.i.h.bf16 %v8037_v58  ;;  %v8038_v47 = vunpack.i.l.bf16 %v8037_v58  ;;  %5887 = vmatmul.mubr.f32.gmra.mxu0 %v5311_v52  ;;  %5692 = vmatmul.mubr.f32.gmra.mxu1 %v5253_v48  ;;  %v8054_v53 = vunpack.i.h.bf16 %v8052_v29  ;;  %v8053_v6 = vunpack.i.l.bf16 %v8052_v29  ;;  %v11686_v52 = vld [vmem:[#allocation3 + $0x10a] sm:$0xff] }
 0xaa3   : > { %v5344_v11 = vsel %vm2648_vm4, %v4640_v56, %v8039_v24  ;;  %v5286_v38 = vsel %vm2648_vm4, %v11665_v28, %v8038_v47  ;;  %v5313_v59 = vsel %vm2648_vm4, %v4576_v10, %v8054_v53  ;;  %v5255_v7 = vsel %vm2648_vm4, %v4643_v17, %v8053_v6 }
 0xaa4   : > { %v8047_v5 = vpop.permute.xlu0 %8046  ;;  %5891 = vmatprep.mubr.f32.mxu0 %v5344_v11  ;;  %v8062_v36 = vpop.permute.xlu1 %8061  ;;  %5696 = vmatprep.mubr.f32.mxu1 %v5286_v38  ;;  %v11693_v11 = vld [vmem:[#allocation3 + $0x112] sm:$0xff] }
 0xaa5   : > { %v8049_v16 = vunpack.i.h.bf16 %v8047_v5  ;;  %v8048_v40 = vunpack.i.l.bf16 %v8047_v5  ;;  %5892 = vmatmul.mubr.f32.gmra.mxu0 %v5312_v12  ;;  %5697 = vmatmul.mubr.f32.gmra.mxu1 %v5254_v62  ;;  %v8064_v61 = vunpack.i.h.bf16 %v8062_v36  ;;  %v8063_v57 = vunpack.i.l.bf16 %v8062_v36  ;;  %v4646_v38 = vld [vmem:[#allocation3 + $0x110] sm:$0xff] }
 0xaa7   : > { %v5345_v26 = vsel %vm2648_vm4, %v4641_v41, %v8049_v16  ;;  %v5287_v4 = vsel %vm2648_vm4, %v11672_v34, %v8048_v40  ;;  %v5314_v46 = vsel %vm2648_vm4, %v4577_v54, %v8064_v61  ;;  %v5256_v15 = vsel %vm2648_vm4, %v4644_v39, %v8063_v57  ;;  %v4645_v41 = vld [vmem:[#allocation3 + $0x108] sm:$0xff]  ;;  %v4580_v61 = vld [vmem:[#allocation3 + $0xf1] sm:$0xff]  ;;  %v4647_v57 = vld [vmem:[#allocation3 + $0x120] sm:$0xff] }
 0xaa8   : > { %v8057_v1 = vpop.permute.xlu0 %8056  ;;  %5896 = vmatprep.mubr.f32.mxu0 %v5345_v26  ;;  %v8072_v43 = vpop.permute.xlu1 %8071  ;;  %5701 = vmatprep.mubr.f32.mxu1 %v5287_v4 }
 0xaa9   : > { %v8059_v13 = vunpack.i.h.bf16 %v8057_v1  ;;  %v8058_v30 = vunpack.i.l.bf16 %v8057_v1  ;;  %5897 = vmatmul.mubr.f32.gmra.mxu0 %v5313_v59  ;;  %5702 = vmatmul.mubr.f32.gmra.mxu1 %v5255_v7  ;;  %v8074_v33 = vunpack.i.h.bf16 %v8072_v43  ;;  %v8073_v21 = vunpack.i.l.bf16 %v8072_v43 }
 0xaab   : > { %v5346_v35 = vsel %vm2648_vm4, %v4642_v2, %v8059_v13  ;;  %v5288_v56 = vsel %vm2648_vm4, %v11679_v23, %v8058_v30  ;;  %v5315_v60 = vsel %vm2648_vm4, %v4578_v3, %v8074_v33  ;;  %v5257_v48 = vsel %vm2648_vm4, %v4645_v41, %v8073_v21 }
 0xaac   : > { %v8067_v19 = vpop.permute.xlu0 %8066  ;;  %5901 = vmatprep.mubr.f32.mxu0 %v5346_v35  ;;  %v8082_v20 = vpop.permute.xlu1 %8081  ;;  %5706 = vmatprep.mubr.f32.mxu1 %v5288_v56  ;;  %v11707_v56 = vld [vmem:[#allocation3 + $0x12a] sm:$0xff] }
 0xaad   : > { %v8069_v55 = vunpack.i.h.bf16 %v8067_v19  ;;  %v8068_v63 = vunpack.i.l.bf16 %v8067_v19  ;;  %5902 = vmatmul.mubr.f32.gmra.mxu0 %v5314_v46  ;;  %5707 = vmatmul.mubr.f32.gmra.mxu1 %v5256_v15  ;;  %v8084_v0 = vunpack.i.h.bf16 %v8082_v20  ;;  %v8083_v32 = vunpack.i.l.bf16 %v8082_v20  ;;  %v4581_v46 = vld [vmem:[#allocation3 + $0xf9] sm:$0xff]  ;;  %v4648_v19 = vld [vmem:[#allocation3 + $0x128] sm:$0xff] }
 0xaaf   : > { %v5347_v45 = vsel %vm2648_vm4, %v4643_v17, %v8069_v55  ;;  %v5289_v51 = vsel %vm2648_vm4, %v11686_v52, %v8068_v63  ;;  %v5316_v12 = vsel %vm2648_vm4, %v4579_v42, %v8084_v0  ;;  %v5258_v16 = vsel %vm2648_vm4, %v4646_v38, %v8083_v32  ;;  %v11700_v17 = vld [vmem:[#allocation3 + $0x122] sm:$0xff]  ;;  %v11714_v32 = vld [vmem:[#allocation3 + $0x13a] sm:$0xff] }
 0xab0   : > { %v8077_v58 = vpop.permute.xlu0 %8076  ;;  %5906 = vmatprep.mubr.f32.mxu0 %v5347_v45  ;;  %v8092_v29 = vpop.permute.xlu1 %8091  ;;  %5711 = vmatprep.mubr.f32.mxu1 %v5289_v51  ;;  %v4582_v45 = vld [vmem:[#allocation3 + $0x109] sm:$0xff] }
 0xab1   : > { %v8079_v24 = vunpack.i.h.bf16 %v8077_v58  ;;  %v8078_v47 = vunpack.i.l.bf16 %v8077_v58  ;;  %5907 = vmatmul.mubr.f32.gmra.mxu0 %v5315_v60  ;;  %5712 = vmatmul.mubr.f32.gmra.mxu1 %v5257_v48  ;;  %v8094_v53 = vunpack.i.h.bf16 %v8092_v29  ;;  %v8093_v5 = vunpack.i.l.bf16 %v8092_v29  ;;  %v4649_v29 = vld [vmem:[#allocation3 + $0x138] sm:$0xff] }
 0xab3   : > { %v5348_v2 = vsel %vm2648_vm4, %v4644_v39, %v8079_v24  ;;  %v5290_v6 = vsel %vm2648_vm4, %v11693_v11, %v8078_v47  ;;  %v5317_v26 = vsel %vm2648_vm4, %v4580_v61, %v8094_v53  ;;  %v5259_v30 = vsel %vm2648_vm4, %v4647_v57, %v8093_v5 }
 0xab4   : > { %v8087_v36 = vpop.permute.xlu0 %8086  ;;  %5911 = vmatprep.mubr.f32.mxu0 %v5348_v2  ;;  %v8102_v62 = vpop.permute.xlu1 %8101  ;;  %5716 = vmatprep.mubr.f32.mxu1 %v5290_v6 }
 0xab5   : > { %v8089_v40 = vunpack.i.h.bf16 %v8087_v36  ;;  %v8088_v10 = vunpack.i.l.bf16 %v8087_v36  ;;  %5912 = vmatmul.mubr.f32.gmra.mxu0 %v5316_v12  ;;  %5717 = vmatmul.mubr.f32.gmra.mxu1 %v5258_v16  ;;  %v8104_v59 = vunpack.i.h.bf16 %v8102_v62  ;;  %v8103_v43 = vunpack.i.l.bf16 %v8102_v62  ;;  %v11721_v36 = vld [vmem:[#allocation3 + $0x142] sm:$0xff] }
 0xab6   : > { %v4650_v16 = vld [vmem:[#allocation3 + $0x140] sm:$0xff] }
 0xab7   : > { %v5349_v4 = vsel %vm2648_vm4, %v4645_v41, %v8089_v40  ;;  %v5291_v1 = vsel %vm2648_vm4, %v11700_v17, %v8088_v10  ;;  %v5318_v39 = vsel %vm2648_vm4, %v4581_v46, %v8104_v59  ;;  %v5260_v3 = vsel %vm2648_vm4, %v4648_v19, %v8103_v43 }
 0xab8   : > { %v8097_v7 = vpop.permute.xlu0 %8096  ;;  %5916 = vmatprep.mubr.f32.mxu0 %v5349_v4  ;;  %v8112_v13 = vpop.permute.xlu1 %8111  ;;  %5721 = vmatprep.mubr.f32.mxu1 %v5291_v1  ;;  %v4584_v1 = vld [vmem:[#allocation3 + $0x121] sm:$0xff] }
 0xab9   : > { %v8099_v54 = vunpack.i.h.bf16 %v8097_v7  ;;  %v8098_v33 = vunpack.i.l.bf16 %v8097_v7  ;;  %5917 = vmatmul.mubr.f32.gmra.mxu0 %v5317_v26  ;;  %5722 = vmatmul.mubr.f32.gmra.mxu1 %v5259_v30  ;;  %v8114_v35 = vunpack.i.h.bf16 %v8112_v13  ;;  %v8113_v15 = vunpack.i.l.bf16 %v8112_v13  ;;  %v11728_v13 = vld [vmem:[#allocation3 + $0x152] sm:$0xff] }
 0xabb   : > { %v5350_v21 = vsel %vm2648_vm4, %v4646_v38, %v8099_v54  ;;  %v5292_v20 = vsel %vm2648_vm4, %v11707_v56, %v8098_v33  ;;  %v5319_v51 = vsel %vm2648_vm4, %v4582_v45, %v8114_v35  ;;  %v5261_v53 = vsel %vm2648_vm4, %v4649_v29, %v8113_v15  ;;  %v4583_v38 = vld [vmem:[#allocation3 + $0x111] sm:$0xff]  ;;  %v4585_v15 = vld [vmem:[#allocation3 + $0x129] sm:$0xff] }
 0xabc   : > { %v8107_v55 = vpop.permute.xlu0 %8106  ;;  %5921 = vmatprep.mubr.f32.mxu0 %v5350_v21  ;;  %v8122_v63 = vpop.permute.xlu1 %8121  ;;  %5726 = vmatprep.mubr.f32.mxu1 %v5292_v20  ;;  %v4651_v54 = vld [vmem:[#allocation3 + $0x150] sm:$0xff] }
 0xabd   : > { %v8109_v0 = vunpack.i.h.bf16 %v8107_v55  ;;  %v8108_v60 = vunpack.i.l.bf16 %v8107_v55  ;;  %5922 = vmatmul.mubr.f32.gmra.mxu0 %v5318_v39  ;;  %5727 = vmatmul.mubr.f32.gmra.mxu1 %v5260_v3  ;;  %v8124_v41 = vunpack.i.h.bf16 %v8122_v63  ;;  %v8123_v24 = vunpack.i.l.bf16 %v8122_v63  ;;  %v11735_v3 = vld [vmem:[#allocation3 + $0x15a] sm:$0xff] }
 0xabf   : > { %v5351_v58 = vsel %vm2648_vm4, %v4647_v57, %v8109_v0  ;;  %v5293_v48 = vsel %vm2648_vm4, %v11714_v32, %v8108_v60  ;;  %v5320_v5 = vsel %vm2648_vm4, %v4583_v38, %v8124_v41  ;;  %v5262_v26 = vsel %vm2648_vm4, %v4650_v16, %v8123_v24  ;;  %v4652_v60 = vld [vmem:[#allocation3 + $0x158] sm:$0xff]  ;;  %v4653_v38 = vld [vmem:[#allocation3 + $0x168] sm:$0xff] }
 0xac0   : > { %v8117_v47 = vpop.permute.xlu0 %8116  ;;  %5926 = vmatprep.mubr.f32.mxu0 %v5351_v58  ;;  %v8132_v42 = vpop.permute.xlu1 %8131  ;;  %5731 = vmatprep.mubr.f32.mxu1 %v5293_v48 }
 0xac1   : > { %v8119_v12 = vunpack.i.h.bf16 %v8117_v47  ;;  %v8118_v2 = vunpack.i.l.bf16 %v8117_v47  ;;  %5927 = vmatmul.mubr.f32.gmra.mxu0 %v5319_v51  ;;  %5732 = vmatmul.mubr.f32.gmra.mxu1 %v5261_v53  ;;  %v8134_v6 = vunpack.i.h.bf16 %v8132_v42  ;;  %v8133_v10 = vunpack.i.l.bf16 %v8132_v42  ;;  %v4586_v47 = vld [vmem:[#allocation3 + $0x139] sm:$0xff] }
 0xac3   : > { %v5352_v62 = vsel %vm2648_vm4, %v4648_v19, %v8119_v12  ;;  %v5294_v40 = vsel %vm2648_vm4, %v11721_v36, %v8118_v2  ;;  %v5321_v7 = vsel %vm2648_vm4, %v4584_v1, %v8134_v6  ;;  %v5263_v21 = vsel %vm2648_vm4, %v4651_v54, %v8133_v10  ;;  %v11742_v12 = vld [vmem:[#allocation3 + $0x16a] sm:$0xff] }
 0xac4   : > { %v8127_v61 = vpop.permute.xlu0 %8126  ;;  %5931 = vmatprep.mubr.f32.mxu0 %v5352_v62  ;;  %v8142_v59 = vpop.permute.xlu1 %8141  ;;  %5736 = vmatprep.mubr.f32.mxu1 %v5294_v40  ;;  %v4654_v1 = vld [vmem:[#allocation3 + $0x170] sm:$0xff] }
 0xac5   : > { %v8129_v4 = vunpack.i.h.bf16 %v8127_v61  ;;  %v8128_v57 = vunpack.i.l.bf16 %v8127_v61  ;;  %5932 = vmatmul.mubr.f32.gmra.mxu0 %v5320_v5  ;;  %5737 = vmatmul.mubr.f32.gmra.mxu1 %v5262_v26  ;;  %v8144_v43 = vunpack.i.h.bf16 %v8142_v59  ;;  %v8143_v46 = vunpack.i.l.bf16 %v8142_v59  ;;  %v4587_v61 = vld [vmem:[#allocation3 + $0x141] sm:$0xff] }
 0xac7   : > { %v5353_v30 = vsel %vm2648_vm4, %v4649_v29, %v8129_v4  ;;  %v5295_v33 = vsel %vm2648_vm4, %v11728_v13, %v8128_v57  ;;  %v5322_v63 = vsel %vm2648_vm4, %v4585_v15, %v8144_v43  ;;  %v5264_v29 = vsel %vm2648_vm4, %v4652_v60, %v8143_v46  ;;  %v11749_v4 = vld [vmem:[#allocation3 + $0x172] sm:$0xff] }
 0xac8   : > { %v8137_v35 = vpop.permute.xlu0 %8136  ;;  %5936 = vmatprep.mubr.f32.mxu0 %v5353_v30  ;;  %v8152_v39 = vpop.permute.xlu1 %8151  ;;  %5741 = vmatprep.mubr.f32.mxu1 %v5295_v33 }
 0xac9   : > { %v8139_v19 = vunpack.i.h.bf16 %v8137_v35  ;;  %v8138_v20 = vunpack.i.l.bf16 %v8137_v35  ;;  %5937 = vmatmul.mubr.f32.gmra.mxu0 %v5321_v7  ;;  %5742 = vmatmul.mubr.f32.gmra.mxu1 %v5263_v21  ;;  %v8154_v55 = vunpack.i.h.bf16 %v8152_v39  ;;  %v8153_v41 = vunpack.i.l.bf16 %v8152_v39  ;;  %v4691_v35 = vld [vmem:[#allocation3 + $0x32] sm:$0xff] }
 0xaca   : > { %v4588_v39 = vld [vmem:[#allocation3 + $0x151] sm:$0xff] }
 0xacb   : > { %v5354_v0 = vsel %vm2648_vm4, %v4650_v16, %v8139_v19  ;;  %v5296_v45 = vsel %vm2648_vm4, %v11735_v3, %v8138_v20  ;;  %v5323_v53 = vsel %vm2648_vm4, %v4586_v47, %v8154_v55  ;;  %v5265_v16 = vsel %vm2648_vm4, %v4653_v38, %v8153_v41  ;;  %v4692_v55 = vld [vmem:[#allocation3 + $0x3a] sm:$0xff]  ;;  %v4693_v41 = vld [vmem:[#allocation3 + $0x4a] sm:$0xff] }
 0xacc   : > { %v8147_v51 = vpop.permute.xlu0 %8146  ;;  %5941 = vmatprep.mubr.f32.mxu0 %v5354_v0  ;;  %v8162_v58 = vpop.permute.xlu1 %8161  ;;  %5746 = vmatprep.mubr.f32.mxu1 %v5296_v45  ;;  %v8455_v45 = vld [vmem:[%s12263_s13 + $0x18] sm:$0xff] }
 0xacd   : > { %v8149_v48 = vunpack.i.h.bf16 %v8147_v51  ;;  %v8148_v24 = vunpack.i.l.bf16 %v8147_v51  ;;  %5942 = vmatmul.mubr.f32.gmra.mxu0 %v5322_v63  ;;  %5747 = vmatmul.mubr.f32.gmra.mxu1 %v5264_v29  ;;  %v8164_v42 = vunpack.i.h.bf16 %v8162_v58  ;;  %v8163_v5 = vunpack.i.l.bf16 %v8162_v58  ;;  %v4589_v51 = vld [vmem:[#allocation3 + $0x159] sm:$0xff] }
 0xacf   : > { %v5355_v2 = vsel %vm2648_vm4, %v4651_v54, %v8149_v48  ;;  %v5297_v6 = vsel %vm2648_vm4, %v11742_v12, %v8148_v24  ;;  %v5324_v26 = vsel %vm2648_vm4, %v4587_v61, %v8164_v42  ;;  %v5266_v30 = vsel %vm2648_vm4, %v4654_v1, %v8163_v5  ;;  %v4655_v48 = vld [vmem:[#allocation3 + $0x180] sm:$0xff]  ;;  %v4694_v24 = vld [vmem:[#allocation3 + $0x52] sm:$0xff] }
 0xad0   : > { %v8157_v62 = vpop.permute.xlu0 %8156  ;;  %5946 = vmatprep.mubr.f32.mxu0 %v5355_v2  ;;  %5751 = vmatprep.mubr.f32.mxu1 %v5297_v6  ;;  %v8172_v59 = vpop.permute.xlu1 %8171 }
 0xad1   : > { %v8159_v40 = vunpack.i.h.bf16 %v8157_v62  ;;  %v8158_v10 = vunpack.i.l.bf16 %v8157_v62  ;;  %5947 = vmatmul.mubr.f32.gmra.mxu0 %v5323_v53  ;;  %5752 = vmatmul.mubr.f32.gmra.mxu1 %v5265_v16  ;;  %v8173_v54 = vunpack.i.l.bf16 %v8172_v59  ;;  %v8174_v20 = vunpack.i.h.bf16 %v8172_v59  ;;  %v4695_v53 = vld [vmem:[#allocation3 + $0x62] sm:$0xff]  ;;  %v4696_v16 = vld [vmem:[#allocation3 + $0x6a] sm:$0xff]  ;;  %v4657_v59 = vld [vmem:[#allocation3 + $0x198] sm:$0xff] }
 0xad2   : > { %v4656_v62 = vld [vmem:[#allocation3 + $0x188] sm:$0xff] }
 0xad3   : > { %v5356_v57 = vsel %vm2648_vm4, %v4652_v60, %v8159_v40  ;;  %v5298_v43 = vsel %vm2648_vm4, %v11749_v4, %v8158_v10  ;;  %v5358_v0 = vsel %vm2648_vm4, %v4654_v1, %v8173_v54  ;;  %v5326_v29 = vsel %vm2648_vm4, %v4589_v51, %v8174_v20  ;;  %v4722_v20 = vld [vmem:[#allocation3 + $0x1a2] sm:$0xff] }
 0xad4   : > { %v8167_v7 = vpop.permute.xlu0 %8166  ;;  %5951 = vmatprep.mubr.f32.mxu0 %v5356_v57  ;;  %5756 = vmatprep.mubr.f32.mxu1 %v5298_v43  ;;  %v8182_v60 = vpop.permute.xlu1 %8181  ;;  %v6235_v51 = vld [vmem:[%s8711_s23 + $0xb8] sm:$0xff] }
 0xad5   : > { %v8169_v33 = vunpack.i.h.bf16 %v8167_v7  ;;  %v8168_v46 = vunpack.i.l.bf16 %v8167_v7  ;;  %5952 = vmatmul.mubr.f32.gmra.mxu0 %v5324_v26  ;;  %5757 = vmatmul.mubr.f32.gmra.mxu1 %v5266_v30  ;;  %v8183_v47 = vunpack.i.l.bf16 %v8182_v60  ;;  %v8184_v6 = vunpack.i.h.bf16 %v8182_v60  ;;  %v4658_v7 = vld [vmem:[#allocation3 + $0x1a0] sm:$0xff]  ;;  %v6239_v60 = vld [vmem:[%s8711_s23 + $0xd8] sm:$0xff] }
 0xad6   : > { %7237 = vmatprep.mubr.msk.f32.mxu1 %vm2648_vm4, %v4691_v35 }
 0xad7   : > { %v5357_v21 = vsel %vm2648_vm4, %v4653_v38, %v8168_v46  ;;  %v5325_v19 = vsel %vm2648_vm4, %v4588_v39, %v8169_v33  ;;  %v4590_v38 = vld [vmem:[#allocation3 + $0x169] sm:$0xff]  ;;  %v5360_v10 = vsel %vm2648_vm4, %v4656_v62, %v8183_v47  ;;  %v6213_v33 = vld [vmem:[%s8711_s23 + $0x8] sm:$0xff]  ;;  %v6230_v39 = vld [vmem:[%s8711_s23 + $0x90] sm:$0xff] }
 0xad8   : > { %v8177_v15 = vpop.permute.xlu0 %8176  ;;  %5956 = vmatprep.mubr.f32.mxu0 %v5357_v21  ;;  %v8192_v61 = vpop.permute.xlu1 %8191  ;;  %v4720_v21 = vld [vmem:[#allocation3 + $0x18a] sm:$0xff] }
 0xad9   : > { %v8178_v63 = vunpack.i.l.bf16 %v8177_v15  ;;  %5957 = vmatmul.mubr.f32.gmra.mxu0 %v5325_v19  ;;  %7238 = vmatmul.mubr.msk.f32.vlgmr.msra.gmra.mxu1 %vm2648_vm4, %v4692_v55  ;;  %v8179_v58 = vunpack.i.h.bf16 %v8177_v15  ;;  %v8193_v1 = vunpack.i.l.bf16 %v8192_v61  ;;  %v6232_v55 = vld [vmem:[%s8711_s23 + $0xa0] sm:$0xff]  ;;  %v6243_v47 = vld [vmem:[%s8711_s23 + $0xf8] sm:$0xff] }
 0xada   : > { %5961 = vmatprep.mubr.f32.mxu0 %v5358_v0  ;;  %7345 = vmatpush3.msra.mxu1 %v8455_v45  ;;  %v6233_v0 = vld [vmem:[%s8711_s23 + $0xa8] sm:$0xff]  ;;  %v6234_v45 = vld [vmem:[%s8711_s23 + $0xb0] sm:$0xff] }
 0xadb   : > { %7240 = vmatprep.mubr.msk.f32.mxu1 %vm2648_vm4, %v4693_v41  ;;  %7342 = vmatprep.subr.mxu1 %v11567_v9  ;;  %v5359_v42 = vsel %vm2648_vm4, %v4655_v48, %v8178_v63  ;;  %v5327_v5 = vsel %vm2648_vm4, %v4590_v38, %v8179_v58  ;;  %v5362_v54 = vsel %vm2648_vm4, %v4658_v7, %v8193_v1  ;;  %v6238_v63 = vld [vmem:[%s8711_s23 + $0xd0] sm:$0xff]  ;;  %v6240_v41 = vld [vmem:[%s8711_s23 + $0xe0] sm:$0xff]  ;;  %v6241_v58 = vld [vmem:[%s8711_s23 + $0xe8] sm:$0xff] }
 0xadc   : > { %v8187_v2 = vpop.permute.xlu0 %8186  ;;  %7346 = vmatpush3.msra.mxu1 %v11567_v9  ;;  %v4591_v9 = vld [vmem:[#allocation3 + $0x171] sm:$0xff]  ;;  %v6242_v48 = vld [vmem:[%s8711_s23 + $0xf0] sm:$0xff] }
 0xadd   : > { %5962 = vmatmul.mubr.f32.gmra.mxu0 %v5326_v29  ;;  %7241 = vmatmul.mubr.msk.f32.gmra.mxu1 %vm2648_vm4, %v4694_v24  ;;  %v8188_v40 = vunpack.i.l.bf16 %v8187_v2  ;;  %v8189_v26 = vunpack.i.h.bf16 %v8187_v2  ;;  %v5328_v57 = vsel %vm2648_vm4, %v4591_v9, %v8184_v6  ;;  %v6236_v29 = vld [vmem:[%s8711_s23 + $0xc0] sm:$0xff]  ;;  %v6237_v24 = vld [vmem:[%s8711_s23 + $0xc8] sm:$0xff] }
 0xade   : > { %5966 = vmatprep.mubr.f32.mxu0 %v5359_v42  ;;  %7243 = vmatprep.mubr.msk.f32.mxu1 %vm2648_vm4, %v4695_v53 }
 0xadf   : > { %7343 = vmatprep.subr.mxu1 %v11579_v27  ;;  %v5361_v43 = vsel %vm2648_vm4, %v4657_v59, %v8188_v40 }
 0xae0   : > { %7347 = vmatpush3.msra.mxu1 %v11579_v27  ;;  %v4592_v27 = vld [vmem:[#allocation3 + $0x181] sm:$0xff] }
 0xae1   : > { %5967 = vmatmul.mubr.f32.gmra.mxu0 %v5327_v5  ;;  %7244 = vmatmul.mubr.msk.f32.gmra.mxu1 %vm2648_vm4, %v4696_v16  ;;  %v5329_v30 = vsel %vm2648_vm4, %v4592_v27, %v8189_v26  ;;  %v11897_v16 = vld [vmem:[%s12262_s12] ss:$0 sm:$0xff] }
 0xae2   : > { %5971 = vmatprep.mubr.f32.mxu0 %v5360_v10  ;;  %7246 = vmatprep.mubr.msk.f32.mxu1 %vm2648_vm4, %v11601_v8  ;;  %v8194_v8 = vunpack.i.h.bf16 %v8192_v61 }
 0xae3   : > { %7344 = vmatprep.subr.mxu1 %v11591_v22 }
 0xae4   : > { %7348 = vmatpush3.msra.mxu1 %v11591_v22 }
 0xae5   : > { %5972 = vmatmul.mubr.f32.gmra.mxu0 %v5328_v57  ;;  %7247 = vmatmul.mubr.msk.f32.gmra.mxu1 %vm2648_vm4, %v11609_v31  ;;  %v4593_v31 = vld [vmem:[#allocation3 + $0x189] sm:$0xff] }
 0xae6   : > { %5976 = vmatprep.mubr.f32.mxu0 %v5361_v43  ;;  %7249 = vmatprep.mubr.msk.f32.mxu1 %vm2648_vm4, %v11616_v49  ;;  %v6212_v49 = vld [vmem:[%s8711_s23] sm:$0xff]  ;;  %v5330_v22 = vsel %vm2648_vm4, %v4593_v31, %v8194_v8 }
 0xae9   : > { %5977 = vmatmul.mubr.f32.gmra.mxu0 %v5329_v30  ;;  %7250 = vmatmul.mubr.msk.f32.gmra.mxu1 %vm2648_vm4, %v11623_v14  ;;  %v6214_v14 = vld [vmem:[%s8711_s23 + $0x10] sm:$0xff] }
 0xaea   : > { %5981 = vmatprep.mubr.f32.mxu0 %v5362_v54  ;;  %7252 = vmatprep.mubr.msk.f32.mxu1 %vm2648_vm4, %v11630_v44  ;;  %v6215_v44 = vld [vmem:[%s8711_s23 + $0x18] sm:$0xff] }
 0xaed   : > { %5982 = vmatmul.mubr.f32.gmra.mxu0 %v5330_v22  ;;  %7253 = vmatmul.mubr.msk.f32.gmra.mxu1 %vm2648_vm4, %v11637_v18  ;;  %v6216_v18 = vld [vmem:[%s8711_s23 + $0x20] sm:$0xff] }
 0xaee   : > { %7293 = vmatprep.mubr.msk.f32.mxu0 %vm535_vm1, %v6212_v49  ;;  %7255 = vmatprep.mubr.msk.f32.mxu1 %vm2648_vm4, %v11644_v37  ;;  %v6217_v37 = vld [vmem:[%s8711_s23 + $0x28] sm:$0xff] }
 0xaf1   : > { %7294 = vmatmul.mubr.msk.f32.vlgmr.msra.gmra.mxu0 %vm535_vm1, %v6213_v33  ;;  %7256 = vmatmul.mubr.msk.f32.gmra.mxu1 %vm2648_vm4, %v11651_v25  ;;  %v6218_v25 = vld [vmem:[%s8711_s23 + $0x30] sm:$0xff] }
 0xaf2   : > { %7296 = vmatprep.mubr.msk.f32.mxu0 %vm535_vm1, %v6214_v14  ;;  %7258 = vmatprep.mubr.msk.f32.mxu1 %vm2648_vm4, %v11658_v50  ;;  %v6219_v50 = vld [vmem:[%s8711_s23 + $0x38] sm:$0xff] }
 0xaf5   : > { %7297 = vmatmul.mubr.msk.f32.gmra.mxu0 %vm535_vm1, %v6215_v44  ;;  %7259 = vmatmul.mubr.msk.f32.gmra.mxu1 %vm2648_vm4, %v11665_v28  ;;  %v6220_v28 = vld [vmem:[%s8711_s23 + $0x40] sm:$0xff] }
 0xaf6   : > { %7299 = vmatprep.mubr.msk.f32.mxu0 %vm535_vm1, %v6216_v18  ;;  %7261 = vmatprep.mubr.msk.f32.mxu1 %vm2648_vm4, %v11672_v34  ;;  %v6221_v34 = vld [vmem:[%s8711_s23 + $0x48] sm:$0xff] }
 0xaf9   : > { %7300 = vmatmul.mubr.msk.f32.gmra.mxu0 %vm535_vm1, %v6217_v37  ;;  %7262 = vmatmul.mubr.msk.f32.gmra.mxu1 %vm2648_vm4, %v11679_v23  ;;  %v6222_v23 = vld [vmem:[%s8711_s23 + $0x50] sm:$0xff] }
 0xafa   : > { %7302 = vmatprep.mubr.msk.f32.mxu0 %vm535_vm1, %v6218_v25  ;;  %7264 = vmatprep.mubr.msk.f32.mxu1 %vm2648_vm4, %v11686_v52  ;;  %v6223_v52 = vld [vmem:[%s8711_s23 + $0x58] sm:$0xff] }
 0xafd   : > { %7303 = vmatmul.mubr.msk.f32.gmra.mxu0 %vm535_vm1, %v6219_v50  ;;  %7265 = vmatmul.mubr.msk.f32.gmra.mxu1 %vm2648_vm4, %v11693_v11  ;;  %v6224_v11 = vld [vmem:[%s8711_s23 + $0x60] sm:$0xff] }
 0xafe   : > { %7305 = vmatprep.mubr.msk.f32.mxu0 %vm535_vm1, %v6220_v28  ;;  %7267 = vmatprep.mubr.msk.f32.mxu1 %vm2648_vm4, %v11700_v17  ;;  %v6225_v17 = vld [vmem:[%s8711_s23 + $0x68] sm:$0xff] }
 0xb01   : > { %7306 = vmatmul.mubr.msk.f32.gmra.mxu0 %vm535_vm1, %v6221_v34  ;;  %7268 = vmatmul.mubr.msk.f32.gmra.mxu1 %vm2648_vm4, %v11707_v56  ;;  %v6226_v56 = vld [vmem:[%s8711_s23 + $0x70] sm:$0xff] }
 0xb02   : > { %7308 = vmatprep.mubr.msk.f32.mxu0 %vm535_vm1, %v6222_v23  ;;  %7270 = vmatprep.mubr.msk.f32.mxu1 %vm2648_vm4, %v11714_v32  ;;  %v6227_v32 = vld [vmem:[%s8711_s23 + $0x78] sm:$0xff] }
 0xb05   : > { %7309 = vmatmul.mubr.msk.f32.gmra.mxu0 %vm535_vm1, %v6223_v52  ;;  %7271 = vmatmul.mubr.msk.f32.gmra.mxu1 %vm2648_vm4, %v11721_v36  ;;  %v6228_v36 = vld [vmem:[%s8711_s23 + $0x80] sm:$0xff] }
 0xb06   : > { %7311 = vmatprep.mubr.msk.f32.mxu0 %vm535_vm1, %v6224_v11  ;;  %7273 = vmatprep.mubr.msk.f32.mxu1 %vm2648_vm4, %v11728_v13  ;;  %v4719_v13 = vld [vmem:[#allocation3 + $0x182] sm:$0xff] }
 0xb09   : > { %7312 = vmatmul.mubr.msk.f32.gmra.mxu0 %vm535_vm1, %v6225_v17  ;;  %7274 = vmatmul.mubr.msk.f32.gmra.mxu1 %vm2648_vm4, %v11735_v3  ;;  %v6229_v3 = vld [vmem:[%s8711_s23 + $0x88] sm:$0xff] }
 0xb0a   : > { %7314 = vmatprep.mubr.msk.f32.mxu0 %vm535_vm1, %v6226_v56  ;;  %7276 = vmatprep.mubr.msk.f32.mxu1 %vm2648_vm4, %v11742_v12  ;;  %v4721_v12 = vld [vmem:[#allocation3 + $0x19a] sm:$0xff] }
 0xb0c   : > { %v5603_v46 = vpop.f32.mrf.mxu1 }
 0xb0d   : > { %7315 = vmatmul.mubr.msk.f32.gmra.mxu0 %vm535_vm1, %v6227_v32  ;;  %7277 = vmatmul.mubr.msk.f32.gmra.mxu1 %vm2648_vm4, %v11749_v4  ;;  %v6231_v4 = vld [vmem:[%s8711_s23 + $0x98] sm:$0xff]  ;;  %v5604_v10 = vadd.f32 %v11897_v16, %v5603_v46  ;;  %s485_s23 = sand.u32 1, %s8508_s19  }
 0xb0e   : > { %7317 = vmatprep.mubr.msk.f32.mxu0 %vm535_vm1, %v6228_v36  ;;  %7279 = vmatprep.mubr.msk.f32.mxu1 %vm2648_vm4, %v4719_v13  ;;  %v5605_v35 = vpop.f32.mrf.mxu1  ;;  %s6720_s25 = sshll.u32 %s485_s23, 8  ;;  %s12210_s30 = scalar_lea.sflag [#allocation5], %s485_s23 }
 0xb0f   : > { %s12023_s16 = scalar_lea.vmem [#allocation4], %s6720_s25  ;;  %s8523_s25 = smov [#allocation4]  }
 0xb10   : > { %v5608_v19 = vpop.f32.mrf.mxu1  ;;  %s6654_s20 = sshll.u32 %s12023_s16, 4  ;;  %s8460_s17 = sshll.u32 %s8523_s25, 4  ;;  %s12198_s20 = int_to_ptr.vmem [resolvable:$true] %s6654_s20  ;;  %s8461_s17 = int_to_ptr.vmem [resolvable:$false] %s8460_s17 }
 0xb11   : > { %7318 = vmatmul.mubr.msk.f32.gmra.mxu0 %vm535_vm1, %v6229_v3  ;;  %7280 = vmatmul.mubr.msk.f32.gmra.mxu1 %vm2648_vm4, %v4720_v21  ;;  %v5609_v1 = vadd.f32 %v11897_v16, %v5608_v19  ;;  %s8456_s26 = scalar_lea.vmem %s12198_s20, 4096  ;;  %s8462_s22 = scalar_lea.vmem %s8461_s17, 8192 }
 0xb12   : > { %7320 = vmatprep.mubr.msk.f32.mxu0 %vm535_vm1, %v6230_v39  ;;  %7282 = vmatprep.mubr.msk.f32.mxu1 %vm2648_vm4, %v4721_v12  ;;  %v5610_v15 = vpop.f32.mrf.mxu1  ;;  %p8457_p11 = scmp.ne.s32.totalorder %s12198_s20, %s8456_s26  ;;  %p8463_p0 = scmp.lt.s32.totalorder %s12198_s20, %s8461_s17 }
 0xb13   : > { %p8464_p1 = scmp.lt.s32.totalorder %s8462_s22, %s8456_s26 }
 0xb14   : > { %p8458_p12 = pnand %p8457_p11, %p8644_p5 }
 0xb15   : > { %7321 = vmatmul.mubr.msk.f32.gmra.mxu0 %vm535_vm1, %v6231_v4  ;;  %7283 = vmatmul.mubr.msk.f32.gmra.mxu1 %vm2648_vm4, %v4722_v20  ;;  %p8465_p2 = por %p8464_p1, %p8463_p0 }
 0xb16   : > { %7323 = vmatprep.mubr.msk.f32.mxu0 %vm535_vm1, %v6232_v55  ;;  %7332 = vmatprep.mubr.msk.f32.mxu1 %vm535_vm1, %v6238_v63  ;;  %p8459_p13 = pneg %p8458_p12 }
 0xb18   : > { %p8466_p3 = pnand %p8465_p2, %p8459_p13 }
 0xb19   : > { %7324 = vmatmul.mubr.msk.f32.gmra.mxu0 %vm535_vm1, %v6233_v0  ;;  %7333 = vmatmul.mubr.msk.f32.vlgmr.msra.gmra.mxu1 %vm535_vm1, %v6239_v60 }
 0xb1a   : > { %7326 = vmatprep.mubr.msk.f32.mxu0 %vm535_vm1, %v6234_v45  ;;  %7335 = vmatprep.mubr.msk.f32.mxu1 %vm535_vm1, %v6240_v41 }
 0xb1d   : > { %7327 = vmatmul.mubr.msk.f32.gmra.mxu0 %vm535_vm1, %v6235_v51  ;;  %7336 = vmatmul.mubr.msk.f32.gmra.mxu1 %vm535_vm1, %v6241_v58 }
 0xb1e   : > { %7329 = vmatprep.mubr.msk.f32.mxu0 %vm535_vm1, %v6236_v29  ;;  %7338 = vmatprep.mubr.msk.f32.mxu1 %vm535_vm1, %v6242_v48 }
 0xb1f   : > { %v5613_v42 = vpop.f32.mrf.mxu1 }
 0xb20   : > { %v5614_v54 = vadd.f32 %v11897_v16, %v5613_v42 }
 0xb21   : > { %7330 = vmatmul.mubr.msk.f32.gmra.mxu0 %vm535_vm1, %v6237_v24  ;;  %7339 = vmatmul.mubr.msk.f32.gmra.mxu1 %vm535_vm1, %v6243_v47  ;;  %v5615_v53 = vpop.f32.mrf.mxu1 }
 0xb23   : > { %v5618_v2 = vpop.f32.mrf.mxu1 }
 0xb24   : > { %v5619_v44 = vadd.f32 %v11897_v16, %v5618_v2 }
 0xb25   : > { %v5620_v38 = vpop.f32.mrf.mxu1 }
 0xb27   : > { %v5623_v6 = vpop.f32.mrf.mxu1 }
 0xb28   : > { %v5624_v34 = vadd.f32 %v11897_v16, %v5623_v6 }
 0xb29   : > { %v5625_v5 = vpop.f32.mrf.mxu1 }
 0xb2b   : > { %v5628_v62 = vpop.f32.mrf.mxu1 }
 0xb2c   : > { %v5629_v32 = vadd.f32 %v11897_v16, %v5628_v62 }
 0xb2d   : > { %v5630_v40 = vpop.f32.mrf.mxu1 }
 0xb31   : > { %v5828_v61 = vpop.f32.mrf.mxu0  ;;  %v5633_v59 = vpop.f32.mrf.mxu1 }
 0xb32   : > { %v11900_v9 = vadd.f32 %v5828_v61, %v5604_v10  ;;  %v5634_v39 = vadd.f32 %v11897_v16, %v5633_v59 }
 0xb33   : > { %v5830_v26 = vpop.f32.mrf.mxu0  ;;  %v5635_v57 = vpop.f32.mrf.mxu1 }
 0xb35   : > { %v5833_v43 = vpop.f32.mrf.mxu0  ;;  %v5638_v7 = vpop.f32.mrf.mxu1 }
 0xb36   : > { %v11903_v27 = vadd.f32 %v5833_v43, %v5609_v1  ;;  %v5639_v15 = vadd.f32 %v11897_v16, %v5638_v7 }
 0xb37   : > { %v5835_v8 = vpop.f32.mrf.mxu0  ;;  %v5640_v30 = vpop.f32.mrf.mxu1 }
 0xb39   : > { %v5838_v31 = vpop.f32.mrf.mxu0  ;;  %v5643_v49 = vpop.f32.mrf.mxu1 }
 0xb3a   : > { %v11906_v22 = vadd.f32 %v5838_v31, %v5614_v54  ;;  %v5644_v41 = vadd.f32 %v11897_v16, %v5643_v49 }
 0xb3b   : > { %v5840_v33 = vpop.f32.mrf.mxu0  ;;  %v5645_v14 = vpop.f32.mrf.mxu1 }
 0xb3d   : > { %v5843_v18 = vpop.f32.mrf.mxu0  ;;  %v5648_v37 = vpop.f32.mrf.mxu1 }
 0xb3e   : > { %v11909_v25 = vadd.f32 %v5843_v18, %v5619_v44  ;;  %v5649_v47 = vadd.f32 %v11897_v16, %v5648_v37 }
 0xb3f   : > { %v5845_v50 = vpop.f32.mrf.mxu0  ;;  %v5650_v28 = vpop.f32.mrf.mxu1 }
 0xb41   : > { %v5848_v23 = vpop.f32.mrf.mxu0  ;;  %v5653_v52 = vpop.f32.mrf.mxu1 }
 0xb42   : > { %v11912_v11 = vadd.f32 %v5848_v23, %v5624_v34  ;;  %v5654_v5 = vadd.f32 %v11897_v16, %v5653_v52 }
 0xb43   : > { %v5850_v17 = vpop.f32.mrf.mxu0  ;;  %v5655_v56 = vpop.f32.mrf.mxu1 }
 0xb45   : > { %v5853_v36 = vpop.f32.mrf.mxu0  ;;  %v5658_v46 = vpop.f32.mrf.mxu1 }
 0xb46   : > { %v11915_v13 = vadd.f32 %v5853_v36, %v5629_v32  ;;  %v5659_v26 = vadd.f32 %v11897_v16, %v5658_v46 }
 0xb47   : > { %v5855_v3 = vpop.f32.mrf.mxu0  ;;  %v5660_v35 = vpop.f32.mrf.mxu1 }
 0xb49   : > { %v5858_v12 = vpop.f32.mrf.mxu0  ;;  %v5663_v21 = vpop.f32.mrf.mxu1 }
 0xb4a   : > { %v11918_v19 = vadd.f32 %v5858_v12, %v5634_v39  ;;  %v5664_v30 = vadd.f32 %v11897_v16, %v5663_v21 }
 0xb4b   : > { %v5860_v4 = vpop.f32.mrf.mxu0  ;;  %v5665_v20 = vpop.f32.mrf.mxu1 }
 0xb4d   : > { %v5863_v55 = vpop.f32.mrf.mxu0  ;;  %v5668_v63 = vpop.f32.mrf.mxu1 }
 0xb4e   : > { %v11921_v0 = vadd.f32 %v5863_v55, %v5639_v15  ;;  %v5669_v44 = vadd.f32 %v11897_v16, %v5668_v63 }
 0xb4f   : > { %v5865_v60 = vpop.f32.mrf.mxu0  ;;  %v5670_v45 = vpop.f32.mrf.mxu1 }
 0xb51   : > { %v5868_v51 = vpop.f32.mrf.mxu0  ;;  %v5673_v58 = vpop.f32.mrf.mxu1 }
 0xb52   : > { %v11924_v29 = vadd.f32 %v5868_v51, %v5644_v41  ;;  %v5674_v23 = vadd.f32 %v11897_v16, %v5673_v58 }
 0xb53   : > { %v5870_v48 = vpop.f32.mrf.mxu0  ;;  %v5675_v24 = vpop.f32.mrf.mxu1 }
 0xb55   : > { %v5873_v42 = vpop.f32.mrf.mxu0  ;;  %v5678_v53 = vpop.f32.mrf.mxu1 }
 0xb56   : > { %v11927_v2 = vadd.f32 %v5873_v42, %v5649_v47  ;;  %v5679_v46 = vadd.f32 %v11897_v16, %v5678_v53 }
 0xb57   : > { %v5875_v38 = vpop.f32.mrf.mxu0  ;;  %v5680_v6 = vpop.f32.mrf.mxu1 }
 0xb59   : > { %v5878_v62 = vpop.f32.mrf.mxu0  ;;  %v5683_v40 = vpop.f32.mrf.mxu1 }
 0xb5a   : > { %v11930_v10 = vadd.f32 %v5878_v62, %v5654_v5  ;;  %v5684_v4 = vadd.f32 %v11897_v16, %v5683_v40 }
 0xb5b   : > { %v5880_v61 = vpop.f32.mrf.mxu0  ;;  %v5685_v59 = vpop.f32.mrf.mxu1 }
 0xb5d   : > { %v5883_v57 = vpop.f32.mrf.mxu0  ;;  %v5688_v1 = vpop.f32.mrf.mxu1 }
 0xb5e   : > { %v11933_v43 = vadd.f32 %v5883_v57, %v5659_v26  ;;  %v5689_v45 = vadd.f32 %v11897_v16, %v5688_v1 }
 0xb5f   : > { %v5885_v7 = vpop.f32.mrf.mxu0  ;;  %v5690_v8 = vpop.f32.mrf.mxu1 }
 0xb61   : > { %v5888_v54 = vpop.f32.mrf.mxu0  ;;  %v5693_v31 = vpop.f32.mrf.mxu1 }
 0xb62   : > { %v11936_v49 = vadd.f32 %v5888_v54, %v5664_v30  ;;  %v5694_v47 = vadd.f32 %v11897_v16, %v5693_v31 }
 0xb63   : > { %v5890_v33 = vpop.f32.mrf.mxu0  ;;  %v5695_v14 = vpop.f32.mrf.mxu1 }
 0xb65   : > { %v5893_v18 = vpop.f32.mrf.mxu0  ;;  %v5698_v37 = vpop.f32.mrf.mxu1 }
 0xb66   : > { %v11939_v50 = vadd.f32 %v5893_v18, %v5669_v44  ;;  %v5699_v62 = vadd.f32 %v11897_v16, %v5698_v37 }
 0xb67   : > { %v5895_v28 = vpop.f32.mrf.mxu0  ;;  %v5700_v34 = vpop.f32.mrf.mxu1 }
 0xb69   : > { %v5898_v52 = vpop.f32.mrf.mxu0  ;;  %v5703_v17 = vpop.f32.mrf.mxu1 }
 0xb6a   : > { %v11942_v56 = vadd.f32 %v5898_v52, %v5674_v23  ;;  %v5704_v1 = vadd.f32 %v11897_v16, %v5703_v17 }
 0xb6b   : > { %v5900_v32 = vpop.f32.mrf.mxu0  ;;  %v5705_v36 = vpop.f32.mrf.mxu1 }
 0xb6d   : > { %v5903_v3 = vpop.f32.mrf.mxu0  ;;  %v5708_v35 = vpop.f32.mrf.mxu1 }
 0xb6e   : > { %v11945_v39 = vadd.f32 %v5903_v3, %v5679_v46  ;;  %v5709_v33 = vadd.f32 %v11897_v16, %v5708_v35 }
 0xb6f   : > { %v5905_v12 = vpop.f32.mrf.mxu0  ;;  %v5710_v21 = vpop.f32.mrf.mxu1 }
 0xb71   : > { %v5908_v20 = vpop.f32.mrf.mxu0  ;;  %v5713_v15 = vpop.f32.mrf.mxu1 }
 0xb72   : > { %v11948_v55 = vadd.f32 %v5908_v20, %v5684_v4  ;;  %v5714_v34 = vadd.f32 %v11897_v16, %v5713_v15 }
 0xb73   : > { %v5910_v63 = vpop.f32.mrf.mxu0  ;;  %v5715_v60 = vpop.f32.mrf.mxu1 }
 0xb75   : > { %v5913_v41 = vpop.f32.mrf.mxu0  ;;  %v5718_v51 = vpop.f32.mrf.mxu1 }
 0xb76   : > { %v11951_v58 = vadd.f32 %v5913_v41, %v5689_v45  ;;  %v5719_v46 = vadd.f32 %v11897_v16, %v5718_v51 }
 0xb77   : > { %v5915_v48 = vpop.f32.mrf.mxu0  ;;  %v5720_v24 = vpop.f32.mrf.mxu1 }
 0xb79   : > { %v5918_v42 = vpop.f32.mrf.mxu0  ;;  %v5723_v53 = vpop.f32.mrf.mxu1 }
 0xb7a   : > { %v11954_v38 = vadd.f32 %v5918_v42, %v5694_v47  ;;  %v5724_v20 = vadd.f32 %v11897_v16, %v5723_v53 }
 0xb7b   : > { %v5920_v6 = vpop.f32.mrf.mxu0  ;;  %v5725_v5 = vpop.f32.mrf.mxu1 }
 0xb7d   : > { %v5923_v40 = vpop.f32.mrf.mxu0  ;;  %v5728_v61 = vpop.f32.mrf.mxu1 }
 0xb7e   : > { %v11957_v59 = vadd.f32 %v5923_v40, %v5699_v62  ;;  %v5729_v48 = vadd.f32 %v11897_v16, %v5728_v61 }
 0xb7f   : > { %v5925_v26 = vpop.f32.mrf.mxu0  ;;  %v5730_v57 = vpop.f32.mrf.mxu1 }
 0xb81   : > { %v5928_v7 = vpop.f32.mrf.mxu0  ;;  %v5733_v8 = vpop.f32.mrf.mxu1 }
 0xb82   : > { %v11960_v30 = vadd.f32 %v5928_v7, %v5704_v1  ;;  %v5734_v5 = vadd.f32 %v11897_v16, %v5733_v8 }
 0xb83   : > { %v5930_v54 = vpop.f32.mrf.mxu0  ;;  %v5735_v31 = vpop.f32.mrf.mxu1 }
 0xb85   : > { %v5933_v14 = vpop.f32.mrf.mxu0  ;;  %v11963_v44 = vpop.f32.mrf.mxu1 }
 0xb86   : > { %v11965_v18 = vadd.f32 %v5933_v14, %v5709_v33 }
 0xb87   : > { %v5935_v37 = vpop.f32.mrf.mxu0  ;;  %v5740_v28 = vpop.f32.mrf.mxu1 }
 0xb89   : > { %v5938_v23 = vpop.f32.mrf.mxu0  ;;  %v11968_v52 = vpop.f32.mrf.mxu1 }
 0xb8a   : > { %v11970_v17 = vadd.f32 %v5938_v23, %v5714_v34 }
 0xb8b   : > { %v5940_v32 = vpop.f32.mrf.mxu0  ;;  %v5745_v36 = vpop.f32.mrf.mxu1 }
 0xb8d   : > { %v5943_v3 = vpop.f32.mrf.mxu0  ;;  %v11973_v35 = vpop.f32.mrf.mxu1 }
 0xb8e   : > { %v11975_v12 = vadd.f32 %v5943_v3, %v5719_v46 }
 0xb8f   : > { %v5945_v21 = vpop.f32.mrf.mxu0  ;;  %v5750_v4 = vpop.f32.mrf.mxu1 }
 0xb91   : > { %v5948_v63 = vpop.f32.mrf.mxu0  ;;  %v11978_v15 = vpop.f32.mrf.mxu1 }
 0xb92   : > { %v11980_v60 = vadd.f32 %v5948_v63, %v5724_v20  ;;  %v12006_v63 = vld [vmem:[%s12264_s14] ss:$0 sm:$0xff] }
 0xb93   : > { %v5950_v45 = vpop.f32.mrf.mxu0  ;;  %v5755_v41 = vpop.f32.mrf.mxu1 }
 0xb95   : > { %v5953_v24 = vpop.f32.mrf.mxu0  ;;  %v11983_v51 = vpop.f32.mrf.mxu1 }
 0xb96   : > { %v11985_v47 = vadd.f32 %v5953_v24, %v5729_v48 }
 0xb97   : > { %v5955_v42 = vpop.f32.mrf.mxu0  ;;  %v5760_v6 = vpop.f32.mrf.mxu1 }
 0xb99   : > { %v5958_v62 = vpop.f32.mrf.mxu0  ;;  %v7239_v53 = vpop.f32.mrf.mxu1 }
 0xb9a   : > { %v11988_v40 = vadd.f32 %v5958_v62, %v5734_v5  ;;  %v6059_v24 = vadd.f32 %v7239_v53, %v11903_v27 }
 0xb9b   : > { %v5960_v26 = vpop.f32.mrf.mxu0  ;;  %v6053_v57 = vpop.f32.mrf.mxu1 }
 0xb9c   : > { %v6054_v62 = vadd.f32 %v6053_v57, %v11900_v9 }
 0xb9d   : > { %v11990_v1 = vpop.f32.mrf.mxu0  ;;  %v7242_v7 = vpop.f32.mrf.mxu1 }
 0xb9f   : > { %v5965_v61 = vpop.f32.mrf.mxu0  ;;  %v6063_v54 = vpop.f32.mrf.mxu1 }
 0xba1   : > { %v11992_v31 = vpop.f32.mrf.mxu0  ;;  %v7245_v33 = vpop.f32.mrf.mxu1 }
 0xba3   : > { %v5970_v14 = vpop.f32.mrf.mxu0  ;;  %v6073_v37 = vpop.f32.mrf.mxu1 }
 0xba5   : > { %v11994_v28 = vpop.f32.mrf.mxu0  ;;  %v7248_v8 = vpop.f32.mrf.mxu1 }
 0xba7   : > { %v5975_v34 = vpop.f32.mrf.mxu0  ;;  %v6083_v23 = vpop.f32.mrf.mxu1 }
 0xba9   : > { %v11996_v32 = vpop.f32.mrf.mxu0  ;;  %v7251_v36 = vpop.f32.mrf.mxu1 }
 0xbab   : > { %v5980_v46 = vpop.f32.mrf.mxu0  ;;  %v6093_v3 = vpop.f32.mrf.mxu1 }
 0xbac   : > { %v6069_v46 = vadd.f32 %v7242_v7, %v11909_v25 }
 0xbad   : > { %v11998_v21 = vpop.f32.mrf.mxu0  ;;  %v12001_v4 = vpop.f32.mrf.mxu1 }
 0xbaf   : > { %v5985_v20 = vpop.f32.mrf.mxu0  ;;  %v12008_v45 = vpop.f32.mrf.mxu1 }
 0xbb0   : > { %v6064_v20 = vadd.f32 %v6063_v54, %v11906_v22  ;;  %v6074_v22 = vadd.f32 %v6073_v37, %v11912_v11  ;;  %v6084_v11 = vadd.f32 %v6083_v23, %v11918_v19  ;;  %v6094_v19 = vadd.f32 %v6093_v3, %v11924_v29 }
 0xbb1   : > { %v7295_v41 = vpop.f32.mrf.mxu0  ;;  %v12012_v48 = vpop.f32.mrf.mxu1  ;;  %v6104_v3 = vadd.f32 %v12008_v45, %v11930_v10 }
 0xbb2   : > { %v6423_v42 = vadd.f32 %v7295_v41, %v12006_v63 }
 0xbb3   : > { %v6417_v6 = vpop.f32.mrf.mxu0  ;;  %v12016_v5 = vpop.f32.mrf.mxu1 }
 0xbb4   : > { %v6577_v26 = vadd.f32 %v6423_v42, %v6059_v24  ;;  %v6418_v61 = vadd.f32 %v12006_v63, %v6417_v6  ;;  %v6079_v42 = vadd.f32 %v7245_v33, %v11915_v13  ;;  %v6089_v13 = vadd.f32 %v7248_v8, %v11921_v0 }
 0xbb5   : > { %v7298_v14 = vpop.f32.mrf.mxu0  ;;  %v12020_v34 = vpop.f32.mrf.mxu1  ;;  %v6099_v0 = vadd.f32 %v7251_v36, %v11927_v2  ;;  %v6109_v2 = vadd.f32 %v12001_v4, %v11933_v43  ;;  %v6119_v4 = vadd.f32 %v12012_v48, %v11939_v50  ;;  %v6114_v45 = vadd.f32 %v12016_v5, %v11936_v49 }
 0xbb6   : > { %6609 = vst.msk [vmem:[%s12023_s16 + $0x8] sm:$0xff] %vm2648_vm4, %v6577_v26  ;;  %v6576_v27 = vadd.f32 %v6418_v61, %v6054_v62  ;;  %v6433_v53 = vadd.f32 %v7298_v14, %v12006_v63  ;;  %v6129_v48 = vadd.f32 %v12020_v34, %v11945_v39 }
 0xbb7   : > { %v6427_v9 = vpop.f32.mrf.mxu0  ;;  %v12028_v57 = vpop.f32.mrf.mxu1 }
 0xbb8   : > { %6608 = vst.msk [vmem:[%s12023_s16] sm:$0xff] %vm2648_vm4, %v6576_v27  ;;  %v6579_v41 = vadd.f32 %v6433_v53, %v6069_v46  ;;  %v6428_v25 = vadd.f32 %v12006_v63, %v6427_v9  ;;  %v6124_v49 = vadd.f32 %v12028_v57, %v11942_v56 }
 0xbb9   : > { %v7301_v7 = vpop.f32.mrf.mxu0  ;;  %v12034_v24 = vpop.f32.mrf.mxu1 }
 0xbba   : > { %6611 = vst.msk [vmem:[%s12023_s16 + $0x18] sm:$0xff] %vm2648_vm4, %v6579_v41  ;;  %v6578_v6 = vadd.f32 %v6428_v25, %v6064_v20  ;;  %v6443_v62 = vadd.f32 %v7301_v7, %v12006_v63  ;;  %v6139_v39 = vadd.f32 %v12034_v24, %v11951_v58  ;;  %v5739_v58 = vadd.f32 %v11897_v16, %v11963_v44 }
 0xbbb   : > { %v6437_v26 = vpop.f32.mrf.mxu0  ;;  %v12040_v61 = vpop.f32.mrf.mxu1 }
 0xbbc   : > { %6610 = vst.msk [vmem:[%s12023_s16 + $0x10] sm:$0xff] %vm2648_vm4, %v6578_v6  ;;  %v6581_v54 = vadd.f32 %v6443_v62, %v6079_v42  ;;  %v6438_v14 = vadd.f32 %v12006_v63, %v6437_v26  ;;  %v6134_v56 = vadd.f32 %v12040_v61, %v11948_v55 }
 0xbbd   : > { %v7304_v46 = vpop.f32.mrf.mxu0  ;;  %v12046_v27 = vpop.f32.mrf.mxu1 }
 0xbbe   : > { %6613 = vst.msk [vmem:[%s12023_s16 + $0x28] sm:$0xff] %vm2648_vm4, %v6581_v54  ;;  %v6580_v33 = vadd.f32 %v6438_v14, %v6074_v22  ;;  %v6453_v53 = vadd.f32 %v7304_v46, %v12006_v63  ;;  %v6149_v24 = vadd.f32 %v12046_v27, %v11957_v59  ;;  %v5749_v59 = vadd.f32 %v11897_v16, %v11973_v35 }
 0xbbf   : > { %v6447_v9 = vpop.f32.mrf.mxu0  ;;  %v12052_v20 = vpop.f32.mrf.mxu1 }
 0xbc0   : > { %6612 = vst.msk [vmem:[%s12023_s16 + $0x20] sm:$0xff] %vm2648_vm4, %v6580_v33  ;;  %v6583_v37 = vadd.f32 %v6453_v53, %v6089_v13  ;;  %v6448_v41 = vadd.f32 %v12006_v63, %v6447_v9 }
 0xbc1   : > { %v7307_v25 = vpop.f32.mrf.mxu0  ;;  %v12058_v7 = vpop.f32.mrf.mxu1 }
 0xbc2   : > { %6615 = vst.msk [vmem:[%s12023_s16 + $0x38] sm:$0xff] %vm2648_vm4, %v6583_v37  ;;  %v6582_v8 = vadd.f32 %v6448_v41, %v6084_v11  ;;  %v6463_v42 = vadd.f32 %v7307_v25, %v12006_v63  ;;  %v6159_v27 = vadd.f32 %v12058_v7, %v11965_v18 }
 0xbc3   : > { %v6457_v6 = vpop.f32.mrf.mxu0  ;;  %v12064_v62 = vpop.f32.mrf.mxu1 }
 0xbc4   : > { %6614 = vst.msk [vmem:[%s12023_s16 + $0x30] sm:$0xff] %vm2648_vm4, %v6582_v8  ;;  %v6585_v23 = vadd.f32 %v6463_v42, %v6099_v0  ;;  %v6458_v26 = vadd.f32 %v12006_v63, %v6457_v6  ;;  %v6154_v35 = vadd.f32 %v12064_v62, %v11960_v30 }
 0xbc5   : > { %v7310_v22 = vpop.f32.mrf.mxu0  ;;  %v12070_v54 = vpop.f32.mrf.mxu1 }
 0xbc6   : > { %6617 = vst.msk [vmem:[%s12023_s16 + $0x48] sm:$0xff] %vm2648_vm4, %v6585_v23  ;;  %v6584_v36 = vadd.f32 %v6458_v26, %v6094_v19  ;;  %v6473_v14 = vadd.f32 %v7310_v22, %v12006_v63  ;;  %v6169_v30 = vadd.f32 %v12070_v54, %v11975_v12 }
 0xbc7   : > { %v6467_v46 = vpop.f32.mrf.mxu0  ;;  %v12077_v29 = vpop.f32.mrf.mxu1 }
 0xbc8   : > { %6616 = vst.msk [vmem:[%s12023_s16 + $0x40] sm:$0xff] %vm2648_vm4, %v6584_v36  ;;  %v6587_v13 = vadd.f32 %v6473_v14, %v6109_v2  ;;  %v6468_v33 = vadd.f32 %v12006_v63, %v6467_v46  ;;  %v6164_v54 = vadd.f32 %v12077_v29, %v11970_v17 }
 0xbc9   : > { %v7313_v53 = vpop.f32.mrf.mxu0  ;;  %v12084_v43 = vpop.f32.mrf.mxu1 }
 0xbca   : > { %6619 = vst.msk [vmem:[%s12023_s16 + $0x58] sm:$0xff] %vm2648_vm4, %v6587_v13  ;;  %v6586_v9 = vadd.f32 %v6468_v33, %v6104_v3  ;;  %v6483_v11 = vadd.f32 %v7313_v53, %v12006_v63  ;;  %v6179_v17 = vadd.f32 %v12084_v43, %v11985_v47 }
 0xbcb   : > { %v6477_v37 = vpop.f32.mrf.mxu0  ;;  %v12091_v10 = vpop.f32.mrf.mxu1 }
 0xbcc   : > { %6618 = vst.msk [vmem:[%s12023_s16 + $0x50] sm:$0xff] %vm2648_vm4, %v6586_v9  ;;  %v6589_v41 = vadd.f32 %v6483_v11, %v6119_v4  ;;  %v6478_v25 = vadd.f32 %v12006_v63, %v6477_v37  ;;  %v5964_v4 = vadd.f32 %v11990_v1, %v5739_v58  ;;  %v6144_v9 = vadd.f32 %v12052_v20, %v11954_v38 }
 0xbcd   : > { %v7316_v0 = vpop.f32.mrf.mxu0  ;;  %v7278_v50 = vpop.f32.mrf.mxu1  ;;  %v6174_v47 = vadd.f32 %v12091_v10, %v11980_v60 }
 0xbce   : > { %6621 = vst.msk [vmem:[%s12023_s16 + $0x68] sm:$0xff] %vm2648_vm4, %v6589_v41  ;;  %v6588_v8 = vadd.f32 %v6478_v25, %v6114_v45  ;;  %v6493_v42 = vadd.f32 %v7316_v0, %v12006_v63  ;;  %v6189_v41 = vadd.f32 %v7278_v50, %v5964_v4  ;;  %v5744_v25 = vadd.f32 %v11897_v16, %v11968_v52 }
 0xbcf   : > { %v6487_v6 = vpop.f32.mrf.mxu0  ;;  %v6183_v19 = vpop.f32.mrf.mxu1  ;;  %v5974_v0 = vadd.f32 %v11994_v28, %v5749_v59  ;;  %v5759_v52 = vadd.f32 %v11897_v16, %v11983_v51 }
 0xbd0   : > { %6620 = vst.msk [vmem:[%s12023_s16 + $0x60] sm:$0xff] %vm2648_vm4, %v6588_v8  ;;  %v6591_v5 = vadd.f32 %v6493_v42, %v6129_v48  ;;  %v6488_v23 = vadd.f32 %v12006_v63, %v6487_v6  ;;  %v6184_v18 = vadd.f32 %v6183_v19, %v11988_v40  ;;  %v5969_v28 = vadd.f32 %v11992_v31, %v5744_v25 }
 0xbd1   : > { %v7319_v26 = vpop.f32.mrf.mxu0  ;;  %v7281_v22 = vpop.f32.mrf.mxu1  ;;  %v5754_v31 = vadd.f32 %v11897_v16, %v11978_v15  ;;  %v5984_v12 = vadd.f32 %v11998_v21, %v5759_v52 }
 0xbd2   : > { %6623 = vst.msk [vmem:[%s12023_s16 + $0x78] sm:$0xff] %vm2648_vm4, %v6591_v5  ;;  %v6590_v34 = vadd.f32 %v6488_v23, %v6124_v49  ;;  %v6503_v2 = vadd.f32 %v7319_v26, %v12006_v63  ;;  %v6199_v40 = vadd.f32 %v7281_v22, %v5974_v0 }
 0xbd3   : > { %v6497_v36 = vpop.f32.mrf.mxu0  ;;  %v6193_v14 = vpop.f32.mrf.mxu1  ;;  %v5979_v21 = vadd.f32 %v11996_v32, %v5754_v31 }
 0xbd4   : > { %6622 = vst.msk [vmem:[%s12023_s16 + $0x70] sm:$0xff] %vm2648_vm4, %v6590_v34  ;;  %v6593_v57 = vadd.f32 %v6503_v2, %v6139_v39  ;;  %v6498_v46 = vadd.f32 %v12006_v63, %v6497_v36  ;;  %v6194_v26 = vadd.f32 %v6193_v14, %v5969_v28 }
 0xbd5   : > { %v7322_v3 = vpop.f32.mrf.mxu0  ;;  %v7284_v13 = vpop.f32.mrf.mxu1 }
 0xbd6   : > { %6625 = vst.msk [vmem:[%s12023_s16 + $0x88] sm:$0xff] %vm2648_vm4, %v6593_v57  ;;  %v6592_v33 = vadd.f32 %v6498_v46, %v6134_v56  ;;  %v6513_v53 = vadd.f32 %v7322_v3, %v12006_v63  ;;  %v6209_v29 = vadd.f32 %v7284_v13, %v5984_v12 }
 0xbd7   : > { %v6507_v55 = vpop.f32.mrf.mxu0  ;;  %v12125_v61 = vpop.f32.mrf.mxu1 }
 0xbd8   : > { %6624 = vst.msk [vmem:[%s12023_s16 + $0x80] sm:$0xff] %vm2648_vm4, %v6592_v33  ;;  %v6595_v44 = vadd.f32 %v6513_v53, %v6149_v24  ;;  %v6508_v11 = vadd.f32 %v12006_v63, %v6507_v55  ;;  %v6204_v32 = vadd.f32 %v12125_v61, %v5979_v21 }
 0xbd9   : > { %v7325_v37 = vpop.f32.mrf.mxu0  ;;  %v7334_v45 = vpop.f32.mrf.mxu1 }
 0xbda   : > { %6627 = vst.msk [vmem:[%s12023_s16 + $0x98] sm:$0xff] %vm2648_vm4, %v6595_v44  ;;  %v6594_v1 = vadd.f32 %v6508_v11, %v6144_v9  ;;  %v6523_v38 = vadd.f32 %v7325_v37, %v12006_v63  ;;  %v6553_v20 = vadd.f32 %v7334_v45, %v12006_v63 }
 0xbdb   : > { %v6517_v7 = vpop.f32.mrf.mxu0  ;;  %v6547_v48 = vpop.f32.mrf.mxu1 }
 0xbdc   : > { %6626 = vst.msk [vmem:[%s12023_s16 + $0x90] sm:$0xff] %vm2648_vm4, %v6594_v1  ;;  %v6597_v50 = vadd.f32 %v6523_v38, %v6159_v27  ;;  %v6518_v8 = vadd.f32 %v12006_v63, %v6517_v7  ;;  %v6603_v42 = vadd.f32 %v6553_v20, %v6189_v41  ;;  %v6548_v6 = vadd.f32 %v12006_v63, %v6547_v48 }
 0xbdd   : > { %v7328_v62 = vpop.f32.mrf.mxu0  ;;  %v7337_v19 = vpop.f32.mrf.mxu1 }
 0xbde   : > { %6629 = vst.msk [vmem:[%s12023_s16 + $0xa8] sm:$0xff] %vm2648_vm4, %v6597_v50  ;;  %v6596_v49 = vadd.f32 %v6518_v8, %v6154_v35  ;;  %v6533_v5 = vadd.f32 %v7328_v62, %v12006_v63  ;;  %6635 = vst.msk [vmem:[%s12023_s16 + $0xd8] sm:$0xff] %vm2648_vm4, %v6603_v42  ;;  %v6602_v23 = vadd.f32 %v6548_v6, %v6184_v18 }
 0xbdf   : > { %v6563_v51 = vadd.f32 %v7337_v19, %v12006_v63  ;;  %v6527_v22 = vpop.f32.mrf.mxu0  ;;  %v6557_v39 = vpop.f32.mrf.mxu1 }
 0xbe0   : > { %6628 = vst.msk [vmem:[%s12023_s16 + $0xa0] sm:$0xff] %vm2648_vm4, %v6596_v49  ;;  %v6599_v34 = vadd.f32 %v6533_v5, %v6169_v30  ;;  %v6528_v2 = vadd.f32 %v12006_v63, %v6527_v22  ;;  %6634 = vst.msk [vmem:[%s12023_s16 + $0xd0] sm:$0xff] %vm2648_vm4, %v6602_v23  ;;  %v6558_v15 = vadd.f32 %v12006_v63, %v6557_v39 }
 0xbe1   : > { %v6605_v16 = vadd.f32 %v6563_v51, %v6199_v40  ;;  %v7331_v36 = vpop.f32.mrf.mxu0  ;;  %v7340_v14 = vpop.f32.mrf.mxu1 }
 0xbe2   : > { %6631 = vst.msk [vmem:[%s12023_s16 + $0xb8] sm:$0xff] %vm2648_vm4, %v6599_v34  ;;  %v6598_v56 = vadd.f32 %v6528_v2, %v6164_v54  ;;  %v6543_v57 = vadd.f32 %v7331_v36, %v12006_v63  ;;  %v6604_v46 = vadd.f32 %v6558_v15, %v6194_v26  ;;  %v6573_v3 = vadd.f32 %v7340_v14, %v12006_v63 }
 0xbe3   : > { %6637 = vst.msk [vmem:[%s12023_s16 + $0xe8] sm:$0xff] %vm2648_vm4, %v6605_v16  ;;  %v6537_v43 = vpop.f32.mrf.mxu0  ;;  %v6567_v13 = vpop.f32.mrf.mxu1 }
 0xbe4   : > { %6630 = vst.msk [vmem:[%s12023_s16 + $0xb0] sm:$0xff] %vm2648_vm4, %v6598_v56  ;;  %v6601_v58 = vadd.f32 %v6543_v57, %v6179_v17  ;;  %v6538_v24 = vadd.f32 %v12006_v63, %v6537_v43  ;;  %6636 = vst.msk [vmem:[%s12023_s16 + $0xe0] sm:$0xff] %vm2648_vm4, %v6604_v46  ;;  %v6607_v33 = vadd.f32 %v6573_v3, %v6209_v29 }
 0xbe5   : > { %v6568_v53 = vadd.f32 %v12006_v63, %v6567_v13 }
 0xbe6   : > { %6633 = vst.msk [vmem:[%s12023_s16 + $0xc8] sm:$0xff] %vm2648_vm4, %v6601_v58  ;;  %v6600_v60 = vadd.f32 %v6538_v24, %v6174_v47  ;;  %6639 = vst.msk [vmem:[%s12023_s16 + $0xf8] sm:$0xff] %vm2648_vm4, %v6607_v33 }
 0xbe7   : > { %v6606_v10 = vadd.f32 %v6568_v53, %v6204_v32 }
 0xbe8   : > { %6632 = vst.msk [vmem:[%s12023_s16 + $0xc0] sm:$0xff] %vm2648_vm4, %v6600_v60 }
 0xbe9   : > { %6638 = vst.msk [vmem:[%s12023_s16 + $0xf0] sm:$0xff] %vm2648_vm4, %v6606_v10 }
 0xbea   : > { %8469 = shalt.err (!%p8466_p3)
}
 0xbeb   : > { %s8470_s23 = scalar_lea.hbm %s12196_s27, 4096  ;;  %s8474_s25 = scalar_lea.hbm %s12265_s15, 8192 }
 0xbec   : > { %p8471_p4 = scmp.ne.s32.totalorder %s12196_s27, %s8470_s23  ;;  %p8475_p9 = scmp.lt.s32.totalorder %s12196_s27, %s12265_s15 }
 0xbed   : > { %p8476_p10 = scmp.lt.s32.totalorder %s8474_s25, %s8470_s23 }
 0xbee   : > { %p8472_p7 = pnand %p8471_p4, %p8644_p5 }
 0xbef   : > { %p8477_p11 = por %p8476_p10, %p8475_p9 }
 0xbf0   : > { %p8473_p8 = pneg %p8472_p7 }
 0xbf2   : > { %p8478_p12 = pnand %p8477_p11, %p8473_p8 }
 0xbf4   : > { %8481 = shalt.err (!%p8478_p12)
}
 0xbf5   : > { %s8524_s26 = smov 128   ;;  %s8525_s17 = smov 8  }
 0xbf6   : > { %7349 = dma.vmem_to_hbm [thread:$0]  (%p8644_p5), %s12198_s20, 4096, %s12196_s27, %s12210_s30, %s8524_s26, %s8524_s26, %s8525_s17  }
 0xbf7 PF: > { %p7355_p13 = scmp.ge.s32.totalorder %s8516_s21, 2  ;;  %s6669_s22 = sand.u32 1, %s8504_s18  }
 0xbf8   : > { %s6670_s1 = scalar_lea.sflag [#allocation5], %s6669_s22 }
 0xbf9   : > { %p7352_p0 = pnand %p7355_p13, %p8648_p6 }
 0xbfb   : > { %p7353_p1 = pneg %p7352_p0 }
 0xbfd   : > { %8499 = dma.done.wait (%p7353_p1), %s6670_s1, 4096  }
 0xbfe   : > { %8501 = vsyncadd (%p7353_p1), %s6670_s1, 4294963200  ;;  %s12280_s2 = sld [smem:[#allocation7_spill]]  ;;  %p25_p2 = scmp.ge.s32.totalorder %s8631_s24, 4  }
 0xbff   : > { %s12281_s20 = sld [smem:[#allocation8_spill]]  ;;  %s12282_s18 = smov %s8508_s19 }
 0xc00   : > { %s12284_s21 = smov %s8631_s24  ;;  %27 = sbr.rel (!%p25_p2) target bundleno = 7 (0x7), region = 121 }
 0xc04   : > { %s12283_s19 = smov %s12280_s2 }
 0xc05   :  { %6675 = vsyncpa [#allocation5], 1 }
 0xc06   :  { %6677 = vsyncpa [#allocation5 + $0x1], 1 }

</bundles_post_ra>
